<compile_context>
chip_gen: v5e
topology: v5e:2x2
jax: 0.10.0
libtpu: 0.0.40
codegen_flags: <defaults>
</compile_context>

<pallas_src>
import jax
import jax.numpy as jnp
from jax import lax
from jax.experimental import pallas as pl
from jax.experimental.pallas import tpu as pltpu


# ------------------------------ fused Pallas kernel ------------------------------ #

def _make_fused_kernel(num_blocks):
    """Ref order: x, [wtaps, bias, shift]*num_blocks, lin_w, lin_b | out | pad scratch."""

    def kernel(*refs):
        x_ref = refs[0]
        blk_refs = refs[1:1 + 3 * num_blocks]
        lw_ref, lb_ref = refs[1 + 3 * num_blocks:3 + 3 * num_blocks]
        out_ref = refs[3 + 3 * num_blocks]
        pad_ref = refs[4 + 3 * num_blocks]          # reused bf16 padded-activation scratch

        def block(x, wtaps_ref, bias_ref, shift_ref):
            n, h, w, cin = x.shape                  # n == 1 (one sample per grid step)
            cout = wtaps_ref.shape[-1]
            hp, wp = h + 2, w + 2

            # --- write the zero-padded (pad=1) activation into the bf16 scratch.
            #     Only the 1-pixel border is zeroed (no full memset); the interior
            #     is fully overwritten by one dense store. ---
            zrow = jnp.zeros((1, 1, wp, cin), jnp.bfloat16)
            zcol = jnp.zeros((1, hp, 1, cin), jnp.bfloat16)
            pad_ref[:, 0:1, 0:wp, 0:cin] = zrow
            pad_ref[:, hp - 1:hp, 0:wp, 0:cin] = zrow
            pad_ref[:, 0:hp, 0:1, 0:cin] = zcol
            pad_ref[:, 0:hp, wp - 1:wp, 0:cin] = zcol
            pad_ref[:, 1:h + 1, 1:w + 1, 0:cin] = x.astype(jnp.bfloat16)

            # --- Conv2d(3x3, s=1, p=1): 9 shifted-window matmuls, bf16 operands,
            #     f32 accumulation in registers (MXU is far from saturated here). ---
            acc = None
            for dh in range(3):
                for dw in range(3):
                    win = pad_ref[:, dh:dh + h, dw:dw + w, 0:cin].reshape(h * w, cin)
                    z = jnp.dot(win, wtaps_ref[dh * 3 + dw],
                                preferred_element_type=jnp.float32)
                    acc = z if acc is None else acc + z

            # --- conv bias (BatchNorm scale already folded in) + ReLU, f32 ---
            acc = jnp.maximum(acc + bias_ref[...], 0.0)

            # --- MaxPool2d(2, 2) via pairwise max; the per-channel BN shift is
            #     added AFTER pooling (adds commute with max -> 4x fewer elements). ---
            ho, wo = h // 2, w // 2
            y = acc.reshape(1, ho, 2, w, cout)
            y = jnp.maximum(y[:, :, 0], y[:, :, 1])            # pool over H (outer-dim select)
            y = y.reshape(1, ho, wo, 2, cout)
            y = jnp.maximum(y[:, :, :, 0, :], y[:, :, :, 1, :])  # pool over W
            # TODO(synk): Dropout2d(p=0.3) is identity in eval/inference; training-mode
            # channel dropout is intentionally not implemented.
            return y + shift_ref[...]                # (1, ho, wo, cout), f32, stays in VMEM

        x = x_ref[...]
        for i in range(num_blocks):
            w_r, b_r, s_r = blk_refs[3 * i:3 * i + 3]
            x = block(x, w_r, b_r, s_r)

        # --- final Linear straight from VMEM: sum of per-spatial-position
        #     (1, C) @ (C, out) matmuls (no minor-dim-changing flatten/relayout).
        #     The weight was pre-permuted from torch's (C,H,W) flatten order. ---
        _, s, _, _ = x.shape
        out_dim = lb_ref.shape[-1]
        lacc = None
        for i in range(s):
            for j in range(s):
                z = jnp.dot(x[:, i, j, :].astype(jnp.bfloat16), lw_ref[i, j],
                            preferred_element_type=jnp.float32)
                lacc = z if lacc is None else lacc + z
        out_ref[...] = (lacc + lb_ref[...]).astype(out_ref.dtype).reshape(1, 1, out_dim)

    return kernel


# --------------------------------- JAX wrappers --------------------------------- #

def prepare_params(params):
    """One-time repack of parameters into the layouts the fused kernel consumes.

    Folds the BatchNorm scale into the conv weights and bias (valid because
    relu(z)*s == relu(z*s) and max-pool commutes with a positive per-channel
    scale; asserted below), leaving only a post-pool per-channel shift.
    Conv/linear weights are stored in bf16 (the MXU operand dtype).
    Call outside jit (uses a Python-level positivity check).
    """
    blocks = []
    for blk in params["blocks"]:
        kh, kw, cin, cout = blk["w"].shape
        scale = blk["scale"]
        assert bool(jnp.all(scale > 0)), "BN-scale folding requires scale > 0 per channel"
        w_folded = (blk["w"] * scale).reshape(kh * kw, cin, cout)      # tap = kh*3 + kw
        blocks.append(dict(
            wtaps=w_folded.astype(jnp.bfloat16),                       # (9, Cin, Cout) bf16
            bias=(blk["b"] * scale).reshape(1, cout).astype(jnp.float32),
            shift=blk["shift"].reshape(1, cout).astype(jnp.float32),
        ))
    # Permute Linear weight from torch's NCHW flatten order (C,H,W) to (H, W, C, out).
    out_dim, feat = params["linear_w"].shape
    c_last = params["blocks"][-1]["w"].shape[-1]
    side = int(round((feat // c_last) ** 0.5))
    lw = params["linear_w"].reshape(out_dim, c_last, side, side)
    lw = jnp.transpose(lw, (2, 3, 1, 0))                               # (H, W, C, out)
    return dict(blocks=blocks,
                linear_w=lw.astype(jnp.bfloat16),
                linear_b=params["linear_b"].reshape(1, out_dim).astype(jnp.float32))


def simple_conv_net_forward(x_nchw, prepped):
    x = jnp.transpose(x_nchw, (0, 2, 3, 1)).astype(jnp.float32)   # NCHW -> NHWC once at entry
    n, h, w, cin = x.shape
    blocks = prepped["blocks"]
    out_dim = prepped["linear_b"].shape[-1]

    inputs = [x]
    in_specs = [pl.BlockSpec((1, h, w, cin), lambda b: (b, 0, 0, 0))]
    hp_max = wp_max = c_max = 0
    size, c = h, cin
    for blk in blocks:
        hp_max = max(hp_max, size + 2)
        wp_max = max(wp_max, size + 2)
        c_max = max(c_max, c)
        inputs += [blk["wtaps"], blk["bias"], blk["shift"]]
        in_specs += [pl.BlockSpec(blk["wtaps"].shape, lambda b: (0, 0, 0)),
                     pl.BlockSpec(blk["bias"].shape, lambda b: (0, 0)),
                     pl.BlockSpec(blk["shift"].shape, lambda b: (0, 0))]
        size, c = size // 2, blk["wtaps"].shape[-1]
    inputs += [prepped["linear_w"], prepped["linear_b"]]
    in_specs += [pl.BlockSpec(prepped["linear_w"].shape, lambda b: (0, 0, 0, 0)),
                 pl.BlockSpec(prepped["linear_b"].shape, lambda b: (0, 0))]

    out = pl.pallas_call(
        _make_fused_kernel(len(blocks)),
        # 3-D output so the per-sample block (1, 1, out_dim) matches the full
        # trailing dims (TPU block-shape rule); squeezed back below.
        out_shape=jax.ShapeDtypeStruct((n, 1, out_dim), jnp.float32),
        grid=(n,),
        in_specs=in_specs,
        out_specs=pl.BlockSpec((1, 1, out_dim), lambda b: (b, 0, 0)),
        # ONE reused padded-activation scratch, sized for the largest block, bf16.
        scratch_shapes=[pltpu.VMEM((1, hp_max, wp_max, c_max), jnp.bfloat16)],
        compiler_params=pltpu.CompilerParams(dimension_semantics=("parallel",)),
    )(*inputs)
    return out.reshape(n, out_dim)


# ------------------------------ params / references ------------------------------ #

def init_params(key, in_channels, hidden_channels, output_size, input_size):
    blocks = []
    cin, size = in_channels, input_size
    keys = jax.random.split(key, len(hidden_channels) + 1)
    for kb, cout in zip(keys[:-1], hidden_channels):
        k1, k2, k3, k4, k5, k6 = jax.random.split(kb, 6)
        w = jax.random.normal(k1, (3, 3, cin, cout), jnp.float32) * (9.0 * cin) ** -0.5
        b = 0.05 * jax.random.normal(k2, (cout,), jnp.float32)
        gamma = 1.0 + 0.1 * jax.random.normal(k3, (cout,), jnp.float32)
        beta = 0.1 * jax.random.normal(k4, (cout,), jnp.float32)
        running_mean = 0.1 * jax.random.normal(k5, (cout,), jnp.float32)
        running_var = 0.5 + jax.random.uniform(k6, (cout,), jnp.float32)
        scale = gamma / jnp.sqrt(running_var + 1e-5)
        shift = beta - running_mean * scale
        blocks.append(dict(w=w, b=b, scale=scale, shift=shift))
        cin, size = cout, size // 2
    kl1, kl2 = jax.random.split(keys[-1])
    feat = cin * size * size
    linear_w = jax.random.normal(kl1, (output_size, feat), jnp.float32) * feat ** -0.5
    linear_b = 0.05 * jax.random.normal(kl2, (output_size,), jnp.float32)
    return dict(blocks=blocks, linear_w=linear_w, linear_b=linear_b)


def reference_forward(x_nchw, params):
    """Pure-JAX reference mirroring the PyTorch forward (eval mode), f32 HIGHEST."""
    x = x_nchw
    for blk in params["blocks"]:
        w_oihw = jnp.transpose(blk["w"], (3, 2, 0, 1))        # -> (Cout, Cin, kh, kw)
        x = lax.conv_general_dilated(
            x, w_oihw, window_strides=(1, 1), padding=((1, 1), (1, 1)),
            dimension_numbers=("NCHW", "OIHW", "NCHW"),
            precision=lax.Precision.HIGHEST)
        x = x + blk["b"].reshape(1, -1, 1, 1)
        x = jnp.maximum(x, 0.0)
        x = x * blk["scale"].reshape(1, -1, 1, 1) + blk["shift"].reshape(1, -1, 1, 1)
        x = lax.reduce_window(x, -jnp.inf, lax.max, (1, 1, 2, 2), (1, 1, 2, 2), "VALID")
    x = x.reshape(x.shape[0], -1)
    return jnp.dot(x, params["linear_w"].T, precision=lax.Precision.HIGHEST) + params["linear_b"]


def reference_forward_matched(x_nchw, prepped):
    """Pure-JAX reference mirroring the kernel's exact math (bf16 operands, f32
    accumulation, same tap/accumulation order) — tight wiring check."""
    x = jnp.transpose(x_nchw, (0, 2, 3, 1)).astype(jnp.float32)
    for blk in prepped["blocks"]:
        n, h, w, cin = x.shape
        cout = blk["wtaps"].shape[-1]
        xp = jnp.zeros((n, h + 2, w + 2, cin), jnp.bfloat16)
        xp = xp.at[:, 1:h + 1, 1:w + 1, :].set(x.astype(jnp.bfloat16))
        acc = None
        for dh in range(3):
            for dw in range(3):
                win = xp[:, dh:dh + h, dw:dw + w, :].reshape(n * h * w, cin)
                z = jnp.dot(win, blk["wtaps"][dh * 3 + dw],
                            preferred_element_type=jnp.float32).reshape(n, h, w, cout)
                acc = z if acc is None else acc + z
        acc = jnp.maximum(acc + blk["bias"], 0.0)
        ho, wo = h // 2, w // 2
        y = acc.reshape(n, ho, 2, w, cout)
        y = jnp.maximum(y[:, :, 0], y[:, :, 1])
        y = y.reshape(n, ho, wo, 2, cout)
        y = jnp.maximum(y[:, :, :, 0, :], y[:, :, :, 1, :])
        x = y + blk["shift"]
    n, s, _, _ = x.shape
    out_dim = prepped["linear_b"].shape[-1]
    acc = None
    for i in range(s):
        for j in range(s):
            z = jnp.dot(x[:, i, j, :].astype(jnp.bfloat16), prepped["linear_w"][i, j],
                        preferred_element_type=jnp.float32)
            acc = z if acc is None else acc + z
    return acc + prepped["linear_b"]


if __name__ == "__main__":
    key = jax.random.PRNGKey(0)
    batch, in_channels, input_size = 2, 4, 16
    hidden_channels = [8, 16, 32]
    output_size = 2

    k_x, k_p = jax.random.split(key)
    x = jax.random.normal(k_x, (batch, in_channels, input_size, input_size), jnp.float32)
    params = init_params(k_p, in_channels, hidden_channels, output_size, input_size)
    prepped = prepare_params(params)

    fwd = jax.jit(simple_conv_net_forward)
    out = jax.block_until_ready(fwd(x, prepped))
    assert out.shape == (batch, output_size), out.shape

    # (1) tight check vs. the matched-precision reference (same bf16/f32 math,
    #     same tap and accumulation order): catches Pallas wiring/layout bugs.
    matched = reference_forward_matched(x, prepped)
    err_m = float(jnp.max(jnp.abs(out - matched)))
    assert err_m <= 5e-3, f"mismatch vs matched-precision reference: {err_m}"

    # (2) sanity check vs. the true-semantics f32 (HIGHEST) reference; the only
    #     expected drift is single-pass bf16 matmul rounding (~1e-2).
    ref = reference_forward(x, params)
    err = float(jnp.max(jnp.abs(out - ref)))
    ref_scale = float(jnp.max(jnp.abs(ref)))
    assert err <= 0.1 * max(1.0, ref_scale), f"mismatch vs f32 reference: {err} (scale {ref_scale})"

    print("KERNEL_OK")
</pallas_src>

<mosaic_0001>
module attributes {stable_mosaic.version = 11 : i64} {
  func.func @kernel(%arg0: i32, %arg1: memref<1x16x16x4xf32, #tpu.memory_space<vmem>>, %arg2: memref<9x4x8xbf16, #tpu.memory_space<vmem>>, %arg3: memref<1x8xf32, #tpu.memory_space<vmem>>, %arg4: memref<1x8xf32, #tpu.memory_space<vmem>>, %arg5: memref<9x8x16xbf16, #tpu.memory_space<vmem>>, %arg6: memref<1x16xf32, #tpu.memory_space<vmem>>, %arg7: memref<1x16xf32, #tpu.memory_space<vmem>>, %arg8: memref<9x16x32xbf16, #tpu.memory_space<vmem>>, %arg9: memref<1x32xf32, #tpu.memory_space<vmem>>, %arg10: memref<1x32xf32, #tpu.memory_space<vmem>>, %arg11: memref<2x2x32x2xbf16, #tpu.memory_space<vmem>>, %arg12: memref<1x2xf32, #tpu.memory_space<vmem>>, %arg13: memref<1x1x2xf32, #tpu.memory_space<vmem>>, %arg14: memref<1x18x18x16xbf16, #tpu.memory_space<vmem>>) attributes {dimension_semantics = [#tpu.dimension_semantics<parallel>], iteration_bounds = array<i64: 2>, scalar_prefetch = 0 : i64, scratch_operands = 1 : i64, tpu.core_type = #tpu.core_type<tc>, window_params = [{transform_indices = @transform_0, window_bounds = array<i64: 1, 16, 16, 4>}, {pipeline_mode = #tpu.pipeline_mode<synchronous>, transform_indices = @transform_1, window_bounds = array<i64: 9, 4, 8>}, {pipeline_mode = #tpu.pipeline_mode<synchronous>, transform_indices = @transform_2, window_bounds = array<i64: 1, 8>}, {pipeline_mode = #tpu.pipeline_mode<synchronous>, transform_indices = @transform_3, window_bounds = array<i64: 1, 8>}, {pipeline_mode = #tpu.pipeline_mode<synchronous>, transform_indices = @transform_4, window_bounds = array<i64: 9, 8, 16>}, {pipeline_mode = #tpu.pipeline_mode<synchronous>, transform_indices = @transform_5, window_bounds = array<i64: 1, 16>}, {pipeline_mode = #tpu.pipeline_mode<synchronous>, transform_indices = @transform_6, window_bounds = array<i64: 1, 16>}, {pipeline_mode = #tpu.pipeline_mode<synchronous>, transform_indices = @transform_7, window_bounds = array<i64: 9, 16, 32>}, {pipeline_mode = #tpu.pipeline_mode<synchronous>, transform_indices = @transform_8, window_bounds = array<i64: 1, 32>}, {pipeline_mode = #tpu.pipeline_mode<synchronous>, transform_indices = @transform_9, window_bounds = array<i64: 1, 32>}, {pipeline_mode = #tpu.pipeline_mode<synchronous>, transform_indices = @transform_10, window_bounds = array<i64: 2, 2, 32, 2>}, {pipeline_mode = #tpu.pipeline_mode<synchronous>, transform_indices = @transform_11, window_bounds = array<i64: 1, 2>}, {transform_indices = @transform_12, window_bounds = array<i64: 1, 1, 2>}]} {
    %c0 = arith.constant 0 : index
    %c0_0 = arith.constant 0 : index
    %c0_1 = arith.constant 0 : index
    %c0_2 = arith.constant 0 : index
    %0 = vector.load %arg1[%c0, %c0_0, %c0_1, %c0_2] : memref<1x16x16x4xf32, #tpu.memory_space<vmem>>, vector<1x16x16x4xf32>
    %cst = arith.constant 0.000000e+00 : bf16
    %1 = vector.broadcast %cst : bf16 to vector<1x1x18x4xbf16>
    %cst_3 = arith.constant 0.000000e+00 : bf16
    %2 = vector.broadcast %cst_3 : bf16 to vector<1x18x1x4xbf16>
    %c0_4 = arith.constant 0 : index
    %c0_5 = arith.constant 0 : index
    %c0_6 = arith.constant 0 : index
    %c0_7 = arith.constant 0 : index
    %3 = vector.load %arg14[%c0_4, %c0_5, %c0_6, %c0_7] : memref<1x18x18x16xbf16, #tpu.memory_space<vmem>>, vector<1x1x18x4xbf16>
    tpu.vector_store %arg14[%c0_4, %c0_5, %c0_6, %c0_7], %1 {strides = array<i32>} : memref<1x18x18x16xbf16, #tpu.memory_space<vmem>>, vector<1x1x18x4xbf16>,
    %c0_8 = arith.constant 0 : index
    %c17 = arith.constant 17 : index
    %c0_9 = arith.constant 0 : index
    %c0_10 = arith.constant 0 : index
    %4 = vector.load %arg14[%c0_8, %c17, %c0_9, %c0_10] : memref<1x18x18x16xbf16, #tpu.memory_space<vmem>>, vector<1x1x18x4xbf16>
    tpu.vector_store %arg14[%c0_8, %c17, %c0_9, %c0_10], %1 {strides = array<i32>} : memref<1x18x18x16xbf16, #tpu.memory_space<vmem>>, vector<1x1x18x4xbf16>,
    %c0_11 = arith.constant 0 : index
    %c0_12 = arith.constant 0 : index
    %c0_13 = arith.constant 0 : index
    %c0_14 = arith.constant 0 : index
    %5 = vector.load %arg14[%c0_11, %c0_12, %c0_13, %c0_14] : memref<1x18x18x16xbf16, #tpu.memory_space<vmem>>, vector<1x18x1x4xbf16>
    tpu.vector_store %arg14[%c0_11, %c0_12, %c0_13, %c0_14], %2 {strides = array<i32>} : memref<1x18x18x16xbf16, #tpu.memory_space<vmem>>, vector<1x18x1x4xbf16>,
    %c0_15 = arith.constant 0 : index
    %c0_16 = arith.constant 0 : index
    %c17_17 = arith.constant 17 : index
    %c0_18 = arith.constant 0 : index
    %6 = vector.load %arg14[%c0_15, %c0_16, %c17_17, %c0_18] : memref<1x18x18x16xbf16, #tpu.memory_space<vmem>>, vector<1x18x1x4xbf16>
    tpu.vector_store %arg14[%c0_15, %c0_16, %c17_17, %c0_18], %2 {strides = array<i32>} : memref<1x18x18x16xbf16, #tpu.memory_space<vmem>>, vector<1x18x1x4xbf16>,
    %7 = arith.truncf %0 : vector<1x16x16x4xf32> to vector<1x16x16x4xbf16>
    %c0_19 = arith.constant 0 : index
    %c1 = arith.constant 1 : index
    %c1_20 = arith.constant 1 : index
    %c0_21 = arith.constant 0 : index
    %8 = vector.load %arg14[%c0_19, %c1, %c1_20, %c0_21] : memref<1x18x18x16xbf16, #tpu.memory_space<vmem>>, vector<1x16x16x4xbf16>
    tpu.vector_store %arg14[%c0_19, %c1, %c1_20, %c0_21], %7 {strides = array<i32>} : memref<1x18x18x16xbf16, #tpu.memory_space<vmem>>, vector<1x16x16x4xbf16>,
    %c0_22 = arith.constant 0 : index
    %c0_23 = arith.constant 0 : index
    %c0_24 = arith.constant 0 : index
    %c0_25 = arith.constant 0 : index
    %9 = vector.load %arg14[%c0_22, %c0_23, %c0_24, %c0_25] : memref<1x18x18x16xbf16, #tpu.memory_space<vmem>>, vector<1x16x16x4xbf16>
    %10 = vector.shape_cast %9 : vector<1x16x16x4xbf16> to vector<256x4xbf16>
    %c0_26 = arith.constant 0 : index
    %c0_27 = arith.constant 0 : index
    %c0_28 = arith.constant 0 : index
    %11 = vector.load %arg2[%c0_26, %c0_27, %c0_28] : memref<9x4x8xbf16, #tpu.memory_space<vmem>>, vector<1x4x8xbf16>
    %12 = vector.shape_cast %11 : vector<1x4x8xbf16> to vector<4x8xbf16>
    %cst_29 = arith.constant dense<0.000000e+00> : vector<256x8xf32>
    %13 = tpu.matmul %10, %12, %cst_29 {dimension_numbers = #tpu.dot_dimension_numbers<[1], [0], [0], [1], [0, 0, 1, 1], [], []>} : vector<256x4xbf16>, vector<4x8xbf16>, vector<256x8xf32> -> vector<256x8xf32>
    %c0_30 = arith.constant 0 : index
    %c0_31 = arith.constant 0 : index
    %c1_32 = arith.constant 1 : index
    %c0_33 = arith.constant 0 : index
    %14 = vector.load %arg14[%c0_30, %c0_31, %c1_32, %c0_33] : memref<1x18x18x16xbf16, #tpu.memory_space<vmem>>, vector<1x16x16x4xbf16>
    %15 = vector.shape_cast %14 : vector<1x16x16x4xbf16> to vector<256x4xbf16>
    %c1_34 = arith.constant 1 : index
    %c0_35 = arith.constant 0 : index
    %c0_36 = arith.constant 0 : index
    %16 = vector.load %arg2[%c1_34, %c0_35, %c0_36] : memref<9x4x8xbf16, #tpu.memory_space<vmem>>, vector<1x4x8xbf16>
    %17 = vector.shape_cast %16 : vector<1x4x8xbf16> to vector<4x8xbf16>
    %cst_37 = arith.constant dense<0.000000e+00> : vector<256x8xf32>
    %18 = tpu.matmul %15, %17, %cst_37 {dimension_numbers = #tpu.dot_dimension_numbers<[1], [0], [0], [1], [0, 0, 1, 1], [], []>} : vector<256x4xbf16>, vector<4x8xbf16>, vector<256x8xf32> -> vector<256x8xf32>
    %19 = arith.addf %13, %18 : vector<256x8xf32>
    %c0_38 = arith.constant 0 : index
    %c0_39 = arith.constant 0 : index
    %c2 = arith.constant 2 : index
    %c0_40 = arith.constant 0 : index
    %20 = vector.load %arg14[%c0_38, %c0_39, %c2, %c0_40] : memref<1x18x18x16xbf16, #tpu.memory_space<vmem>>, vector<1x16x16x4xbf16>
    %21 = vector.shape_cast %20 : vector<1x16x16x4xbf16> to vector<256x4xbf16>
    %c2_41 = arith.constant 2 : index
    %c0_42 = arith.constant 0 : index
    %c0_43 = arith.constant 0 : index
    %22 = vector.load %arg2[%c2_41, %c0_42, %c0_43] : memref<9x4x8xbf16, #tpu.memory_space<vmem>>, vector<1x4x8xbf16>
    %23 = vector.shape_cast %22 : vector<1x4x8xbf16> to vector<4x8xbf16>
    %cst_44 = arith.constant dense<0.000000e+00> : vector<256x8xf32>
    %24 = tpu.matmul %21, %23, %cst_44 {dimension_numbers = #tpu.dot_dimension_numbers<[1], [0], [0], [1], [0, 0, 1, 1], [], []>} : vector<256x4xbf16>, vector<4x8xbf16>, vector<256x8xf32> -> vector<256x8xf32>
    %25 = arith.addf %19, %24 : vector<256x8xf32>
    %c0_45 = arith.constant 0 : index
    %c1_46 = arith.constant 1 : index
    %c0_47 = arith.constant 0 : index
    %c0_48 = arith.constant 0 : index
    %26 = vector.load %arg14[%c0_45, %c1_46, %c0_47, %c0_48] : memref<1x18x18x16xbf16, #tpu.memory_space<vmem>>, vector<1x16x16x4xbf16>
    %27 = vector.shape_cast %26 : vector<1x16x16x4xbf16> to vector<256x4xbf16>
    %c3 = arith.constant 3 : index
    %c0_49 = arith.constant 0 : index
    %c0_50 = arith.constant 0 : index
    %28 = vector.load %arg2[%c3, %c0_49, %c0_50] : memref<9x4x8xbf16, #tpu.memory_space<vmem>>, vector<1x4x8xbf16>
    %29 = vector.shape_cast %28 : vector<1x4x8xbf16> to vector<4x8xbf16>
    %cst_51 = arith.constant dense<0.000000e+00> : vector<256x8xf32>
    %30 = tpu.matmul %27, %29, %cst_51 {dimension_numbers = #tpu.dot_dimension_numbers<[1], [0], [0], [1], [0, 0, 1, 1], [], []>} : vector<256x4xbf16>, vector<4x8xbf16>, vector<256x8xf32> -> vector<256x8xf32>
    %31 = arith.addf %25, %30 : vector<256x8xf32>
    %c0_52 = arith.constant 0 : index
    %c1_53 = arith.constant 1 : index
    %c1_54 = arith.constant 1 : index
    %c0_55 = arith.constant 0 : index
    %32 = vector.load %arg14[%c0_52, %c1_53, %c1_54, %c0_55] : memref<1x18x18x16xbf16, #tpu.memory_space<vmem>>, vector<1x16x16x4xbf16>
    %33 = vector.shape_cast %32 : vector<1x16x16x4xbf16> to vector<256x4xbf16>
    %c4 = arith.constant 4 : index
    %c0_56 = arith.constant 0 : index
    %c0_57 = arith.constant 0 : index
    %34 = vector.load %arg2[%c4, %c0_56, %c0_57] : memref<9x4x8xbf16, #tpu.memory_space<vmem>>, vector<1x4x8xbf16>
    %35 = vector.shape_cast %34 : vector<1x4x8xbf16> to vector<4x8xbf16>
    %cst_58 = arith.constant dense<0.000000e+00> : vector<256x8xf32>
    %36 = tpu.matmul %33, %35, %cst_58 {dimension_numbers = #tpu.dot_dimension_numbers<[1], [0], [0], [1], [0, 0, 1, 1], [], []>} : vector<256x4xbf16>, vector<4x8xbf16>, vector<256x8xf32> -> vector<256x8xf32>
    %37 = arith.addf %31, %36 : vector<256x8xf32>
    %c0_59 = arith.constant 0 : index
    %c1_60 = arith.constant 1 : index
    %c2_61 = arith.constant 2 : index
    %c0_62 = arith.constant 0 : index
    %38 = vector.load %arg14[%c0_59, %c1_60, %c2_61, %c0_62] : memref<1x18x18x16xbf16, #tpu.memory_space<vmem>>, vector<1x16x16x4xbf16>
    %39 = vector.shape_cast %38 : vector<1x16x16x4xbf16> to vector<256x4xbf16>
    %c5 = arith.constant 5 : index
    %c0_63 = arith.constant 0 : index
    %c0_64 = arith.constant 0 : index
    %40 = vector.load %arg2[%c5, %c0_63, %c0_64] : memref<9x4x8xbf16, #tpu.memory_space<vmem>>, vector<1x4x8xbf16>
    %41 = vector.shape_cast %40 : vector<1x4x8xbf16> to vector<4x8xbf16>
    %cst_65 = arith.constant dense<0.000000e+00> : vector<256x8xf32>
    %42 = tpu.matmul %39, %41, %cst_65 {dimension_numbers = #tpu.dot_dimension_numbers<[1], [0], [0], [1], [0, 0, 1, 1], [], []>} : vector<256x4xbf16>, vector<4x8xbf16>, vector<256x8xf32> -> vector<256x8xf32>
    %43 = arith.addf %37, %42 : vector<256x8xf32>
    %c0_66 = arith.constant 0 : index
    %c2_67 = arith.constant 2 : index
    %c0_68 = arith.constant 0 : index
    %c0_69 = arith.constant 0 : index
    %44 = vector.load %arg14[%c0_66, %c2_67, %c0_68, %c0_69] : memref<1x18x18x16xbf16, #tpu.memory_space<vmem>>, vector<1x16x16x4xbf16>
    %45 = vector.shape_cast %44 : vector<1x16x16x4xbf16> to vector<256x4xbf16>
    %c6 = arith.constant 6 : index
    %c0_70 = arith.constant 0 : index
    %c0_71 = arith.constant 0 : index
    %46 = vector.load %arg2[%c6, %c0_70, %c0_71] : memref<9x4x8xbf16, #tpu.memory_space<vmem>>, vector<1x4x8xbf16>
    %47 = vector.shape_cast %46 : vector<1x4x8xbf16> to vector<4x8xbf16>
    %cst_72 = arith.constant dense<0.000000e+00> : vector<256x8xf32>
    %48 = tpu.matmul %45, %47, %cst_72 {dimension_numbers = #tpu.dot_dimension_numbers<[1], [0], [0], [1], [0, 0, 1, 1], [], []>} : vector<256x4xbf16>, vector<4x8xbf16>, vector<256x8xf32> -> vector<256x8xf32>
    %49 = arith.addf %43, %48 : vector<256x8xf32>
    %c0_73 = arith.constant 0 : index
    %c2_74 = arith.constant 2 : index
    %c1_75 = arith.constant 1 : index
    %c0_76 = arith.constant 0 : index
    %50 = vector.load %arg14[%c0_73, %c2_74, %c1_75, %c0_76] : memref<1x18x18x16xbf16, #tpu.memory_space<vmem>>, vector<1x16x16x4xbf16>
    %51 = vector.shape_cast %50 : vector<1x16x16x4xbf16> to vector<256x4xbf16>
    %c7 = arith.constant 7 : index
    %c0_77 = arith.constant 0 : index
    %c0_78 = arith.constant 0 : index
    %52 = vector.load %arg2[%c7, %c0_77, %c0_78] : memref<9x4x8xbf16, #tpu.memory_space<vmem>>, vector<1x4x8xbf16>
    %53 = vector.shape_cast %52 : vector<1x4x8xbf16> to vector<4x8xbf16>
    %cst_79 = arith.constant dense<0.000000e+00> : vector<256x8xf32>
    %54 = tpu.matmul %51, %53, %cst_79 {dimension_numbers = #tpu.dot_dimension_numbers<[1], [0], [0], [1], [0, 0, 1, 1], [], []>} : vector<256x4xbf16>, vector<4x8xbf16>, vector<256x8xf32> -> vector<256x8xf32>
    %55 = arith.addf %49, %54 : vector<256x8xf32>
    %c0_80 = arith.constant 0 : index
    %c2_81 = arith.constant 2 : index
    %c2_82 = arith.constant 2 : index
    %c0_83 = arith.constant 0 : index
    %56 = vector.load %arg14[%c0_80, %c2_81, %c2_82, %c0_83] : memref<1x18x18x16xbf16, #tpu.memory_space<vmem>>, vector<1x16x16x4xbf16>
    %57 = vector.shape_cast %56 : vector<1x16x16x4xbf16> to vector<256x4xbf16>
    %c8 = arith.constant 8 : index
    %c0_84 = arith.constant 0 : index
    %c0_85 = arith.constant 0 : index
    %58 = vector.load %arg2[%c8, %c0_84, %c0_85] : memref<9x4x8xbf16, #tpu.memory_space<vmem>>, vector<1x4x8xbf16>
    %59 = vector.shape_cast %58 : vector<1x4x8xbf16> to vector<4x8xbf16>
    %cst_86 = arith.constant dense<0.000000e+00> : vector<256x8xf32>
    %60 = tpu.matmul %57, %59, %cst_86 {dimension_numbers = #tpu.dot_dimension_numbers<[1], [0], [0], [1], [0, 0, 1, 1], [], []>} : vector<256x4xbf16>, vector<4x8xbf16>, vector<256x8xf32> -> vector<256x8xf32>
    %61 = arith.addf %55, %60 : vector<256x8xf32>
    %c0_87 = arith.constant 0 : index
    %c0_88 = arith.constant 0 : index
    %62 = vector.load %arg3[%c0_87, %c0_88] : memref<1x8xf32, #tpu.memory_space<vmem>>, vector<1x8xf32>
    %63 = vector.broadcast %62 : vector<1x8xf32> to vector<256x8xf32>
    %64 = arith.addf %61, %63 : vector<256x8xf32>
    %cst_89 = arith.constant 0.000000e+00 : f32
    %65 = vector.broadcast %cst_89 : f32 to vector<256x8xf32>
    %66 = arith.maximumf %64, %65 : vector<256x8xf32>
    %67 = vector.shape_cast %66 : vector<256x8xf32> to vector<1x8x2x16x8xf32>
    %68 = vector.extract_strided_slice %67 {offsets = [0, 0, 0, 0, 0], sizes = [1, 8, 1, 16, 8], strides = [1, 1, 1, 1, 1]} : vector<1x8x2x16x8xf32> to vector<1x8x1x16x8xf32>
    %69 = vector.shape_cast %68 : vector<1x8x1x16x8xf32> to vector<1x8x16x8xf32>
    %70 = vector.extract_strided_slice %67 {offsets = [0, 0, 1, 0, 0], sizes = [1, 8, 1, 16, 8], strides = [1, 1, 1, 1, 1]} : vector<1x8x2x16x8xf32> to vector<1x8x1x16x8xf32>
    %71 = vector.shape_cast %70 : vector<1x8x1x16x8xf32> to vector<1x8x16x8xf32>
    %72 = arith.maximumf %69, %71 : vector<1x8x16x8xf32>
    %73 = vector.shape_cast %72 : vector<1x8x16x8xf32> to vector<1x8x8x2x8xf32>
    %74 = vector.extract_strided_slice %73 {offsets = [0, 0, 0, 0, 0], sizes = [1, 8, 8, 1, 8], strides = [1, 1, 1, 1, 1]} : vector<1x8x8x2x8xf32> to vector<1x8x8x1x8xf32>
    %75 = vector.shape_cast %74 : vector<1x8x8x1x8xf32> to vector<1x8x8x8xf32>
    %76 = vector.extract_strided_slice %73 {offsets = [0, 0, 0, 1, 0], sizes = [1, 8, 8, 1, 8], strides = [1, 1, 1, 1, 1]} : vector<1x8x8x2x8xf32> to vector<1x8x8x1x8xf32>
    %77 = vector.shape_cast %76 : vector<1x8x8x1x8xf32> to vector<1x8x8x8xf32>
    %78 = arith.maximumf %75, %77 : vector<1x8x8x8xf32>
    %c0_90 = arith.constant 0 : index
    %c0_91 = arith.constant 0 : index
    %79 = vector.load %arg4[%c0_90, %c0_91] : memref<1x8xf32, #tpu.memory_space<vmem>>, vector<1x8xf32>
    %80 = vector.shape_cast %79 : vector<1x8xf32> to vector<1x1x1x8xf32>
    %81 = vector.broadcast %80 : vector<1x1x1x8xf32> to vector<1x8x8x8xf32>
    %82 = arith.addf %78, %81 : vector<1x8x8x8xf32>
    %cst_92 = arith.constant 0.000000e+00 : bf16
    %83 = vector.broadcast %cst_92 : bf16 to vector<1x1x10x8xbf16>
    %cst_93 = arith.constant 0.000000e+00 : bf16
    %84 = vector.broadcast %cst_93 : bf16 to vector<1x10x1x8xbf16>
    %c0_94 = arith.constant 0 : index
    %c0_95 = arith.constant 0 : index
    %c0_96 = arith.constant 0 : index
    %c0_97 = arith.constant 0 : index
    %85 = vector.load %arg14[%c0_94, %c0_95, %c0_96, %c0_97] : memref<1x18x18x16xbf16, #tpu.memory_space<vmem>>, vector<1x1x10x8xbf16>
    tpu.vector_store %arg14[%c0_94, %c0_95, %c0_96, %c0_97], %83 {strides = array<i32>} : memref<1x18x18x16xbf16, #tpu.memory_space<vmem>>, vector<1x1x10x8xbf16>,
    %c0_98 = arith.constant 0 : index
    %c9 = arith.constant 9 : index
    %c0_99 = arith.constant 0 : index
    %c0_100 = arith.constant 0 : index
    %86 = vector.load %arg14[%c0_98, %c9, %c0_99, %c0_100] : memref<1x18x18x16xbf16, #tpu.memory_space<vmem>>, vector<1x1x10x8xbf16>
    tpu.vector_store %arg14[%c0_98, %c9, %c0_99, %c0_100], %83 {strides = array<i32>} : memref<1x18x18x16xbf16, #tpu.memory_space<vmem>>, vector<1x1x10x8xbf16>,
    %c0_101 = arith.constant 0 : index
    %c0_102 = arith.constant 0 : index
    %c0_103 = arith.constant 0 : index
    %c0_104 = arith.constant 0 : index
    %87 = vector.load %arg14[%c0_101, %c0_102, %c0_103, %c0_104] : memref<1x18x18x16xbf16, #tpu.memory_space<vmem>>, vector<1x10x1x8xbf16>
    tpu.vector_store %arg14[%c0_101, %c0_102, %c0_103, %c0_104], %84 {strides = array<i32>} : memref<1x18x18x16xbf16, #tpu.memory_space<vmem>>, vector<1x10x1x8xbf16>,
    %c0_105 = arith.constant 0 : index
    %c0_106 = arith.constant 0 : index
    %c9_107 = arith.constant 9 : index
    %c0_108 = arith.constant 0 : index
    %88 = vector.load %arg14[%c0_105, %c0_106, %c9_107, %c0_108] : memref<1x18x18x16xbf16, #tpu.memory_space<vmem>>, vector<1x10x1x8xbf16>
    tpu.vector_store %arg14[%c0_105, %c0_106, %c9_107, %c0_108], %84 {strides = array<i32>} : memref<1x18x18x16xbf16, #tpu.memory_space<vmem>>, vector<1x10x1x8xbf16>,
    %89 = arith.truncf %82 : vector<1x8x8x8xf32> to vector<1x8x8x8xbf16>
    %c0_109 = arith.constant 0 : index
    %c1_110 = arith.constant 1 : index
    %c1_111 = arith.constant 1 : index
    %c0_112 = arith.constant 0 : index
    %90 = vector.load %arg14[%c0_109, %c1_110, %c1_111, %c0_112] : memref<1x18x18x16xbf16, #tpu.memory_space<vmem>>, vector<1x8x8x8xbf16>
    tpu.vector_store %arg14[%c0_109, %c1_110, %c1_111, %c0_112], %89 {strides = array<i32>} : memref<1x18x18x16xbf16, #tpu.memory_space<vmem>>, vector<1x8x8x8xbf16>,
    %c0_113 = arith.constant 0 : index
    %c0_114 = arith.constant 0 : index
    %c0_115 = arith.constant 0 : index
    %c0_116 = arith.constant 0 : index
    %91 = vector.load %arg14[%c0_113, %c0_114, %c0_115, %c0_116] : memref<1x18x18x16xbf16, #tpu.memory_space<vmem>>, vector<1x8x8x8xbf16>
    %92 = vector.shape_cast %91 : vector<1x8x8x8xbf16> to vector<64x8xbf16>
    %c0_117 = arith.constant 0 : index
    %c0_118 = arith.constant 0 : index
    %c0_119 = arith.constant 0 : index
    %93 = vector.load %arg5[%c0_117, %c0_118, %c0_119] : memref<9x8x16xbf16, #tpu.memory_space<vmem>>, vector<1x8x16xbf16>
    %94 = vector.shape_cast %93 : vector<1x8x16xbf16> to vector<8x16xbf16>
    %cst_120 = arith.constant dense<0.000000e+00> : vector<64x16xf32>
    %95 = tpu.matmul %92, %94, %cst_120 {dimension_numbers = #tpu.dot_dimension_numbers<[1], [0], [0], [1], [0, 0, 1, 1], [], []>} : vector<64x8xbf16>, vector<8x16xbf16>, vector<64x16xf32> -> vector<64x16xf32>
    %c0_121 = arith.constant 0 : index
    %c0_122 = arith.constant 0 : index
    %c1_123 = arith.constant 1 : index
    %c0_124 = arith.constant 0 : index
    %96 = vector.load %arg14[%c0_121, %c0_122, %c1_123, %c0_124] : memref<1x18x18x16xbf16, #tpu.memory_space<vmem>>, vector<1x8x8x8xbf16>
    %97 = vector.shape_cast %96 : vector<1x8x8x8xbf16> to vector<64x8xbf16>
    %c1_125 = arith.constant 1 : index
    %c0_126 = arith.constant 0 : index
    %c0_127 = arith.constant 0 : index
    %98 = vector.load %arg5[%c1_125, %c0_126, %c0_127] : memref<9x8x16xbf16, #tpu.memory_space<vmem>>, vector<1x8x16xbf16>
    %99 = vector.shape_cast %98 : vector<1x8x16xbf16> to vector<8x16xbf16>
    %cst_128 = arith.constant dense<0.000000e+00> : vector<64x16xf32>
    %100 = tpu.matmul %97, %99, %cst_128 {dimension_numbers = #tpu.dot_dimension_numbers<[1], [0], [0], [1], [0, 0, 1, 1], [], []>} : vector<64x8xbf16>, vector<8x16xbf16>, vector<64x16xf32> -> vector<64x16xf32>
    %101 = arith.addf %95, %100 : vector<64x16xf32>
    %c0_129 = arith.constant 0 : index
    %c0_130 = arith.constant 0 : index
    %c2_131 = arith.constant 2 : index
    %c0_132 = arith.constant 0 : index
    %102 = vector.load %arg14[%c0_129, %c0_130, %c2_131, %c0_132] : memref<1x18x18x16xbf16, #tpu.memory_space<vmem>>, vector<1x8x8x8xbf16>
    %103 = vector.shape_cast %102 : vector<1x8x8x8xbf16> to vector<64x8xbf16>
    %c2_133 = arith.constant 2 : index
    %c0_134 = arith.constant 0 : index
    %c0_135 = arith.constant 0 : index
    %104 = vector.load %arg5[%c2_133, %c0_134, %c0_135] : memref<9x8x16xbf16, #tpu.memory_space<vmem>>, vector<1x8x16xbf16>
    %105 = vector.shape_cast %104 : vector<1x8x16xbf16> to vector<8x16xbf16>
    %cst_136 = arith.constant dense<0.000000e+00> : vector<64x16xf32>
    %106 = tpu.matmul %103, %105, %cst_136 {dimension_numbers = #tpu.dot_dimension_numbers<[1], [0], [0], [1], [0, 0, 1, 1], [], []>} : vector<64x8xbf16>, vector<8x16xbf16>, vector<64x16xf32> -> vector<64x16xf32>
    %107 = arith.addf %101, %106 : vector<64x16xf32>
    %c0_137 = arith.constant 0 : index
    %c1_138 = arith.constant 1 : index
    %c0_139 = arith.constant 0 : index
    %c0_140 = arith.constant 0 : index
    %108 = vector.load %arg14[%c0_137, %c1_138, %c0_139, %c0_140] : memref<1x18x18x16xbf16, #tpu.memory_space<vmem>>, vector<1x8x8x8xbf16>
    %109 = vector.shape_cast %108 : vector<1x8x8x8xbf16> to vector<64x8xbf16>
    %c3_141 = arith.constant 3 : index
    %c0_142 = arith.constant 0 : index
    %c0_143 = arith.constant 0 : index
    %110 = vector.load %arg5[%c3_141, %c0_142, %c0_143] : memref<9x8x16xbf16, #tpu.memory_space<vmem>>, vector<1x8x16xbf16>
    %111 = vector.shape_cast %110 : vector<1x8x16xbf16> to vector<8x16xbf16>
    %cst_144 = arith.constant dense<0.000000e+00> : vector<64x16xf32>
    %112 = tpu.matmul %109, %111, %cst_144 {dimension_numbers = #tpu.dot_dimension_numbers<[1], [0], [0], [1], [0, 0, 1, 1], [], []>} : vector<64x8xbf16>, vector<8x16xbf16>, vector<64x16xf32> -> vector<64x16xf32>
    %113 = arith.addf %107, %112 : vector<64x16xf32>
    %c0_145 = arith.constant 0 : index
    %c1_146 = arith.constant 1 : index
    %c1_147 = arith.constant 1 : index
    %c0_148 = arith.constant 0 : index
    %114 = vector.load %arg14[%c0_145, %c1_146, %c1_147, %c0_148] : memref<1x18x18x16xbf16, #tpu.memory_space<vmem>>, vector<1x8x8x8xbf16>
    %115 = vector.shape_cast %114 : vector<1x8x8x8xbf16> to vector<64x8xbf16>
    %c4_149 = arith.constant 4 : index
    %c0_150 = arith.constant 0 : index
    %c0_151 = arith.constant 0 : index
    %116 = vector.load %arg5[%c4_149, %c0_150, %c0_151] : memref<9x8x16xbf16, #tpu.memory_space<vmem>>, vector<1x8x16xbf16>
    %117 = vector.shape_cast %116 : vector<1x8x16xbf16> to vector<8x16xbf16>
    %cst_152 = arith.constant dense<0.000000e+00> : vector<64x16xf32>
    %118 = tpu.matmul %115, %117, %cst_152 {dimension_numbers = #tpu.dot_dimension_numbers<[1], [0], [0], [1], [0, 0, 1, 1], [], []>} : vector<64x8xbf16>, vector<8x16xbf16>, vector<64x16xf32> -> vector<64x16xf32>
    %119 = arith.addf %113, %118 : vector<64x16xf32>
    %c0_153 = arith.constant 0 : index
    %c1_154 = arith.constant 1 : index
    %c2_155 = arith.constant 2 : index
    %c0_156 = arith.constant 0 : index
    %120 = vector.load %arg14[%c0_153, %c1_154, %c2_155, %c0_156] : memref<1x18x18x16xbf16, #tpu.memory_space<vmem>>, vector<1x8x8x8xbf16>
    %121 = vector.shape_cast %120 : vector<1x8x8x8xbf16> to vector<64x8xbf16>
    %c5_157 = arith.constant 5 : index
    %c0_158 = arith.constant 0 : index
    %c0_159 = arith.constant 0 : index
    %122 = vector.load %arg5[%c5_157, %c0_158, %c0_159] : memref<9x8x16xbf16, #tpu.memory_space<vmem>>, vector<1x8x16xbf16>
    %123 = vector.shape_cast %122 : vector<1x8x16xbf16> to vector<8x16xbf16>
    %cst_160 = arith.constant dense<0.000000e+00> : vector<64x16xf32>
    %124 = tpu.matmul %121, %123, %cst_160 {dimension_numbers = #tpu.dot_dimension_numbers<[1], [0], [0], [1], [0, 0, 1, 1], [], []>} : vector<64x8xbf16>, vector<8x16xbf16>, vector<64x16xf32> -> vector<64x16xf32>
    %125 = arith.addf %119, %124 : vector<64x16xf32>
    %c0_161 = arith.constant 0 : index
    %c2_162 = arith.constant 2 : index
    %c0_163 = arith.constant 0 : index
    %c0_164 = arith.constant 0 : index
    %126 = vector.load %arg14[%c0_161, %c2_162, %c0_163, %c0_164] : memref<1x18x18x16xbf16, #tpu.memory_space<vmem>>, vector<1x8x8x8xbf16>
    %127 = vector.shape_cast %126 : vector<1x8x8x8xbf16> to vector<64x8xbf16>
    %c6_165 = arith.constant 6 : index
    %c0_166 = arith.constant 0 : index
    %c0_167 = arith.constant 0 : index
    %128 = vector.load %arg5[%c6_165, %c0_166, %c0_167] : memref<9x8x16xbf16, #tpu.memory_space<vmem>>, vector<1x8x16xbf16>
    %129 = vector.shape_cast %128 : vector<1x8x16xbf16> to vector<8x16xbf16>
    %cst_168 = arith.constant dense<0.000000e+00> : vector<64x16xf32>
    %130 = tpu.matmul %127, %129, %cst_168 {dimension_numbers = #tpu.dot_dimension_numbers<[1], [0], [0], [1], [0, 0, 1, 1], [], []>} : vector<64x8xbf16>, vector<8x16xbf16>, vector<64x16xf32> -> vector<64x16xf32>
    %131 = arith.addf %125, %130 : vector<64x16xf32>
    %c0_169 = arith.constant 0 : index
    %c2_170 = arith.constant 2 : index
    %c1_171 = arith.constant 1 : index
    %c0_172 = arith.constant 0 : index
    %132 = vector.load %arg14[%c0_169, %c2_170, %c1_171, %c0_172] : memref<1x18x18x16xbf16, #tpu.memory_space<vmem>>, vector<1x8x8x8xbf16>
    %133 = vector.shape_cast %132 : vector<1x8x8x8xbf16> to vector<64x8xbf16>
    %c7_173 = arith.constant 7 : index
    %c0_174 = arith.constant 0 : index
    %c0_175 = arith.constant 0 : index
    %134 = vector.load %arg5[%c7_173, %c0_174, %c0_175] : memref<9x8x16xbf16, #tpu.memory_space<vmem>>, vector<1x8x16xbf16>
    %135 = vector.shape_cast %134 : vector<1x8x16xbf16> to vector<8x16xbf16>
    %cst_176 = arith.constant dense<0.000000e+00> : vector<64x16xf32>
    %136 = tpu.matmul %133, %135, %cst_176 {dimension_numbers = #tpu.dot_dimension_numbers<[1], [0], [0], [1], [0, 0, 1, 1], [], []>} : vector<64x8xbf16>, vector<8x16xbf16>, vector<64x16xf32> -> vector<64x16xf32>
    %137 = arith.addf %131, %136 : vector<64x16xf32>
    %c0_177 = arith.constant 0 : index
    %c2_178 = arith.constant 2 : index
    %c2_179 = arith.constant 2 : index
    %c0_180 = arith.constant 0 : index
    %138 = vector.load %arg14[%c0_177, %c2_178, %c2_179, %c0_180] : memref<1x18x18x16xbf16, #tpu.memory_space<vmem>>, vector<1x8x8x8xbf16>
    %139 = vector.shape_cast %138 : vector<1x8x8x8xbf16> to vector<64x8xbf16>
    %c8_181 = arith.constant 8 : index
    %c0_182 = arith.constant 0 : index
    %c0_183 = arith.constant 0 : index
    %140 = vector.load %arg5[%c8_181, %c0_182, %c0_183] : memref<9x8x16xbf16, #tpu.memory_space<vmem>>, vector<1x8x16xbf16>
    %141 = vector.shape_cast %140 : vector<1x8x16xbf16> to vector<8x16xbf16>
    %cst_184 = arith.constant dense<0.000000e+00> : vector<64x16xf32>
    %142 = tpu.matmul %139, %141, %cst_184 {dimension_numbers = #tpu.dot_dimension_numbers<[1], [0], [0], [1], [0, 0, 1, 1], [], []>} : vector<64x8xbf16>, vector<8x16xbf16>, vector<64x16xf32> -> vector<64x16xf32>
    %143 = arith.addf %137, %142 : vector<64x16xf32>
    %c0_185 = arith.constant 0 : index
    %c0_186 = arith.constant 0 : index
    %144 = vector.load %arg6[%c0_185, %c0_186] : memref<1x16xf32, #tpu.memory_space<vmem>>, vector<1x16xf32>
    %145 = vector.broadcast %144 : vector<1x16xf32> to vector<64x16xf32>
    %146 = arith.addf %143, %145 : vector<64x16xf32>
    %cst_187 = arith.constant 0.000000e+00 : f32
    %147 = vector.broadcast %cst_187 : f32 to vector<64x16xf32>
    %148 = arith.maximumf %146, %147 : vector<64x16xf32>
    %149 = vector.shape_cast %148 : vector<64x16xf32> to vector<1x4x2x8x16xf32>
    %150 = vector.extract_strided_slice %149 {offsets = [0, 0, 0, 0, 0], sizes = [1, 4, 1, 8, 16], strides = [1, 1, 1, 1, 1]} : vector<1x4x2x8x16xf32> to vector<1x4x1x8x16xf32>
    %151 = vector.shape_cast %150 : vector<1x4x1x8x16xf32> to vector<1x4x8x16xf32>
    %152 = vector.extract_strided_slice %149 {offsets = [0, 0, 1, 0, 0], sizes = [1, 4, 1, 8, 16], strides = [1, 1, 1, 1, 1]} : vector<1x4x2x8x16xf32> to vector<1x4x1x8x16xf32>
    %153 = vector.shape_cast %152 : vector<1x4x1x8x16xf32> to vector<1x4x8x16xf32>
    %154 = arith.maximumf %151, %153 : vector<1x4x8x16xf32>
    %155 = vector.shape_cast %154 : vector<1x4x8x16xf32> to vector<1x4x4x2x16xf32>
    %156 = vector.extract_strided_slice %155 {offsets = [0, 0, 0, 0, 0], sizes = [1, 4, 4, 1, 16], strides = [1, 1, 1, 1, 1]} : vector<1x4x4x2x16xf32> to vector<1x4x4x1x16xf32>
    %157 = vector.shape_cast %156 : vector<1x4x4x1x16xf32> to vector<1x4x4x16xf32>
    %158 = vector.extract_strided_slice %155 {offsets = [0, 0, 0, 1, 0], sizes = [1, 4, 4, 1, 16], strides = [1, 1, 1, 1, 1]} : vector<1x4x4x2x16xf32> to vector<1x4x4x1x16xf32>
    %159 = vector.shape_cast %158 : vector<1x4x4x1x16xf32> to vector<1x4x4x16xf32>
    %160 = arith.maximumf %157, %159 : vector<1x4x4x16xf32>
    %c0_188 = arith.constant 0 : index
    %c0_189 = arith.constant 0 : index
    %161 = vector.load %arg7[%c0_188, %c0_189] : memref<1x16xf32, #tpu.memory_space<vmem>>, vector<1x16xf32>
    %162 = vector.shape_cast %161 : vector<1x16xf32> to vector<1x1x1x16xf32>
    %163 = vector.broadcast %162 : vector<1x1x1x16xf32> to vector<1x4x4x16xf32>
    %164 = arith.addf %160, %163 : vector<1x4x4x16xf32>
    %cst_190 = arith.constant 0.000000e+00 : bf16
    %165 = vector.broadcast %cst_190 : bf16 to vector<1x1x6x16xbf16>
    %cst_191 = arith.constant 0.000000e+00 : bf16
    %166 = vector.broadcast %cst_191 : bf16 to vector<1x6x1x16xbf16>
    %c0_192 = arith.constant 0 : index
    %c0_193 = arith.constant 0 : index
    %c0_194 = arith.constant 0 : index
    %c0_195 = arith.constant 0 : index
    %167 = vector.load %arg14[%c0_192, %c0_193, %c0_194, %c0_195] : memref<1x18x18x16xbf16, #tpu.memory_space<vmem>>, vector<1x1x6x16xbf16>
    tpu.vector_store %arg14[%c0_192, %c0_193, %c0_194, %c0_195], %165 {strides = array<i32>} : memref<1x18x18x16xbf16, #tpu.memory_space<vmem>>, vector<1x1x6x16xbf16>,
    %c0_196 = arith.constant 0 : index
    %c5_197 = arith.constant 5 : index
    %c0_198 = arith.constant 0 : index
    %c0_199 = arith.constant 0 : index
    %168 = vector.load %arg14[%c0_196, %c5_197, %c0_198, %c0_199] : memref<1x18x18x16xbf16, #tpu.memory_space<vmem>>, vector<1x1x6x16xbf16>
    tpu.vector_store %arg14[%c0_196, %c5_197, %c0_198, %c0_199], %165 {strides = array<i32>} : memref<1x18x18x16xbf16, #tpu.memory_space<vmem>>, vector<1x1x6x16xbf16>,
    %c0_200 = arith.constant 0 : index
    %c0_201 = arith.constant 0 : index
    %c0_202 = arith.constant 0 : index
    %c0_203 = arith.constant 0 : index
    %169 = vector.load %arg14[%c0_200, %c0_201, %c0_202, %c0_203] : memref<1x18x18x16xbf16, #tpu.memory_space<vmem>>, vector<1x6x1x16xbf16>
    tpu.vector_store %arg14[%c0_200, %c0_201, %c0_202, %c0_203], %166 {strides = array<i32>} : memref<1x18x18x16xbf16, #tpu.memory_space<vmem>>, vector<1x6x1x16xbf16>,
    %c0_204 = arith.constant 0 : index
    %c0_205 = arith.constant 0 : index
    %c5_206 = arith.constant 5 : index
    %c0_207 = arith.constant 0 : index
    %170 = vector.load %arg14[%c0_204, %c0_205, %c5_206, %c0_207] : memref<1x18x18x16xbf16, #tpu.memory_space<vmem>>, vector<1x6x1x16xbf16>
    tpu.vector_store %arg14[%c0_204, %c0_205, %c5_206, %c0_207], %166 {strides = array<i32>} : memref<1x18x18x16xbf16, #tpu.memory_space<vmem>>, vector<1x6x1x16xbf16>,
    %171 = arith.truncf %164 : vector<1x4x4x16xf32> to vector<1x4x4x16xbf16>
    %c0_208 = arith.constant 0 : index
    %c1_209 = arith.constant 1 : index
    %c1_210 = arith.constant 1 : index
    %c0_211 = arith.constant 0 : index
    %172 = vector.load %arg14[%c0_208, %c1_209, %c1_210, %c0_211] : memref<1x18x18x16xbf16, #tpu.memory_space<vmem>>, vector<1x4x4x16xbf16>
    tpu.vector_store %arg14[%c0_208, %c1_209, %c1_210, %c0_211], %171 {strides = array<i32>} : memref<1x18x18x16xbf16, #tpu.memory_space<vmem>>, vector<1x4x4x16xbf16>,
    %c0_212 = arith.constant 0 : index
    %c0_213 = arith.constant 0 : index
    %c0_214 = arith.constant 0 : index
    %c0_215 = arith.constant 0 : index
    %173 = vector.load %arg14[%c0_212, %c0_213, %c0_214, %c0_215] : memref<1x18x18x16xbf16, #tpu.memory_space<vmem>>, vector<1x4x4x16xbf16>
    %174 = vector.shape_cast %173 : vector<1x4x4x16xbf16> to vector<16x16xbf16>
    %c0_216 = arith.constant 0 : index
    %c0_217 = arith.constant 0 : index
    %c0_218 = arith.constant 0 : index
    %175 = vector.load %arg8[%c0_216, %c0_217, %c0_218] : memref<9x16x32xbf16, #tpu.memory_space<vmem>>, vector<1x16x32xbf16>
    %176 = vector.shape_cast %175 : vector<1x16x32xbf16> to vector<16x32xbf16>
    %cst_219 = arith.constant dense<0.000000e+00> : vector<16x32xf32>
    %177 = tpu.matmul %174, %176, %cst_219 {dimension_numbers = #tpu.dot_dimension_numbers<[1], [0], [0], [1], [0, 0, 1, 1], [], []>} : vector<16x16xbf16>, vector<16x32xbf16>, vector<16x32xf32> -> vector<16x32xf32>
    %c0_220 = arith.constant 0 : index
    %c0_221 = arith.constant 0 : index
    %c1_222 = arith.constant 1 : index
    %c0_223 = arith.constant 0 : index
    %178 = vector.load %arg14[%c0_220, %c0_221, %c1_222, %c0_223] : memref<1x18x18x16xbf16, #tpu.memory_space<vmem>>, vector<1x4x4x16xbf16>
    %179 = vector.shape_cast %178 : vector<1x4x4x16xbf16> to vector<16x16xbf16>
    %c1_224 = arith.constant 1 : index
    %c0_225 = arith.constant 0 : index
    %c0_226 = arith.constant 0 : index
    %180 = vector.load %arg8[%c1_224, %c0_225, %c0_226] : memref<9x16x32xbf16, #tpu.memory_space<vmem>>, vector<1x16x32xbf16>
    %181 = vector.shape_cast %180 : vector<1x16x32xbf16> to vector<16x32xbf16>
    %cst_227 = arith.constant dense<0.000000e+00> : vector<16x32xf32>
    %182 = tpu.matmul %179, %181, %cst_227 {dimension_numbers = #tpu.dot_dimension_numbers<[1], [0], [0], [1], [0, 0, 1, 1], [], []>} : vector<16x16xbf16>, vector<16x32xbf16>, vector<16x32xf32> -> vector<16x32xf32>
    %183 = arith.addf %177, %182 : vector<16x32xf32>
    %c0_228 = arith.constant 0 : index
    %c0_229 = arith.constant 0 : index
    %c2_230 = arith.constant 2 : index
    %c0_231 = arith.constant 0 : index
    %184 = vector.load %arg14[%c0_228, %c0_229, %c2_230, %c0_231] : memref<1x18x18x16xbf16, #tpu.memory_space<vmem>>, vector<1x4x4x16xbf16>
    %185 = vector.shape_cast %184 : vector<1x4x4x16xbf16> to vector<16x16xbf16>
    %c2_232 = arith.constant 2 : index
    %c0_233 = arith.constant 0 : index
    %c0_234 = arith.constant 0 : index
    %186 = vector.load %arg8[%c2_232, %c0_233, %c0_234] : memref<9x16x32xbf16, #tpu.memory_space<vmem>>, vector<1x16x32xbf16>
    %187 = vector.shape_cast %186 : vector<1x16x32xbf16> to vector<16x32xbf16>
    %cst_235 = arith.constant dense<0.000000e+00> : vector<16x32xf32>
    %188 = tpu.matmul %185, %187, %cst_235 {dimension_numbers = #tpu.dot_dimension_numbers<[1], [0], [0], [1], [0, 0, 1, 1], [], []>} : vector<16x16xbf16>, vector<16x32xbf16>, vector<16x32xf32> -> vector<16x32xf32>
    %189 = arith.addf %183, %188 : vector<16x32xf32>
    %c0_236 = arith.constant 0 : index
    %c1_237 = arith.constant 1 : index
    %c0_238 = arith.constant 0 : index
    %c0_239 = arith.constant 0 : index
    %190 = vector.load %arg14[%c0_236, %c1_237, %c0_238, %c0_239] : memref<1x18x18x16xbf16, #tpu.memory_space<vmem>>, vector<1x4x4x16xbf16>
    %191 = vector.shape_cast %190 : vector<1x4x4x16xbf16> to vector<16x16xbf16>
    %c3_240 = arith.constant 3 : index
    %c0_241 = arith.constant 0 : index
    %c0_242 = arith.constant 0 : index
    %192 = vector.load %arg8[%c3_240, %c0_241, %c0_242] : memref<9x16x32xbf16, #tpu.memory_space<vmem>>, vector<1x16x32xbf16>
    %193 = vector.shape_cast %192 : vector<1x16x32xbf16> to vector<16x32xbf16>
    %cst_243 = arith.constant dense<0.000000e+00> : vector<16x32xf32>
    %194 = tpu.matmul %191, %193, %cst_243 {dimension_numbers = #tpu.dot_dimension_numbers<[1], [0], [0], [1], [0, 0, 1, 1], [], []>} : vector<16x16xbf16>, vector<16x32xbf16>, vector<16x32xf32> -> vector<16x32xf32>
    %195 = arith.addf %189, %194 : vector<16x32xf32>
    %c0_244 = arith.constant 0 : index
    %c1_245 = arith.constant 1 : index
    %c1_246 = arith.constant 1 : index
    %c0_247 = arith.constant 0 : index
    %196 = vector.load %arg14[%c0_244, %c1_245, %c1_246, %c0_247] : memref<1x18x18x16xbf16, #tpu.memory_space<vmem>>, vector<1x4x4x16xbf16>
    %197 = vector.shape_cast %196 : vector<1x4x4x16xbf16> to vector<16x16xbf16>
    %c4_248 = arith.constant 4 : index
    %c0_249 = arith.constant 0 : index
    %c0_250 = arith.constant 0 : index
    %198 = vector.load %arg8[%c4_248, %c0_249, %c0_250] : memref<9x16x32xbf16, #tpu.memory_space<vmem>>, vector<1x16x32xbf16>
    %199 = vector.shape_cast %198 : vector<1x16x32xbf16> to vector<16x32xbf16>
    %cst_251 = arith.constant dense<0.000000e+00> : vector<16x32xf32>
    %200 = tpu.matmul %197, %199, %cst_251 {dimension_numbers = #tpu.dot_dimension_numbers<[1], [0], [0], [1], [0, 0, 1, 1], [], []>} : vector<16x16xbf16>, vector<16x32xbf16>, vector<16x32xf32> -> vector<16x32xf32>
    %201 = arith.addf %195, %200 : vector<16x32xf32>
    %c0_252 = arith.constant 0 : index
    %c1_253 = arith.constant 1 : index
    %c2_254 = arith.constant 2 : index
    %c0_255 = arith.constant 0 : index
    %202 = vector.load %arg14[%c0_252, %c1_253, %c2_254, %c0_255] : memref<1x18x18x16xbf16, #tpu.memory_space<vmem>>, vector<1x4x4x16xbf16>
    %203 = vector.shape_cast %202 : vector<1x4x4x16xbf16> to vector<16x16xbf16>
    %c5_256 = arith.constant 5 : index
    %c0_257 = arith.constant 0 : index
    %c0_258 = arith.constant 0 : index
    %204 = vector.load %arg8[%c5_256, %c0_257, %c0_258] : memref<9x16x32xbf16, #tpu.memory_space<vmem>>, vector<1x16x32xbf16>
    %205 = vector.shape_cast %204 : vector<1x16x32xbf16> to vector<16x32xbf16>
    %cst_259 = arith.constant dense<0.000000e+00> : vector<16x32xf32>
    %206 = tpu.matmul %203, %205, %cst_259 {dimension_numbers = #tpu.dot_dimension_numbers<[1], [0], [0], [1], [0, 0, 1, 1], [], []>} : vector<16x16xbf16>, vector<16x32xbf16>, vector<16x32xf32> -> vector<16x32xf32>
    %207 = arith.addf %201, %206 : vector<16x32xf32>
    %c0_260 = arith.constant 0 : index
    %c2_261 = arith.constant 2 : index
    %c0_262 = arith.constant 0 : index
    %c0_263 = arith.constant 0 : index
    %208 = vector.load %arg14[%c0_260, %c2_261, %c0_262, %c0_263] : memref<1x18x18x16xbf16, #tpu.memory_space<vmem>>, vector<1x4x4x16xbf16>
    %209 = vector.shape_cast %208 : vector<1x4x4x16xbf16> to vector<16x16xbf16>
    %c6_264 = arith.constant 6 : index
    %c0_265 = arith.constant 0 : index
    %c0_266 = arith.constant 0 : index
    %210 = vector.load %arg8[%c6_264, %c0_265, %c0_266] : memref<9x16x32xbf16, #tpu.memory_space<vmem>>, vector<1x16x32xbf16>
    %211 = vector.shape_cast %210 : vector<1x16x32xbf16> to vector<16x32xbf16>
    %cst_267 = arith.constant dense<0.000000e+00> : vector<16x32xf32>
    %212 = tpu.matmul %209, %211, %cst_267 {dimension_numbers = #tpu.dot_dimension_numbers<[1], [0], [0], [1], [0, 0, 1, 1], [], []>} : vector<16x16xbf16>, vector<16x32xbf16>, vector<16x32xf32> -> vector<16x32xf32>
    %213 = arith.addf %207, %212 : vector<16x32xf32>
    %c0_268 = arith.constant 0 : index
    %c2_269 = arith.constant 2 : index
    %c1_270 = arith.constant 1 : index
    %c0_271 = arith.constant 0 : index
    %214 = vector.load %arg14[%c0_268, %c2_269, %c1_270, %c0_271] : memref<1x18x18x16xbf16, #tpu.memory_space<vmem>>, vector<1x4x4x16xbf16>
    %215 = vector.shape_cast %214 : vector<1x4x4x16xbf16> to vector<16x16xbf16>
    %c7_272 = arith.constant 7 : index
    %c0_273 = arith.constant 0 : index
    %c0_274 = arith.constant 0 : index
    %216 = vector.load %arg8[%c7_272, %c0_273, %c0_274] : memref<9x16x32xbf16, #tpu.memory_space<vmem>>, vector<1x16x32xbf16>
    %217 = vector.shape_cast %216 : vector<1x16x32xbf16> to vector<16x32xbf16>
    %cst_275 = arith.constant dense<0.000000e+00> : vector<16x32xf32>
    %218 = tpu.matmul %215, %217, %cst_275 {dimension_numbers = #tpu.dot_dimension_numbers<[1], [0], [0], [1], [0, 0, 1, 1], [], []>} : vector<16x16xbf16>, vector<16x32xbf16>, vector<16x32xf32> -> vector<16x32xf32>
    %219 = arith.addf %213, %218 : vector<16x32xf32>
    %c0_276 = arith.constant 0 : index
    %c2_277 = arith.constant 2 : index
    %c2_278 = arith.constant 2 : index
    %c0_279 = arith.constant 0 : index
    %220 = vector.load %arg14[%c0_276, %c2_277, %c2_278, %c0_279] : memref<1x18x18x16xbf16, #tpu.memory_space<vmem>>, vector<1x4x4x16xbf16>
    %221 = vector.shape_cast %220 : vector<1x4x4x16xbf16> to vector<16x16xbf16>
    %c8_280 = arith.constant 8 : index
    %c0_281 = arith.constant 0 : index
    %c0_282 = arith.constant 0 : index
    %222 = vector.load %arg8[%c8_280, %c0_281, %c0_282] : memref<9x16x32xbf16, #tpu.memory_space<vmem>>, vector<1x16x32xbf16>
    %223 = vector.shape_cast %222 : vector<1x16x32xbf16> to vector<16x32xbf16>
    %cst_283 = arith.constant dense<0.000000e+00> : vector<16x32xf32>
    %224 = tpu.matmul %221, %223, %cst_283 {dimension_numbers = #tpu.dot_dimension_numbers<[1], [0], [0], [1], [0, 0, 1, 1], [], []>} : vector<16x16xbf16>, vector<16x32xbf16>, vector<16x32xf32> -> vector<16x32xf32>
    %225 = arith.addf %219, %224 : vector<16x32xf32>
    %c0_284 = arith.constant 0 : index
    %c0_285 = arith.constant 0 : index
    %226 = vector.load %arg9[%c0_284, %c0_285] : memref<1x32xf32, #tpu.memory_space<vmem>>, vector<1x32xf32>
    %227 = vector.broadcast %226 : vector<1x32xf32> to vector<16x32xf32>
    %228 = arith.addf %225, %227 : vector<16x32xf32>
    %cst_286 = arith.constant 0.000000e+00 : f32
    %229 = vector.broadcast %cst_286 : f32 to vector<16x32xf32>
    %230 = arith.maximumf %228, %229 : vector<16x32xf32>
    %231 = vector.shape_cast %230 : vector<16x32xf32> to vector<1x2x2x4x32xf32>
    %232 = vector.extract_strided_slice %231 {offsets = [0, 0, 0, 0, 0], sizes = [1, 2, 1, 4, 32], strides = [1, 1, 1, 1, 1]} : vector<1x2x2x4x32xf32> to vector<1x2x1x4x32xf32>
    %233 = vector.shape_cast %232 : vector<1x2x1x4x32xf32> to vector<1x2x4x32xf32>
    %234 = vector.extract_strided_slice %231 {offsets = [0, 0, 1, 0, 0], sizes = [1, 2, 1, 4, 32], strides = [1, 1, 1, 1, 1]} : vector<1x2x2x4x32xf32> to vector<1x2x1x4x32xf32>
    %235 = vector.shape_cast %234 : vector<1x2x1x4x32xf32> to vector<1x2x4x32xf32>
    %236 = arith.maximumf %233, %235 : vector<1x2x4x32xf32>
    %237 = vector.shape_cast %236 : vector<1x2x4x32xf32> to vector<1x2x2x2x32xf32>
    %238 = vector.extract_strided_slice %237 {offsets = [0, 0, 0, 0, 0], sizes = [1, 2, 2, 1, 32], strides = [1, 1, 1, 1, 1]} : vector<1x2x2x2x32xf32> to vector<1x2x2x1x32xf32>
    %239 = vector.shape_cast %238 : vector<1x2x2x1x32xf32> to vector<1x2x2x32xf32>
    %240 = vector.extract_strided_slice %237 {offsets = [0, 0, 0, 1, 0], sizes = [1, 2, 2, 1, 32], strides = [1, 1, 1, 1, 1]} : vector<1x2x2x2x32xf32> to vector<1x2x2x1x32xf32>
    %241 = vector.shape_cast %240 : vector<1x2x2x1x32xf32> to vector<1x2x2x32xf32>
    %242 = arith.maximumf %239, %241 : vector<1x2x2x32xf32>
    %c0_287 = arith.constant 0 : index
    %c0_288 = arith.constant 0 : index
    %243 = vector.load %arg10[%c0_287, %c0_288] : memref<1x32xf32, #tpu.memory_space<vmem>>, vector<1x32xf32>
    %244 = vector.shape_cast %243 : vector<1x32xf32> to vector<1x1x1x32xf32>
    %245 = vector.broadcast %244 : vector<1x1x1x32xf32> to vector<1x2x2x32xf32>
    %246 = arith.addf %242, %245 : vector<1x2x2x32xf32>
    %247 = vector.extract_strided_slice %246 {offsets = [0, 0, 0, 0], sizes = [1, 1, 1, 32], strides = [1, 1, 1, 1]} : vector<1x2x2x32xf32> to vector<1x1x1x32xf32>
    %248 = vector.shape_cast %247 : vector<1x1x1x32xf32> to vector<1x32xf32>
    %249 = arith.truncf %248 : vector<1x32xf32> to vector<1x32xbf16>
    %c0_289 = arith.constant 0 : index
    %c0_290 = arith.constant 0 : index
    %c0_291 = arith.constant 0 : index
    %c0_292 = arith.constant 0 : index
    %250 = vector.load %arg11[%c0_289, %c0_290, %c0_291, %c0_292] : memref<2x2x32x2xbf16, #tpu.memory_space<vmem>>, vector<1x1x32x2xbf16>
    %251 = vector.shape_cast %250 : vector<1x1x32x2xbf16> to vector<32x2xbf16>
    %cst_293 = arith.constant dense<0.000000e+00> : vector<1x2xf32>
    %252 = tpu.matmul %249, %251, %cst_293 {dimension_numbers = #tpu.dot_dimension_numbers<[1], [0], [0], [1], [0, 0, 1, 1], [], []>} : vector<1x32xbf16>, vector<32x2xbf16>, vector<1x2xf32> -> vector<1x2xf32>
    %253 = vector.extract_strided_slice %246 {offsets = [0, 0, 1, 0], sizes = [1, 1, 1, 32], strides = [1, 1, 1, 1]} : vector<1x2x2x32xf32> to vector<1x1x1x32xf32>
    %254 = vector.shape_cast %253 : vector<1x1x1x32xf32> to vector<1x32xf32>
    %255 = arith.truncf %254 : vector<1x32xf32> to vector<1x32xbf16>
    %c0_294 = arith.constant 0 : index
    %c1_295 = arith.constant 1 : index
    %c0_296 = arith.constant 0 : index
    %c0_297 = arith.constant 0 : index
    %256 = vector.load %arg11[%c0_294, %c1_295, %c0_296, %c0_297] : memref<2x2x32x2xbf16, #tpu.memory_space<vmem>>, vector<1x1x32x2xbf16>
    %257 = vector.shape_cast %256 : vector<1x1x32x2xbf16> to vector<32x2xbf16>
    %cst_298 = arith.constant dense<0.000000e+00> : vector<1x2xf32>
    %258 = tpu.matmul %255, %257, %cst_298 {dimension_numbers = #tpu.dot_dimension_numbers<[1], [0], [0], [1], [0, 0, 1, 1], [], []>} : vector<1x32xbf16>, vector<32x2xbf16>, vector<1x2xf32> -> vector<1x2xf32>
    %259 = arith.addf %252, %258 : vector<1x2xf32>
    %260 = vector.extract_strided_slice %246 {offsets = [0, 1, 0, 0], sizes = [1, 1, 1, 32], strides = [1, 1, 1, 1]} : vector<1x2x2x32xf32> to vector<1x1x1x32xf32>
    %261 = vector.shape_cast %260 : vector<1x1x1x32xf32> to vector<1x32xf32>
    %262 = arith.truncf %261 : vector<1x32xf32> to vector<1x32xbf16>
    %c1_299 = arith.constant 1 : index
    %c0_300 = arith.constant 0 : index
    %c0_301 = arith.constant 0 : index
    %c0_302 = arith.constant 0 : index
    %263 = vector.load %arg11[%c1_299, %c0_300, %c0_301, %c0_302] : memref<2x2x32x2xbf16, #tpu.memory_space<vmem>>, vector<1x1x32x2xbf16>
    %264 = vector.shape_cast %263 : vector<1x1x32x2xbf16> to vector<32x2xbf16>
    %cst_303 = arith.constant dense<0.000000e+00> : vector<1x2xf32>
    %265 = tpu.matmul %262, %264, %cst_303 {dimension_numbers = #tpu.dot_dimension_numbers<[1], [0], [0], [1], [0, 0, 1, 1], [], []>} : vector<1x32xbf16>, vector<32x2xbf16>, vector<1x2xf32> -> vector<1x2xf32>
    %266 = arith.addf %259, %265 : vector<1x2xf32>
    %267 = vector.extract_strided_slice %246 {offsets = [0, 1, 1, 0], sizes = [1, 1, 1, 32], strides = [1, 1, 1, 1]} : vector<1x2x2x32xf32> to vector<1x1x1x32xf32>
    %268 = vector.shape_cast %267 : vector<1x1x1x32xf32> to vector<1x32xf32>
    %269 = arith.truncf %268 : vector<1x32xf32> to vector<1x32xbf16>
    %c1_304 = arith.constant 1 : index
    %c1_305 = arith.constant 1 : index
    %c0_306 = arith.constant 0 : index
    %c0_307 = arith.constant 0 : index
    %270 = vector.load %arg11[%c1_304, %c1_305, %c0_306, %c0_307] : memref<2x2x32x2xbf16, #tpu.memory_space<vmem>>, vector<1x1x32x2xbf16>
    %271 = vector.shape_cast %270 : vector<1x1x32x2xbf16> to vector<32x2xbf16>
    %cst_308 = arith.constant dense<0.000000e+00> : vector<1x2xf32>
    %272 = tpu.matmul %269, %271, %cst_308 {dimension_numbers = #tpu.dot_dimension_numbers<[1], [0], [0], [1], [0, 0, 1, 1], [], []>} : vector<1x32xbf16>, vector<32x2xbf16>, vector<1x2xf32> -> vector<1x2xf32>
    %273 = arith.addf %266, %272 : vector<1x2xf32>
    %c0_309 = arith.constant 0 : index
    %c0_310 = arith.constant 0 : index
    %274 = vector.load %arg12[%c0_309, %c0_310] : memref<1x2xf32, #tpu.memory_space<vmem>>, vector<1x2xf32>
    %275 = arith.addf %273, %274 : vector<1x2xf32>
    %276 = vector.shape_cast %275 : vector<1x2xf32> to vector<1x1x2xf32>
    %c0_311 = arith.constant 0 : index
    %c0_312 = arith.constant 0 : index
    %c0_313 = arith.constant 0 : index
    %277 = vector.load %arg13[%c0_311, %c0_312, %c0_313] : memref<1x1x2xf32, #tpu.memory_space<vmem>>, vector<1x1x2xf32>
    tpu.vector_store %arg13[%c0_311, %c0_312, %c0_313], %276 {strides = array<i32>} : memref<1x1x2xf32, #tpu.memory_space<vmem>>, vector<1x1x2xf32>,
    return
  }
  func.func @transform_0(%arg0: i32) -> (i32, i32, i32, i32) {
    %c0_i32 = arith.constant 0 : i32
    %c0_i32_0 = arith.constant 0 : i32
    %c0_i32_1 = arith.constant 0 : i32
    %c0_i32_2 = arith.constant 0 : i32
    return %arg0, %c0_i32, %c0_i32_0, %c0_i32_1 : i32, i32, i32, i32
  }
  func.func @transform_1(%arg0: i32) -> (i32, i32, i32) {
    %c0_i32 = arith.constant 0 : i32
    %c0_i32_0 = arith.constant 0 : i32
    %c0_i32_1 = arith.constant 0 : i32
    %c0_i32_2 = arith.constant 0 : i32
    return %c0_i32, %c0_i32_0, %c0_i32_1 : i32, i32, i32
  }
  func.func @transform_2(%arg0: i32) -> (i32, i32) {
    %c0_i32 = arith.constant 0 : i32
    %c0_i32_0 = arith.constant 0 : i32
    %c0_i32_1 = arith.constant 0 : i32
    return %c0_i32, %c0_i32_0 : i32, i32
  }
  func.func @transform_3(%arg0: i32) -> (i32, i32) {
    %c0_i32 = arith.constant 0 : i32
    %c0_i32_0 = arith.constant 0 : i32
    %c0_i32_1 = arith.constant 0 : i32
    return %c0_i32, %c0_i32_0 : i32, i32
  }
  func.func @transform_4(%arg0: i32) -> (i32, i32, i32) {
    %c0_i32 = arith.constant 0 : i32
    %c0_i32_0 = arith.constant 0 : i32
    %c0_i32_1 = arith.constant 0 : i32
    %c0_i32_2 = arith.constant 0 : i32
    return %c0_i32, %c0_i32_0, %c0_i32_1 : i32, i32, i32
  }
  func.func @transform_5(%arg0: i32) -> (i32, i32) {
    %c0_i32 = arith.constant 0 : i32
    %c0_i32_0 = arith.constant 0 : i32
    %c0_i32_1 = arith.constant 0 : i32
    return %c0_i32, %c0_i32_0 : i32, i32
  }
  func.func @transform_6(%arg0: i32) -> (i32, i32) {
    %c0_i32 = arith.constant 0 : i32
    %c0_i32_0 = arith.constant 0 : i32
    %c0_i32_1 = arith.constant 0 : i32
    return %c0_i32, %c0_i32_0 : i32, i32
  }
  func.func @transform_7(%arg0: i32) -> (i32, i32, i32) {
    %c0_i32 = arith.constant 0 : i32
    %c0_i32_0 = arith.constant 0 : i32
    %c0_i32_1 = arith.constant 0 : i32
    %c0_i32_2 = arith.constant 0 : i32
    return %c0_i32, %c0_i32_0, %c0_i32_1 : i32, i32, i32
  }
  func.func @transform_8(%arg0: i32) -> (i32, i32) {
    %c0_i32 = arith.constant 0 : i32
    %c0_i32_0 = arith.constant 0 : i32
    %c0_i32_1 = arith.constant 0 : i32
    return %c0_i32, %c0_i32_0 : i32, i32
  }
  func.func @transform_9(%arg0: i32) -> (i32, i32) {
    %c0_i32 = arith.constant 0 : i32
    %c0_i32_0 = arith.constant 0 : i32
    %c0_i32_1 = arith.constant 0 : i32
    return %c0_i32, %c0_i32_0 : i32, i32
  }
  func.func @transform_10(%arg0: i32) -> (i32, i32, i32, i32) {
    %c0_i32 = arith.constant 0 : i32
    %c0_i32_0 = arith.constant 0 : i32
    %c0_i32_1 = arith.constant 0 : i32
    %c0_i32_2 = arith.constant 0 : i32
    %c0_i32_3 = arith.constant 0 : i32
    return %c0_i32, %c0_i32_0, %c0_i32_1, %c0_i32_2 : i32, i32, i32, i32
  }
  func.func @transform_11(%arg0: i32) -> (i32, i32) {
    %c0_i32 = arith.constant 0 : i32
    %c0_i32_0 = arith.constant 0 : i32
    %c0_i32_1 = arith.constant 0 : i32
    return %c0_i32, %c0_i32_0 : i32, i32
  }
  func.func @transform_12(%arg0: i32) -> (i32, i32, i32) {
    %c0_i32 = arith.constant 0 : i32
    %c0_i32_0 = arith.constant 0 : i32
    %c0_i32_1 = arith.constant 0 : i32
    return %arg0, %c0_i32, %c0_i32_0 : i32, i32, i32
  }
}

</mosaic_0001>

<bundles_post_ra>
// kernel: simple_conv_net_forward.1
= control target key start
LH: loop header
LB: loop body
LE: loop exit
PB: predicated region body
PF: predicated region fallthrough
CT: control target
= control target key end

     0   :  { %s12269_s0 = inlined_call_operand.vmem [shape: f32[2,16,16,4], index: 0, kind: input, shape index: {}]   ;;  %s12270_s1 = inlined_call_operand.vmem [shape: bf16[9,4,8], index: 1, kind: input, shape index: {}]   ;;  %s12271_s2 = inlined_call_operand.vmem [shape: f32[1,8], index: 2, kind: input, shape index: {}]   ;;  %s12272_s3 = inlined_call_operand.vmem [shape: f32[1,8], index: 3, kind: input, shape index: {}]   ;;  %s12273_s4 = inlined_call_operand.vmem [shape: bf16[9,8,16], index: 4, kind: input, shape index: {}]   ;;  %s12274_s5 = inlined_call_operand.vmem [shape: f32[1,16], index: 5, kind: input, shape index: {}]   ;;  %s12275_s6 = inlined_call_operand.vmem [shape: f32[1,16], index: 6, kind: input, shape index: {}]   ;;  %s12276_s7 = inlined_call_operand.vmem [shape: bf16[9,16,32], index: 7, kind: input, shape index: {}]   ;;  %s12277_s8 = inlined_call_operand.vmem [shape: f32[1,32], index: 8, kind: input, shape index: {}]   ;;  %s12278_s9 = inlined_call_operand.vmem [shape: f32[1,32], index: 9, kind: input, shape index: {}]   ;;  %s12279_s10 = inlined_call_operand.vmem [shape: bf16[2,2,32,2], index: 10, kind: input, shape index: {}]   ;;  %s12280_s11 = inlined_call_operand.vmem [shape: f32[1,2], index: 11, kind: input, shape index: {}]   ;;  %s12281_s12 = inlined_call_operand.hbm [shape: f32[2,1,2], index: 12, kind: output, shape index: {}]  }
   0x1   :  { %12320 = sst [smem:[#allocation38_spill]] %s12269_s0 }
   0x2   :  { %12321 = sst [smem:[#allocation39_spill]] %s12270_s1 }
   0x3   :  { %17 = vsyncpa [#allocation4], 0 }
   0x4   :  { %19 = vsyncpa [#allocation4 + $0x1], 0  ;;  %s9477_s21 = smov 0   ;;  %s9479_s22 = smov 0  }
   0x5   :  { %s9481_s23 = smov 0   ;;  %s9483_s24 = smov 0  }
   0x6 LB: > { %s9498_s25 = sadd.s32 4294967295, %s9409_s24   ;;  %s8462_s26 = sadd.s32 4294967294, %s9409_s24   ;;  %s9409_s24 = sphi %s9483_s24, %s12606_s24   ;;  %s9405_s23 = sphi %s9481_s23, %s12605_s23   ;;  %s9401_s22 = sphi %s9479_s22, %s12604_s22   ;;  %s9397_s21 = sphi %s9477_s21, %s12603_s21  }
   0x7   : > { %s9502_s27 = sadd.s32 1, %s9409_s24   ;;  %s289_s28 = sadd.s32 1, %s9405_s23 }
   0x8   : > { %s286_s29 = ssub.s32 %s9409_s24, %s9502_s27  ;;  %p299_p0 = scmp.ne.s32.totalorder %s9405_s23, %s9401_s22 }
   0x9   : > { %p287_p1 = scmp.eq.s32.totalorder %s286_s29, 0  ;;  %p300_p2 = scmp.eq.s32.totalorder %s9498_s25, 1 }
   0xa   : > { %p305_p3 = scmp.ne.s32.totalorder %s9401_s22, %s9397_s21  ;;  %p306_p4 = scmp.eq.s32.totalorder %s8462_s26, 1 }
   0xb   : > { %s9513_s30 = scalar_select %p287_p1, %s9405_s23, %s289_s28  }
   0xc   : > { %p9515_p5 = por %p300_p2, %p299_p0  ;;  %p9519_p6 = por %p306_p4, %p305_p3 }
   0xd   : > { %p8465_p7 = scmp.ge.s32.totalorder %s9409_s24, 1  ;;  %p365_p8 = scmp.lt.s32.totalorder %s9409_s24, 3 }
   0xf   : > { %p366_p9 = pnand %p8465_p7, %p365_p8 }
  0x11   : > { %369 = sbr.rel (%p366_p9) target bundleno = 1682 (0x692), region = 68 }
  0x16   : > { %vm12300_vm0 = vcmask 1041408   ;;  %s12324_s1 = sld [smem:[#allocation39_spill]]  ;;  %vm444_vm1 = vcmask 27648   ;;  %vm447_vm2 = vcmask 24576   ;;  %v12282_v5 = vmov 0   ;;  %p406_p10 = scmp.lt.s32.totalorder %s9498_s25, 1 }
  0x17   : > { %445 = vst.msk [vmem:[#allocation2] sm:$0xf] %vm444_vm1, %v12282_v5  ;;  %vm454_vm3 = vsmask.f32 256  ;;  %vm510_vm5 = vsmask.f32 7938 }
  0x18   : > { %446 = vst.msk [vmem:[#allocation2 + $0x4] sm:$0xf] %vm444_vm1, %v12282_v5  ;;  %vm9542_vm4 = vmand %vm447_vm2, %vm454_vm3  ;;  %v459_v10 = vld [vmem:[#allocation2 + $0xc] sm:$0x1]  ;;  %vm1931_vm6 = vcmask 1042432   ;;  %vm1932_vm7 = vcmask 1046532  }
  0x19   : > { %448 = vst.msk [vmem:[#allocation2 + $0x8] sm:$0x1] %vm447_vm2, %v12282_v5  ;;  %s407_s29 = scalar_select %p406_p10, %s9498_s25, 1  ;;  %v460_v11 = vsel %vm9542_vm4, 0, %v459_v10  ;;  %vm598_vm8 = vsmask.f32 4368  ;;  %vm9565_vm9 = vmand %vm447_vm2, %vm510_vm5 }
  0x1a   : > { %450 = vst.msk [vmem:[#allocation2 + $0xcc] sm:$0xf] %vm444_vm1, %v12282_v5  ;;  %vm9572_vm10 = vmor %vm1931_vm6, %vm1932_vm7  ;;  %v12329_v16 = vmov 0  ;;  %s12332_s0 = sld [smem:[#allocation38_spill]]  ;;  %vm5479_vm11 = vcmask 60416   ;;  %vm1521_vm12 = vcmask 31744  }
  0x1b   : > { %451 = vst.msk [vmem:[#allocation2 + $0xd0] sm:$0xf] %vm444_vm1, %v12282_v5  ;;  %s9195_s15 = sshll.u32 %s407_s29, 8  ;;  %v12330_v16 = vsel %vm9572_vm10, 4294967295, %v12329_v16  ;;  %vm1084_vm13 = vsmask.f32 3328  ;;  %vm9609_vm6 = vmor %vm454_vm3, %vm598_vm8  ;;  %s8403_s29 = scalar_lea.hbm %s12281_s12, %s9498_s25 }
  0x1c   : > { %v8581_v0 = vld [vmem:[%s12324_s1 + $0x4] sm:$0x3]  ;;  %v8598_v1 = vld [vmem:[%s12324_s1 + $0x6] sm:$0x3]  ;;  %v8468_v4 = vld [vmem:[%s12324_s1 + $0x2] sm:$0x3] }
  0x1d   : > { %v2145_v2 = vsel %vm12300_vm0, %v8581_v0, 0  ;;  %v2431_v3 = vsel %vm12300_vm0, %v8598_v1, 0  ;;  %v1572_v7 = vsel %vm12300_vm0, %v8468_v4, 0  ;;  %v1067_v8 = vld [vmem:[%s12324_s1] sm:$0x3]  ;;  %12331 = vst [vmem:[#allocation6_spill] sm:$0xff] %v12330_v16 }
  0x1e   : > { %2154 = vmatpush.bf16.msra.mxu2 %v2145_v2  ;;  %2440 = vmatpush.bf16.msra.mxu3 %v2431_v3  ;;  %v1792_v9 = vsel %vm12300_vm0, %v1067_v8, 0  ;;  %452 = vst.msk [vmem:[#allocation2 + $0xd4] sm:$0x1] %vm447_vm2, %v12282_v5  ;;  %v8679_v13 = vld [vmem:[%s12324_s1 + $0x8] sm:$0x3]  ;;  %vm5481_vm15 = vcmask 57344   ;;  %vm9602_vm2 = vmand %vm444_vm1, %vm510_vm5 }
  0x1f   : > { %1581 = vmatpush.bf16.msra.mxu0 %v1572_v7  ;;  %1801 = vmatpush.bf16.msra.mxu1 %v1792_v9  ;;  %461 = vst [vmem:[#allocation2 + $0xc] sm:$0x1] %v460_v11  ;;  %v456_v14 = vld [vmem:[#allocation2] sm:$0x1]  ;;  %v1883_v15 = vld [vmem:[#allocation2] sm:$0xe]  ;;  %vm9651_vm8 = vmand %vm5481_vm15, %vm454_vm3 }
  0x20   : > { %s9579_s20 = scalar_lea.vmem %s12332_s0, %s9195_s15  ;;  %v3085_v17 = vsel %vm12300_vm0, %v8679_v13, 0  ;;  %v457_v18 = vsel %vm9542_vm4, 0, %v456_v14  ;;  %v1036_v19 = vld [vmem:[#allocation2 + $0x4] sm:$0xf]  ;;  %v8565_v20 = vrot.slane %v1883_v15, 9  ;;  %s8407_s19 = sshll.u32 %s8403_s29, 4  ;;  %s8408_s19 = int_to_ptr.hbm [resolvable:$true] %s8407_s19 }
  0x21   : > { %v412_v21 = vld [vmem:[%s9579_s20] sm:$0xff]  ;;  %v413_v22 = vld [vmem:[%s9579_s20 + $0x8] sm:$0xff]  ;;  %458 = vst [vmem:[#allocation2] sm:$0x1] %v457_v18  ;;  %v512_v23 = vld [vmem:[#allocation2 + $0x8] sm:$0x1] }
  0x22   : > { %v1936_v24 = vrot.slane %v1036_v19, 5  ;;  %v566_v25 = vpack.c.bf16 %v412_v21, %v412_v21  ;;  %v567_v26 = vpack.c.bf16 %v413_v22, %v413_v22  ;;  %v1097_v27 = vshll.u32 %v1036_v19, 16  ;;  %v515_v30 = vld [vmem:[#allocation2 + $0x14] sm:$0x1]  ;;  %v414_v34 = vld [vmem:[%s9579_s20 + $0x10] sm:$0xff]  ;;  %v416_v57 = vld [vmem:[%s9579_s20 + $0x20] sm:$0xff] }
  0x23   : > { %3094 = vmatpush.bf16.msrb.mxu0 %v3085_v17  ;;  %v513_v28 = vsel %vm9565_vm9, 0, %v512_v23  ;;  %vm1085_vm14 = vsmask.f32 7440  ;;  %v1101_v29 = vshrl.u32 %v1036_v19, 16  ;;  %v415_v35 = vld [vmem:[%s9579_s20 + $0x18] sm:$0xff]  ;;  %v516_v44 = vsel %vm9565_vm9, 0, %v515_v30 }
  0x24   : > { %514 = vst [vmem:[#allocation2 + $0x8] sm:$0x1] %v513_v28  ;;  %v9590_v31 = vsel %vm9572_vm10, %v8565_v20, %v1936_v24  ;;  %v601_v32 = vshrl.u32 %v566_v25, 16  ;;  %v604_v33 = vshll.u32 %v566_v25, 16  ;;  %v1938_v36 = vrot.slane %v1936_v24, 4  ;;  %vm9629_vm7 = vmor %vm1084_vm13, %vm1085_vm14  ;;  %s9361_s26 = sshra.s32 %s8408_s19, 4  ;;  %s9362_s26 = int_to_ptr.hbm [resolvable:$true] %s9361_s26 }
  0x25   : > { %v609_v37 = vshrl.u32 %v567_v26, 16  ;;  %v612_v38 = vshll.u32 %v567_v26, 16  ;;  %v9594_v39 = vrot.slane %v1097_v27, 5  ;;  %v462_v40 = vld [vmem:[#allocation2 + $0x18] sm:$0x1]  ;;  %v1103_v43 = vrot.slane %v1101_v29, 4  ;;  %vm9669_vm13 = vmand %vm5481_vm15, %vm510_vm5  ;;  %p9368_p0 = scmp.lt.s32.totalorder %s9362_s26, %s12281_s12 }
  0x26   : > { %v603_v41 = vrot.slane %v601_v32, 7  ;;  %v923_v42 = vld [vmem:[#allocation2 + $0xc] sm:$0xf]  ;;  %v463_v45 = vsel %vm9542_vm4, 0, %v462_v40  ;;  %v2048_v47 = vunpack.c.l.b16 %v9590_v31  ;;  %517 = vst [vmem:[#allocation2 + $0x14] sm:$0x1] %v516_v44  ;;  %v568_v49 = vpack.c.bf16 %v414_v34, %v414_v34 }
  0x27   : > { %v611_v48 = vrot.slane %v609_v37, 7  ;;  %v569_v50 = vpack.c.bf16 %v415_v35, %v415_v35  ;;  %v518_v51 = vld [vmem:[#allocation2 + $0x20] sm:$0x1]  ;;  %v1104_v55 = vor.u32 %v1103_v43, %v9594_v39  ;;  %464 = vst [vmem:[#allocation2 + $0x18] sm:$0x1] %v463_v45  ;;  %v9624_v11 = vpack.c.bf16 %v416_v57, %v416_v57  ;;  %s9363_s28 = scalar_lea.hbm %s9362_s26, 1 }
  0x28   : > { %v606_v53 = vor.u32 %v604_v33, %v603_v41  ;;  %v607_v54 = vrot.slane %v603_v41, 4  ;;  %v519_v56 = vsel %vm9565_vm9, 0, %v518_v51  ;;  %v1035_v60 = vld [vmem:[#allocation2] sm:$0xf]  ;;  %v618_v62 = vshrl.u32 %v568_v49, 16  ;;  %p9364_p11 = scmp.ne.s32.totalorder %s9362_s26, %s9363_s28  ;;  %s9367_s29 = scalar_lea.hbm %s12281_s12, 2 }
  0x29   : > { %v614_v58 = vor.u32 %v612_v38, %v611_v48  ;;  %v616_v59 = vrot.slane %v611_v48, 4  ;;  %v9196_v61 = vld [vmem:[#allocation2] sm:$0xff]  ;;  %v621_v63 = vshll.u32 %v568_v49, 16  ;;  %v1088_v2 = vshrl.u32 %v1035_v60, 16  ;;  %520 = vst [vmem:[#allocation2 + $0x20] sm:$0x1] %v519_v56  ;;  %p9369_p1 = scmp.lt.s32.totalorder %s9367_s29, %s9363_s28 }
  0x2a   : > { %v465_v0 = vld [vmem:[#allocation2 + $0x24] sm:$0x1]  ;;  %v924_v1 = vsel %vm9602_vm2, %v606_v53, %v923_v42  ;;  %v1091_v3 = vshll.u32 %v1035_v60, 16  ;;  %v1105_v4 = vrot.slane %v1104_v55, 4  ;;  %5480 = vst.msk [vmem:[#allocation2] sm:$0xf] %vm5479_vm11, %v12282_v5  ;;  %8549 = vmatmul.msk.bf16.vlgmr.msra.gmra.mxu1 %vm1521_vm12, %v9196_v61  ;;  %p9365_p12 = pnand %p9364_p11, %p9515_p5 }
  0x2b   : > { %v1068_v7 = vld [vmem:[#allocation2 + $0x8] sm:$0x1]  ;;  %v615_v8 = vsel %vm9609_vm6, %v607_v54, %v614_v58  ;;  %925 = vst [vmem:[#allocation2 + $0xc] sm:$0xf] %v924_v1  ;;  %v620_v9 = vrot.slane %v618_v62, 7  ;;  %v626_v10 = vshrl.u32 %v569_v50, 16  ;;  %p9370_p2 = por %p9369_p1, %p9368_p0 }
  0x2c   : > { %v1939_v13 = vrot.slane %v1068_v7, 5  ;;  %926 = vst.msk [vmem:[#allocation2 + $0x10] sm:$0xf] %vm444_vm1, %v615_v8  ;;  %v1090_v14 = vrot.slane %v1088_v2, 4  ;;  %v1093_v15 = vrot.slane %v1091_v3, 5  ;;  %v1107_v17 = vshll.u32 %v1068_v7, 16  ;;  %p9366_p13 = pneg %p9365_p12 }
  0x2d   : > { %v12337_v18 = vmov 0  ;;  %5482 = vst.msk [vmem:[#allocation2 + $0x4] sm:$0x1] %vm5481_vm15, %v12282_v5  ;;  %v623_v19 = vor.u32 %v621_v63, %v620_v9  ;;  %v624_v20 = vrot.slane %v620_v9, 4  ;;  %v9635_v21 = vrot.slane %v626_v10, 7  ;;  %v417_v1 = vld [vmem:[%s9579_s20 + $0x28] sm:$0xff] }
  0x2e   : > { %v12338_v18 = vsel %vm9629_vm7, 4294967295, %v12337_v18  ;;  %v629_v22 = vshll.u32 %v569_v50, 16  ;;  %v1940_v23 = vsel %vm9572_vm10, %v1938_v36, %v1939_v13  ;;  %v1094_v24 = vor.u32 %v1093_v15, %v1090_v14  ;;  %v927_v26 = vld [vmem:[#allocation2 + $0x14] sm:$0x1]  ;;  %v930_v31 = vld [vmem:[#allocation2 + $0x18] sm:$0xf]  ;;  %p9371_p3 = pnand %p9370_p2, %p9366_p13 }
  0x2f   : > { %12339 = vst [vmem:[#allocation7_spill] sm:$0xff] %v12338_v18  ;;  %v1109_v25 = vrot.slane %v1107_v17, 5  ;;  %v466_v27 = vsel %vm9542_vm4, 0, %v465_v0  ;;  %v2049_v28 = vunpack.c.l.b16 %v1940_v23  ;;  %v928_v29 = vsel %vm9542_vm4, %v616_v59, %v927_v26 }
  0x30   : > { %v631_v30 = vor.u32 %v629_v22, %v9635_v21  ;;  %467 = vst [vmem:[#allocation2 + $0x24] sm:$0x1] %v466_v27  ;;  %v1095_v32 = vrot.slane %v1094_v24, 4  ;;  %v931_v34 = vsel %vm9602_vm2, %v623_v19, %v930_v31  ;;  %v635_v35 = vshrl.u32 %v9624_v11, 16  ;;  %v934_v27 = vld [vmem:[#allocation2 + $0x20] sm:$0x1] }
  0x31   : > { %v1110_v33 = vsel %vm9629_vm7, %v1105_v4, %v1109_v25  ;;  %929 = vst [vmem:[#allocation2 + $0x14] sm:$0x1] %v928_v29  ;;  %v2080_v36 = vpack.c.b16 %v2049_v28, %v2048_v47  ;;  %v12340_v38 = vmov 0  ;;  %v5488_v40 = vld [vmem:[#allocation2] sm:$0x1]  ;;  %v638_v42 = vshll.u32 %v9624_v11, 16 }
  0x32   : > { %v1474_v37 = vunpack.c.l.b16 %v1110_v33  ;;  %v12341_v38 = vsel %vm9651_vm8, 4294967295, %v12340_v38  ;;  %v632_v41 = vsel %vm9609_vm6, %v624_v20, %v631_v30  ;;  %932 = vst [vmem:[#allocation2 + $0x18] sm:$0xf] %v931_v34  ;;  %v1100_v43 = vsel %vm9629_vm7, %v1095_v32, %v9594_v39  ;;  %v1884_v45 = vld [vmem:[#allocation2 + $0xc] sm:$0xe] }
  0x33   : > { %12342 = vst [vmem:[#allocation8_spill] sm:$0xff] %v12341_v38  ;;  %v5489_v44 = vsel %vm9651_vm8, 0, %v5488_v40  ;;  %v9664_v47 = vrot.slane %v635_v35, 7  ;;  %8582 = vmatmul.msk.bf16.vlgmr.msra.gmra.mxu2 %vm1521_vm12, %v2080_v36  ;;  %v9212_v48 = vld [vmem:[#allocation2 + $0xc] sm:$0xff]  ;;  %v1473_v49 = vunpack.c.l.b16 %v1100_v43  ;;  %v8566_v51 = vrot.slane %v1884_v45, 9 }
  0x34   : > { %933 = vst.msk [vmem:[#allocation2 + $0x1c] sm:$0xf] %vm444_vm1, %v632_v41  ;;  %v1038_v50 = vld [vmem:[#allocation2 + $0x10] sm:$0xf]  ;;  %v5519_v53 = vld [vmem:[#allocation2 + $0x4] sm:$0x1]  ;;  %8663 = vmatmul.msk.bf16.vlgmr.msra.gmra.mxu3 %vm1521_vm12, %v9212_v48  ;;  %v571_v20 = vpack.c.bf16 %v417_v1, %v417_v1 }
  0x35   : > { %5490 = vst [vmem:[#allocation2] sm:$0x1] %v5489_v44  ;;  %v1943_v54 = vrot.slane %v1038_v50, 5  ;;  %v1037_v55 = vld [vmem:[#allocation2 + $0xc] sm:$0xf]  ;;  %v1121_v56 = vshll.u32 %v1038_v50, 16  ;;  %v1505_v57 = vpack.c.b16 %v1474_v37, %v1473_v49  ;;  %v640_v22 = vor.u32 %v638_v42, %v9664_v47 }
  0x36   : > { %v5520_v58 = vsel %vm9669_vm13, 0, %v5519_v53  ;;  %v1112_v59 = vshrl.u32 %v1037_v55, 16  ;;  %v1115_v60 = vshll.u32 %v1037_v55, 16  ;;  %v1125_v0 = vshrl.u32 %v1038_v50, 16  ;;  %v9197_v8 = vld [vmem:[#allocation2 + $0xc] sm:$0xff] }
  0x37   : > { %5521 = vst [vmem:[#allocation2 + $0x4] sm:$0x1] %v5520_v58  ;;  %v1944_v61 = vsel %vm9572_vm10, %v8566_v51, %v1943_v54  ;;  %v1945_v62 = vrot.slane %v1943_v54, 4  ;;  %v1123_v63 = vrot.slane %v1121_v56, 5  ;;  %8469 = vmatmul.msk.bf16.vlgmr.msra.gmra.mxu0 %vm1521_vm12, %v1505_v57  ;;  %v633_v3 = vrot.slane %v9635_v21, 4  ;;  %v418_v33 = vld [vmem:[%s9579_s20 + $0x30] sm:$0xff] }
  0x38   : > { %v1069_v2 = vld [vmem:[#allocation2 + $0x14] sm:$0x1]  ;;  %v1114_v4 = vrot.slane %v1112_v59, 4  ;;  %v1117_v7 = vrot.slane %v1115_v60, 5  ;;  %v1127_v10 = vrot.slane %v1125_v0, 4  ;;  %v2050_v13 = vunpack.c.l.b16 %v1944_v61 }
  0x39   : > { %v1946_v9 = vrot.slane %v1069_v2, 5  ;;  %v1131_v11 = vshll.u32 %v1069_v2, 16  ;;  %v9681_v15 = vld [vmem:[#allocation2 + $0xc] sm:$0xf]  ;;  %v5522_v19 = vld [vmem:[#allocation2 + $0x10] sm:$0x1]  ;;  %v935_v31 = vsel %vm9542_vm4, %v633_v3, %v934_v27  ;;  %v572_v60 = vpack.c.bf16 %v418_v33, %v418_v33 }
  0x3a   : > { %v1118_v14 = vor.u32 %v1117_v7, %v1114_v4  ;;  %v5491_v17 = vld [vmem:[#allocation2 + $0xc] sm:$0x1]  ;;  %v1128_v21 = vor.u32 %v1127_v10, %v1123_v63  ;;  %v9686_v25 = vld [vmem:[#allocation2 + $0x10] sm:$0xf]  ;;  %8550 = vmatmul.msk.bf16.gmra.mxu1 %vm1521_vm12, %v9197_v8  ;;  %v5523_v30 = vsel %vm9669_vm13, 0, %v5522_v19  ;;  %v641_v36 = vrot.slane %v9664_v47, 4 }
  0x3b   : > { %v1947_v23 = vsel %vm9572_vm10, %v1945_v62, %v1946_v9  ;;  %v1133_v24 = vrot.slane %v1131_v11, 5  ;;  %v5492_v26 = vsel %vm9651_vm8, 0, %v5491_v17  ;;  %v1040_v32 = vld [vmem:[#allocation2 + $0x1c] sm:$0xf]  ;;  %5524 = vst [vmem:[#allocation2 + $0x10] sm:$0x1] %v5523_v30 }
  0x3c   : > { %v2051_v28 = vunpack.c.l.b16 %v1947_v23  ;;  %v1119_v29 = vrot.slane %v1118_v14, 4  ;;  %5493 = vst [vmem:[#allocation2 + $0xc] sm:$0x1] %v5492_v26  ;;  %v1129_v34 = vrot.slane %v1128_v21, 4  ;;  %v1885_v35 = vld [vmem:[#allocation2 + $0x18] sm:$0xe] }
  0x3d   : > { %936 = vst [vmem:[#allocation2 + $0x20] sm:$0x1] %v935_v31  ;;  %v1950_v40 = vrot.slane %v1040_v32, 5  ;;  %v643_v41 = vshrl.u32 %v571_v20, 16  ;;  %v937_v42 = vld [vmem:[#allocation2 + $0x24] sm:$0xf] }
  0x3e   : > { %v1124_v37 = vsel %vm9629_vm7, %v1119_v29, %v1123_v63  ;;  %v2081_v43 = vpack.c.b16 %v2051_v28, %v2050_v13  ;;  %v1134_v44 = vsel %vm9629_vm7, %v1129_v34, %v1133_v24  ;;  %v646_v48 = vshll.u32 %v571_v20, 16  ;;  %v1039_v49 = vld [vmem:[#allocation2 + $0x18] sm:$0xf]  ;;  %v521_v54 = vld [vmem:[#allocation2 + $0x2c] sm:$0x1]  ;;  %v419_v59 = vld [vmem:[%s9579_s20 + $0x38] sm:$0xff] }
  0x3f   : > { %v1475_v45 = vunpack.c.l.b16 %v1124_v37  ;;  %v1476_v50 = vunpack.c.l.b16 %v1134_v44  ;;  %v8567_v51 = vrot.slane %v1885_v35, 9  ;;  %v9701_v53 = vrot.slane %v643_v41, 7  ;;  %v468_v55 = vld [vmem:[#allocation2 + $0x30] sm:$0x1]  ;;  %v9213_v61 = vld [vmem:[#allocation2 + $0x18] sm:$0xff]  ;;  %v421_v44 = vld [vmem:[%s9579_s20 + $0x48] sm:$0xff] }
  0x40   : > { %v938_v47 = vsel %vm9602_vm2, %v640_v22, %v937_v42  ;;  %v1136_v56 = vshrl.u32 %v1039_v49, 16  ;;  %v1139_v57 = vshll.u32 %v1039_v49, 16  ;;  %v1145_v58 = vshll.u32 %v1040_v32, 16  ;;  %v524_v8 = vld [vmem:[#allocation2 + $0x38] sm:$0x1] }
  0x41   : > { %939 = vst [vmem:[#allocation2 + $0x24] sm:$0xf] %v938_v47  ;;  %v1506_v62 = vpack.c.b16 %v1476_v50, %v1475_v45  ;;  %v1952_v63 = vrot.slane %v1950_v40, 4  ;;  %v648_v0 = vor.u32 %v646_v48, %v9701_v53  ;;  %v1149_v1 = vshrl.u32 %v1040_v32, 16  ;;  %v9198_v26 = vld [vmem:[#allocation2 + $0x18] sm:$0xff] }
  0x42   : > { %v1138_v2 = vrot.slane %v1136_v56, 4  ;;  %v1141_v3 = vrot.slane %v1139_v57, 5  ;;  %v9707_v4 = vrot.slane %v1145_v58, 5  ;;  %v522_v7 = vsel %vm9565_vm9, 0, %v521_v54  ;;  %v420_v34 = vld [vmem:[%s9579_s20 + $0x40] sm:$0xff] }
  0x43   : > { %8583 = vmatmul.msk.bf16.gmra.mxu2 %vm1521_vm12, %v2081_v43  ;;  %v649_v9 = vsel %vm9609_vm6, %v641_v36, %v648_v0  ;;  %v1151_v10 = vrot.slane %v1149_v1, 4  ;;  %523 = vst [vmem:[#allocation2 + $0x2c] sm:$0x1] %v522_v7  ;;  %v469_v11 = vsel %vm9542_vm4, 0, %v468_v55  ;;  %v573_v13 = vpack.c.bf16 %v419_v59, %v419_v59  ;;  %v471_v35 = vld [vmem:[#allocation2 + $0x3c] sm:$0x1] }
  0x44   : > { %v1070_v14 = vld [vmem:[#allocation2 + $0x20] sm:$0x1]  ;;  %940 = vst.msk [vmem:[#allocation2 + $0x28] sm:$0xf] %vm444_vm1, %v649_v9  ;;  %v1142_v17 = vor.u32 %v1141_v3, %v1138_v2  ;;  %v652_v19 = vshrl.u32 %v572_v60, 16  ;;  %8664 = vmatmul.msk.bf16.gmra.mxu3 %vm1521_vm12, %v9213_v61  ;;  %v655_v21 = vshll.u32 %v572_v60, 16  ;;  %v1951_v24 = vsel %vm9572_vm10, %v8567_v51, %v1950_v40 }
  0x45   : > { %v1953_v20 = vrot.slane %v1070_v14, 5  ;;  %v1152_v22 = vor.u32 %v1151_v10, %v9707_v4  ;;  %v1155_v23 = vshll.u32 %v1070_v14, 16  ;;  %470 = vst [vmem:[#allocation2 + $0x30] sm:$0x1] %v469_v11  ;;  %v660_v28 = vshrl.u32 %v573_v13, 16 }
  0x46   : > { %v654_v27 = vrot.slane %v652_v19, 7  ;;  %v525_v29 = vsel %vm9565_vm9, 0, %v524_v8  ;;  %v650_v31 = vrot.slane %v9701_v53, 4  ;;  %v1143_v32 = vrot.slane %v1142_v17, 4  ;;  %v5888_v18 = vld [vmem:[#allocation2 + $0x10] sm:$0x1] }
  0x47   : > { %8470 = vmatmul.msk.bf16.gmra.mxu0 %vm1521_vm12, %v1506_v62  ;;  %v1954_v30 = vsel %vm9572_vm10, %v1952_v63, %v1953_v20  ;;  %v663_v33 = vshll.u32 %v573_v13, 16  ;;  %v1153_v36 = vrot.slane %v1152_v22, 4  ;;  %v1157_v37 = vrot.slane %v1155_v23, 5  ;;  %526 = vst [vmem:[#allocation2 + $0x38] sm:$0x1] %v525_v29 }
  0x48   : > { %v1041_v40 = vld [vmem:[#allocation2 + $0x24] sm:$0xf]  ;;  %v2052_v41 = vunpack.c.l.b16 %v1951_v24  ;;  %v657_v42 = vor.u32 %v655_v21, %v654_v27  ;;  %v658_v43 = vrot.slane %v654_v27, 4  ;;  %v2053_v45 = vunpack.c.l.b16 %v1954_v30 }
  0x49   : > { %v662_v49 = vrot.slane %v660_v28, 7  ;;  %v1160_v50 = vshrl.u32 %v1041_v40, 16  ;;  %v574_v51 = vpack.c.bf16 %v420_v34, %v420_v34  ;;  %v1148_v53 = vsel %vm9629_vm7, %v1143_v32, %v9707_v4  ;;  %v527_v62 = vld [vmem:[#allocation2 + $0x44] sm:$0x1]  ;;  %v1886_v63 = vld [vmem:[#allocation2 + $0x24] sm:$0xe] }
  0x4a   : > { %v941_v48 = vld [vmem:[#allocation2 + $0x2c] sm:$0x1]  ;;  %8551 = vmatmul.msk.bf16.gmra.mxu1 %vm1521_vm12, %v9198_v26  ;;  %v1163_v55 = vshll.u32 %v1041_v40, 16  ;;  %v472_v56 = vsel %vm9542_vm4, 0, %v471_v35  ;;  %v1158_v57 = vsel %vm9629_vm7, %v1153_v36, %v1157_v37  ;;  %v575_v61 = vpack.c.bf16 %v421_v44, %v421_v44  ;;  %v474_v36 = vld [vmem:[#allocation2 + $0x48] sm:$0x1] }
  0x4b   : > { %v942_v47 = vsel %vm9542_vm4, %v650_v31, %v941_v48  ;;  %v1042_v54 = vld [vmem:[#allocation2 + $0x28] sm:$0xf]  ;;  %v665_v58 = vor.u32 %v663_v33, %v662_v49  ;;  %v667_v59 = vrot.slane %v662_v49, 4  ;;  %v1162_v2 = vrot.slane %v1160_v50, 4  ;;  %473 = vst [vmem:[#allocation2 + $0x3c] sm:$0x1] %v472_v56 }
  0x4c   : > { %943 = vst [vmem:[#allocation2 + $0x2c] sm:$0x1] %v942_v47  ;;  %v944_v60 = vld [vmem:[#allocation2 + $0x30] sm:$0xf]  ;;  %v1957_v0 = vrot.slane %v1042_v54, 5  ;;  %v1169_v3 = vshll.u32 %v1042_v54, 16  ;;  %v1477_v4 = vunpack.c.l.b16 %v1148_v53  ;;  %v2082_v10 = vpack.c.b16 %v2053_v45, %v2052_v41 }
  0x4d   : > { %v945_v1 = vsel %vm9602_vm2, %v657_v42, %v944_v60  ;;  %v666_v7 = vsel %vm9609_vm6, %v658_v43, %v665_v58  ;;  %v1165_v8 = vrot.slane %v1163_v55, 5  ;;  %v1173_v9 = vshrl.u32 %v1042_v54, 16  ;;  %v9214_v21 = vld [vmem:[#allocation2 + $0x24] sm:$0xff] }
  0x4e   : > { %946 = vst [vmem:[#allocation2 + $0x30] sm:$0xf] %v945_v1  ;;  %v1478_v11 = vunpack.c.l.b16 %v1158_v57  ;;  %v1171_v13 = vrot.slane %v1169_v3, 5  ;;  %v948_v14 = vld [vmem:[#allocation2 + $0x38] sm:$0x1]  ;;  %v669_v17 = vshrl.u32 %v574_v51, 16 }
  0x4f   : > { %947 = vst.msk [vmem:[#allocation2 + $0x34] sm:$0xf] %vm444_vm1, %v666_v7  ;;  %v1175_v19 = vrot.slane %v1173_v9, 4  ;;  %v949_v20 = vsel %vm9542_vm4, %v667_v59, %v948_v14  ;;  %v672_v22 = vshll.u32 %v574_v51, 16  ;;  %v677_v23 = vshrl.u32 %v575_v61, 16  ;;  %v422_v45 = vld [vmem:[%s9579_s20 + $0x50] sm:$0xff] }
  0x50   : > { %950 = vst [vmem:[#allocation2 + $0x38] sm:$0x1] %v949_v20  ;;  %v671_v24 = vrot.slane %v669_v17, 7  ;;  %v680_v26 = vshll.u32 %v575_v61, 16  ;;  %v528_v27 = vsel %vm9565_vm9, 0, %v527_v62  ;;  %v8568_v28 = vrot.slane %v1886_v63, 9 }
  0x51   : > { %v1166_v29 = vor.u32 %v1165_v8, %v1162_v2  ;;  %v679_v30 = vrot.slane %v677_v23, 7  ;;  %529 = vst [vmem:[#allocation2 + $0x44] sm:$0x1] %v528_v27  ;;  %v1507_v31 = vpack.c.b16 %v1478_v11, %v1477_v4  ;;  %v1176_v33 = vor.u32 %v1175_v19, %v1171_v13  ;;  %v9199_v49 = vld [vmem:[#allocation2 + $0x24] sm:$0xff]  ;;  %v423_v1 = vld [vmem:[%s9579_s20 + $0x58] sm:$0xff] }
  0x52   : > { %v674_v34 = vor.u32 %v672_v22, %v671_v24  ;;  %v675_v35 = vrot.slane %v671_v24, 4  ;;  %v1959_v37 = vrot.slane %v1957_v0, 4  ;;  %v951_v42 = vld [vmem:[#allocation2 + $0x3c] sm:$0xf]  ;;  %v475_v50 = vsel %vm9542_vm4, 0, %v474_v36 }
  0x53   : > { %8584 = vmatmul.msk.bf16.gmra.mxu2 %vm1521_vm12, %v2082_v10  ;;  %v1071_v32 = vld [vmem:[#allocation2 + $0x2c] sm:$0x1]  ;;  %v682_v43 = vor.u32 %v680_v26, %v679_v30  ;;  %v1167_v48 = vrot.slane %v1166_v29, 4  ;;  %v1958_v51 = vsel %vm9572_vm10, %v8568_v28, %v1957_v0  ;;  %v1177_v53 = vrot.slane %v1176_v33, 4  ;;  %476 = vst [vmem:[#allocation2 + $0x48] sm:$0x1] %v475_v50 }
  0x54   : > { %v1960_v40 = vrot.slane %v1071_v32, 5  ;;  %v1179_v41 = vshll.u32 %v1071_v32, 16  ;;  %8665 = vmatmul.msk.bf16.gmra.mxu3 %vm1521_vm12, %v9214_v21  ;;  %v952_v44 = vsel %vm9602_vm2, %v674_v34, %v951_v42  ;;  %v684_v58 = vrot.slane %v679_v30, 4 }
  0x55   : > { %v683_v54 = vsel %vm9609_vm6, %v675_v35, %v682_v43  ;;  %953 = vst [vmem:[#allocation2 + $0x3c] sm:$0xf] %v952_v44  ;;  %v1043_v55 = vld [vmem:[#allocation2 + $0x30] sm:$0xf]  ;;  %v576_v59 = vpack.c.bf16 %v422_v45, %v422_v45  ;;  %v2054_v61 = vunpack.c.l.b16 %v1958_v51  ;;  %v1172_v62 = vsel %vm9629_vm7, %v1167_v48, %v1171_v13 }
  0x56   : > { %v1181_v47 = vrot.slane %v1179_v41, 5  ;;  %v1961_v56 = vsel %vm9572_vm10, %v1959_v37, %v1960_v40  ;;  %v1044_v57 = vld [vmem:[#allocation2 + $0x34] sm:$0xf]  ;;  %954 = vst.msk [vmem:[#allocation2 + $0x40] sm:$0xf] %vm444_vm1, %v683_v54  ;;  %v1184_v63 = vshrl.u32 %v1043_v55, 16  ;;  %v1479_v10 = vunpack.c.l.b16 %v1172_v62 }
  0x57   : > { %8471 = vmatmul.msk.bf16.gmra.mxu0 %vm1521_vm12, %v1507_v31  ;;  %v1187_v0 = vshll.u32 %v1043_v55, 16  ;;  %v2055_v2 = vunpack.c.l.b16 %v1961_v56  ;;  %v1193_v4 = vshll.u32 %v1044_v57, 16  ;;  %v1197_v7 = vshrl.u32 %v1044_v57, 16  ;;  %v1887_v11 = vld [vmem:[#allocation2 + $0x30] sm:$0xe]  ;;  %v424_v54 = vld [vmem:[%s9579_s20 + $0x60] sm:$0xff] }
  0x58   : > { %v955_v60 = vld [vmem:[#allocation2 + $0x44] sm:$0x1]  ;;  %v1182_v3 = vsel %vm9629_vm7, %v1177_v53, %v1181_v47  ;;  %v686_v9 = vshrl.u32 %v576_v59, 16  ;;  %v1964_v14 = vrot.slane %v1044_v57, 5  ;;  %v577_v13 = vpack.c.bf16 %v423_v1, %v423_v1  ;;  %v1072_v20 = vld [vmem:[#allocation2 + $0x38] sm:$0x1] }
  0x59   : > { %v956_v8 = vsel %vm9542_vm4, %v684_v58, %v955_v60  ;;  %v689_v17 = vshll.u32 %v576_v59, 16  ;;  %v1480_v19 = vunpack.c.l.b16 %v1182_v3  ;;  %v1186_v22 = vrot.slane %v1184_v63, 4  ;;  %v9215_v31 = vld [vmem:[#allocation2 + $0x30] sm:$0xff]  ;;  %v425_v55 = vld [vmem:[%s9579_s20 + $0x68] sm:$0xff] }
  0x5a   : > { %8552 = vmatmul.msk.bf16.gmra.mxu1 %vm1521_vm12, %v9199_v49  ;;  %957 = vst [vmem:[#allocation2 + $0x44] sm:$0x1] %v956_v8  ;;  %v1189_v23 = vrot.slane %v1187_v0, 5  ;;  %v688_v21 = vrot.slane %v686_v9, 7  ;;  %v2083_v24 = vpack.c.b16 %v2055_v2, %v2054_v61  ;;  %v9771_v26 = vrot.slane %v1193_v4, 5  ;;  %v9200_v58 = vld [vmem:[#allocation2 + $0x30] sm:$0xff] }
  0x5b   : > { %v1199_v27 = vrot.slane %v1197_v7, 4  ;;  %v8569_v28 = vrot.slane %v1887_v11, 9  ;;  %v958_v30 = vld [vmem:[#allocation2 + $0x48] sm:$0xf]  ;;  %v1966_v32 = vrot.slane %v1964_v14, 4  ;;  %v1967_v33 = vrot.slane %v1072_v20, 5 }
  0x5c   : > { %v691_v29 = vor.u32 %v689_v17, %v688_v21  ;;  %v694_v34 = vshrl.u32 %v577_v13, 16  ;;  %v697_v35 = vshll.u32 %v577_v13, 16  ;;  %v1508_v36 = vpack.c.b16 %v1480_v19, %v1479_v10  ;;  %v530_v45 = vld [vmem:[#allocation2 + $0x50] sm:$0x1]  ;;  %v1045_v51 = vld [vmem:[#allocation2 + $0x3c] sm:$0xf] }
  0x5d   : > { %v1190_v37 = vor.u32 %v1189_v23, %v1186_v22  ;;  %v1200_v41 = vor.u32 %v1199_v27, %v9771_v26  ;;  %v1203_v42 = vshll.u32 %v1072_v20, 16  ;;  %v692_v43 = vrot.slane %v688_v21, 4  ;;  %v477_v53 = vld [vmem:[#allocation2 + $0x54] sm:$0x1]  ;;  %v9792_v63 = vld [vmem:[#allocation2 + $0x40] sm:$0xf] }
  0x5e   : > { %v959_v40 = vsel %vm9602_vm2, %v691_v29, %v958_v30  ;;  %v9777_v44 = vrot.slane %v694_v34, 7  ;;  %v1965_v48 = vsel %vm9572_vm10, %v8569_v28, %v1964_v14  ;;  %v1968_v49 = vsel %vm9572_vm10, %v1966_v32, %v1967_v33  ;;  %v533_v7 = vld [vmem:[#allocation2 + $0x5c] sm:$0x1]  ;;  %v1888_v29 = vld [vmem:[#allocation2 + $0x3c] sm:$0xe] }
  0x5f   : > { %960 = vst [vmem:[#allocation2 + $0x48] sm:$0xf] %v959_v40  ;;  %v1191_v47 = vrot.slane %v1190_v37, 4  ;;  %v1201_v56 = vrot.slane %v1200_v41, 4  ;;  %v1205_v57 = vrot.slane %v1203_v42, 5  ;;  %v531_v60 = vsel %vm9565_vm9, 0, %v530_v45 }
  0x60   : > { %v699_v50 = vor.u32 %v697_v35, %v9777_v44  ;;  %v2056_v61 = vunpack.c.l.b16 %v1965_v48  ;;  %v2057_v62 = vunpack.c.l.b16 %v1968_v49  ;;  %v1208_v0 = vshrl.u32 %v1045_v51, 16  ;;  %532 = vst [vmem:[#allocation2 + $0x50] sm:$0x1] %v531_v60  ;;  %v480_v48 = vld [vmem:[#allocation2 + $0x60] sm:$0x1]  ;;  %v427_v60 = vld [vmem:[%s9579_s20 + $0x78] sm:$0xff] }
  0x61   : > { %v478_v1 = vsel %vm9542_vm4, 0, %v477_v53  ;;  %v1211_v2 = vshll.u32 %v1045_v51, 16  ;;  %v578_v3 = vpack.c.bf16 %v424_v54, %v424_v54  ;;  %v579_v4 = vpack.c.bf16 %v425_v55, %v425_v55  ;;  %v1073_v41 = vld [vmem:[#allocation2 + $0x44] sm:$0x1]  ;;  %v426_v53 = vld [vmem:[%s9579_s20 + $0x70] sm:$0xff] }
  0x62   : > { %v700_v59 = vsel %vm9609_vm6, %v692_v43, %v699_v50  ;;  %v1196_v8 = vsel %vm9629_vm7, %v1191_v47, %v9771_v26  ;;  %v534_v9 = vsel %vm9565_vm9, 0, %v533_v7  ;;  %v1206_v10 = vsel %vm9629_vm7, %v1201_v56, %v1205_v57  ;;  %479 = vst [vmem:[#allocation2 + $0x54] sm:$0x1] %v478_v1  ;;  %v9201_v1 = vld [vmem:[#allocation2 + $0x3c] sm:$0xff] }
  0x63   : > { %8585 = vmatmul.msk.bf16.gmra.mxu2 %vm1521_vm12, %v2083_v24  ;;  %961 = vst.msk [vmem:[#allocation2 + $0x4c] sm:$0xf] %vm444_vm1, %v700_v59  ;;  %v1217_v11 = vshll.u32 %v9792_v63, 16  ;;  %v1221_v14 = vshrl.u32 %v9792_v63, 16  ;;  %v703_v13 = vshrl.u32 %v578_v3, 16  ;;  %v2084_v17 = vpack.c.b16 %v2057_v62, %v2056_v61 }
  0x64   : > { %8666 = vmatmul.msk.bf16.gmra.mxu3 %vm1521_vm12, %v9215_v31  ;;  %v1210_v19 = vrot.slane %v1208_v0, 4  ;;  %v706_v20 = vshll.u32 %v578_v3, 16  ;;  %v711_v22 = vshrl.u32 %v579_v4, 16  ;;  %535 = vst [vmem:[#allocation2 + $0x5c] sm:$0x1] %v534_v9  ;;  %v701_v23 = vrot.slane %v9777_v44, 4 }
  0x65   : > { %v1213_v21 = vrot.slane %v1211_v2, 5  ;;  %v705_v24 = vrot.slane %v703_v13, 7  ;;  %v714_v26 = vshll.u32 %v579_v4, 16  ;;  %v1481_v27 = vunpack.c.l.b16 %v1196_v8 }
  0x66   : > { %v1482_v28 = vunpack.c.l.b16 %v1206_v10  ;;  %v1971_v30 = vrot.slane %v9792_v63, 5  ;;  %v713_v31 = vrot.slane %v711_v22, 7  ;;  %v1219_v32 = vrot.slane %v1217_v11, 5  ;;  %v1047_v2 = vld [vmem:[#allocation2 + $0x48] sm:$0xf] }
  0x67   : > { %8472 = vmatmul.msk.bf16.gmra.mxu0 %vm1521_vm12, %v1508_v36  ;;  %v1223_v33 = vrot.slane %v1221_v14, 4  ;;  %v708_v34 = vor.u32 %v706_v20, %v705_v24  ;;  %v709_v35 = vrot.slane %v705_v24, 4  ;;  %v9216_v36 = vld [vmem:[#allocation2 + $0x3c] sm:$0xff]  ;;  %v962_v37 = vld [vmem:[#allocation2 + $0x50] sm:$0x1]  ;;  %v8570_v42 = vrot.slane %v1888_v29, 9 }
  0x68   : > { %v716_v40 = vor.u32 %v714_v26, %v713_v31  ;;  %v1214_v43 = vor.u32 %v1213_v21, %v1210_v19  ;;  %v963_v44 = vsel %vm9542_vm4, %v701_v23, %v962_v37  ;;  %v718_v45 = vrot.slane %v713_v31, 4 }
  0x69   : > { %v1973_v49 = vrot.slane %v1971_v30, 4  ;;  %964 = vst [vmem:[#allocation2 + $0x50] sm:$0x1] %v963_v44  ;;  %v965_v51 = vld [vmem:[#allocation2 + $0x54] sm:$0xf]  ;;  %v1509_v47 = vpack.c.b16 %v1482_v28, %v1481_v27  ;;  %v1224_v54 = vor.u32 %v1223_v33, %v1219_v32  ;;  %v1227_v55 = vshll.u32 %v1073_v41, 16 }
  0x6a   : > { %8553 = vmatmul.msk.bf16.gmra.mxu1 %vm1521_vm12, %v9200_v58  ;;  %v717_v50 = vsel %vm9609_vm6, %v709_v35, %v716_v40  ;;  %v966_v56 = vsel %vm9602_vm2, %v708_v34, %v965_v51  ;;  %v1974_v58 = vrot.slane %v1073_v41, 5  ;;  %v481_v61 = vsel %vm9542_vm4, 0, %v480_v48  ;;  %v1048_v8 = vld [vmem:[#allocation2 + $0x4c] sm:$0xf]  ;;  %v1889_v40 = vld [vmem:[#allocation2 + $0x48] sm:$0xe] }
  0x6b   : > { %968 = vst.msk [vmem:[#allocation2 + $0x58] sm:$0xf] %vm444_vm1, %v717_v50  ;;  %v969_v57 = vld [vmem:[#allocation2 + $0x5c] sm:$0x1]  ;;  %v580_v62 = vpack.c.bf16 %v426_v53, %v426_v53  ;;  %v1215_v63 = vrot.slane %v1214_v43, 4  ;;  %v581_v0 = vpack.c.bf16 %v427_v60, %v427_v60  ;;  %v1225_v4 = vrot.slane %v1224_v54, 4 }
  0x6c   : > { %967 = vst [vmem:[#allocation2 + $0x54] sm:$0xf] %v966_v56  ;;  %v970_v59 = vsel %vm9542_vm4, %v718_v45, %v969_v57  ;;  %v1229_v7 = vrot.slane %v1227_v55, 5  ;;  %v1972_v11 = vsel %vm9572_vm10, %v8570_v42, %v1971_v30  ;;  %v1975_v14 = vsel %vm9572_vm10, %v1973_v49, %v1974_v58  ;;  %v536_v48 = vld [vmem:[#allocation2 + $0x68] sm:$0x1]  ;;  %v428_v58 = vld [vmem:[%s9579_s20 + $0x80] sm:$0xff] }
  0x6d   : > { %971 = vst [vmem:[#allocation2 + $0x5c] sm:$0x1] %v970_v59  ;;  %v720_v3 = vshrl.u32 %v580_v62, 16  ;;  %v723_v9 = vshll.u32 %v580_v62, 16  ;;  %v728_v10 = vshrl.u32 %v581_v0, 16  ;;  %v1220_v19 = vsel %vm9629_vm7, %v1215_v63, %v1219_v32  ;;  %v9217_v50 = vld [vmem:[#allocation2 + $0x48] sm:$0xff] }
  0x6e   : > { %482 = vst [vmem:[#allocation2 + $0x60] sm:$0x1] %v481_v61  ;;  %v1232_v20 = vshrl.u32 %v1047_v2, 16  ;;  %v1235_v22 = vshll.u32 %v1047_v2, 16  ;;  %v1241_v21 = vshll.u32 %v1048_v8, 16  ;;  %v1245_v24 = vshrl.u32 %v1048_v8, 16 }
  0x6f   : > { %v722_v13 = vrot.slane %v720_v3, 7  ;;  %v9831_v23 = vrot.slane %v728_v10, 7  ;;  %v2058_v28 = vunpack.c.l.b16 %v1972_v11  ;;  %v2059_v29 = vunpack.c.l.b16 %v1975_v14  ;;  %v429_v59 = vld [vmem:[%s9579_s20 + $0x88] sm:$0xff]  ;;  %v9202_v10 = vld [vmem:[#allocation2 + $0x48] sm:$0xff] }
  0x70   : > { %v1230_v30 = vsel %vm9629_vm7, %v1225_v4, %v1229_v7  ;;  %v1483_v33 = vunpack.c.l.b16 %v1220_v19  ;;  %v1234_v34 = vrot.slane %v1232_v20, 4  ;;  %v1237_v32 = vrot.slane %v1235_v22, 5  ;;  %v1074_v49 = vld [vmem:[#allocation2 + $0x50] sm:$0x1] }
  0x71   : > { %v725_v26 = vor.u32 %v723_v9, %v722_v13  ;;  %v726_v27 = vrot.slane %v722_v13, 4  ;;  %v1484_v37 = vunpack.c.l.b16 %v1230_v30  ;;  %v9839_v41 = vrot.slane %v1241_v21, 5  ;;  %v539_v30 = vld [vmem:[#allocation2 + $0x74] sm:$0x1] }
  0x72   : > { %v1247_v42 = vrot.slane %v1245_v24, 4  ;;  %v2085_v44 = vpack.c.b16 %v2059_v29, %v2058_v28  ;;  %v1978_v45 = vrot.slane %v1048_v8, 5  ;;  %v8571_v51 = vrot.slane %v1889_v40, 9  ;;  %v1050_v20 = vld [vmem:[#allocation2 + $0x58] sm:$0xf] }
  0x73   : > { %8586 = vmatmul.msk.bf16.gmra.mxu2 %vm1521_vm12, %v2084_v17  ;;  %v731_v17 = vshll.u32 %v581_v0, 16  ;;  %v1238_v53 = vor.u32 %v1237_v32, %v1234_v34  ;;  %v1510_v54 = vpack.c.b16 %v1484_v37, %v1483_v33  ;;  %v1251_v56 = vshll.u32 %v1074_v49, 16  ;;  %v1049_v14 = vld [vmem:[#allocation2 + $0x54] sm:$0xf] }
  0x74   : > { %8667 = vmatmul.msk.bf16.gmra.mxu3 %vm1521_vm12, %v9216_v36  ;;  %v1248_v55 = vor.u32 %v1247_v42, %v9839_v41  ;;  %v537_v57 = vsel %vm9565_vm9, 0, %v536_v48  ;;  %v1980_v60 = vrot.slane %v1978_v45, 4  ;;  %v1981_v61 = vrot.slane %v1074_v49, 5  ;;  %v1075_v49 = vld [vmem:[#allocation2 + $0x5c] sm:$0x1] }
  0x75   : > { %v733_v31 = vor.u32 %v731_v17, %v9831_v23  ;;  %v972_v36 = vld [vmem:[#allocation2 + $0x60] sm:$0xf]  ;;  %538 = vst [vmem:[#allocation2 + $0x68] sm:$0x1] %v537_v57  ;;  %v582_v63 = vpack.c.bf16 %v428_v58, %v428_v58  ;;  %v583_v0 = vpack.c.bf16 %v429_v59, %v429_v59  ;;  %v1979_v3 = vsel %vm9572_vm10, %v8571_v51, %v1978_v45  ;;  %v486_v57 = vld [vmem:[#allocation2 + $0x78] sm:$0x1] }
  0x76   : > { %v973_v43 = vsel %vm9602_vm2, %v725_v26, %v972_v36  ;;  %v1249_v4 = vrot.slane %v1248_v55, 4  ;;  %v1253_v7 = vrot.slane %v1251_v56, 5  ;;  %v1982_v9 = vsel %vm9572_vm10, %v1980_v60, %v1981_v61  ;;  %v9218_v55 = vld [vmem:[#allocation2 + $0x54] sm:$0xff]  ;;  %v430_v61 = vld [vmem:[%s9579_s20 + $0x90] sm:$0xff] }
  0x77   : > { %8473 = vmatmul.msk.bf16.gmra.mxu0 %vm1521_vm12, %v1509_v47  ;;  %v734_v35 = vsel %vm9609_vm6, %v726_v27, %v733_v31  ;;  %974 = vst [vmem:[#allocation2 + $0x60] sm:$0xf] %v973_v43  ;;  %v483_v47 = vld [vmem:[#allocation2 + $0x6c] sm:$0x1]  ;;  %v737_v2 = vshrl.u32 %v582_v63, 16  ;;  %v745_v8 = vshrl.u32 %v583_v0, 16  ;;  %v2060_v17 = vunpack.c.l.b16 %v1979_v3 }
  0x78   : > { %975 = vst.msk [vmem:[#allocation2 + $0x64] sm:$0xf] %vm444_vm1, %v734_v35  ;;  %v484_v62 = vsel %vm9542_vm4, 0, %v483_v47  ;;  %v735_v11 = vrot.slane %v9831_v23, 4  ;;  %v740_v22 = vshll.u32 %v582_v63, 16  ;;  %v2061_v24 = vunpack.c.l.b16 %v1982_v9 }
  0x79   : > { %485 = vst [vmem:[#allocation2 + $0x6c] sm:$0x1] %v484_v62  ;;  %v739_v13 = vrot.slane %v737_v2, 7  ;;  %v747_v21 = vrot.slane %v745_v8, 7  ;;  %v1254_v26 = vsel %vm9629_vm7, %v1249_v4, %v1253_v7  ;;  %v1256_v27 = vshrl.u32 %v1049_v14, 16  ;;  %v431_v62 = vld [vmem:[%s9579_s20 + $0x98] sm:$0xff] }
  0x7a   : > { %8554 = vmatmul.msk.bf16.gmra.mxu1 %vm1521_vm12, %v9201_v1  ;;  %v1239_v1 = vrot.slane %v1238_v53, 4  ;;  %v1259_v28 = vshll.u32 %v1049_v14, 16  ;;  %v748_v34 = vshll.u32 %v583_v0, 16  ;;  %v1265_v35 = vshll.u32 %v1050_v20, 16 }
  0x7b   : > { %v742_v31 = vor.u32 %v740_v22, %v739_v13  ;;  %v743_v33 = vrot.slane %v739_v13, 4  ;;  %v1269_v36 = vshrl.u32 %v1050_v20, 16  ;;  %v1486_v43 = vunpack.c.l.b16 %v1254_v26 }
  0x7c   : > { %v1244_v19 = vsel %vm9629_vm7, %v1239_v1, %v9839_v41  ;;  %v976_v29 = vld [vmem:[#allocation2 + $0x68] sm:$0x1]  ;;  %v750_v37 = vor.u32 %v748_v34, %v747_v21  ;;  %v540_v41 = vsel %vm9565_vm9, 0, %v539_v30  ;;  %v1985_v45 = vrot.slane %v1050_v20, 5 }
  0x7d   : > { %v977_v23 = vsel %vm9542_vm4, %v735_v11, %v976_v29  ;;  %v1485_v42 = vunpack.c.l.b16 %v1244_v19  ;;  %v2086_v48 = vpack.c.b16 %v2061_v24, %v2060_v17  ;;  %v1261_v51 = vrot.slane %v1259_v28, 5  ;;  %541 = vst [vmem:[#allocation2 + $0x74] sm:$0x1] %v540_v41  ;;  %v9203_v17 = vld [vmem:[#allocation2 + $0x54] sm:$0xff]  ;;  %v542_v41 = vld [vmem:[#allocation2 + $0x80] sm:$0x1] }
  0x7e   : > { %978 = vst [vmem:[#allocation2 + $0x68] sm:$0x1] %v977_v23  ;;  %v751_v53 = vsel %vm9609_vm6, %v743_v33, %v750_v37  ;;  %v1267_v47 = vrot.slane %v1265_v35, 5  ;;  %v1987_v59 = vrot.slane %v1985_v45, 4  ;;  %v1988_v60 = vrot.slane %v1075_v49, 5 }
  0x7f   : > { %982 = vst.msk [vmem:[#allocation2 + $0x70] sm:$0xf] %vm444_vm1, %v751_v53  ;;  %v1511_v58 = vpack.c.b16 %v1486_v43, %v1485_v42  ;;  %v487_v63 = vsel %vm9542_vm4, 0, %v486_v57  ;;  %v752_v1 = vrot.slane %v747_v21, 4  ;;  %v584_v2 = vpack.c.bf16 %v430_v61, %v430_v61  ;;  %v1051_v19 = vld [vmem:[#allocation2 + $0x60] sm:$0xf] }
  0x80   : > { %v979_v32 = vld [vmem:[#allocation2 + $0x6c] sm:$0xf]  ;;  %488 = vst [vmem:[#allocation2 + $0x78] sm:$0x1] %v487_v63  ;;  %v585_v3 = vpack.c.bf16 %v431_v62, %v431_v62  ;;  %v1275_v7 = vshll.u32 %v1075_v49, 16  ;;  %v1989_v11 = vsel %vm9572_vm10, %v1987_v59, %v1988_v60  ;;  %v1283_v33 = vshll.u32 %v1051_v19, 16 }
  0x81   : > { %v980_v40 = vsel %vm9602_vm2, %v742_v31, %v979_v32  ;;  %v754_v8 = vshrl.u32 %v584_v2, 16  ;;  %v757_v21 = vshll.u32 %v584_v2, 16  ;;  %v1052_v29 = vld [vmem:[#allocation2 + $0x64] sm:$0xf]  ;;  %v1280_v31 = vshrl.u32 %v1051_v19, 16  ;;  %v432_v63 = vld [vmem:[%s9579_s20 + $0xa0] sm:$0xff] }
  0x82   : > { %981 = vst [vmem:[#allocation2 + $0x6c] sm:$0xf] %v980_v40  ;;  %v762_v9 = vshrl.u32 %v585_v3, 16  ;;  %v1277_v26 = vrot.slane %v1275_v7, 5  ;;  %v765_v28 = vshll.u32 %v585_v3, 16  ;;  %v1289_v43 = vshll.u32 %v1052_v29, 16 }
  0x83   : > { %8587 = vmatmul.msk.bf16.gmra.mxu2 %vm1521_vm12, %v2085_v44  ;;  %v1890_v44 = vld [vmem:[#allocation2 + $0x54] sm:$0xe]  ;;  %v756_v22 = vrot.slane %v754_v8, 7  ;;  %v1282_v49 = vrot.slane %v1280_v31, 4  ;;  %v489_v60 = vld [vmem:[#allocation2 + $0x84] sm:$0x1] }
  0x84   : > { %8668 = vmatmul.msk.bf16.gmra.mxu3 %vm1521_vm12, %v9217_v50  ;;  %v1258_v50 = vrot.slane %v1256_v27, 4  ;;  %v8572_v56 = vrot.slane %v1890_v44, 9  ;;  %v983_v14 = vld [vmem:[#allocation2 + $0x74] sm:$0x1]  ;;  %v764_v27 = vrot.slane %v762_v9, 7  ;;  %v1293_v44 = vshrl.u32 %v1052_v29, 16 }
  0x85   : > { %v984_v20 = vsel %vm9542_vm4, %v752_v1, %v983_v14  ;;  %v759_v30 = vor.u32 %v757_v21, %v756_v22  ;;  %v760_v23 = vrot.slane %v756_v22, 4  ;;  %v1076_v59 = vld [vmem:[#allocation2 + $0x68] sm:$0x1]  ;;  %v490_v1 = vsel %vm9542_vm4, 0, %v489_v60 }
  0x86   : > { %v1262_v0 = vor.u32 %v1261_v51, %v1258_v50  ;;  %985 = vst [vmem:[#allocation2 + $0x74] sm:$0x1] %v984_v20  ;;  %v767_v34 = vor.u32 %v765_v28, %v764_v27  ;;  %v1285_v50 = vrot.slane %v1283_v33, 5  ;;  %v1295_v57 = vrot.slane %v1293_v44, 4  ;;  %v9908_v20 = vld [vmem:[#allocation2 + $0x70] sm:$0xf] }
  0x87   : > { %8474 = vmatmul.msk.bf16.gmra.mxu0 %vm1521_vm12, %v1510_v54  ;;  %v1271_v54 = vrot.slane %v1269_v36, 4  ;;  %v986_v32 = vld [vmem:[#allocation2 + $0x78] sm:$0xf]  ;;  %v2063_v36 = vunpack.c.l.b16 %v1989_v11  ;;  %v769_v62 = vrot.slane %v764_v27, 4  ;;  %491 = vst [vmem:[#allocation2 + $0x84] sm:$0x1] %v490_v1 }
  0x88   : > { %v1263_v13 = vrot.slane %v1262_v0, 4  ;;  %v987_v40 = vsel %vm9602_vm2, %v759_v30, %v986_v32  ;;  %v1286_v61 = vor.u32 %v1285_v50, %v1282_v49  ;;  %v433_v0 = vld [vmem:[%s9579_s20 + $0xa8] sm:$0xff]  ;;  %v1995_v9 = vrot.slane %v1076_v59, 5  ;;  %v545_v49 = vld [vmem:[#allocation2 + $0x8c] sm:$0x1] }
  0x89   : > { %v1272_v4 = vor.u32 %v1271_v54, %v1267_v47  ;;  %988 = vst [vmem:[#allocation2 + $0x78] sm:$0xf] %v987_v40  ;;  %v1891_v54 = vld [vmem:[#allocation2 + $0x60] sm:$0xe]  ;;  %v587_v7 = vpack.c.bf16 %v433_v0, %v433_v0  ;;  %v1299_v11 = vshll.u32 %v1076_v59, 16  ;;  %v1313_v40 = vshll.u32 %v9908_v20, 16 }
  0x8a   : > { %8555 = vmatmul.msk.bf16.gmra.mxu1 %vm1521_vm12, %v9202_v10  ;;  %v1986_v10 = vsel %vm9572_vm10, %v8572_v56, %v1985_v45  ;;  %v1268_v37 = vsel %vm9629_vm7, %v1263_v13, %v1267_v47  ;;  %v768_v45 = vsel %vm9609_vm6, %v760_v23, %v767_v34  ;;  %v9899_v56 = vrot.slane %v1289_v43, 5  ;;  %v1053_v22 = vld [vmem:[#allocation2 + $0x6c] sm:$0xf] }
  0x8b   : > { %v1273_v24 = vrot.slane %v1272_v4, 4  ;;  %v2062_v35 = vunpack.c.l.b16 %v1986_v10  ;;  %989 = vst.msk [vmem:[#allocation2 + $0x7c] sm:$0xf] %vm444_vm1, %v768_v45  ;;  %v1487_v53 = vunpack.c.l.b16 %v1268_v37  ;;  %v8573_v3 = vrot.slane %v1891_v54, 9  ;;  %v9220_v1 = vld [vmem:[#allocation2 + $0x6c] sm:$0xff] }
  0x8c   : > { %v586_v4 = vpack.c.bf16 %v432_v63, %v432_v63  ;;  %v1296_v10 = vor.u32 %v1295_v57, %v9899_v56  ;;  %v1287_v19 = vrot.slane %v1286_v61, 4  ;;  %v1301_v33 = vrot.slane %v1299_v11, 5  ;;  %v434_v11 = vld [vmem:[%s9579_s20 + $0xb0] sm:$0xff] }
  0x8d   : > { %v1278_v42 = vsel %vm9629_vm7, %v1273_v24, %v1277_v26  ;;  %v2087_v51 = vpack.c.b16 %v2063_v36, %v2062_v35  ;;  %v9204_v26 = vld [vmem:[#allocation2 + $0x60] sm:$0xff]  ;;  %v782_v34 = vshll.u32 %v587_v7, 16  ;;  %v1304_v32 = vshrl.u32 %v1053_v22, 16  ;;  %v1077_v63 = vld [vmem:[#allocation2 + $0x74] sm:$0x1] }
  0x8e   : > { %v1488_v47 = vunpack.c.l.b16 %v1278_v42  ;;  %v771_v13 = vshrl.u32 %v586_v4, 16  ;;  %v774_v28 = vshll.u32 %v586_v4, 16  ;;  %v1297_v31 = vrot.slane %v1296_v10, 4  ;;  %v993_v43 = vld [vmem:[#allocation2 + $0x84] sm:$0xf] }
  0x8f   : > { %v1307_v35 = vshll.u32 %v1053_v22, 16  ;;  %v1292_v50 = vsel %vm9629_vm7, %v1287_v19, %v9899_v56  ;;  %v1306_v54 = vrot.slane %v1304_v32, 4  ;;  %v546_v57 = vsel %vm9565_vm9, 0, %v545_v49 }
  0x90   : > { %v1512_v2 = vpack.c.b16 %v1488_v47, %v1487_v53  ;;  %v773_v27 = vrot.slane %v771_v13, 7  ;;  %v1999_v47 = vrot.slane %v9908_v20, 5  ;;  %v9936_v59 = vrot.slane %v1313_v40, 5  ;;  %547 = vst [vmem:[#allocation2 + $0x8c] sm:$0x1] %v546_v57 }
  0x91   : > { %v1489_v61 = vunpack.c.l.b16 %v1292_v50  ;;  %v1323_v19 = vshll.u32 %v1077_v63, 16  ;;  %vm12299_vm14 = vcmask 1044484  }
  0x92   : > { %v776_v36 = vor.u32 %v774_v28, %v773_v27  ;;  %v777_v37 = vrot.slane %v773_v27, 4  ;;  %v9959_v50 = vld [vmem:[#allocation2 + $0x7c] sm:$0xf] }
  0x93   : > { %8588 = vmatmul.msk.bf16.gmra.mxu2 %vm1521_vm12, %v2086_v48  ;;  %v543_v48 = vsel %vm9565_vm9, 0, %v542_v41  ;;  %v1317_v41 = vshrl.u32 %v9908_v20, 16  ;;  %v588_v20 = vpack.c.bf16 %v434_v11, %v434_v11  ;;  %v1893_v11 = vld [vmem:[#allocation2 + $0x78] sm:$0xe] }
  0x94   : > { %8669 = vmatmul.msk.bf16.gmra.mxu3 %vm1521_vm12, %v9218_v55  ;;  %544 = vst [vmem:[#allocation2 + $0x80] sm:$0x1] %v543_v48  ;;  %v1992_v55 = vrot.slane %v1052_v29, 5  ;;  %v994_v48 = vsel %vm9602_vm2, %v776_v36, %v993_v43  ;;  %v9205_v36 = vld [vmem:[#allocation2 + $0x6c] sm:$0xff]  ;;  %v1055_v43 = vld [vmem:[#allocation2 + $0x78] sm:$0xf] }
  0x95   : > { %995 = vst [vmem:[#allocation2 + $0x84] sm:$0xf] %v994_v48  ;;  %v1319_v56 = vrot.slane %v1317_v41, 4  ;;  %v788_v28 = vshrl.u32 %v588_v20, 16  ;;  %v791_v40 = vshll.u32 %v588_v20, 16 }
  0x96   : > { %v1994_v8 = vrot.slane %v1992_v55, 4  ;;  %v1993_v24 = vsel %vm9572_vm10, %v8573_v3, %v1992_v55  ;;  %v1309_v55 = vrot.slane %v1307_v35, 5  ;;  %v2001_v3 = vrot.slane %v1999_v47, 4 }
  0x97   : > { %8475 = vmatmul.msk.bf16.gmra.mxu0 %vm1521_vm12, %v1511_v58  ;;  %v9219_v58 = vld [vmem:[#allocation2 + $0x60] sm:$0xff]  ;;  %v2064_v44 = vunpack.c.l.b16 %v1993_v24  ;;  %v997_v27 = vld [vmem:[#allocation2 + $0x8c] sm:$0x1] }
  0x98   : > { %v1996_v30 = vsel %vm9572_vm10, %v1994_v8, %v1995_v9  ;;  %v1310_v4 = vor.u32 %v1309_v55, %v1306_v54  ;;  %v2002_v8 = vrot.slane %v1077_v63, 5  ;;  %v1320_v9 = vor.u32 %v1319_v56, %v9936_v59 }
  0x99   : > { %v2065_v45 = vunpack.c.l.b16 %v1996_v30 }
  0x9a   : > { %8556 = vmatmul.msk.bf16.gmra.mxu1 %vm1521_vm12, %v9203_v17  ;;  %v779_v17 = vshrl.u32 %v587_v7, 16  ;;  %v492_v7 = vld [vmem:[#allocation2 + $0x90] sm:$0x1] }
  0x9b   : > { %v990_v14 = vld [vmem:[#allocation2 + $0x80] sm:$0x1]  ;;  %v2088_v60 = vpack.c.b16 %v2065_v45, %v2064_v44  ;;  %v493_v13 = vsel %vm9542_vm4, 0, %v492_v7  ;;  %v2006_v7 = vrot.slane %v9959_v50, 5 }
  0x9c   : > { %v991_v21 = vsel %vm9542_vm4, %v769_v62, %v990_v14  ;;  %v9915_v29 = vrot.slane %v779_v17, 7  ;;  %v435_v14 = vld [vmem:[%s9579_s20 + $0xb8] sm:$0xff]  ;;  %494 = vst [vmem:[#allocation2 + $0x90] sm:$0x1] %v493_v13 }
  0x9d   : > { %992 = vst [vmem:[#allocation2 + $0x80] sm:$0x1] %v991_v21  ;;  %v589_v22 = vpack.c.bf16 %v435_v14, %v435_v14 }
  0x9e   : > { %v784_v42 = vor.u32 %v782_v34, %v9915_v29  ;;  %v786_v10 = vrot.slane %v9915_v29, 4  ;;  %v1321_v34 = vrot.slane %v1320_v9, 4 }
  0x9f   : > { %v796_v29 = vshrl.u32 %v589_v22, 16  ;;  %v799_v45 = vshll.u32 %v589_v22, 16 }
  0xa0   : > { %v785_v53 = vsel %vm9609_vm6, %v777_v37, %v784_v42  ;;  %v998_v32 = vsel %vm9542_vm4, %v786_v10, %v997_v27  ;;  %v790_v37 = vrot.slane %v788_v28, 7  ;;  %v9221_v27 = vld [vmem:[#allocation2 + $0x78] sm:$0xff]  ;;  %v8575_v28 = vrot.slane %v1893_v11, 9 }
  0xa1   : > { %996 = vst.msk [vmem:[#allocation2 + $0x88] sm:$0xf] %vm444_vm1, %v785_v53  ;;  %v798_v44 = vrot.slane %v796_v29, 7  ;;  %v2008_v29 = vrot.slane %v2006_v7, 4 }
  0xa2   : > { %999 = vst [vmem:[#allocation2 + $0x8c] sm:$0x1] %v998_v32  ;;  %v793_v53 = vor.u32 %v791_v40, %v790_v37 }
  0xa3   : > { %8589 = vmatmul.msk.bf16.gmra.mxu2 %vm1521_vm12, %v2087_v51  ;;  %v1302_v51 = vsel %vm9629_vm7, %v1297_v31, %v1301_v33  ;;  %v2003_v31 = vsel %vm9572_vm10, %v2001_v3, %v2002_v8  ;;  %v1311_v33 = vrot.slane %v1310_v4, 4  ;;  %v1000_v56 = vld [vmem:[#allocation2 + $0x90] sm:$0xf] }
  0xa4   : > { %8670 = vmatmul.msk.bf16.gmra.mxu3 %vm1521_vm12, %v9219_v58  ;;  %v1892_v58 = vld [vmem:[#allocation2 + $0x6c] sm:$0xe]  ;;  %v1490_v62 = vunpack.c.l.b16 %v1302_v51  ;;  %v548_v51 = vld [vmem:[#allocation2 + $0x98] sm:$0x1]  ;;  %v2067_v54 = vunpack.c.l.b16 %v2003_v31  ;;  %v1001_v63 = vsel %vm9602_vm2, %v793_v53, %v1000_v56  ;;  %v495_v31 = vld [vmem:[#allocation2 + $0x9c] sm:$0x1] }
  0xa5   : > { %v1316_v55 = vsel %vm9629_vm7, %v1311_v33, %v9936_v59  ;;  %v549_v57 = vsel %vm9565_vm9, 0, %v548_v51  ;;  %v1341_v59 = vshrl.u32 %v9959_v50, 16  ;;  %1002 = vst [vmem:[#allocation2 + $0x90] sm:$0xf] %v1001_v63 }
  0xa6   : > { %v1513_v17 = vpack.c.b16 %v1490_v62, %v1489_v61  ;;  %v1328_v61 = vshrl.u32 %v1055_v43, 16  ;;  %v1331_v62 = vshll.u32 %v1055_v43, 16  ;;  %550 = vst [vmem:[#allocation2 + $0x98] sm:$0x1] %v549_v57  ;;  %v1491_v9 = vunpack.c.l.b16 %v1316_v55  ;;  %v1057_v55 = vld [vmem:[#allocation2 + $0x84] sm:$0xf] }
  0xa7   : > { %8476 = vmatmul.msk.bf16.gmra.mxu0 %vm1521_vm12, %v1512_v2  ;;  %v1803_v23 = vpop.f32.mrf.mxu1  ;;  %v8574_v2 = vrot.slane %v1892_v58, 9  ;;  %v801_v58 = vor.u32 %v799_v45, %v798_v44  ;;  %v1355_v11 = vshll.u32 %v1057_v55, 16 }
  0xa8   : > { %v1333_v20 = vrot.slane %v1331_v62, 5 }
  0xaa   : > { %8557 = vmatmul.msk.bf16.gmra.mxu1 %vm1521_vm12, %v9204_v26  ;;  %v2000_v26 = vsel %vm9572_vm10, %v8574_v2, %v1999_v47  ;;  %v794_v47 = vrot.slane %v790_v37, 4  ;;  %v1337_v2 = vshll.u32 %v9959_v50, 16 }
  0xab   : > { %v2066_v49 = vunpack.c.l.b16 %v2000_v26 }
  0xac   : > { %v802_v3 = vsel %vm9609_vm6, %v794_v47, %v801_v58  ;;  %v2007_v47 = vsel %vm9572_vm10, %v8575_v28, %v2006_v7 }
  0xad   : > { %1003 = vst.msk [vmem:[#allocation2 + $0x94] sm:$0xf] %vm444_vm1, %v802_v3  ;;  %v2089_v13 = vpack.c.b16 %v2067_v54, %v2066_v49  ;;  %v1004_v32 = vld [vmem:[#allocation2 + $0x98] sm:$0x1] }
  0xaf   : > { %v9938_v0 = vpop.f32.mrf.mxu1 }
  0xb3   : > { %8590 = vmatmul.msk.bf16.gmra.mxu2 %vm1521_vm12, %v2088_v60 }
  0xb4   : > { %v1583_v21 = vpop.f32.mrf.mxu0  ;;  %8671 = vmatmul.msk.bf16.gmra.mxu3 %vm1521_vm12, %v9220_v1 }
  0xb5   : > { %v1804_v24 = vadd.f32 %v1803_v23, %v1583_v21  ;;  %v1325_v23 = vrot.slane %v1323_v19, 5  ;;  %v1330_v19 = vrot.slane %v1328_v61, 4  ;;  %v9999_v61 = vld [vmem:[#allocation2 + $0x88] sm:$0xf] }
  0xb6   : > { %v2156_v30 = vpop.f32.mrf.mxu2 }
  0xb7   : > { %v2236_v35 = vadd.f32 %v2156_v30, %v1804_v24  ;;  %8477 = vmatmul.msk.bf16.gmra.mxu0 %vm1521_vm12, %v1513_v17  ;;  %v2442_v41 = vpop.f32.mrf.mxu3  ;;  %v9955_v42 = vpop.f32.mrf.mxu1  ;;  %v1326_v60 = vsel %vm9629_vm7, %v1321_v34, %v1325_v23  ;;  %v1078_v17 = vld [vmem:[#allocation2 + $0x80] sm:$0x1]  ;;  %v9980_v24 = vrot.slane %v1337_v2, 5  ;;  %v803_v30 = vrot.slane %v798_v44, 4 }
  0xb8   : > { %v1492_v10 = vunpack.c.l.b16 %v1326_v60  ;;  %v2009_v34 = vrot.slane %v1078_v17, 5  ;;  %v437_v23 = vld [vmem:[%s9579_s20 + $0xc8] sm:$0xff]  ;;  %v1334_v37 = vor.u32 %v1333_v20, %v1330_v19  ;;  %v1347_v45 = vshll.u32 %v1078_v17, 16  ;;  %v9206_v60 = vld [vmem:[#allocation2 + $0x78] sm:$0xff] }
  0xb9   : > { %v9957_v48 = vadd.f32 %v2442_v41, %v2236_v35  ;;  %v436_v35 = vld [vmem:[%s9579_s20 + $0xc0] sm:$0xff]  ;;  %v1005_v40 = vsel %vm9542_vm4, %v803_v30, %v1004_v32  ;;  %v591_v49 = vpack.c.bf16 %v437_v23, %v437_v23  ;;  %v2068_v20 = vunpack.c.l.b16 %v2007_v47  ;;  %v1894_v32 = vld [vmem:[#allocation2 + $0x84] sm:$0xe] }
  0xba   : > { %8558 = vmatmul.msk.bf16.gmra.mxu1 %vm1521_vm12, %v9205_v36  ;;  %v1514_v33 = vpack.c.b16 %v1492_v10, %v1491_v9  ;;  %v496_v36 = vsel %vm9542_vm4, 0, %v495_v31  ;;  %v590_v41 = vpack.c.bf16 %v436_v35, %v436_v35  ;;  %1006 = vst [vmem:[#allocation2 + $0x98] sm:$0x1] %v1005_v40  ;;  %v2010_v54 = vsel %vm9572_vm10, %v2008_v29, %v2009_v34  ;;  %v1079_v34 = vld [vmem:[#allocation2 + $0x8c] sm:$0x1] }
  0xbb   : > { %497 = vst [vmem:[#allocation2 + $0x9c] sm:$0x1] %v496_v36  ;;  %v813_v57 = vshrl.u32 %v591_v49, 16  ;;  %v1335_v56 = vrot.slane %v1334_v37, 4  ;;  %v2013_v30 = vrot.slane %v9999_v61, 5  ;;  %v1357_v36 = vrot.slane %v1355_v11, 5 }
  0xbc   : > { %v1585_v1 = vpop.f32.mrf.mxu0  ;;  %v805_v51 = vshrl.u32 %v590_v41, 16  ;;  %v808_v62 = vshll.u32 %v590_v41, 16  ;;  %v551_v40 = vld [vmem:[#allocation2 + $0xa4] sm:$0x1] }
  0xbd   : > { %v1806_v4 = vadd.f32 %v9938_v0, %v1585_v1  ;;  %v1343_v0 = vrot.slane %v1341_v59, 4  ;;  %v1349_v59 = vrot.slane %v1347_v45, 5  ;;  %v10003_v3 = vrot.slane %v813_v57, 7  ;;  %v498_v57 = vld [vmem:[#allocation2 + $0xa8] sm:$0x1] }
  0xbe   : > { %v2158_v8 = vpop.f32.mrf.mxu2  ;;  %v1340_v28 = vsel %vm9629_vm7, %v1335_v56, %v9980_v24  ;;  %v552_v47 = vsel %vm9565_vm9, 0, %v551_v40 }
  0xbf   : > { %v2237_v14 = vadd.f32 %v2158_v8, %v1806_v4  ;;  %v2444_v22 = vpop.f32.mrf.mxu3  ;;  %v9978_v21 = vpop.f32.mrf.mxu1  ;;  %v1344_v44 = vor.u32 %v1343_v0, %v9980_v24  ;;  %v816_v4 = vshll.u32 %v591_v49, 16  ;;  %v1352_v8 = vshrl.u32 %v1057_v55, 16  ;;  %v9222_v55 = vld [vmem:[#allocation2 + $0x84] sm:$0xff]  ;;  %553 = vst [vmem:[#allocation2 + $0xa4] sm:$0x1] %v552_v47 }
  0xc0   : > { %v820_v11 = vrot.slane %v10003_v3, 4 }
  0xc1   : > { %v9982_v26 = vadd.f32 %v2444_v22, %v2237_v14  ;;  %v1345_v2 = vrot.slane %v1344_v44, 4  ;;  %v1361_v14 = vshll.u32 %v9999_v61, 16  ;;  %v818_v17 = vor.u32 %v816_v4, %v10003_v3 }
  0xc2   : > { %v1007_v19 = vld [vmem:[#allocation2 + $0x9c] sm:$0xf]  ;;  %v2069_v22 = vunpack.c.l.b16 %v2010_v54  ;;  %v1354_v23 = vrot.slane %v1352_v8, 4  ;;  %v1493_v44 = vunpack.c.l.b16 %v1340_v28  ;;  %v1059_v28 = vld [vmem:[#allocation2 + $0x90] sm:$0xf] }
  0xc3   : > { %8591 = vmatmul.msk.bf16.gmra.mxu2 %vm1521_vm12, %v2089_v13  ;;  %v1365_v13 = vshrl.u32 %v9999_v61, 16  ;;  %v1350_v29 = vsel %vm9629_vm7, %v1345_v2, %v1349_v59  ;;  %v10023_v37 = vrot.slane %v1361_v14, 5  ;;  %v438_v61 = vld [vmem:[%s9579_s20 + $0xd0] sm:$0xff] }
  0xc4   : > { %v1588_v43 = vpop.f32.mrf.mxu0  ;;  %8672 = vmatmul.msk.bf16.gmra.mxu3 %vm1521_vm12, %v9221_v27  ;;  %v1494_v45 = vunpack.c.l.b16 %v1350_v29  ;;  %v592_v2 = vpack.c.bf16 %v438_v61, %v438_v61 }
  0xc5   : > { %v1809_v50 = vadd.f32 %v9955_v42, %v1588_v43  ;;  %v807_v42 = vrot.slane %v805_v51, 7  ;;  %v1367_v24 = vrot.slane %v1365_v13, 4  ;;  %v2090_v43 = vpack.c.b16 %v2069_v22, %v2068_v20 }
  0xc6   : > { %v2161_v53 = vpop.f32.mrf.mxu2  ;;  %v2015_v51 = vrot.slane %v2013_v30, 4  ;;  %v822_v14 = vshrl.u32 %v592_v2, 16  ;;  %v1011_v3 = vld [vmem:[#allocation2 + $0xa4] sm:$0x1] }
  0xc7   : > { %v2238_v58 = vadd.f32 %v2161_v53, %v1809_v50  ;;  %8478 = vmatmul.msk.bf16.gmra.mxu0 %vm1521_vm12, %v1514_v33  ;;  %v2447_v63 = vpop.f32.mrf.mxu3  ;;  %v10001_v1 = vpop.f32.mrf.mxu1  ;;  %v810_v9 = vor.u32 %v808_v62, %v807_v42  ;;  %v811_v10 = vrot.slane %v807_v42, 4  ;;  %v2016_v53 = vrot.slane %v1079_v34, 5  ;;  %v439_v42 = vld [vmem:[%s9579_s20 + $0xd8] sm:$0xff] }
  0xc8   : > { %v1368_v56 = vor.u32 %v1367_v24, %v10023_v37  ;;  %v499_v62 = vsel %vm9542_vm4, 0, %v498_v57  ;;  %v593_v59 = vpack.c.bf16 %v439_v42, %v439_v42  ;;  %v824_v29 = vrot.slane %v822_v14, 7 }
  0xc9   : > { %v10005_v7 = vadd.f32 %v2447_v63, %v2238_v58  ;;  %v1008_v0 = vsel %vm9602_vm2, %v810_v9, %v1007_v19  ;;  %v819_v31 = vsel %vm9609_vm6, %v811_v10, %v818_v17  ;;  %v1358_v58 = vor.u32 %v1357_v36, %v1354_v23  ;;  %500 = vst [vmem:[#allocation2 + $0xa8] sm:$0x1] %v499_v62 }
  0xca   : > { %8559 = vmatmul.msk.bf16.gmra.mxu1 %vm1521_vm12, %v9206_v60  ;;  %1009 = vst [vmem:[#allocation2 + $0x9c] sm:$0xf] %v1008_v0  ;;  %v1371_v60 = vshll.u32 %v1079_v34, 16  ;;  %v1515_v63 = vpack.c.b16 %v1494_v45, %v1493_v44  ;;  %v2017_v9 = vsel %vm9572_vm10, %v2015_v51, %v2016_v53  ;;  %v830_v13 = vshrl.u32 %v593_v59, 16 }
  0xcb   : > { %1010 = vst.msk [vmem:[#allocation2 + $0xa0] sm:$0xf] %vm444_vm1, %v819_v31  ;;  %v1359_v19 = vrot.slane %v1358_v58, 4  ;;  %v1369_v20 = vrot.slane %v1368_v56, 4  ;;  %v833_v23 = vshll.u32 %v593_v59, 16  ;;  %v1012_v24 = vsel %vm9542_vm4, %v820_v11, %v1011_v3 }
  0xcc   : > { %v1590_v27 = vpop.f32.mrf.mxu0  ;;  %v1373_v22 = vrot.slane %v1371_v60, 5  ;;  %v1376_v45 = vshrl.u32 %v1059_v28, 16  ;;  %1013 = vst [vmem:[#allocation2 + $0xa4] sm:$0x1] %v1012_v24  ;;  %v1379_v51 = vshll.u32 %v1059_v28, 16 }
  0xcd   : > { %v1811_v33 = vadd.f32 %v9978_v21, %v1590_v27  ;;  %v8576_v21 = vrot.slane %v1894_v32, 9  ;;  %v9207_v27 = vld [vmem:[#allocation2 + $0x84] sm:$0xff]  ;;  %v10045_v32 = vld [vmem:[#allocation2 + $0x94] sm:$0xf]  ;;  %v554_v59 = vld [vmem:[#allocation2 + $0xb0] sm:$0x1] }
  0xce   : > { %v2163_v35 = vpop.f32.mrf.mxu2  ;;  %v1374_v44 = vsel %vm9629_vm7, %v1369_v20, %v1373_v22  ;;  %v1385_v53 = vshll.u32 %v10045_v32, 16  ;;  %v1389_v47 = vshrl.u32 %v10045_v32, 16  ;;  %v2020_v56 = vrot.slane %v10045_v32, 5 }
  0xcf   : > { %v2239_v41 = vadd.f32 %v2163_v35, %v1811_v33  ;;  %v2449_v49 = vpop.f32.mrf.mxu3  ;;  %v10025_v50 = vpop.f32.mrf.mxu1  ;;  %v2014_v8 = vsel %vm9572_vm10, %v8576_v21, %v2013_v30  ;;  %v825_v30 = vshll.u32 %v592_v2, 16  ;;  %v10047_v35 = vrot.slane %v830_v13, 7 }
  0xd0   : > { %v2070_v33 = vunpack.c.l.b16 %v2014_v8  ;;  %v1014_v21 = vld [vmem:[#allocation2 + $0xa8] sm:$0xf]  ;;  %v1496_v62 = vunpack.c.l.b16 %v1374_v44  ;;  %v1378_v2 = vrot.slane %v1376_v45, 4  ;;  %v1080_v8 = vld [vmem:[#allocation2 + $0x98] sm:$0x1]  ;;  %v1391_v11 = vrot.slane %v1389_v47, 4 }
  0xd1   : > { %v10029_v54 = vadd.f32 %v2449_v49, %v2239_v41  ;;  %v827_v40 = vor.u32 %v825_v30, %v824_v29  ;;  %v828_v41 = vrot.slane %v824_v29, 4  ;;  %v835_v49 = vor.u32 %v833_v23, %v10047_v35  ;;  %v440_v29 = vld [vmem:[%s9579_s20 + $0xe0] sm:$0xff]  ;;  %v441_v30 = vld [vmem:[%s9579_s20 + $0xe8] sm:$0xff] }
  0xd2   : > { %v555_v13 = vsel %vm9565_vm9, 0, %v554_v59  ;;  %v2022_v22 = vrot.slane %v2020_v56, 4  ;;  %v1395_v28 = vshll.u32 %v1080_v8, 16  ;;  %v594_v32 = vpack.c.bf16 %v440_v29, %v440_v29 }
  0xd3   : > { %8592 = vmatmul.msk.bf16.gmra.mxu2 %vm1521_vm12, %v2090_v43  ;;  %v1364_v43 = vsel %vm9629_vm7, %v1359_v19, %v10023_v37  ;;  %v836_v37 = vsel %vm9609_vm6, %v828_v41, %v835_v49  ;;  %v9223_v19 = vld [vmem:[#allocation2 + $0x90] sm:$0xff]  ;;  %556 = vst [vmem:[#allocation2 + $0xb0] sm:$0x1] %v555_v13  ;;  %v595_v3 = vpack.c.bf16 %v441_v30, %v441_v30  ;;  %v1061_v41 = vld [vmem:[#allocation2 + $0x9c] sm:$0xf]  ;;  %v837_v47 = vrot.slane %v10047_v35, 4 }
  0xd4   : > { %v1593_v4 = vpop.f32.mrf.mxu0  ;;  %8673 = vmatmul.msk.bf16.gmra.mxu3 %vm1521_vm12, %v9222_v55  ;;  %v1015_v55 = vsel %vm9602_vm2, %v827_v40, %v1014_v21  ;;  %1017 = vst.msk [vmem:[#allocation2 + $0xac] sm:$0xf] %vm444_vm1, %v836_v37  ;;  %v1495_v42 = vunpack.c.l.b16 %v1364_v43  ;;  %v839_v43 = vshrl.u32 %v594_v32, 16  ;;  %v9208_v37 = vld [vmem:[#allocation2 + $0x90] sm:$0xff]  ;;  %v1403_v59 = vshll.u32 %v1061_v41, 16 }
  0xd5   : > { %v1814_v10 = vadd.f32 %v10001_v1, %v1593_v4  ;;  %v2071_v1 = vunpack.c.l.b16 %v2017_v9  ;;  %1016 = vst [vmem:[#allocation2 + $0xa8] sm:$0xf] %v1015_v55  ;;  %v1381_v9 = vrot.slane %v1379_v51, 5  ;;  %v847_v44 = vshrl.u32 %v595_v3, 16 }
  0xd6   : > { %v2166_v17 = vpop.f32.mrf.mxu2  ;;  %v1397_v51 = vrot.slane %v1395_v28, 5 }
  0xd7   : > { %v2240_v0 = vadd.f32 %v2166_v17, %v1814_v10  ;;  %8479 = vmatmul.msk.bf16.gmra.mxu0 %vm1521_vm12, %v1515_v63  ;;  %v2452_v31 = vpop.f32.mrf.mxu3  ;;  %v1818_v34 = vpop.f32.mrf.mxu1  ;;  %v2091_v61 = vpack.c.b16 %v2071_v1, %v2070_v33  ;;  %v1895_v63 = vld [vmem:[#allocation2 + $0x90] sm:$0xe]  ;;  %v10069_v10 = vrot.slane %v1385_v53, 5  ;;  %v501_v1 = vld [vmem:[#allocation2 + $0xb4] sm:$0x1] }
  0xd8   : > { %v8577_v20 = vrot.slane %v1895_v63, 9  ;;  %v502_v24 = vsel %vm9542_vm4, 0, %v501_v1  ;;  %v10088_v53 = vld [vmem:[#allocation2 + $0xa0] sm:$0xf]  ;;  %v850_v63 = vshll.u32 %v595_v3, 16  ;;  %v1405_v3 = vrot.slane %v1403_v59, 5 }
  0xd9   : > { %v10049_v36 = vadd.f32 %v2452_v31, %v2240_v0  ;;  %v1516_v0 = vpack.c.b16 %v1496_v62, %v1495_v42  ;;  %v1382_v31 = vor.u32 %v1381_v9, %v1378_v2  ;;  %v1392_v33 = vor.u32 %v1391_v11, %v10069_v10  ;;  %503 = vst [vmem:[#allocation2 + $0xb4] sm:$0x1] %v502_v24 }
  0xda   : > { %8560 = vmatmul.msk.bf16.gmra.mxu1 %vm1521_vm12, %v9207_v27  ;;  %v2023_v27 = vrot.slane %v1080_v8, 5  ;;  %v2021_v49 = vsel %vm9572_vm10, %v8577_v20, %v2020_v56  ;;  %v1400_v42 = vshrl.u32 %v1061_v41, 16  ;;  %v842_v56 = vshll.u32 %v594_v32, 16 }
  0xdb   : > { %v10094_v62 = vrot.slane %v847_v44, 7  ;;  %v1409_v35 = vshll.u32 %v10088_v53, 16  ;;  %v1413_v9 = vshrl.u32 %v10088_v53, 16  ;;  %v1896_v44 = vld [vmem:[#allocation2 + $0x9c] sm:$0xe] }
  0xdc   : > { %v1595_v57 = vpop.f32.mrf.mxu0  ;;  %v2024_v21 = vsel %vm9572_vm10, %v2022_v22, %v2023_v27  ;;  %v557_v22 = vld [vmem:[#allocation2 + $0xbc] sm:$0x1]  ;;  %v9225_v52 = vld [vmem:[#allocation2 + $0xa8] sm:$0xff] }
  0xdd   : > { %v1816_v58 = vadd.f32 %v10025_v50, %v1595_v57  ;;  %v1393_v57 = vrot.slane %v1392_v33, 4  ;;  %v852_v13 = vor.u32 %v850_v63, %v10094_v62  ;;  %v2073_v20 = vunpack.c.l.b16 %v2024_v21 }
  0xde   : > { %v2168_v60 = vpop.f32.mrf.mxu2  ;;  %v1402_v33 = vrot.slane %v1400_v42, 4  ;;  %v558_v24 = vsel %vm9565_vm9, 0, %v557_v22  ;;  %v2027_v21 = vrot.slane %v10088_v53, 5  ;;  %v443_v42 = vld [vmem:[%s9579_s20 + $0xf8] sm:$0xff]  ;;  %v854_v53 = vrot.slane %v10094_v62, 4 }
  0xdf   : > { %v2241_v4 = vadd.f32 %v2168_v60, %v1816_v58  ;;  %v2454_v50 = vpop.f32.mrf.mxu3  ;;  %v10071_v14 = vpop.f32.mrf.mxu1  ;;  %v841_v58 = vrot.slane %v839_v43, 7  ;;  %v1398_v28 = vsel %vm9629_vm7, %v1393_v57, %v1397_v51  ;;  %559 = vst [vmem:[#allocation2 + $0xbc] sm:$0x1] %v558_v24  ;;  %v8578_v57 = vrot.slane %v1896_v44, 9 }
  0xe0   : > { %v1021_v30 = vld [vmem:[#allocation2 + $0xb4] sm:$0xf]  ;;  %v1498_v43 = vunpack.c.l.b16 %v1398_v28 }
  0xe1   : > { %v10075_v17 = vadd.f32 %v2454_v50, %v2241_v4  ;;  %v1018_v4 = vld [vmem:[#allocation2 + $0xb0] sm:$0x1]  ;;  %v845_v8 = vrot.slane %v841_v58, 4  ;;  %v844_v50 = vor.u32 %v842_v56, %v841_v58 }
  0xe2   : > { %v1019_v11 = vsel %vm9542_vm4, %v837_v47, %v1018_v4  ;;  %v9224_v47 = vld [vmem:[#allocation2 + $0x9c] sm:$0xff] }
  0xe3   : > { %8593 = vmatmul.msk.bf16.gmra.mxu2 %vm1521_vm12, %v2091_v61  ;;  %1020 = vst [vmem:[#allocation2 + $0xb0] sm:$0x1] %v1019_v11  ;;  %v853_v29 = vsel %vm9609_vm6, %v845_v8, %v852_v13  ;;  %v1022_v1 = vsel %vm9602_vm2, %v844_v50, %v1021_v30  ;;  %v2029_v8 = vrot.slane %v2027_v21, 4  ;;  %v597_v11 = vpack.c.bf16 %v443_v42, %v443_v42  ;;  %v9209_v30 = vld [vmem:[#allocation2 + $0x9c] sm:$0xff] }
  0xe4   : > { %v1598_v23 = vpop.f32.mrf.mxu0  ;;  %8674 = vmatmul.msk.bf16.gmra.mxu3 %vm1521_vm12, %v9223_v19  ;;  %v2072_v19 = vunpack.c.l.b16 %v2021_v49  ;;  %1024 = vst.msk [vmem:[#allocation2 + $0xb8] sm:$0xf] %vm444_vm1, %v853_v29 }
  0xe5   : > { %v1819_v40 = vadd.f32 %v1818_v34, %v1598_v23  ;;  %v1383_v34 = vrot.slane %v1382_v31, 4  ;;  %v10115_v23 = vrot.slane %v1409_v35, 5  ;;  %1023 = vst [vmem:[#allocation2 + $0xb4] sm:$0xf] %v1022_v1  ;;  %v864_v28 = vshrl.u32 %v597_v11, 16 }
  0xe6   : > { %v2171_v45 = vpop.f32.mrf.mxu2  ;;  %v2092_v41 = vpack.c.b16 %v2073_v20, %v2072_v19  ;;  %v2028_v20 = vsel %vm9572_vm10, %v8578_v57, %v2027_v21 }
  0xe7   : > { %v2242_v55 = vadd.f32 %v2171_v45, %v1819_v40  ;;  %8480 = vmatmul.msk.bf16.gmra.mxu0 %vm1521_vm12, %v1516_v0  ;;  %v2457_v60 = vpop.f32.mrf.mxu3  ;;  %v10092_v61 = vpop.f32.mrf.mxu1  ;;  %v1388_v27 = vsel %vm9629_vm7, %v1383_v34, %v10069_v10  ;;  %v1415_v10 = vrot.slane %v1413_v9, 4  ;;  %v504_v34 = vld [vmem:[#allocation2 + $0xc0] sm:$0x1]  ;;  %v10140_v24 = vrot.slane %v864_v28, 7 }
  0xe8   : > { %v505_v56 = vsel %vm9542_vm4, 0, %v504_v34  ;;  %v2074_v44 = vunpack.c.l.b16 %v2028_v20 }
  0xe9   : > { %v10096_v2 = vadd.f32 %v2457_v60, %v2242_v55  ;;  %v1081_v55 = vld [vmem:[#allocation2 + $0xa4] sm:$0x1]  ;;  %v1416_v58 = vor.u32 %v1415_v10, %v10115_v23  ;;  %v442_v60 = vld [vmem:[%s9579_s20 + $0xf0] sm:$0xff]  ;;  %506 = vst [vmem:[#allocation2 + $0xc0] sm:$0x1] %v505_v56  ;;  %s404_s20 = sand.u32 1, %s9401_s22  }
  0xea   : > { %8561 = vmatmul.msk.bf16.gmra.mxu1 %vm1521_vm12, %v9208_v37  ;;  %v1406_v37 = vor.u32 %v1405_v3, %v1402_v33  ;;  %v1419_v59 = vshll.u32 %v1081_v55, 16  ;;  %v596_v35 = vpack.c.bf16 %v442_v60, %v442_v60  ;;  %v2030_v9 = vrot.slane %v1081_v55, 5  ;;  %v1063_v3 = vld [vmem:[#allocation2 + $0xa8] sm:$0xf]  ;;  %s405_s17 = scalar_lea.vmem [#allocation3], %s404_s20  ;;  %s8395_s25 = scalar_lea.sflag [#allocation4], %s404_s20 }
  0xeb   : > { %v1424_v57 = vshrl.u32 %v1063_v3, 16  ;;  %v1427_v60 = vshll.u32 %v1063_v3, 16  ;;  %s8405_s18 = sshll.u32 %s405_s17, 4  ;;  %s8406_s18 = int_to_ptr.vmem [resolvable:$true] %s8405_s18 }
  0xec   : > { %v1600_v0 = vpop.f32.mrf.mxu0  ;;  %v856_v13 = vshrl.u32 %v596_v35, 16  ;;  %v1407_v22 = vrot.slane %v1406_v37, 4  ;;  %v1421_v29 = vrot.slane %v1419_v59, 5  ;;  %v2031_v1 = vsel %vm9572_vm10, %v2029_v8, %v2030_v9 }
  0xed   : > { %v1821_v31 = vadd.f32 %v10071_v14, %v1600_v0  ;;  %v1497_v14 = vunpack.c.l.b16 %v1388_v27  ;;  %v1417_v0 = vrot.slane %v1416_v58, 4  ;;  %v1025_v27 = vld [vmem:[#allocation2 + $0xbc] sm:$0x1]  ;;  %v859_v10 = vshll.u32 %v596_v35, 16 }
  0xee   : > { %v2173_v32 = vpop.f32.mrf.mxu2  ;;  %v2075_v55 = vunpack.c.l.b16 %v2031_v1  ;;  %v1426_v20 = vrot.slane %v1424_v57, 4  ;;  %v1429_v46 = vrot.slane %v1427_v60, 5 }
  0xef   : > { %v2243_v40 = vadd.f32 %v2173_v32, %v1821_v31  ;;  %v2459_v45 = vpop.f32.mrf.mxu3  ;;  %v10119_v49 = vpop.f32.mrf.mxu1  ;;  %v1517_v63 = vpack.c.b16 %v1498_v43, %v1497_v14  ;;  %v1026_v31 = vsel %vm9542_vm4, %v854_v53, %v1025_v27  ;;  %v867_v43 = vshll.u32 %v597_v11, 16  ;;  %v1082_v27 = vld [vmem:[#allocation2 + $0xb0] sm:$0x1] }
  0xf0   : > { %1027 = vst [vmem:[#allocation2 + $0xbc] sm:$0x1] %v1026_v31  ;;  %v1422_v34 = vsel %vm9629_vm7, %v1417_v0, %v1421_v29  ;;  %v2093_v8 = vpack.c.b16 %v2075_v55, %v2074_v44  ;;  %v2037_v31 = vrot.slane %v1082_v27, 5  ;;  %v1443_v1 = vshll.u32 %v1082_v27, 16  ;;  %v9210_v44 = vld [vmem:[#allocation2 + $0xa8] sm:$0xff] }
  0xf1   : > { %v10122_v51 = vadd.f32 %v2459_v45, %v2243_v40  ;;  %v1412_v45 = vsel %vm9629_vm7, %v1407_v22, %v10115_v23  ;;  %v869_v37 = vor.u32 %v867_v43, %v10140_v24  ;;  %v1500_v9 = vunpack.c.l.b16 %v1422_v34 }
  0xf2   : > { %v1499_v35 = vunpack.c.l.b16 %v1412_v45  ;;  %v1066_v45 = vld [vmem:[#allocation2 + $0xb8] sm:$0xf] }
  0xf3   : > { %8594 = vmatmul.msk.bf16.gmra.mxu2 %vm1521_vm12, %v2092_v41  ;;  %v1064_v41 = vld [vmem:[#allocation2 + $0xac] sm:$0xf] }
  0xf4   : > { %v1603_v4 = vpop.f32.mrf.mxu0  ;;  %8675 = vmatmul.msk.bf16.gmra.mxu3 %vm1521_vm12, %v9224_v47  ;;  %v1028_v47 = vld [vmem:[#allocation2 + $0xc0] sm:$0xf]  ;;  %v1433_v42 = vshll.u32 %v1064_v41, 16  ;;  %v1437_v56 = vshrl.u32 %v1064_v41, 16  ;;  %v2034_v11 = vrot.slane %v1064_v41, 5  ;;  %v1518_v28 = vpack.c.b16 %v1500_v9, %v1499_v35 }
  0xf5   : > { %v1824_v50 = vadd.f32 %v10092_v61, %v1603_v4  ;;  %v858_v61 = vrot.slane %v856_v13, 7  ;;  %v1065_v41 = vld [vmem:[#allocation2 + $0xb4] sm:$0xf] }
  0xf6   : > { %v2176_v19 = vpop.f32.mrf.mxu2  ;;  %v1435_v22 = vrot.slane %v1433_v42, 5  ;;  %v1439_v0 = vrot.slane %v1437_v56, 4  ;;  %v2036_v29 = vrot.slane %v2034_v11, 4  ;;  %v1451_v60 = vshll.u32 %v1065_v41, 16  ;;  %v1898_v9 = vld [vmem:[#allocation2 + $0xb4] sm:$0xe] }
  0xf7   : > { %v2244_v62 = vadd.f32 %v2176_v19, %v1824_v50  ;;  %8481 = vmatmul.msk.bf16.gmra.mxu0 %vm1521_vm12, %v1517_v63  ;;  %v2462_v33 = vpop.f32.mrf.mxu3  ;;  %v1828_v32 = vpop.f32.mrf.mxu1  ;;  %v862_v14 = vrot.slane %v858_v61, 4  ;;  %v861_v21 = vor.u32 %v859_v10, %v858_v61  ;;  %v1897_v19 = vld [vmem:[#allocation2 + $0xa8] sm:$0xe]  ;;  %v1430_v61 = vor.u32 %v1429_v46, %v1426_v20 }
  0xf8   : > { %v1457_v42 = vshll.u32 %v1066_v45, 16  ;;  %v1461_v56 = vshrl.u32 %v1066_v45, 16 }
  0xf9   : > { %v10142_v40 = vadd.f32 %v2462_v33, %v2244_v62  ;;  %v1029_v63 = vsel %vm9602_vm2, %v861_v21, %v1028_v47  ;;  %v870_v59 = vsel %vm9609_vm6, %v862_v14, %v869_v37  ;;  %v8579_v62 = vrot.slane %v1897_v19, 9  ;;  %v8729_v19 = vld [vmem:[%s12324_s1 + $0xc] sm:$0x3] }
  0xfa   : > { %8562 = vmatmul.msk.bf16.gmra.mxu1 %vm1521_vm12, %v9209_v30  ;;  %1030 = vst [vmem:[#allocation2 + $0xc0] sm:$0xf] %v1029_v63  ;;  %v1440_v33 = vor.u32 %v1439_v0, %v1435_v22  ;;  %v2038_v47 = vsel %vm9572_vm10, %v2036_v29, %v2037_v31  ;;  %v1431_v34 = vrot.slane %v1430_v61, 4  ;;  %v10176_v46 = vrot.slane %v1457_v42, 5  ;;  %v1083_v29 = vld [vmem:[#allocation2 + $0xbc] sm:$0x1] }
  0xfb   : > { %1031 = vst.msk [vmem:[#allocation2 + $0xc4] sm:$0xf] %vm444_vm1, %v870_v59  ;;  %v2035_v43 = vsel %vm9572_vm10, %v8579_v62, %v2034_v11  ;;  %v1463_v0 = vrot.slane %v1461_v56, 4  ;;  %vm12295_vm1 = vcmask 1043456   ;;  %vm12297_vm2 = vcmask 1046534  }
  0xfc   : > { %v1605_v58 = vpop.f32.mrf.mxu0  ;;  %v1441_v57 = vrot.slane %v1440_v33, 4  ;;  %v2076_v63 = vunpack.c.l.b16 %v2035_v43  ;;  %v8580_v33 = vrot.slane %v1898_v9, 9  ;;  %v8712_v43 = vld [vmem:[%s12324_s1 + $0xa] sm:$0x3]  ;;  %vm12296_vm6 = vcmask 1047559  }
  0xfd   : > { %v1826_v23 = vadd.f32 %v10119_v49, %v1605_v58  ;;  %v1448_v58 = vshrl.u32 %v1065_v41, 16 }
  0xfe   : > { %v2178_v53 = vpop.f32.mrf.mxu2 }
  0xff   : > { %v2245_v4 = vadd.f32 %v2178_v53, %v1826_v23  ;;  %v2464_v50 = vpop.f32.mrf.mxu3  ;;  %v1830_v13 = vpop.f32.mrf.mxu1  ;;  %v2077_v23 = vunpack.c.l.b16 %v2038_v47  ;;  %v1436_v53 = vsel %vm9629_vm7, %v1431_v34, %v1435_v22  ;;  %v1450_v11 = vrot.slane %v1448_v58, 4 }
 0x100   : > { %v1467_v47 = vshll.u32 %v1083_v29, 16  ;;  %v3483_v34 = vsel %vm12300_vm0, %v8712_v43, 0 }
 0x101   : > { %v10157_v49 = vadd.f32 %v2464_v50, %v2245_v4  ;;  %v2041_v4 = vrot.slane %v1066_v45, 5  ;;  %v1453_v50 = vrot.slane %v1451_v60, 5  ;;  %v2094_v22 = vpack.c.b16 %v2077_v23, %v2076_v63  ;;  %3492 = vmatpush.bf16.msrb.mxu1 %v3483_v34 }
 0x102   : > { %v2044_v45 = vrot.slane %v1083_v29, 5 }
 0x103   : > { %8595 = vmatmul.msk.bf16.gmra.mxu2 %vm1521_vm12, %v2093_v8  ;;  %v2043_v41 = vrot.slane %v2041_v4, 4  ;;  %v2042_v42 = vsel %vm9572_vm10, %v8580_v33, %v2041_v4  ;;  %v9211_v4 = vld [vmem:[#allocation2 + $0xb4] sm:$0xff] }
 0x104   : > { %v1608_v30 = vpop.f32.mrf.mxu0  ;;  %8676 = vmatmul.msk.bf16.gmra.mxu3 %vm1521_vm12, %v9225_v52  ;;  %v3770_v52 = vsel %vm12300_vm0, %v8729_v19, 0 }
 0x105   : > { %v1829_v3 = vadd.f32 %v1828_v32, %v1608_v30  ;;  %v1445_v32 = vrot.slane %v1443_v1, 5  ;;  %3779 = vmatpush.bf16.msrb.mxu2 %v3770_v52  ;;  %v5494_v30 = vld [vmem:[#allocation2 + $0x18] sm:$0x1]  ;;  %v3274_v52 = vrot.slane %v9686_v25, 5 }
 0x106   : > { %v2181_v10 = vpop.f32.mrf.mxu2  ;;  %v5495_v58 = vsel %vm9651_vm8, 0, %v5494_v30  ;;  %v3208_v30 = vld [vmem:[#allocation2 + $0xc] sm:$0xe] }
 0x107   : > { %v2246_v14 = vadd.f32 %v2181_v10, %v1829_v3  ;;  %8482 = vmatmul.msk.bf16.gmra.mxu0 %vm1521_vm12, %v1518_v28  ;;  %v2467_v21 = vpop.f32.mrf.mxu3  ;;  %v1833_v55 = vpop.f32.mrf.mxu1  ;;  %v1446_v35 = vsel %vm9629_vm7, %v1441_v57, %v1445_v32  ;;  %v1501_v28 = vunpack.c.l.b16 %v1436_v53  ;;  %v9226_v10 = vld [vmem:[#allocation2 + $0xb4] sm:$0xff]  ;;  %v10192_v57 = vld [vmem:[#allocation2 + $0x1c] sm:$0xf] }
 0x108   : > { %v1502_v62 = vunpack.c.l.b16 %v1446_v35  ;;  %v3955_v53 = vshrl.u32 %v10192_v57, 16 }
 0x109   : > { %v10166_v37 = vadd.f32 %v2467_v21, %v2246_v14  ;;  %v1454_v14 = vor.u32 %v1453_v50, %v1450_v11  ;;  %v1464_v21 = vor.u32 %v1463_v0, %v10176_v46  ;;  %v1469_v50 = vrot.slane %v1467_v47, 5  ;;  %v8843_v0 = vld [vmem:[%s12324_s1 + $0x10] sm:$0x3] }
 0x10a   : > { %8563 = vmatmul.msk.bf16.gmra.mxu1 %vm1521_vm12, %v9210_v44  ;;  %v3893_v44 = vld [vmem:[#allocation2 + $0x18] sm:$0xf]  ;;  %v1519_v32 = vpack.c.b16 %v1502_v62, %v1501_v28  ;;  %v2612_v28 = vshll.u32 %v9686_v25, 16  ;;  %v2616_v62 = vshrl.u32 %v9686_v25, 16  ;;  %v2556_v25 = vld [vmem:[#allocation2 + $0x14] sm:$0x1] }
 0x10b   : > { %v3942_v56 = vshrl.u32 %v3893_v44, 16  ;;  %v3945_v23 = vshll.u32 %v3893_v44, 16  ;;  %v1455_v9 = vrot.slane %v1454_v14, 4  ;;  %v1465_v11 = vrot.slane %v1464_v21, 4  ;;  %v3895_v44 = vld [vmem:[#allocation2 + $0x20] sm:$0x1] }
 0x10c   : > { %v1610_v59 = vpop.f32.mrf.mxu0  ;;  %v8696_v21 = vrot.slane %v3208_v30, 9  ;;  %v3276_v47 = vrot.slane %v3274_v52, 4  ;;  %v3277_v34 = vrot.slane %v2556_v25, 5 }
 0x10d   : > { %v1831_v8 = vadd.f32 %v1830_v13, %v1610_v59  ;;  %v8810_v13 = vld [vmem:[%s12324_s1 + $0xe] sm:$0x3]  ;;  %v3951_v59 = vshll.u32 %v10192_v57, 16  ;;  %v3944_v29 = vrot.slane %v3942_v56, 4  ;;  %v1460_v43 = vsel %vm9629_vm7, %v1455_v9, %v10176_v46 }
 0x10e   : > { %v2183_v20 = vpop.f32.mrf.mxu2  ;;  %v4424_v1 = vsel %vm12300_vm0, %v8810_v13, 0  ;;  %v4822_v13 = vsel %vm12300_vm0, %v8843_v0, 0 }
 0x10f   : > { %v2247_v27 = vadd.f32 %v2183_v20, %v1831_v8  ;;  %v2469_v31 = vpop.f32.mrf.mxu3  ;;  %v10182_v61 = vpop.f32.mrf.mxu1  ;;  %4433 = vmatpush.bf16.msrb.mxu3 %v4424_v1  ;;  %v2045_v8 = vsel %vm9572_vm10, %v2043_v41, %v2044_v45  ;;  %v2606_v20 = vshll.u32 %v9681_v15, 16  ;;  %v10218_v33 = vrot.slane %v3951_v59, 5  ;;  %4831 = vmatpush.bf16.msra.mxu0 %v4822_v13 }
 0x110   : > { %v3957_v1 = vrot.slane %v3955_v53, 4  ;;  %v2078_v41 = vunpack.c.l.b16 %v2042_v42  ;;  %v2079_v14 = vunpack.c.l.b16 %v2045_v8  ;;  %v1470_v45 = vsel %vm9629_vm7, %v1465_v11, %v1469_v50 }
 0x111   : > { %v10185_v3 = vadd.f32 %v2469_v31, %v2247_v27  ;;  %v2608_v56 = vrot.slane %v2606_v20, 5  ;;  %v10228_v42 = vrot.slane %v2612_v28, 5  ;;  %v1503_v8 = vunpack.c.l.b16 %v1460_v43  ;;  %v3896_v28 = vld [vmem:[#allocation2 + $0x24] sm:$0xf] }
 0x112   : > { %v3958_v59 = vor.u32 %v3957_v1, %v10218_v33  ;;  %v1504_v11 = vunpack.c.l.b16 %v1470_v45  ;;  %v3275_v50 = vsel %vm9572_vm10, %v8696_v21, %v3274_v52  ;;  %v10241_v1 = vld [vmem:[#allocation2 + $0x28] sm:$0xf]  ;;  %v3969_v45 = vshll.u32 %v3896_v28, 16 }
 0x113   : > { %8596 = vmatmul.msk.bf16.gmra.mxu2 %vm1521_vm12, %v2094_v22  ;;  %v3386_v52 = vunpack.c.l.b16 %v3275_v50 }
 0x114   : > { %v1613_v60 = vpop.f32.mrf.mxu0  ;;  %8677 = vmatmul.msk.bf16.gmra.mxu3 %vm1521_vm12, %v9226_v10  ;;  %v10220_v10 = vld [vmem:[#allocation2 + $0x18] sm:$0xf]  ;;  %v3959_v30 = vrot.slane %v3958_v59, 4  ;;  %v1520_v43 = vpack.c.b16 %v1504_v11, %v1503_v8  ;;  %v5525_v11 = vld [vmem:[#allocation2 + $0x1c] sm:$0x1] }
 0x115   : > { %v1834_v63 = vadd.f32 %v1833_v55, %v1613_v60  ;;  %v2603_v55 = vshrl.u32 %v9681_v15, 16  ;;  %v3947_v15 = vrot.slane %v3945_v23, 5  ;;  %5496 = vst [vmem:[#allocation2 + $0x18] sm:$0x1] %v5495_v58  ;;  %v3961_v58 = vshll.u32 %v3895_v44, 16 }
 0x116   : > { %v2186_v35 = vpop.f32.mrf.mxu2  ;;  %v10246_v44 = vld [vmem:[#allocation2 + $0x1c] sm:$0xf] }
 0x117   : > { %v2248_v19 = vadd.f32 %v2186_v35, %v1834_v63  ;;  %8483 = vmatmul.msk.bf16.gmra.mxu0 %vm1521_vm12, %v1519_v32  ;;  %v2472_v27 = vpop.f32.mrf.mxu3  ;;  %v10211_v22 = vpop.f32.mrf.mxu1  ;;  %v2605_v60 = vrot.slane %v2603_v55, 4  ;;  %v2618_v63 = vrot.slane %v2616_v62, 4  ;;  %v3948_v46 = vor.u32 %v3947_v15, %v3944_v29  ;;  %v9227_v29 = vld [vmem:[#allocation2 + $0xc0] sm:$0xff] }
 0x118   : > { %v2095_v35 = vpack.c.b16 %v2079_v14, %v2078_v41  ;;  %v3963_v15 = vrot.slane %v3961_v58, 5  ;;  %v2636_v8 = vshll.u32 %v10246_v44, 16 }
 0x119   : > { %v10216_v31 = vadd.f32 %v2472_v27, %v2248_v19  ;;  %v3278_v19 = vsel %vm9572_vm10, %v3276_v47, %v3277_v34  ;;  %v2619_v0 = vor.u32 %v2618_v63, %v10228_v42  ;;  %v2622_v27 = vshll.u32 %v2556_v25, 16 }
 0x11a   : > { %8564 = vmatmul.msk.bf16.gmra.mxu1 %vm1521_vm12, %v9211_v4  ;;  %v5497_v4 = vld [vmem:[#allocation2 + $0x24] sm:$0x1]  ;;  %v3949_v13 = vrot.slane %v3948_v46, 4  ;;  %v3387_v41 = vunpack.c.l.b16 %v3278_v19  ;;  %v3966_v25 = vshrl.u32 %v3896_v28, 16  ;;  %v3964_v46 = vsel %vm9629_vm7, %v3959_v30, %v3963_v15 }
 0x11b   : > { %v5498_v14 = vsel %vm9651_vm8, 0, %v5497_v4  ;;  %v2620_v34 = vrot.slane %v2619_v0, 4  ;;  %v2624_v63 = vrot.slane %v2622_v27, 5  ;;  %v3971_v19 = vrot.slane %v3969_v45, 5 }
 0x11c   : > { %v1615_v32 = vpop.f32.mrf.mxu0  ;;  %v3418_v58 = vpack.c.b16 %v3387_v41, %v3386_v52  ;;  %v3968_v50 = vrot.slane %v3966_v25, 4  ;;  %v3898_v41 = vld [vmem:[#allocation2 + $0x2c] sm:$0x1] }
 0x11d   : > { %v1836_v23 = vadd.f32 %v10182_v61, %v1615_v32  ;;  %v2609_v61 = vor.u32 %v2608_v56, %v2605_v60  ;;  %v3975_v32 = vshll.u32 %v10241_v1, 16  ;;  %v3979_v60 = vshrl.u32 %v10241_v1, 16 }
 0x11e   : > { %v2188_v53 = vpop.f32.mrf.mxu2  ;;  %v2625_v15 = vsel %vm9629_vm7, %v2620_v34, %v2624_v63  ;;  %v3985_v63 = vshll.u32 %v3898_v41, 16 }
 0x11f   : > { %v2249_v9 = vadd.f32 %v2188_v53, %v1836_v23  ;;  %v2474_v55 = vpop.f32.mrf.mxu3  ;;  %v10236_v20 = vpop.f32.mrf.mxu1  ;;  %v2610_v47 = vrot.slane %v2609_v61, 4  ;;  %v3954_v23 = vsel %vm9629_vm7, %v3949_v13, %v10218_v33  ;;  %v2627_v53 = vshrl.u32 %v10220_v10, 16  ;;  %v10269_v13 = vld [vmem:[#allocation2 + $0x24] sm:$0xf] }
 0x120   : > { %v5526_v61 = vsel %vm9669_vm13, 0, %v5525_v11  ;;  %v10264_v0 = vrot.slane %v3975_v32, 5  ;;  %v3981_v27 = vrot.slane %v3979_v60, 4  ;;  %v4327_v52 = vunpack.c.l.b16 %v3954_v23  ;;  %5499 = vst [vmem:[#allocation2 + $0x24] sm:$0x1] %v5498_v14 }
 0x121   : > { %v10239_v62 = vadd.f32 %v2474_v55, %v2249_v9  ;;  %v9228_v55 = vld [vmem:[#allocation2 + $0x18] sm:$0xff]  ;;  %v2615_v30 = vsel %vm9629_vm7, %v2610_v47, %v10228_v42  ;;  %v2629_v25 = vrot.slane %v2627_v53, 4  ;;  %v3972_v47 = vor.u32 %v3971_v19, %v3968_v50  ;;  %v5500_v50 = vld [vmem:[#allocation2 + $0x30] sm:$0x1] }
 0x122   : > { %5527 = vst [vmem:[#allocation2 + $0x1c] sm:$0x1] %v5526_v61  ;;  %v3982_v34 = vor.u32 %v3981_v27, %v10264_v0  ;;  %v2988_v23 = vunpack.c.l.b16 %v2615_v30  ;;  %v3987_v30 = vrot.slane %v3985_v63, 5 }
 0x123   : > { %8597 = vmatmul.msk.bf16.gmra.mxu2 %vm1521_vm12, %v2095_v35  ;;  %v2630_v35 = vshll.u32 %v10220_v10, 16  ;;  %v3281_v10 = vrot.slane %v10246_v44, 5  ;;  %v3973_v27 = vrot.slane %v3972_v47, 4 }
 0x124   : > { %v1618_v21 = vpop.f32.mrf.mxu0  ;;  %8678 = vmatmul.msk.bf16.gmra.mxu3 %vm1521_vm12, %v9227_v29  ;;  %v3209_v29 = vld [vmem:[#allocation2 + $0x18] sm:$0xe] }
 0x125   : > { %v1839_v56 = vadd.f32 %v10211_v22, %v1618_v21  ;;  %v2640_v22 = vshrl.u32 %v10246_v44, 16  ;;  %v2559_v44 = vld [vmem:[#allocation2 + $0x20] sm:$0x1]  ;;  %v2632_v45 = vrot.slane %v2630_v35, 5  ;;  %v10277_v21 = vrot.slane %v2636_v8, 5 }
 0x126   : > { %v2191_v59 = vpop.f32.mrf.mxu2 }
 0x127   : > { %v2250_v9 = vadd.f32 %v2191_v59, %v1839_v56  ;;  %8484 = vmatmul.msk.bf16.gmra.mxu0 %vm1521_vm12, %v1520_v43  ;;  %v2477_v33 = vpop.f32.mrf.mxu3  ;;  %v1843_v4 = vpop.f32.mrf.mxu1  ;;  %v4328_v43 = vunpack.c.l.b16 %v3964_v46  ;;  %v2642_v60 = vrot.slane %v2640_v22, 4  ;;  %v8697_v56 = vrot.slane %v3209_v29, 9 }
 0x128   : > { %v3283_v59 = vrot.slane %v3281_v10, 4  ;;  %v2633_v53 = vor.u32 %v2632_v45, %v2629_v25  ;;  %v3983_v29 = vrot.slane %v3982_v34, 4  ;;  %v10291_v25 = vld [vmem:[#allocation2 + $0x34] sm:$0xf] }
 0x129   : > { %v10267_v28 = vadd.f32 %v2477_v33, %v2250_v9  ;;  %v3284_v9 = vrot.slane %v2559_v44, 5  ;;  %v4359_v11 = vpack.c.b16 %v4328_v43, %v4327_v52  ;;  %v2643_v22 = vor.u32 %v2642_v60, %v10277_v21  ;;  %v3899_v43 = vld [vmem:[#allocation2 + $0x30] sm:$0xf]  ;;  %12345 = vst [vmem:[#allocation9_spill] sm:$0xff] %v10291_v25 }
 0x12a   : > { %8713 = vmatmul.msk.bf16.vlgmr.msrb.gmra.mxu1 %vm1521_vm12, %v3418_v58  ;;  %v2989_v58 = vunpack.c.l.b16 %v2625_v15  ;;  %v2646_v33 = vshll.u32 %v2559_v44, 16  ;;  %v3282_v61 = vsel %vm9572_vm10, %v8697_v56, %v3281_v10  ;;  %v5501_v10 = vsel %vm9651_vm8, 0, %v5500_v50 }
 0x12b   : > { %v3388_v52 = vunpack.c.l.b16 %v3282_v61  ;;  %v2634_v45 = vrot.slane %v2633_v53, 4  ;;  %v2644_v56 = vrot.slane %v2643_v22, 4  ;;  %v3990_v47 = vshrl.u32 %v3899_v43, 16 }
 0x12c   : > { %v1620_v32 = vpop.f32.mrf.mxu0  ;;  %v3020_v15 = vpack.c.b16 %v2989_v58, %v2988_v23  ;;  %v3993_v34 = vshll.u32 %v3899_v43, 16  ;;  %v3999_v63 = vshll.u32 %v10291_v25, 16  ;;  %v2654_v58 = vshll.u32 %v10269_v13, 16 }
 0x12d   : > { %v1841_v42 = vadd.f32 %v10236_v20, %v1620_v32  ;;  %v3285_v20 = vsel %vm9572_vm10, %v3283_v59, %v3284_v9  ;;  %v2648_v32 = vrot.slane %v2646_v33, 5  ;;  %v3988_v59 = vsel %vm9629_vm7, %v3983_v29, %v3987_v30  ;;  %v2561_v9 = vld [vmem:[#allocation2 + $0x28] sm:$0xf]  ;;  %v10310_v29 = vld [vmem:[#allocation2 + $0x30] sm:$0xf] }
 0x12e   : > { %v2193_v14 = vpop.f32.mrf.mxu2  ;;  %v3389_v41 = vunpack.c.l.b16 %v3285_v20  ;;  %v2660_v22 = vshll.u32 %v2561_v9, 16  ;;  %v2664_v33 = vshrl.u32 %v2561_v9, 16  ;;  %v3288_v20 = vrot.slane %v2561_v9, 5  ;;  %5502 = vst [vmem:[#allocation2 + $0x30] sm:$0x1] %v5501_v10 }
 0x12f   : > { %v2251_v46 = vadd.f32 %v2193_v14, %v1841_v42  ;;  %v2479_v35 = vpop.f32.mrf.mxu3  ;;  %v10281_v8 = vpop.f32.mrf.mxu1  ;;  %v4003_v14 = vshrl.u32 %v10291_v25, 16  ;;  %v3992_v30 = vrot.slane %v3990_v47, 4  ;;  %v2649_v43 = vsel %vm9629_vm7, %v2644_v56, %v2648_v32  ;;  %v2562_v9 = vld [vmem:[#allocation2 + $0x2c] sm:$0x1] }
 0x131   : > { %v10288_v19 = vadd.f32 %v2479_v35, %v2251_v46  ;;  %v2651_v46 = vshrl.u32 %v10269_v13, 16  ;;  %v9229_v35 = vld [vmem:[#allocation2 + $0x24] sm:$0xff]  ;;  %v4005_v13 = vrot.slane %v4003_v14, 4  ;;  %v2656_v14 = vrot.slane %v2654_v58, 5  ;;  %v5503_v58 = vld [vmem:[#allocation2 + $0x3c] sm:$0x1] }
 0x133   : > { %8794 = vmatmul.msk.bf16.vlgmr.msrb.gmra.mxu2 %vm1521_vm12, %v9228_v55  ;;  %v3978_v55 = vsel %vm9629_vm7, %v3973_v27, %v10264_v0  ;;  %v5528_v0 = vld [vmem:[#allocation2 + $0x28] sm:$0x1]  ;;  %v3210_v27 = vld [vmem:[#allocation2 + $0x24] sm:$0xe]  ;;  %v2653_v47 = vrot.slane %v2651_v46, 4 }
 0x134   : > { %v1623_v44 = vpop.f32.mrf.mxu0  ;;  %8811 = vmatmul.msk.bf16.vlgmr.msrb.gmra.mxu3 %vm1521_vm12, %v4359_v11  ;;  %v5529_v61 = vsel %vm9669_vm13, 0, %v5528_v0  ;;  %v3291_v0 = vrot.slane %v2562_v9, 5 }
 0x135   : > { %v1844_v60 = vadd.f32 %v1843_v4, %v1623_v44  ;;  %v3419_v4 = vpack.c.b16 %v3389_v41, %v3388_v52  ;;  %5530 = vst [vmem:[#allocation2 + $0x28] sm:$0x1] %v5529_v61  ;;  %v10312_v52 = vrot.slane %v3999_v63, 5  ;;  %v2639_v41 = vsel %vm9629_vm7, %v2634_v45, %v10277_v21 }
 0x136   : > { %v2196_v42 = vpop.f32.mrf.mxu2  ;;  %v4329_v44 = vunpack.c.l.b16 %v3978_v55  ;;  %v3290_v63 = vrot.slane %v3288_v20, 4  ;;  %v2666_v21 = vrot.slane %v2664_v33, 4  ;;  %v2657_v33 = vor.u32 %v2656_v14, %v2653_v47  ;;  %v10337_v14 = vld [vmem:[#allocation2 + $0x30] sm:$0xff] }
 0x137   : > { %v2252_v23 = vadd.f32 %v2196_v42, %v1844_v60  ;;  %8680 = vmatmul.msk.bf16.vlgmr.msrb.gmra.mxu0 %vm1521_vm12, %v3020_v15  ;;  %v2482_v11 = vpop.f32.mrf.mxu3  ;;  %v1848_v53 = vpop.f32.mrf.mxu1  ;;  %v3995_v15 = vrot.slane %v3993_v34, 5  ;;  %v4330_v60 = vunpack.c.l.b16 %v3988_v59  ;;  %v3901_v42 = vld [vmem:[#allocation2 + $0x38] sm:$0x1]  ;;  %v8698_v34 = vrot.slane %v3210_v27, 9 }
 0x138   : > { %v4006_v32 = vor.u32 %v4005_v13, %v10312_v52  ;;  %v4009_v56 = vshll.u32 %v3901_v42, 16  ;;  %v2990_v59 = vunpack.c.l.b16 %v2639_v41 }
 0x139   : > { %v10308_v50 = vadd.f32 %v2482_v11, %v2252_v23  ;;  %v10321_v11 = vrot.slane %v2660_v22, 5  ;;  %v3996_v61 = vor.u32 %v3995_v15, %v3992_v30  ;;  %v4360_v25 = vpack.c.b16 %v4330_v60, %v4329_v44 }
 0x13a   : > { %8714 = vmatmul.msk.bf16.gmra.mxu1 %vm1521_vm12, %v3419_v4  ;;  %v2991_v4 = vunpack.c.l.b16 %v2649_v43  ;;  %v3289_v27 = vsel %vm9572_vm10, %v8698_v34, %v3288_v20  ;;  %v2670_v15 = vshll.u32 %v2562_v9, 16  ;;  %v4007_v41 = vrot.slane %v4006_v32, 4  ;;  %v2564_v34 = vld [vmem:[#allocation2 + $0x34] sm:$0xf]  ;;  %v3902_v9 = vld [vmem:[#allocation2 + $0x3c] sm:$0xf] }
 0x13b   : > { %v2667_v30 = vor.u32 %v2666_v21, %v10321_v11  ;;  %v3997_v13 = vrot.slane %v3996_v61, 4  ;;  %v4011_v43 = vrot.slane %v4009_v56, 5  ;;  %v3390_v60 = vunpack.c.l.b16 %v3289_v27  ;;  %v10345_v61 = vld [vmem:[#allocation2 + $0x40] sm:$0xf] }
 0x13c   : > { %v1625_v23 = vpop.f32.mrf.mxu0  ;;  %v3021_v44 = vpack.c.b16 %v2991_v4, %v2990_v59  ;;  %v5504_v20 = vsel %vm9651_vm8, 0, %v5503_v58  ;;  %12347 = vst [vmem:[#allocation11_spill] sm:$0xff] %v10345_v61  ;;  %v2678_v56 = vshll.u32 %v10310_v29, 16  ;;  %v5531_v59 = vld [vmem:[#allocation2 + $0x34] sm:$0x1]  ;;  %v2688_v58 = vshrl.u32 %v2564_v34, 16 }
 0x13d   : > { %v1846_v10 = vadd.f32 %v10281_v8, %v1625_v23  ;;  %v3292_v8 = vsel %vm9572_vm10, %v3290_v63, %v3291_v0  ;;  %v2668_v47 = vrot.slane %v2667_v30, 4  ;;  %v2672_v0 = vrot.slane %v2670_v15, 5  ;;  %v3211_v4 = vld [vmem:[#allocation2 + $0x30] sm:$0xe] }
 0x13e   : > { %v2198_v45 = vpop.f32.mrf.mxu2  ;;  %v3391_v42 = vunpack.c.l.b16 %v3292_v8  ;;  %v4012_v21 = vsel %vm9629_vm7, %v4007_v41, %v4011_v43  ;;  %v4014_v30 = vshrl.u32 %v3902_v9, 16  ;;  %v4017_v15 = vshll.u32 %v3902_v9, 16 }
 0x13f   : > { %v2253_v55 = vadd.f32 %v2198_v45, %v1846_v10  ;;  %v2484_v5 = vpop.f32.mrf.mxu3  ;;  %v10324_v46 = vpop.f32.mrf.mxu1  ;;  %v2675_v45 = vshrl.u32 %v10310_v29, 16  ;;  %v4023_v29 = vshll.u32 %v10345_v61, 16  ;;  %v4027_v43 = vshrl.u32 %v10345_v61, 16 }
 0x140   : > { %v3420_v32 = vpack.c.b16 %v3391_v42, %v3390_v60  ;;  %v2673_v60 = vsel %vm9629_vm7, %v2668_v47, %v2672_v0  ;;  %v8699_v42 = vrot.slane %v3211_v4, 9  ;;  %v4332_v9 = vunpack.c.l.b16 %v4012_v21 }
 0x141   : > { %v10330_v22 = vadd.f32 %v2484_v5, %v2253_v55  ;;  %v2658_v5 = vrot.slane %v2657_v33, 4  ;;  %v2684_v55 = vshll.u32 %v2564_v34, 16  ;;  %v5532_v33 = vsel %vm9669_vm13, 0, %v5531_v59 }
 0x142   : > { %5533 = vst [vmem:[#allocation2 + $0x34] sm:$0x1] %v5532_v33  ;;  %v2690_v59 = vrot.slane %v2688_v58, 4  ;;  %v4019_v33 = vrot.slane %v4017_v15, 5  ;;  %v10366_v47 = vrot.slane %v4023_v29, 5  ;;  %v4029_v0 = vrot.slane %v4027_v43, 4 }
 0x143   : > { %12346 = vst [vmem:[#allocation10_spill] sm:$0xff] %v10330_v22  ;;  %8795 = vmatmul.msk.bf16.gmra.mxu2 %vm1521_vm12, %v9229_v35  ;;  %v4002_v35 = vsel %vm9629_vm7, %v3997_v13, %v10312_v52  ;;  %v2565_v52 = vld [vmem:[#allocation2 + $0x38] sm:$0x1]  ;;  %v2663_v41 = vsel %vm9629_vm7, %v2658_v5, %v10321_v11  ;;  %v2680_v11 = vrot.slane %v2678_v56, 5  ;;  %v5506_v58 = vld [vmem:[#allocation2 + $0x48] sm:$0x1] }
 0x144   : > { %v1628_v23 = vpop.f32.mrf.mxu0  ;;  %8812 = vmatmul.msk.bf16.gmra.mxu3 %vm1521_vm12, %v4360_v25  ;;  %v2694_v29 = vshll.u32 %v2565_v52, 16 }
 0x145   : > { %v1849_v63 = vadd.f32 %v1848_v53, %v1628_v23  ;;  %v3295_v53 = vrot.slane %v2564_v34, 5  ;;  %v3298_v34 = vrot.slane %v2565_v52, 5 }
 0x146   : > { %v2201_v10 = vpop.f32.mrf.mxu2 }
 0x147   : > { %v2254_v25 = vadd.f32 %v2201_v10, %v1849_v63  ;;  %8681 = vmatmul.msk.bf16.gmra.mxu0 %vm1521_vm12, %v3021_v44  ;;  %v2487_v27 = vpop.f32.mrf.mxu3  ;;  %v1853_v8 = vpop.f32.mrf.mxu1  ;;  %v10358_v44 = vld [vmem:[#allocation2 + $0x3c] sm:$0xf]  ;;  %v3297_v23 = vrot.slane %v3295_v53, 4  ;;  %v4331_v63 = vunpack.c.l.b16 %v4002_v35  ;;  %v2677_v10 = vrot.slane %v2675_v45, 4 }
 0x148   : > { %5505 = vst [vmem:[#allocation2 + $0x3c] sm:$0x1] %v5504_v20  ;;  %v2992_v20 = vunpack.c.l.b16 %v2663_v41  ;;  %v3296_v35 = vsel %vm9572_vm10, %v8699_v42, %v3295_v53  ;;  %v4030_v53 = vor.u32 %v4029_v0, %v10366_v47 }
 0x149   : > { %v10351_v13 = vadd.f32 %v2487_v27, %v2254_v25  ;;  %v10363_v25 = vrot.slane %v2684_v55, 5  ;;  %v4016_v27 = vrot.slane %v4014_v30, 4  ;;  %v3299_v21 = vsel %vm9572_vm10, %v3297_v23, %v3298_v34  ;;  %v3905_v34 = vld [vmem:[#allocation2 + $0x48] sm:$0xf] }
 0x14a   : > { %8715 = vmatmul.msk.bf16.gmra.mxu1 %vm1521_vm12, %v3420_v32  ;;  %v2993_v32 = vunpack.c.l.b16 %v2673_v60  ;;  %v4361_v56 = vpack.c.b16 %v4332_v9, %v4331_v63  ;;  %v2681_v55 = vor.u32 %v2680_v11, %v2677_v10  ;;  %v3392_v42 = vunpack.c.l.b16 %v3296_v35  ;;  %v10382_v63 = vld [vmem:[#allocation2 + $0x4c] sm:$0xf] }
 0x14b   : > { %12348 = vst [vmem:[#allocation12_spill] sm:$0xff] %v10351_v13  ;;  %v3904_v13 = vld [vmem:[#allocation2 + $0x44] sm:$0x1]  ;;  %v4020_v43 = vor.u32 %v4019_v33, %v4016_v27  ;;  %v3393_v22 = vunpack.c.l.b16 %v3299_v21  ;;  %v4031_v33 = vrot.slane %v4030_v53, 4  ;;  %v4047_v21 = vshll.u32 %v10382_v63, 16 }
 0x14c   : > { %v1630_v5 = vpop.f32.mrf.mxu0  ;;  %v3022_v60 = vpack.c.b16 %v2993_v32, %v2992_v20  ;;  %v2682_v23 = vrot.slane %v2681_v55, 4  ;;  %12350 = vst [vmem:[#allocation14_spill] sm:$0xff] %v10382_v63  ;;  %v4041_v20 = vshll.u32 %v3905_v34, 16  ;;  %v3212_v53 = vld [vmem:[#allocation2 + $0x3c] sm:$0xe] }
 0x14d   : > { %v1851_v61 = vadd.f32 %v10324_v46, %v1630_v5  ;;  %v2691_v46 = vor.u32 %v2690_v59, %v10363_v25  ;;  %v4033_v5 = vshll.u32 %v3904_v13, 16  ;;  %v2696_v13 = vrot.slane %v2694_v29, 5  ;;  %v2567_v59 = vld [vmem:[#allocation2 + $0x40] sm:$0xf]  ;;  %v2568_v29 = vld [vmem:[#allocation2 + $0x44] sm:$0x1] }
 0x14e   : > { %v2203_v4 = vpop.f32.mrf.mxu2  ;;  %v4021_v10 = vrot.slane %v4020_v43, 4  ;;  %v3421_v0 = vpack.c.b16 %v3393_v22, %v3392_v42  ;;  %v2712_v43 = vshrl.u32 %v2567_v59, 16 }
 0x14f   : > { %v2255_v45 = vadd.f32 %v2203_v4, %v1851_v61  ;;  %v2489_v30 = vpop.f32.mrf.mxu3  ;;  %v10372_v15 = vpop.f32.mrf.mxu1  ;;  %v5507_v61 = vsel %vm9651_vm8, 0, %v5506_v58  ;;  %v2692_v9 = vrot.slane %v2691_v46, 4  ;;  %v4035_v11 = vrot.slane %v4033_v5, 5  ;;  %v9231_v55 = vld [vmem:[#allocation2 + $0x3c] sm:$0xff] }
 0x150   : > { %v2699_v4 = vshrl.u32 %v10358_v44, 16  ;;  %v2702_v58 = vshll.u32 %v10358_v44, 16  ;;  %v4026_v44 = vsel %vm9629_vm7, %v4021_v10, %v10366_v47  ;;  %v3305_v10 = vrot.slane %v2568_v29, 5 }
 0x151   : > { %v10375_v41 = vadd.f32 %v2489_v30, %v2255_v45  ;;  %v4051_v45 = vshrl.u32 %v10382_v63, 16  ;;  %v5534_v30 = vld [vmem:[#allocation2 + $0x40] sm:$0x1] }
 0x152   : > { %v5535_v5 = vsel %vm9669_vm13, 0, %v5534_v30  ;;  %v10406_v30 = vrot.slane %v4047_v21, 5  ;;  %v2704_v63 = vrot.slane %v2702_v58, 5  ;;  %v2714_v21 = vrot.slane %v2712_v43, 4  ;;  %v5509_v58 = vld [vmem:[#allocation2 + $0x54] sm:$0x1] }
 0x153   : > { %12349 = vst [vmem:[#allocation13_spill] sm:$0xff] %v10375_v41  ;;  %8796 = vmatmul.msk.bf16.gmra.mxu2 %vm1521_vm12, %v10337_v14  ;;  %v4038_v14 = vshrl.u32 %v3905_v34, 16  ;;  %v4036_v34 = vsel %vm9629_vm7, %v4031_v33, %v4035_v11  ;;  %v4333_v11 = vunpack.c.l.b16 %v4026_v44  ;;  %v2718_v43 = vshll.u32 %v2568_v29, 16 }
 0x154   : > { %v1633_v52 = vpop.f32.mrf.mxu0  ;;  %8813 = vmatmul.msk.bf16.gmra.mxu3 %vm1521_vm12, %v4361_v56  ;;  %v3302_v56 = vrot.slane %v2567_v59, 5  ;;  %5536 = vst [vmem:[#allocation2 + $0x40] sm:$0x1] %v5535_v5  ;;  %v4334_v33 = vunpack.c.l.b16 %v4036_v34  ;;  %v2701_v5 = vrot.slane %v2699_v4, 4 }
 0x155   : > { %v1854_v27 = vadd.f32 %v1853_v8, %v1633_v52  ;;  %v2708_v8 = vshll.u32 %v2567_v59, 16  ;;  %v3907_v52 = vld [vmem:[#allocation2 + $0x50] sm:$0x1]  ;;  %v10404_v59 = vld [vmem:[#allocation2 + $0x48] sm:$0xf] }
 0x156   : > { %v2206_v35 = vpop.f32.mrf.mxu2  ;;  %5508 = vst [vmem:[#allocation2 + $0x48] sm:$0x1] %v5507_v61  ;;  %v3304_v47 = vrot.slane %v3302_v56, 4 }
 0x157   : > { %v2256_v32 = vadd.f32 %v2206_v35, %v1854_v27  ;;  %8682 = vmatmul.msk.bf16.gmra.mxu0 %vm1521_vm12, %v3022_v60  ;;  %v2492_v46 = vpop.f32.mrf.mxu3  ;;  %v10390_v22 = vpop.f32.mrf.mxu1  ;;  %v2687_v60 = vsel %vm9629_vm7, %v2682_v23, %v10363_v25  ;;  %v4040_v27 = vrot.slane %v4038_v14, 4  ;;  %v4043_v35 = vrot.slane %v4041_v20, 5 }
 0x158   : > { %v2697_v25 = vsel %vm9629_vm7, %v2692_v9, %v2696_v13  ;;  %v8700_v23 = vrot.slane %v3212_v53, 9  ;;  %v10412_v20 = vrot.slane %v2708_v8, 5  ;;  %v3306_v4 = vsel %vm9572_vm10, %v3304_v47, %v3305_v10 }
 0x159   : > { %v10394_v42 = vadd.f32 %v2492_v46, %v2256_v32  ;;  %v4053_v32 = vrot.slane %v4051_v45, 4  ;;  %v4057_v45 = vshll.u32 %v3907_v52, 16  ;;  %v4044_v41 = vor.u32 %v4043_v35, %v4040_v27  ;;  %v3908_v35 = vld [vmem:[#allocation2 + $0x54] sm:$0xf] }
 0x15a   : > { %8716 = vmatmul.msk.bf16.gmra.mxu1 %vm1521_vm12, %v3421_v0  ;;  %v2995_v0 = vunpack.c.l.b16 %v2697_v25  ;;  %v3303_v53 = vsel %vm9572_vm10, %v8700_v23, %v3302_v56  ;;  %v2705_v8 = vor.u32 %v2704_v63, %v2701_v5  ;;  %v2715_v52 = vor.u32 %v2714_v21, %v10412_v20  ;;  %v10424_v23 = vld [vmem:[#allocation2 + $0x58] sm:$0xf] }
 0x15b   : > { %12351 = vst [vmem:[#allocation15_spill] sm:$0xff] %v10394_v42  ;;  %v2994_v42 = vunpack.c.l.b16 %v2687_v60  ;;  %v4054_v9 = vor.u32 %v4053_v32, %v10406_v30  ;;  %v4362_v60 = vpack.c.b16 %v4334_v33, %v4333_v11  ;;  %v4059_v27 = vrot.slane %v4057_v45, 5  ;;  %v2570_v11 = vld [vmem:[#allocation2 + $0x4c] sm:$0xf] }
 0x15c   : > { %v1635_v46 = vpop.f32.mrf.mxu0  ;;  %v4045_v32 = vrot.slane %v4044_v41, 4  ;;  %v3395_v56 = vunpack.c.l.b16 %v3306_v4  ;;  %12353 = vst [vmem:[#allocation17_spill] sm:$0xff] %v10424_v23  ;;  %v5510_v47 = vsel %vm9651_vm8, 0, %v5509_v58  ;;  %v2706_v10 = vrot.slane %v2705_v8, 4 }
 0x15d   : > { %v1856_v14 = vadd.f32 %v10372_v15, %v1635_v46  ;;  %v4055_v25 = vrot.slane %v4054_v9, 4  ;;  %v3394_v46 = vunpack.c.l.b16 %v3303_v53  ;;  %v3023_v63 = vpack.c.b16 %v2995_v0, %v2994_v42 }
 0x15e   : > { %v2208_v61 = vpop.f32.mrf.mxu2  ;;  %v2720_v5 = vrot.slane %v2718_v43, 5  ;;  %v4062_v33 = vshrl.u32 %v3908_v35, 16  ;;  %v2716_v41 = vrot.slane %v2715_v52, 4  ;;  %v4071_v45 = vshll.u32 %v10424_v23, 16 }
 0x15f   : > { %v2257_v13 = vadd.f32 %v2208_v61, %v1856_v14  ;;  %v2494_v44 = vpop.f32.mrf.mxu3  ;;  %v10419_v15 = vpop.f32.mrf.mxu1  ;;  %v4065_v14 = vshll.u32 %v3908_v35, 16  ;;  %v4075_v61 = vshrl.u32 %v10424_v23, 16  ;;  %v4060_v42 = vsel %vm9629_vm7, %v4055_v25, %v4059_v27 }
 0x160   : > { %v2723_v0 = vshrl.u32 %v10404_v59, 16  ;;  %v2726_v4 = vshll.u32 %v10404_v59, 16  ;;  %v2732_v58 = vshll.u32 %v2570_v11, 16  ;;  %v3309_v8 = vrot.slane %v2570_v11, 5 }
 0x161   : > { %v10421_v34 = vadd.f32 %v2494_v44, %v2257_v13  ;;  %v3422_v13 = vpack.c.b16 %v3395_v56, %v3394_v46  ;;  %v5537_v44 = vld [vmem:[#allocation2 + $0x4c] sm:$0x1]  ;;  %v2736_v52 = vshrl.u32 %v2570_v11, 16  ;;  %v4064_v35 = vrot.slane %v4062_v33, 4  ;;  %v3910_v33 = vld [vmem:[#allocation2 + $0x5c] sm:$0x1] }
 0x162   : > { %v4067_v27 = vrot.slane %v4065_v14, 5  ;;  %v10445_v46 = vrot.slane %v4071_v45, 5  ;;  %v4077_v56 = vrot.slane %v4075_v61, 4  ;;  %v2711_v59 = vsel %vm9629_vm7, %v2706_v10, %v10412_v20 }
 0x163   : > { %12352 = vst [vmem:[#allocation16_spill] sm:$0xff] %v10421_v34  ;;  %8797 = vmatmul.msk.bf16.gmra.mxu2 %vm1521_vm12, %v9231_v55  ;;  %v4050_v55 = vsel %vm9629_vm7, %v4045_v32, %v10406_v30  ;;  %v5538_v30 = vsel %vm9669_vm13, 0, %v5537_v44  ;;  %v3213_v32 = vld [vmem:[#allocation2 + $0x48] sm:$0xe]  ;;  %v4336_v14 = vunpack.c.l.b16 %v4060_v42  ;;  %v3311_v45 = vrot.slane %v3309_v8, 4 }
 0x164   : > { %v1638_v29 = vpop.f32.mrf.mxu0  ;;  %8814 = vmatmul.msk.bf16.gmra.mxu3 %vm1521_vm12, %v4362_v60  ;;  %v4335_v11 = vunpack.c.l.b16 %v4050_v55  ;;  %v2725_v44 = vrot.slane %v2723_v0, 4  ;;  %v2738_v23 = vrot.slane %v2736_v52, 4  ;;  %v4068_v10 = vor.u32 %v4067_v27, %v4064_v35  ;;  %v5512_v27 = vld [vmem:[#allocation2 + $0x60] sm:$0x1] }
 0x165   : > { %v1859_v21 = vadd.f32 %v10390_v22, %v1638_v29  ;;  %v9232_v22 = vld [vmem:[#allocation2 + $0x48] sm:$0xff]  ;;  %v2721_v29 = vsel %vm9629_vm7, %v2716_v41, %v2720_v5  ;;  %v4078_v5 = vor.u32 %v4077_v56, %v10445_v46  ;;  %v4081_v41 = vshll.u32 %v3910_v33, 16 }
 0x166   : > { %v2211_v9 = vpop.f32.mrf.mxu2  ;;  %5539 = vst [vmem:[#allocation2 + $0x4c] sm:$0x1] %v5538_v30  ;;  %v10455_v30 = vrot.slane %v2732_v58, 5  ;;  %v4363_v58 = vpack.c.b16 %v4336_v14, %v4335_v11  ;;  %v5513_v11 = vsel %vm9651_vm8, 0, %v5512_v27 }
 0x167   : > { %v2258_v53 = vadd.f32 %v2211_v9, %v1859_v21  ;;  %8683 = vmatmul.msk.bf16.gmra.mxu0 %vm1521_vm12, %v3023_v63  ;;  %v2497_v43 = vpop.f32.mrf.mxu3  ;;  %v1863_v60 = vpop.f32.mrf.mxu1  ;;  %v10447_v63 = vld [vmem:[#allocation2 + $0x54] sm:$0xf]  ;;  %v2571_v21 = vld [vmem:[#allocation2 + $0x50] sm:$0x1]  ;;  %v8701_v9 = vrot.slane %v3213_v32, 9  ;;  %v4079_v33 = vrot.slane %v4078_v5, 4 }
 0x168   : > { %5511 = vst [vmem:[#allocation2 + $0x54] sm:$0x1] %v5510_v47  ;;  %v2996_v47 = vunpack.c.l.b16 %v2711_v59  ;;  %v2742_v35 = vshll.u32 %v2571_v21, 16  ;;  %v4069_v59 = vrot.slane %v4068_v10, 4 }
 0x169   : > { %v10443_v25 = vadd.f32 %v2497_v43, %v2258_v53  ;;  %v3312_v53 = vrot.slane %v2571_v21, 5  ;;  %v2728_v43 = vrot.slane %v2726_v4, 5  ;;  %v3911_v21 = vld [vmem:[#allocation2 + $0x60] sm:$0xf] }
 0x16a   : > { %8717 = vmatmul.msk.bf16.gmra.mxu1 %vm1521_vm12, %v3422_v13  ;;  %v3310_v13 = vsel %vm9572_vm10, %v8701_v9, %v3309_v8  ;;  %v10469_v9 = vld [vmem:[#allocation2 + $0x58] sm:$0xf] }
 0x16b   : > { %12354 = vst [vmem:[#allocation18_spill] sm:$0xff] %v10443_v25  ;;  %v2997_v25 = vunpack.c.l.b16 %v2721_v29  ;;  %v3313_v0 = vsel %vm9572_vm10, %v3311_v45, %v3312_v53  ;;  %v2729_v52 = vor.u32 %v2728_v43, %v2725_v44  ;;  %v4083_v29 = vrot.slane %v4081_v41, 5 }
 0x16c   : > { %v1640_v61 = vpop.f32.mrf.mxu0  ;;  %v4074_v43 = vsel %vm9629_vm7, %v4069_v59, %v10445_v46  ;;  %v2747_v41 = vshrl.u32 %v10447_v63, 16  ;;  %v4086_v46 = vshrl.u32 %v3911_v21, 16  ;;  %v3316_v27 = vrot.slane %v10469_v9, 5 }
 0x16d   : > { %v1861_v20 = vadd.f32 %v10419_v15, %v1640_v61  ;;  %v2739_v15 = vor.u32 %v2738_v23, %v10455_v30  ;;  %v3396_v61 = vunpack.c.l.b16 %v3310_v13  ;;  %v3024_v8 = vpack.c.b16 %v2997_v25, %v2996_v47  ;;  %v10479_v25 = vld [vmem:[#allocation2 + $0x64] sm:$0xf]  ;;  %v5540_v13 = vld [vmem:[#allocation2 + $0x58] sm:$0x1] }
 0x16e   : > { %v2213_v55 = vpop.f32.mrf.mxu2  ;;  %v2730_v45 = vrot.slane %v2729_v52, 4  ;;  %v2744_v23 = vrot.slane %v2742_v35, 5  ;;  %12356 = vst [vmem:[#allocation20_spill] sm:$0xff] %v10479_v25  ;;  %v4095_v35 = vshll.u32 %v10479_v25, 16  ;;  %v3318_v38 = vrot.slane %v3316_v27, 4 }
 0x16f   : > { %v2259_v42 = vadd.f32 %v2213_v55, %v1861_v20  ;;  %v2499_v4 = vpop.f32.mrf.mxu3  ;;  %v10463_v32 = vpop.f32.mrf.mxu1  ;;  %v3397_v20 = vunpack.c.l.b16 %v3313_v0  ;;  %v2740_v44 = vrot.slane %v2739_v15, 4  ;;  %v2750_v55 = vshll.u32 %v10447_v63, 16  ;;  %v9233_v52 = vld [vmem:[#allocation2 + $0x54] sm:$0xff] }
 0x170   : > { %v4089_v0 = vshll.u32 %v3911_v21, 16  ;;  %v5541_v15 = vsel %vm9669_vm13, 0, %v5540_v13  ;;  %v4099_v63 = vshrl.u32 %v10479_v25, 16  ;;  %v4337_v21 = vunpack.c.l.b16 %v4074_v43 }
 0x171   : > { %v10466_v56 = vadd.f32 %v2499_v4, %v2259_v42  ;;  %v3423_v5 = vpack.c.b16 %v3397_v20, %v3396_v61  ;;  %v2760_v42 = vshrl.u32 %v10469_v9, 16  ;;  %5542 = vst [vmem:[#allocation2 + $0x58] sm:$0x1] %v5541_v15  ;;  %v2735_v61 = vsel %vm9629_vm7, %v2730_v45, %v10455_v30 }
 0x172   : > { %v2745_v20 = vsel %vm9629_vm7, %v2740_v44, %v2744_v23  ;;  %v4091_v45 = vrot.slane %v4089_v0, 5  ;;  %v10504_v23 = vrot.slane %v4095_v35, 5  ;;  %v4101_v44 = vrot.slane %v4099_v63, 4 }
 0x173   : > { %12355 = vst [vmem:[#allocation19_spill] sm:$0xff] %v10466_v56  ;;  %8798 = vmatmul.msk.bf16.gmra.mxu2 %vm1521_vm12, %v9232_v22  ;;  %v4084_v22 = vsel %vm9629_vm7, %v4079_v33, %v4083_v29  ;;  %v3214_v33 = vld [vmem:[#allocation2 + $0x54] sm:$0xe]  ;;  %v10493_v29 = vld [vmem:[#allocation2 + $0x60] sm:$0xf] }
 0x174   : > { %v1643_v14 = vpop.f32.mrf.mxu0  ;;  %8815 = vmatmul.msk.bf16.gmra.mxu3 %vm1521_vm12, %v4363_v58  ;;  %5514 = vst [vmem:[#allocation2 + $0x60] sm:$0x1] %v5513_v11  ;;  %v8702_v15 = vrot.slane %v3214_v33, 9 }
 0x175   : > { %v1864_v53 = vadd.f32 %v1863_v60, %v1643_v14  ;;  %v2756_v60 = vshll.u32 %v10469_v9, 16  ;;  %v2752_v14 = vrot.slane %v2750_v55, 5  ;;  %v2574_v9 = vld [vmem:[#allocation2 + $0x5c] sm:$0x1]  ;;  %v2999_v55 = vunpack.c.l.b16 %v2745_v20 }
 0x176   : > { %v2216_v10 = vpop.f32.mrf.mxu2  ;;  %v3319_v25 = vrot.slane %v2574_v9, 5  ;;  %v2766_v33 = vshll.u32 %v2574_v9, 16 }
 0x177   : > { %v2260_v47 = vadd.f32 %v2216_v10, %v1864_v53  ;;  %8684 = vmatmul.msk.bf16.gmra.mxu0 %vm1521_vm12, %v3024_v8  ;;  %v2502_v4 = vpop.f32.mrf.mxu3  ;;  %v1868_v58 = vpop.f32.mrf.mxu1  ;;  %v2749_v8 = vrot.slane %v2747_v41, 4  ;;  %v4338_v53 = vunpack.c.l.b16 %v4084_v22  ;;  %v10501_v10 = vrot.slane %v2756_v60, 5  ;;  %v3913_v22 = vld [vmem:[#allocation2 + $0x68] sm:$0x1] }
 0x178   : > { %v3320_v0 = vsel %vm9572_vm10, %v3318_v38, %v3319_v25 }
 0x179   : > { %v10491_v59 = vadd.f32 %v2502_v4, %v2260_v47  ;;  %v2762_v47 = vrot.slane %v2760_v42, 4  ;;  %v4088_v4 = vrot.slane %v4086_v46, 4  ;;  %v2753_v43 = vor.u32 %v2752_v14, %v2749_v8 }
 0x17a   : > { %8718 = vmatmul.msk.bf16.gmra.mxu1 %vm1521_vm12, %v3423_v5  ;;  %v2998_v5 = vunpack.c.l.b16 %v2735_v61  ;;  %v4364_v60 = vpack.c.b16 %v4338_v53, %v4337_v21  ;;  %v4102_v8 = vor.u32 %v4101_v44, %v10504_v23  ;;  %v4105_v61 = vshll.u32 %v3913_v22, 16  ;;  %v2576_v22 = vld [vmem:[#allocation2 + $0x64] sm:$0xf] }
 0x17b   : > { %12357 = vst [vmem:[#allocation21_spill] sm:$0xff] %v10491_v59  ;;  %v2763_v46 = vor.u32 %v2762_v47, %v10501_v10  ;;  %v4092_v63 = vor.u32 %v4091_v45, %v4088_v4  ;;  %v2754_v20 = vrot.slane %v2753_v43, 4  ;;  %v3399_v53 = vunpack.c.l.b16 %v3320_v0  ;;  %v3914_v47 = vld [vmem:[#allocation2 + $0x6c] sm:$0xf]  ;;  %v3215_v0 = vld [vmem:[#allocation2 + $0x60] sm:$0xe] }
 0x17c   : > { %v1645_v13 = vpop.f32.mrf.mxu0  ;;  %v3025_v14 = vpack.c.b16 %v2999_v55, %v2998_v5  ;;  %v4103_v25 = vrot.slane %v4102_v8, 4  ;;  %v4110_v45 = vshrl.u32 %v3914_v47, 16  ;;  %v4113_v44 = vshll.u32 %v3914_v47, 16 }
 0x17d   : > { %v1866_v30 = vadd.f32 %v10463_v32, %v1645_v13  ;;  %v3317_v32 = vsel %vm9572_vm10, %v8702_v15, %v3316_v27  ;;  %v2764_v13 = vrot.slane %v2763_v46, 4  ;;  %v10517_v27 = vld [vmem:[#allocation2 + $0x70] sm:$0xf]  ;;  %v4093_v38 = vrot.slane %v4092_v63, 4  ;;  %v9234_v46 = vld [vmem:[#allocation2 + $0x60] sm:$0xff] }
 0x17e   : > { %v2218_v11 = vpop.f32.mrf.mxu2  ;;  %v3398_v21 = vunpack.c.l.b16 %v3317_v32  ;;  %12359 = vst [vmem:[#allocation23_spill] sm:$0xff] %v10517_v27  ;;  %v4123_v5 = vshrl.u32 %v10517_v27, 16  ;;  %v3323_v63 = vrot.slane %v2576_v22, 5  ;;  %v2780_v47 = vshll.u32 %v2576_v22, 16 }
 0x17f   : > { %v2261_v41 = vadd.f32 %v2218_v11, %v1866_v30  ;;  %v2504_v59 = vpop.f32.mrf.mxu3  ;;  %v10506_v42 = vpop.f32.mrf.mxu1  ;;  %v2768_v30 = vrot.slane %v2766_v33, 5 }
 0x180   : > { %v3424_v43 = vpack.c.b16 %v3399_v53, %v3398_v21  ;;  %v2774_v21 = vshll.u32 %v10493_v29, 16  ;;  %v10541_v53 = vld [vmem:[#allocation2 + $0x70] sm:$0xf] }
 0x181   : > { %v10513_v35 = vadd.f32 %v2504_v59, %v2261_v41  ;;  %v4107_v59 = vrot.slane %v4105_v61, 5  ;;  %v5543_v41 = vld [vmem:[#allocation2 + $0x64] sm:$0x1]  ;;  %v2769_v33 = vsel %vm9629_vm7, %v2764_v13, %v2768_v30  ;;  %v4098_v61 = vsel %vm9629_vm7, %v4093_v38, %v10504_v23  ;;  %v2577_v23 = vld [vmem:[#allocation2 + $0x68] sm:$0x1] }
 0x182   : > { %v5544_v32 = vsel %vm9669_vm13, 0, %v5543_v41  ;;  %v4112_v13 = vrot.slane %v4110_v45, 4  ;;  %v4115_v30 = vrot.slane %v4113_v44, 5  ;;  %v8703_v41 = vrot.slane %v3215_v0, 9 }
 0x183   : > { %12358 = vst [vmem:[#allocation22_spill] sm:$0xff] %v10513_v35  ;;  %8799 = vmatmul.msk.bf16.gmra.mxu2 %vm1521_vm12, %v9233_v52  ;;  %v2759_v52 = vsel %vm9629_vm7, %v2754_v20, %v10501_v10  ;;  %v2771_v10 = vshrl.u32 %v10493_v29, 16  ;;  %v4108_v20 = vsel %vm9629_vm7, %v4103_v25, %v4107_v59  ;;  %v4125_v25 = vrot.slane %v4123_v5, 4  ;;  %v3916_v29 = vld [vmem:[#allocation2 + $0x74] sm:$0x1] }
 0x184   : > { %v1648_v9 = vpop.f32.mrf.mxu0  ;;  %8816 = vmatmul.msk.bf16.gmra.mxu3 %vm1521_vm12, %v4364_v60  ;;  %5545 = vst [vmem:[#allocation2 + $0x64] sm:$0x1] %v5544_v32  ;;  %v3326_v32 = vrot.slane %v2577_v23, 5  ;;  %v4339_v45 = vunpack.c.l.b16 %v4098_v61  ;;  %v4340_v44 = vunpack.c.l.b16 %v4108_v20  ;;  %v4116_v35 = vor.u32 %v4115_v30, %v4112_v13 }
 0x185   : > { %v1869_v15 = vadd.f32 %v1868_v58, %v1648_v9  ;;  %v4119_v58 = vshll.u32 %v10517_v27, 16  ;;  %v2784_v9 = vshrl.u32 %v2576_v22, 16  ;;  %v2773_v27 = vrot.slane %v2771_v10, 4 }
 0x186   : > { %v2221_v4 = vpop.f32.mrf.mxu2  ;;  %v4129_v56 = vshll.u32 %v3916_v29, 16  ;;  %v3324_v0 = vsel %vm9572_vm10, %v8703_v41, %v3323_v63  ;;  %v4365_v20 = vpack.c.b16 %v4340_v44, %v4339_v45  ;;  %v2578_v41 = vld [vmem:[#allocation2 + $0x6c] sm:$0xf]  ;;  %v2808_v39 = vshrl.u32 %v10541_v53, 16 }
 0x187   : > { %v2262_v11 = vadd.f32 %v2221_v4, %v1869_v15  ;;  %8685 = vmatmul.msk.bf16.gmra.mxu0 %vm1521_vm12, %v3025_v14  ;;  %v2507_v55 = vpop.f32.mrf.mxu3  ;;  %v1873_v60 = vpop.f32.mrf.mxu1  ;;  %v10538_v14 = vld [vmem:[#allocation2 + $0x6c] sm:$0xff]  ;;  %v12361_v15 = vmov 0   ;;  %v3000_v4 = vunpack.c.l.b16 %v2759_v52  ;;  %v10546_v38 = vrot.slane %v4119_v58, 5 }
 0x188   : > { %5485 = vst.msk [vmem:[#allocation2 + $0x70] sm:$0x1] %vm5481_vm15, %v12361_v15  ;;  %v2776_v15 = vrot.slane %v2774_v21, 5  ;;  %v10549_v52 = vrot.slane %v2780_v47, 5  ;;  %v4131_v30 = vrot.slane %v4129_v56, 5  ;;  %vm5752_vm15 = vcmask 1045509  }
 0x189   : > { %v10531_v8 = vadd.f32 %v2507_v55, %v2262_v11  ;;  %v3001_v11 = vunpack.c.l.b16 %v2769_v33  ;;  %v3325_v55 = vrot.slane %v3323_v63, 4  ;;  %v4126_v5 = vor.u32 %v4125_v25, %v10546_v38 }
 0x18a   : > { %8719 = vmatmul.msk.bf16.gmra.mxu1 %vm1521_vm12, %v3424_v43  ;;  %v2786_v43 = vrot.slane %v2784_v9, 4  ;;  %v2777_v21 = vor.u32 %v2776_v15, %v2773_v27  ;;  %v2790_v9 = vshll.u32 %v2577_v23, 16  ;;  %v3400_v25 = vunpack.c.l.b16 %v3324_v0  ;;  %v3918_v15 = vld [vmem:[#allocation2 + $0x7c] sm:$0xf] }
 0x18b   : > { %12360 = vst [vmem:[#allocation24_spill] sm:$0xff] %v10531_v8  ;;  %v3026_v10 = vpack.c.b16 %v3001_v11, %v3000_v4  ;;  %v4127_v13 = vrot.slane %v4126_v5, 4 }
 0x18c   : > { %v1650_v59 = vpop.f32.mrf.mxu0  ;;  %v2787_v47 = vor.u32 %v2786_v43, %v10549_v52  ;;  %v2778_v4 = vrot.slane %v2777_v21, 4  ;;  %v2792_v27 = vrot.slane %v2790_v9, 5  ;;  %v2795_v43 = vshrl.u32 %v2578_v41, 16  ;;  %v2580_v9 = vld [vmem:[#allocation2 + $0x74] sm:$0x1] }
 0x18d   : > { %v1871_v22 = vadd.f32 %v10506_v42, %v1650_v59  ;;  %v3327_v42 = vsel %vm9572_vm10, %v3325_v55, %v3326_v32  ;;  %v3917_v55 = vld [vmem:[#allocation2 + $0x78] sm:$0xf]  ;;  %v4132_v56 = vsel %vm9629_vm7, %v4127_v13, %v4131_v30 }
 0x18e   : > { %v2223_v8 = vpop.f32.mrf.mxu2  ;;  %v3401_v59 = vunpack.c.l.b16 %v3327_v42  ;;  %v2788_v11 = vrot.slane %v2787_v47, 4  ;;  %v4137_v42 = vshll.u32 %v3917_v55, 16  ;;  %v2783_v21 = vsel %vm9629_vm7, %v2778_v4, %v10549_v52 }
 0x18f   : > { %v2263_v58 = vadd.f32 %v2223_v8, %v1871_v22  ;;  %v2509_v33 = vpop.f32.mrf.mxu3  ;;  %v1875_v34 = vpop.f32.mrf.mxu1  ;;  %v4117_v8 = vrot.slane %v4116_v35, 4  ;;  %v5546_v23 = vld [vmem:[#allocation2 + $0x70] sm:$0x1]  ;;  %v3330_v22 = vrot.slane %v10541_v53, 5 }
 0x190   : > { %v5547_v5 = vsel %vm9669_vm13, 0, %v5546_v23  ;;  %v2793_v47 = vsel %vm9629_vm7, %v2788_v11, %v2792_v27  ;;  %v4139_v4 = vrot.slane %v4137_v42, 5  ;;  %vm11060_vm13 = vmand %vm5479_vm11, %vm510_vm5  ;;  %vm12294_vm5 = vcmask 124928  }
 0x191   : > { %v10556_v61 = vadd.f32 %v2509_v33, %v2263_v58  ;;  %v4122_v35 = vsel %vm9629_vm7, %v4117_v8, %v10546_v38  ;;  %v2798_v58 = vshll.u32 %v2578_v41, 16  ;;  %v4134_v33 = vshrl.u32 %v3917_v55, 16  ;;  %v3216_v38 = vld [vmem:[#allocation2 + $0x6c] sm:$0xe]  ;;  %5548 = vst [vmem:[#allocation2 + $0x70] sm:$0x1] %v5547_v5 }
 0x192   : > { %v2804_v8 = vshll.u32 %v10541_v53, 16  ;;  %v4341_v13 = vunpack.c.l.b16 %v4122_v35  ;;  %v8704_v30 = vrot.slane %v3216_v38, 9  ;;  %v2797_v41 = vrot.slane %v2795_v43, 4  ;;  %v3919_v35 = vld [vmem:[#allocation2 + $0x80] sm:$0x1] }
 0x193   : > { %8800 = vmatmul.msk.bf16.gmra.mxu2 %vm1521_vm12, %v9234_v46  ;;  %v2800_v55 = vrot.slane %v2798_v58, 5  ;;  %v2810_v53 = vrot.slane %v2808_v39, 4  ;;  %v2814_v38 = vshll.u32 %v2580_v9, 16 }
 0x194   : > { %v1653_v29 = vpop.f32.mrf.mxu0  ;;  %8817 = vmatmul.msk.bf16.gmra.mxu3 %vm1521_vm12, %v4365_v20  ;;  %v4147_v20 = vshrl.u32 %v3918_v15, 16  ;;  %v10582_v23 = vrot.slane %v2804_v8, 5  ;;  %v3331_v5 = vsel %vm9572_vm10, %v8704_v30, %v3330_v22  ;;  %v2581_v30 = vld [vmem:[#allocation2 + $0x78] sm:$0xf] }
 0x195   : > { %v1874_v63 = vadd.f32 %v1873_v60, %v1653_v29  ;;  %v3425_v60 = vpack.c.b16 %v3401_v59, %v3400_v25  ;;  %v3332_v25 = vrot.slane %v3330_v22, 4  ;;  %v3333_v59 = vrot.slane %v2580_v9, 5  ;;  %v3921_v9 = vld [vmem:[#allocation2 + $0x88] sm:$0xf] }
 0x196   : > { %v2226_v32 = vpop.f32.mrf.mxu2  ;;  %v4149_v11 = vrot.slane %v4147_v20, 4  ;;  %v2811_v8 = vor.u32 %v2810_v53, %v10582_v23  ;;  %v2822_v53 = vshll.u32 %v2581_v30, 16 }
 0x197   : > { %v2264_v46 = vadd.f32 %v2226_v32, %v1874_v63  ;;  %8686 = vmatmul.msk.bf16.gmra.mxu0 %vm1521_vm12, %v3026_v10  ;;  %v2512_v45 = vpop.f32.mrf.mxu3  ;;  %v1878_v44 = vpop.f32.mrf.mxu1  ;;  %v4143_v10 = vshll.u32 %v3918_v15, 16  ;;  %v4342_v63 = vunpack.c.l.b16 %v4132_v56  ;;  %v4136_v32 = vrot.slane %v4134_v33, 4 }
 0x198   : > { %v3334_v56 = vsel %vm9572_vm10, %v3332_v25, %v3333_v59  ;;  %v2801_v33 = vor.u32 %v2800_v55, %v2797_v41  ;;  %v2816_v59 = vrot.slane %v2814_v38, 5 }
 0x199   : > { %v10570_v0 = vadd.f32 %v2512_v45, %v2264_v46  ;;  %v10580_v15 = vrot.slane %v4143_v10, 5  ;;  %v3002_v46 = vunpack.c.l.b16 %v2783_v21  ;;  %v3003_v45 = vunpack.c.l.b16 %v2793_v47 }
 0x19a   : > { %8720 = vmatmul.msk.bf16.gmra.mxu1 %vm1521_vm12, %v3425_v60  ;;  %v4140_v10 = vor.u32 %v4139_v4, %v4136_v32  ;;  %v4153_v21 = vshll.u32 %v3919_v35, 16  ;;  %v3402_v47 = vunpack.c.l.b16 %v3331_v5  ;;  %v3403_v39 = vunpack.c.l.b16 %v3334_v56 }
 0x19b   : > { %v4150_v20 = vor.u32 %v4149_v11, %v10580_v15  ;;  %v3027_v22 = vpack.c.b16 %v3003_v45, %v3002_v46  ;;  %v2812_v4 = vrot.slane %v2811_v8, 4  ;;  %v4167_v45 = vshll.u32 %v3921_v9, 16 }
 0x19c   : > { %v1655_v29 = vpop.f32.mrf.mxu0  ;;  %v4141_v41 = vrot.slane %v4140_v10, 4  ;;  %v4155_v32 = vrot.slane %v4153_v21, 5  ;;  %v3426_v11 = vpack.c.b16 %v3403_v39, %v3402_v47  ;;  %v2824_v8 = vrot.slane %v2822_v53, 5 }
 0x19d   : > { %v1876_v52 = vadd.f32 %v1875_v34, %v1655_v29  ;;  %v4366_v34 = vpack.c.b16 %v4342_v63, %v4341_v13  ;;  %v2802_v13 = vrot.slane %v2801_v33, 4  ;;  %v3920_v29 = vld [vmem:[#allocation2 + $0x84] sm:$0xf]  ;;  %v4151_v55 = vrot.slane %v4150_v20, 4  ;;  %v3217_v20 = vld [vmem:[#allocation2 + $0x78] sm:$0xe] }
 0x19e   : > { %v2228_v27 = vpop.f32.mrf.mxu2  ;;  %v4158_v46 = vshrl.u32 %v3920_v29, 16  ;;  %v4146_v38 = vsel %vm9629_vm7, %v4141_v41, %v10580_v15 }
 0x19f   : > { %v2265_v60 = vadd.f32 %v2228_v27, %v1876_v52  ;;  %v2514_v43 = vpop.f32.mrf.mxu3  ;;  %v1880_v58 = vpop.f32.mrf.mxu1  ;;  %v2819_v27 = vshrl.u32 %v2581_v30, 16  ;;  %v2807_v33 = vsel %vm9629_vm7, %v2802_v13, %v10582_v23  ;;  %v4156_v10 = vsel %vm9629_vm7, %v4151_v55, %v4155_v32  ;;  %v2583_v30 = vld [vmem:[#allocation2 + $0x80] sm:$0x1] }
 0x1a0   : > { %v10611_v13 = vrot.slane %v4167_v45, 5  ;;  %v3340_v41 = vrot.slane %v2583_v30, 5  ;;  %v4343_v32 = vunpack.c.l.b16 %v4146_v38 }
 0x1a1   : > { %v10588_v42 = vadd.f32 %v2514_v43, %v2265_v60  ;;  %v4161_v60 = vshll.u32 %v3920_v29, 16  ;;  %v2821_v21 = vrot.slane %v2819_v27, 4  ;;  %v3922_v27 = vld [vmem:[#allocation2 + $0x8c] sm:$0x1] }
 0x1a3   : > { %8801 = vmatmul.msk.bf16.gmra.mxu2 %vm1521_vm12, %v10538_v14  ;;  %v2582_v14 = vld [vmem:[#allocation2 + $0x7c] sm:$0xf]  ;;  %v4163_v23 = vrot.slane %v4161_v60, 5 }
 0x1a4   : > { %v1658_v25 = vpop.f32.mrf.mxu0  ;;  %8818 = vmatmul.msk.bf16.gmra.mxu3 %vm1521_vm12, %v4366_v34  ;;  %v3337_v43 = vrot.slane %v2582_v14, 5  ;;  %v2828_v47 = vshll.u32 %v2582_v14, 16  ;;  %v2832_v39 = vshrl.u32 %v2582_v14, 16 }
 0x1a5   : > { %v1879_v63 = vadd.f32 %v1878_v44, %v1658_v25  ;;  %v4171_v44 = vshrl.u32 %v3921_v9, 16  ;;  %v4160_v25 = vrot.slane %v4158_v46, 4  ;;  %v8705_v9 = vrot.slane %v3217_v20, 9 }
 0x1a6   : > { %v2231_v52 = vpop.f32.mrf.mxu2  ;;  %v10613_v14 = vrot.slane %v2828_v47, 5  ;;  %v3004_v46 = vunpack.c.l.b16 %v2807_v33  ;;  %v4177_v20 = vshll.u32 %v3922_v27, 16 }
 0x1a7   : > { %v2266_v35 = vadd.f32 %v2231_v52, %v1879_v63  ;;  %8687 = vmatmul.msk.bf16.gmra.mxu0 %vm1521_vm12, %v3027_v22  ;;  %v2517_v5 = vpop.f32.mrf.mxu3  ;;  %v10596_v56 = vpop.f32.mrf.mxu1  ;;  %v2817_v22 = vsel %vm9629_vm7, %v2812_v4, %v2816_v59  ;;  %v4173_v15 = vrot.slane %v4171_v44, 4  ;;  %v3339_v63 = vrot.slane %v3337_v43, 4 }
 0x1a8   : > { %v4344_v52 = vunpack.c.l.b16 %v4156_v10  ;;  %v2834_v59 = vrot.slane %v2832_v39, 4  ;;  %v3005_v60 = vunpack.c.l.b16 %v2817_v22  ;;  %v4164_v45 = vor.u32 %v4163_v23, %v4160_v25 }
 0x1a9   : > { %v10598_v34 = vadd.f32 %v2517_v5, %v2266_v35  ;;  %v2825_v35 = vor.u32 %v2824_v8, %v2821_v21  ;;  %v4174_v44 = vor.u32 %v4173_v15, %v10611_v13  ;;  %v3341_v38 = vsel %vm9572_vm10, %v3339_v63, %v3340_v41  ;;  %v2584_v41 = vld [vmem:[#allocation2 + $0x84] sm:$0xf] }
 0x1aa   : > { %8721 = vmatmul.msk.bf16.gmra.mxu1 %vm1521_vm12, %v3426_v11  ;;  %v9236_v11 = vld [vmem:[#allocation2 + $0x78] sm:$0xff]  ;;  %v4367_v21 = vpack.c.b16 %v4344_v52, %v4343_v32  ;;  %v2838_v8 = vshll.u32 %v2583_v30, 16  ;;  %v2835_v33 = vor.u32 %v2834_v59, %v10613_v14  ;;  %v3028_v39 = vpack.c.b16 %v3005_v60, %v3004_v46  ;;  %v2585_v30 = vld [vmem:[#allocation2 + $0x88] sm:$0xf] }
 0x1ab   : > { %12362 = vst [vmem:[#allocation25_spill] sm:$0xff] %v10598_v34  ;;  %v2826_v47 = vrot.slane %v2825_v35, 4  ;;  %v4165_v22 = vrot.slane %v4164_v45, 4  ;;  %v3405_v23 = vunpack.c.l.b16 %v3341_v38  ;;  %v3344_v46 = vrot.slane %v2585_v30, 5 }
 0x1ac   : > { %v1660_v29 = vpop.f32.mrf.mxu0  ;;  %v2840_v63 = vrot.slane %v2838_v8, 5  ;;  %v2836_v27 = vrot.slane %v2835_v33, 4  ;;  %v2856_v38 = vshrl.u32 %v2585_v30, 16 }
 0x1ad   : > { %v1881_v55 = vadd.f32 %v1880_v58, %v1660_v29  ;;  %v3338_v58 = vsel %vm9572_vm10, %v8705_v9, %v3337_v43  ;;  %v3923_v29 = vld [vmem:[#allocation2 + $0x90] sm:$0xf]  ;;  %v4179_v43 = vrot.slane %v4177_v20, 5  ;;  %v2831_v52 = vsel %vm9629_vm7, %v2826_v47, %v10613_v14  ;;  %v3218_v20 = vld [vmem:[#allocation2 + $0x84] sm:$0xe] }
 0x1ae   : > { %v2233_v53 = vpop.f32.mrf.mxu2  ;;  %v3404_v25 = vunpack.c.l.b16 %v3338_v58  ;;  %v4182_v35 = vshrl.u32 %v3923_v29, 16  ;;  %v4185_v59 = vshll.u32 %v3923_v29, 16  ;;  %v2846_v14 = vshll.u32 %v2584_v41, 16 }
 0x1af   : > { %v2267_v4 = vadd.f32 %v2233_v53, %v1881_v55  ;;  %v2519_v5 = vpop.f32.mrf.mxu3  ;;  %v10615_v34 = vpop.f32.mrf.mxu1  ;;  %v4175_v55 = vrot.slane %v4174_v44, 4  ;;  %v3924_v53 = vld [vmem:[#allocation2 + $0x94] sm:$0xf]  ;;  %v2852_v44 = vshll.u32 %v2585_v30, 16  ;;  %v2841_v47 = vsel %vm9629_vm7, %v2836_v27, %v2840_v63 }
 0x1b0   : > { %v3346_v29 = vrot.slane %v3344_v46, 4  ;;  %v2858_v63 = vrot.slane %v2856_v38, 4 }
 0x1b1   : > { %v10622_v10 = vadd.f32 %v2519_v5, %v2267_v4  ;;  %v4180_v45 = vsel %vm9629_vm7, %v4175_v55, %v4179_v43  ;;  %v2843_v5 = vshrl.u32 %v2584_v41, 16  ;;  %v2848_v41 = vrot.slane %v2846_v14, 5 }
 0x1b2   : > { %v4346_v43 = vunpack.c.l.b16 %v4180_v45  ;;  %v10643_v30 = vrot.slane %v2852_v44, 5 }
 0x1b3   : > { %8802 = vmatmul.msk.bf16.gmra.mxu2 %vm1521_vm12, %v9236_v11  ;;  %v3427_v11 = vpack.c.b16 %v3405_v23, %v3404_v25  ;;  %v8706_v23 = vrot.slane %v3218_v20, 9  ;;  %v3007_v20 = vunpack.c.l.b16 %v2841_v47  ;;  %v2587_v47 = vld [vmem:[#allocation2 + $0x90] sm:$0xf] }
 0x1b4   : > { %v3096_v15 = vpop.f32.mrf.mxu0  ;;  %8819 = vmatmul.msk.bf16.gmra.mxu3 %vm1521_vm12, %v4367_v21  ;;  %v4191_v21 = vshll.u32 %v3924_v53, 16 }
 0x1b5   : > { %v3176_v9 = vadd.f32 %v3096_v15, %v9957_v48  ;;  %v4170_v48 = vsel %vm9629_vm7, %v4165_v22, %v10611_v13  ;;  %v2586_v13 = vld [vmem:[#allocation2 + $0x8c] sm:$0x1]  ;;  %v4187_v22 = vrot.slane %v4185_v59, 5  ;;  %v3006_v59 = vunpack.c.l.b16 %v2831_v52 }
 0x1b6   : > { %v3781_v32 = vpop.f32.mrf.mxu2  ;;  %v4345_v33 = vunpack.c.l.b16 %v4170_v48  ;;  %v3347_v15 = vrot.slane %v2586_v13, 5  ;;  %v4193_v27 = vrot.slane %v4191_v21, 5  ;;  %v3345_v45 = vsel %vm9572_vm10, %v8706_v23, %v3344_v46 }
 0x1b7   : > { %v3574_v4 = vadd.f32 %v10596_v56, %v3176_v9  ;;  %8688 = vmatmul.msk.bf16.gmra.mxu0 %vm1521_vm12, %v3028_v39  ;;  %v4435_v60 = vpop.f32.mrf.mxu3  ;;  %v4195_v56 = vshrl.u32 %v3924_v53, 16  ;;  %v3499_v8 = vpop.f32.mrf.mxu1  ;;  %v4184_v39 = vrot.slane %v4182_v35, 4  ;;  %v2845_v9 = vrot.slane %v2843_v5, 4 }
 0x1b8   : > { %v3348_v5 = vsel %vm9572_vm10, %v3346_v29, %v3347_v15  ;;  %v4368_v44 = vpack.c.b16 %v4346_v43, %v4345_v33  ;;  %v2859_v21 = vor.u32 %v2858_v63, %v10643_v30  ;;  %v3029_v46 = vpack.c.b16 %v3007_v20, %v3006_v59  ;;  %v2588_v43 = vld [vmem:[#allocation2 + $0x94] sm:$0xf] }
 0x1b9   : > { %v3861_v58 = vadd.f32 %v3781_v32, %v3574_v4  ;;  %v4197_v53 = vrot.slane %v4195_v56, 4  ;;  %v3925_v4 = vld [vmem:[#allocation2 + $0x98] sm:$0x1]  ;;  %v4188_v48 = vor.u32 %v4187_v22, %v4184_v39  ;;  %v3406_v22 = vunpack.c.l.b16 %v3345_v45 }
 0x1ba   : > { %8722 = vmatmul.msk.bf16.gmra.mxu1 %vm1521_vm12, %v3427_v11  ;;  %v4201_v56 = vshll.u32 %v3925_v4, 16  ;;  %v2867_v59 = vshrl.u32 %v2587_v47, 16  ;;  %v2876_v20 = vshll.u32 %v2588_v43, 16  ;;  %v2880_v45 = vshrl.u32 %v2588_v43, 16 }
 0x1bb   : > { %v10640_v25 = vadd.f32 %v4435_v60, %v3861_v58  ;;  %v9237_v60 = vld [vmem:[#allocation2 + $0x84] sm:$0xff]  ;;  %v2862_v58 = vshll.u32 %v2586_v13, 16  ;;  %v4198_v52 = vor.u32 %v4197_v53, %v4193_v27  ;;  %v4189_v39 = vrot.slane %v4188_v48, 4  ;;  %v3926_v13 = vld [vmem:[#allocation2 + $0x9c] sm:$0xf] }
 0x1bc   : > { %v3098_v55 = vpop.f32.mrf.mxu0  ;;  %v4203_v63 = vrot.slane %v4201_v56, 5  ;;  %v2870_v48 = vshll.u32 %v2587_v47, 16  ;;  %v2882_v47 = vrot.slane %v2880_v45, 4 }
 0x1bd   : > { %v3177_v32 = vadd.f32 %v3098_v55, %v9982_v26  ;;  %v2849_v26 = vor.u32 %v2848_v41, %v2845_v9  ;;  %v2864_v33 = vrot.slane %v2862_v58, 5  ;;  %v2860_v41 = vrot.slane %v2859_v21, 4 }
 0x1be   : > { %v3783_v35 = vpop.f32.mrf.mxu2 }
 0x1bf   : > { %v3575_v11 = vadd.f32 %v10615_v34, %v3177_v32  ;;  %v4437_v14 = vpop.f32.mrf.mxu3  ;;  %v3407_v34 = vunpack.c.l.b16 %v3348_v5  ;;  %v3501_v29 = vpop.f32.mrf.mxu1  ;;  %v2850_v15 = vrot.slane %v2849_v26, 4  ;;  %v4199_v32 = vrot.slane %v4198_v52, 4  ;;  %v3219_v52 = vld [vmem:[#allocation2 + $0x90] sm:$0xe] }
 0x1c0   : > { %v4206_v5 = vshrl.u32 %v3926_v13, 16  ;;  %v3351_v26 = vrot.slane %v2588_v43, 5  ;;  %v8707_v43 = vrot.slane %v3219_v52, 9 }
 0x1c1   : > { %v3862_v38 = vadd.f32 %v3783_v35, %v3575_v11  ;;  %v4194_v35 = vsel %vm9629_vm7, %v4189_v39, %v4193_v27  ;;  %v3428_v4 = vpack.c.b16 %v3407_v34, %v3406_v22  ;;  %v3927_v11 = vld [vmem:[#allocation2 + $0xa0] sm:$0xf]  ;;  %v2865_v27 = vsel %vm9629_vm7, %v2860_v41, %v2864_v33 }
 0x1c2   : > { %v4219_v21 = vshrl.u32 %v3927_v11, 16  ;;  %v4347_v56 = vunpack.c.l.b16 %v4194_v35  ;;  %v2869_v39 = vrot.slane %v2867_v59, 4  ;;  %v2872_v22 = vrot.slane %v2870_v48, 5 }
 0x1c3   : > { %v10652_v55 = vadd.f32 %v4437_v14, %v3862_v38  ;;  %8803 = vmatmul.msk.bf16.gmra.mxu2 %vm1521_vm12, %v9237_v60  ;;  %v2855_v14 = vsel %vm9629_vm7, %v2850_v15, %v10643_v30  ;;  %v4215_v38 = vshll.u32 %v3927_v11, 16  ;;  %v2589_v30 = vld [vmem:[#allocation2 + $0x98] sm:$0x1]  ;;  %v3928_v11 = vld [vmem:[#allocation2 + $0xa4] sm:$0x1] }
 0x1c4   : > { %v3101_v23 = vpop.f32.mrf.mxu0  ;;  %8820 = vmatmul.msk.bf16.gmra.mxu3 %vm1521_vm12, %v4368_v44  ;;  %v4209_v44 = vshll.u32 %v3926_v13, 16  ;;  %v3353_v13 = vrot.slane %v3351_v26, 4  ;;  %v3008_v48 = vunpack.c.l.b16 %v2855_v14  ;;  %v2873_v45 = vor.u32 %v2872_v22, %v2869_v39 }
 0x1c5   : > { %v3178_v9 = vadd.f32 %v3101_v23, %v10005_v7  ;;  %v4208_v23 = vrot.slane %v4206_v5, 4 }
 0x1c6   : > { %v3786_v53 = vpop.f32.mrf.mxu2  ;;  %v4211_v33 = vrot.slane %v4209_v44, 5  ;;  %v2886_v44 = vshll.u32 %v2589_v30, 16  ;;  %v2874_v39 = vrot.slane %v2873_v45, 4 }
 0x1c7   : > { %v3576_v60 = vadd.f32 %v3499_v8, %v3178_v9  ;;  %8689 = vmatmul.msk.bf16.gmra.mxu0 %vm1521_vm12, %v3029_v46  ;;  %v4440_v7 = vpop.f32.mrf.mxu3  ;;  %v4204_v8 = vsel %vm9629_vm7, %v4199_v32, %v4203_v63  ;;  %v10670_v46 = vrot.slane %v2876_v20, 5  ;;  %v3354_v9 = vrot.slane %v2589_v30, 5  ;;  %v3504_v59 = vpop.f32.mrf.mxu1  ;;  %v9238_v20 = vld [vmem:[#allocation2 + $0x90] sm:$0xff] }
 0x1c8   : > { %v4348_v32 = vunpack.c.l.b16 %v4204_v8  ;;  %v10673_v63 = vrot.slane %v4215_v38, 5 }
 0x1c9   : > { %v3863_v58 = vadd.f32 %v3786_v53, %v3576_v60  ;;  %v4221_v53 = vrot.slane %v4219_v21, 4  ;;  %v2883_v5 = vor.u32 %v2882_v47, %v10670_v46  ;;  %v3355_v38 = vsel %vm9572_vm10, %v3353_v13, %v3354_v9  ;;  %v3929_v47 = vld [vmem:[#allocation2 + $0xa8] sm:$0xf]  ;;  %v2590_v9 = vld [vmem:[#allocation2 + $0x9c] sm:$0xf] }
 0x1ca   : > { %8723 = vmatmul.msk.bf16.gmra.mxu1 %vm1521_vm12, %v3428_v4  ;;  %v3009_v4 = vunpack.c.l.b16 %v2865_v27  ;;  %v4369_v52 = vpack.c.b16 %v4348_v32, %v4347_v56  ;;  %v4225_v27 = vshll.u32 %v3928_v11, 16  ;;  %v3409_v30 = vunpack.c.l.b16 %v3355_v38  ;;  %v2591_v32 = vld [vmem:[#allocation2 + $0xa0] sm:$0xf] }
 0x1cb   : > { %v10667_v34 = vadd.f32 %v4440_v7, %v3863_v58  ;;  %v4212_v58 = vor.u32 %v4211_v33, %v4208_v23  ;;  %v4222_v14 = vor.u32 %v4221_v53, %v10673_v63  ;;  %v4230_v53 = vshrl.u32 %v3929_v47, 16 }
 0x1cc   : > { %v3103_v15 = vpop.f32.mrf.mxu0  ;;  %v3030_v8 = vpack.c.b16 %v3009_v4, %v3008_v48  ;;  %v4227_v13 = vrot.slane %v4225_v27, 5  ;;  %v2879_v4 = vsel %vm9629_vm7, %v2874_v39, %v10670_v46  ;;  %v2900_v46 = vshll.u32 %v2591_v32, 16 }
 0x1cd   : > { %v3179_v41 = vadd.f32 %v3103_v15, %v10029_v54  ;;  %v3352_v54 = vsel %vm9572_vm10, %v8707_v43, %v3351_v26  ;;  %v2884_v15 = vrot.slane %v2883_v5, 4  ;;  %v2888_v26 = vrot.slane %v2886_v44, 5 }
 0x1ce   : > { %v3788_v35 = vpop.f32.mrf.mxu2  ;;  %v3408_v22 = vunpack.c.l.b16 %v3352_v54  ;;  %v4213_v33 = vrot.slane %v4212_v58, 4  ;;  %v4223_v56 = vrot.slane %v4222_v14, 4  ;;  %v2891_v44 = vshrl.u32 %v2590_v9, 16  ;;  %v3220_v58 = vld [vmem:[#allocation2 + $0x9c] sm:$0xe] }
 0x1cf   : > { %v3577_v60 = vadd.f32 %v3501_v29, %v3179_v41  ;;  %v4442_v7 = vpop.f32.mrf.mxu3  ;;  %v3506_v45 = vpop.f32.mrf.mxu1  ;;  %v2889_v5 = vsel %vm9629_vm7, %v2884_v15, %v2888_v26  ;;  %v4232_v14 = vrot.slane %v4230_v53, 4  ;;  %v3931_v53 = vld [vmem:[#allocation2 + $0xb0] sm:$0x1] }
 0x1d0   : > { %v3429_v11 = vpack.c.b16 %v3409_v30, %v3408_v22  ;;  %v4228_v38 = vsel %vm9629_vm7, %v4223_v56, %v4227_v13  ;;  %v8708_v30 = vrot.slane %v3220_v58, 9  ;;  %v10701_v13 = vrot.slane %v2900_v46, 5 }
 0x1d1   : > { %v3864_v21 = vadd.f32 %v3788_v35, %v3577_v60  ;;  %v4233_v35 = vshll.u32 %v3929_v47, 16  ;;  %v3930_v60 = vld [vmem:[#allocation2 + $0xac] sm:$0xf]  ;;  %v4350_v26 = vunpack.c.l.b16 %v4228_v38  ;;  %v3011_v58 = vunpack.c.l.b16 %v2889_v5 }
 0x1d2   : > { %v4243_v39 = vshrl.u32 %v3930_v60, 16 }
 0x1d3   : > { %v10681_v29 = vadd.f32 %v4442_v7, %v3864_v21  ;;  %8804 = vmatmul.msk.bf16.gmra.mxu2 %vm1521_vm12, %v9238_v20  ;;  %v3358_v20 = vrot.slane %v2591_v32, 5  ;;  %v4218_v7 = vsel %vm9629_vm7, %v4213_v33, %v10673_v63  ;;  %v2904_v21 = vshrl.u32 %v2591_v32, 16 }
 0x1d4   : > { %v3106_v23 = vpop.f32.mrf.mxu0  ;;  %8821 = vmatmul.msk.bf16.gmra.mxu3 %vm1521_vm12, %v4369_v52  ;;  %v2592_v52 = vld [vmem:[#allocation2 + $0xa4] sm:$0x1]  ;;  %v4235_v27 = vrot.slane %v4233_v35, 5  ;;  %v4349_v15 = vunpack.c.l.b16 %v4218_v7  ;;  %v2893_v33 = vrot.slane %v2891_v44, 4  ;;  %v3010_v32 = vunpack.c.l.b16 %v2879_v4 }
 0x1d5   : > { %v3180_v43 = vadd.f32 %v3106_v23, %v10049_v36  ;;  %v3360_v63 = vrot.slane %v3358_v20, 4  ;;  %v3361_v47 = vrot.slane %v2592_v52, 5  ;;  %v3359_v7 = vsel %vm9572_vm10, %v8708_v30, %v3358_v20  ;;  %v560_v30 = vld [vmem:[#allocation2 + $0xc8] sm:$0x1] }
 0x1d6   : > { %v3791_v41 = vpop.f32.mrf.mxu2  ;;  %v4236_v35 = vor.u32 %v4235_v27, %v4232_v14  ;;  %v2910_v4 = vshll.u32 %v2592_v52, 16  ;;  %v3031_v20 = vpack.c.b16 %v3011_v58, %v3010_v32  ;;  %v2594_v32 = vld [vmem:[#allocation2 + $0xac] sm:$0xf] }
 0x1d7   : > { %v3578_v48 = vadd.f32 %v3504_v59, %v3180_v43  ;;  %8690 = vmatmul.msk.bf16.gmra.mxu0 %vm1521_vm12, %v3030_v8  ;;  %v4445_v36 = vpop.f32.mrf.mxu3  ;;  %v2894_v59 = vshll.u32 %v2590_v9, 16  ;;  %v4239_v8 = vshll.u32 %v3930_v60, 16  ;;  %v2906_v9 = vrot.slane %v2904_v21, 4  ;;  %v3509_v14 = vpop.f32.mrf.mxu1 }
 0x1d8   : > { %v4245_v60 = vrot.slane %v4243_v39, 4  ;;  %v3362_v44 = vsel %vm9572_vm10, %v3360_v63, %v3361_v47  ;;  %v4249_v21 = vshll.u32 %v3931_v53, 16  ;;  %v4237_v27 = vrot.slane %v4236_v35, 4  ;;  %v2593_v35 = vld [vmem:[#allocation2 + $0xa8] sm:$0xf] }
 0x1d9   : > { %v3865_v54 = vadd.f32 %v3791_v41, %v3578_v48  ;;  %v2896_v43 = vrot.slane %v2894_v59, 5  ;;  %v4241_v48 = vrot.slane %v4239_v8, 5  ;;  %v2907_v46 = vor.u32 %v2906_v9, %v10701_v13 }
 0x1da   : > { %8724 = vmatmul.msk.bf16.gmra.mxu1 %vm1521_vm12, %v3429_v11  ;;  %v3411_v39 = vunpack.c.l.b16 %v3362_v44 }
 0x1db   : > { %v10697_v22 = vadd.f32 %v4445_v36, %v3865_v54  ;;  %v9239_v36 = vld [vmem:[#allocation2 + $0x9c] sm:$0xff]  ;;  %v2897_v54 = vor.u32 %v2896_v43, %v2893_v33  ;;  %v4246_v8 = vor.u32 %v4245_v60, %v4241_v48  ;;  %v2908_v52 = vrot.slane %v2907_v46, 4 }
 0x1dc   : > { %v3108_v23 = vpop.f32.mrf.mxu0  ;;  %v2912_v33 = vrot.slane %v2910_v4, 5  ;;  %v4251_v43 = vrot.slane %v4249_v21, 5  ;;  %v4242_v9 = vsel %vm9629_vm7, %v4237_v27, %v4241_v48  ;;  %v561_v60 = vsel %vm9565_vm9, 0, %v560_v30  ;;  %v3221_v21 = vld [vmem:[#allocation2 + $0xa8] sm:$0xe] }
 0x1dd   : > { %v3181_v56 = vadd.f32 %v3108_v23, %v10075_v17  ;;  %v4370_v17 = vpack.c.b16 %v4350_v26, %v4349_v15  ;;  %v2898_v47 = vrot.slane %v2897_v54, 4  ;;  %v3932_v23 = vld [vmem:[#allocation2 + $0xb4] sm:$0xf]  ;;  %v3933_v15 = vld [vmem:[#allocation2 + $0xb8] sm:$0xf]  ;;  %v2915_v46 = vshrl.u32 %v2593_v35, 16 }
 0x1de   : > { %v3793_v41 = vpop.f32.mrf.mxu2  ;;  %v4263_v58 = vshll.u32 %v3933_v15, 16  ;;  %562 = vst [vmem:[#allocation2 + $0xc8] sm:$0x1] %v561_v60  ;;  %v2918_v4 = vshll.u32 %v2593_v35, 16  ;;  %v4351_v27 = vunpack.c.l.b16 %v4242_v9 }
 0x1df   : > { %v3579_v11 = vadd.f32 %v3506_v45, %v3181_v56  ;;  %v4447_v59 = vpop.f32.mrf.mxu3  ;;  %v3410_v45 = vunpack.c.l.b16 %v3359_v7  ;;  %v871_v7 = vrot.slane %v10140_v24, 4  ;;  %v2903_v48 = vsel %vm9629_vm7, %v2898_v47, %v10701_v13  ;;  %v2595_v13 = vld [vmem:[#allocation2 + $0xb0] sm:$0x1]  ;;  %v3511_v47 = vpop.f32.mrf.mxu1 }
 0x1e0   : > { %v2928_v24 = vshrl.u32 %v2594_v32, 16  ;;  %v10729_v30 = vrot.slane %v4263_v58, 5  ;;  %v2917_v9 = vrot.slane %v2915_v46, 4 }
 0x1e1   : > { %v3866_v38 = vadd.f32 %v3793_v41, %v3579_v11  ;;  %v4247_v41 = vrot.slane %v4246_v8, 4  ;;  %v3430_v53 = vpack.c.b16 %v3411_v39, %v3410_v45  ;;  %v2924_v8 = vshll.u32 %v2594_v32, 16 }
 0x1e2   : > { %v2930_v60 = vrot.slane %v2928_v24, 4  ;;  %v2934_v24 = vshll.u32 %v2595_v13, 16 }
 0x1e3   : > { %v10708_v5 = vadd.f32 %v4447_v59, %v3866_v38  ;;  %8805 = vmatmul.msk.bf16.gmra.mxu2 %vm1521_vm12, %v9239_v36  ;;  %v4257_v36 = vshll.u32 %v3932_v23, 16  ;;  %v4267_v59 = vshrl.u32 %v3933_v15, 16  ;;  %v2913_v38 = vsel %vm9629_vm7, %v2908_v52, %v2912_v33 }
 0x1e4   : > { %v3111_v63 = vpop.f32.mrf.mxu0  ;;  %8822 = vmatmul.msk.bf16.gmra.mxu3 %vm1521_vm12, %v4370_v17  ;;  %v3365_v17 = vrot.slane %v2594_v32, 5  ;;  %v3368_v33 = vrot.slane %v2595_v13, 5  ;;  %v3012_v32 = vunpack.c.l.b16 %v2903_v48  ;;  %v3013_v58 = vunpack.c.l.b16 %v2913_v38  ;;  %v2596_v13 = vld [vmem:[#allocation2 + $0xb4] sm:$0xf] }
 0x1e5   : > { %v3182_v26 = vadd.f32 %v3111_v63, %v10096_v2  ;;  %v4254_v2 = vshrl.u32 %v3932_v23, 16  ;;  %v3934_v23 = vld [vmem:[#allocation2 + $0xbc] sm:$0x1]  ;;  %v4269_v15 = vrot.slane %v4267_v59, 4  ;;  %v2942_v6 = vshll.u32 %v2596_v13, 16 }
 0x1e6   : > { %v3796_v56 = vpop.f32.mrf.mxu2  ;;  %v3367_v52 = vrot.slane %v3365_v17, 4 }
 0x1e7   : > { %v3580_v11 = vadd.f32 %v3509_v14, %v3182_v26  ;;  %8691 = vmatmul.msk.bf16.gmra.mxu0 %vm1521_vm12, %v3031_v20  ;;  %v4450_v44 = vpop.f32.mrf.mxu3  ;;  %v4252_v14 = vsel %vm9629_vm7, %v4247_v41, %v4251_v43  ;;  %v4256_v39 = vrot.slane %v4254_v2, 4  ;;  %v4259_v20 = vrot.slane %v4257_v36, 5  ;;  %v9240_v36 = vld [vmem:[#allocation2 + $0xa8] sm:$0xff] }
 0x1e8   : > { %v8709_v26 = vrot.slane %v3221_v21, 9  ;;  %v2920_v41 = vrot.slane %v2918_v4, 5  ;;  %v3369_v48 = vsel %vm9572_vm10, %v3367_v52, %v3368_v33  ;;  %v563_v52 = vld [vmem:[#allocation2 + $0xd4] sm:$0x1] }
 0x1e9   : > { %v3867_v54 = vadd.f32 %v3796_v56, %v3580_v11  ;;  %v4352_v56 = vunpack.c.l.b16 %v4252_v14  ;;  %v1032_v11 = vld [vmem:[#allocation2 + $0xc8] sm:$0x1]  ;;  %v4260_v21 = vor.u32 %v4259_v20, %v4256_v39  ;;  %v3413_v20 = vunpack.c.l.b16 %v3369_v48 }
 0x1ea   : > { %8725 = vmatmul.msk.bf16.gmra.mxu1 %vm1521_vm12, %v3430_v53  ;;  %v10732_v53 = vrot.slane %v2924_v8, 5  ;;  %v1033_v59 = vsel %vm9542_vm4, %v871_v7, %v1032_v11  ;;  %v3366_v46 = vsel %vm9572_vm10, %v8709_v26, %v3365_v17  ;;  %v2921_v8 = vor.u32 %v2920_v41, %v2917_v9  ;;  %v3935_v9 = vld [vmem:[#allocation2 + $0xc0] sm:$0xf]  ;;  %v3936_v11 = vld [vmem:[#allocation2 + $0xc4] sm:$0xf] }
 0x1eb   : > { %v10726_v45 = vadd.f32 %v4450_v44, %v3867_v54  ;;  %v4273_v44 = vshll.u32 %v3934_v23, 16  ;;  %1034 = vst [vmem:[#allocation2 + $0xc8] sm:$0x1] %v1033_v59  ;;  %v4371_v14 = vpack.c.b16 %v4352_v56, %v4351_v27  ;;  %v3032_v7 = vpack.c.b16 %v3013_v58, %v3012_v32  ;;  %v3222_v59 = vld [vmem:[#allocation2 + $0xb4] sm:$0xe] }
 0x1ec   : > { %v3113_v63 = vpop.f32.mrf.mxu0  ;;  %v2931_v38 = vor.u32 %v2930_v60, %v10732_v53  ;;  %v3412_v39 = vunpack.c.l.b16 %v3366_v46  ;;  %v4261_v17 = vrot.slane %v4260_v21, 4  ;;  %v2922_v27 = vrot.slane %v2921_v8, 4  ;;  %v2597_v60 = vld [vmem:[#allocation2 + $0xb8] sm:$0xf] }
 0x1ed   : > { %v3183_v43 = vadd.f32 %v3113_v63, %v10122_v51  ;;  %v4270_v51 = vor.u32 %v4269_v15, %v10729_v30  ;;  %v4275_v26 = vrot.slane %v4273_v44, 5  ;;  %v2936_v56 = vrot.slane %v2934_v24, 5 }
 0x1ee   : > { %v3798_v35 = vpop.f32.mrf.mxu2  ;;  %v3431_v32 = vpack.c.b16 %v3413_v20, %v3412_v39  ;;  %v3372_v58 = vrot.slane %v2597_v60, 5  ;;  %v4278_v44 = vshrl.u32 %v3935_v9, 16  ;;  %v4281_v12 = vshll.u32 %v3935_v9, 16 }
 0x1ef   : > { %v3581_v2 = vadd.f32 %v3511_v47, %v3183_v43  ;;  %v4452_v54 = vpop.f32.mrf.mxu3  ;;  %v507_v47 = vld [vmem:[#allocation2 + $0xcc] sm:$0x1]  ;;  %v4271_v15 = vrot.slane %v4270_v51, 4  ;;  %v2932_v43 = vrot.slane %v2931_v38, 4  ;;  %v4287_v51 = vshll.u32 %v3936_v11, 16 }
 0x1f0   : > { %v508_v41 = vsel %vm9542_vm4, 0, %v507_v47  ;;  %v4291_v46 = vshrl.u32 %v3936_v11, 16  ;;  %v2952_v8 = vshrl.u32 %v2597_v60, 16  ;;  %v3374_v39 = vrot.slane %v3372_v58, 4 }
 0x1f1   : > { %v3868_v4 = vadd.f32 %v3798_v35, %v3581_v2  ;;  %v564_v35 = vsel %vm9565_vm9, 0, %v563_v52  ;;  %509 = vst [vmem:[#allocation2 + $0xcc] sm:$0x1] %v508_v41  ;;  %v4276_v2 = vsel %vm9629_vm7, %v4271_v15, %v4275_v26  ;;  %v2937_v21 = vsel %vm9629_vm7, %v2932_v43, %v2936_v56 }
 0x1f2   : > { %565 = vst [vmem:[#allocation2 + $0xd4] sm:$0x1] %v564_v35  ;;  %v4354_v48 = vunpack.c.l.b16 %v4276_v2  ;;  %v3015_v26 = vunpack.c.l.b16 %v2937_v21  ;;  %v4289_v52 = vrot.slane %v4287_v51, 5  ;;  %v2954_v56 = vrot.slane %v2952_v8, 4  ;;  %v3937_v9 = vld [vmem:[#allocation2 + $0xc8] sm:$0x1] }
 0x1f3   : > { %v10742_v63 = vadd.f32 %v4452_v54, %v3868_v4  ;;  %8806 = vmatmul.msk.bf16.gmra.mxu2 %vm1521_vm12, %v9240_v36  ;;  %v2939_v36 = vshrl.u32 %v2596_v13, 16  ;;  %v2927_v54 = vsel %vm9629_vm7, %v2922_v27, %v10732_v53  ;;  %v2598_v4 = vld [vmem:[#allocation2 + $0xbc] sm:$0x1]  ;;  %v2944_v53 = vrot.slane %v2942_v6, 5  ;;  %v9241_v13 = vld [vmem:[#allocation2 + $0xb4] sm:$0xff] }
 0x1f4   : > { %v3116_v23 = vpop.f32.mrf.mxu0  ;;  %8823 = vmatmul.msk.bf16.gmra.mxu3 %vm1521_vm12, %v4371_v14  ;;  %v2948_v14 = vshll.u32 %v2597_v60, 16  ;;  %v3375_v20 = vrot.slane %v2598_v4, 5  ;;  %v3014_v15 = vunpack.c.l.b16 %v2927_v54  ;;  %v4293_v27 = vrot.slane %v4291_v46, 4 }
 0x1f5   : > { %v10746_v33 = vadd.f32 %v3116_v23, %v10142_v40  ;;  %v4266_v40 = vsel %vm9629_vm7, %v4261_v17, %v10729_v30  ;;  %v2941_v24 = vrot.slane %v2939_v36, 4  ;;  %v4280_v23 = vrot.slane %v4278_v44, 4 }
 0x1f6   : > { %v4353_v30 = vunpack.c.l.b16 %v4266_v40  ;;  %v4283_v17 = vrot.slane %v4281_v12, 5  ;;  %v2950_v43 = vrot.slane %v2948_v14, 5  ;;  %v3376_v35 = vsel %vm9572_vm10, %v3374_v39, %v3375_v20 }
 0x1f7   : > { %8692 = vmatmul.msk.bf16.gmra.mxu0 %vm1521_vm12, %v3032_v7  ;;  %v8710_v7 = vrot.slane %v3222_v59, 9  ;;  %v3033_v11 = vpack.c.b16 %v3015_v26, %v3014_v15  ;;  %v4294_v40 = vor.u32 %v4293_v27, %v4289_v52  ;;  %v4297_v2 = vshll.u32 %v3937_v9, 16 }
 0x1f8   : > { %v4284_v60 = vor.u32 %v4283_v17, %v4280_v23  ;;  %v2955_v36 = vor.u32 %v2954_v56, %v2950_v43  ;;  %v2958_v6 = vshll.u32 %v2598_v4, 16  ;;  %v3415_v12 = vunpack.c.l.b16 %v3376_v35  ;;  %v3938_v4 = vld [vmem:[#allocation2 + $0xcc] sm:$0xf] }
 0x1f9   : > { %v3373_v41 = vsel %vm9572_vm10, %v8710_v7, %v3372_v58  ;;  %v4295_v51 = vrot.slane %v4294_v40, 4  ;;  %v4299_v46 = vrot.slane %v4297_v2, 5  ;;  %v4302_v17 = vshrl.u32 %v3938_v4, 16 }
 0x1fa   : > { %8726 = vmatmul.msk.bf16.gmra.mxu1 %vm1521_vm12, %v3431_v32  ;;  %v4372_v32 = vpack.c.b16 %v4354_v48, %v4353_v30  ;;  %v3414_v44 = vunpack.c.l.b16 %v3373_v41  ;;  %v4285_v21 = vrot.slane %v4284_v60, 4  ;;  %v3939_v30 = vld [vmem:[#allocation2 + $0xd0] sm:$0xf]  ;;  %v2956_v48 = vrot.slane %v2955_v36, 4 }
 0x1fb   : > { %v2960_v14 = vrot.slane %v2958_v6, 5  ;;  %v4311_v20 = vshll.u32 %v3939_v30, 16  ;;  %v4300_v23 = vsel %vm9629_vm7, %v4295_v51, %v4299_v46  ;;  %v4305_v15 = vshll.u32 %v3938_v4, 16  ;;  %v3940_v46 = vld [vmem:[#allocation2 + $0xd4] sm:$0x1] }
 0x1fc   : > { %v3118_v38 = vpop.f32.mrf.mxu0  ;;  %v3432_v8 = vpack.c.b16 %v3415_v12, %v3414_v44  ;;  %v4290_v39 = vsel %vm9629_vm7, %v4285_v21, %v4289_v52  ;;  %v4315_v26 = vshrl.u32 %v3939_v30, 16  ;;  %v4356_v40 = vunpack.c.l.b16 %v4300_v23  ;;  %v9242_v12 = vld [vmem:[#allocation2 + $0xc0] sm:$0xff] }
 0x1fd   : > { %v10766_v47 = vadd.f32 %v3118_v38, %v10157_v49  ;;  %v2945_v49 = vor.u32 %v2944_v53, %v2941_v24  ;;  %v2600_v38 = vld [vmem:[#allocation2 + $0xc4] sm:$0xf]  ;;  %v2599_v24 = vld [vmem:[#allocation2 + $0xc0] sm:$0xf]  ;;  %v2961_v27 = vsel %vm9629_vm7, %v2956_v48, %v2960_v14  ;;  %v4304_v2 = vrot.slane %v4302_v17, 4 }
 0x1fe   : > { %v3379_v7 = vrot.slane %v2600_v38, 5  ;;  %v3223_v53 = vld [vmem:[#allocation2 + $0xc0] sm:$0xe]  ;;  %v2963_v56 = vshrl.u32 %v2599_v24, 16  ;;  %v2966_v9 = vshll.u32 %v2599_v24, 16  ;;  %v2976_v35 = vshrl.u32 %v2600_v38, 16 }
 0x1ff   : > { %v2946_v58 = vrot.slane %v2945_v49, 4  ;;  %v8711_v52 = vrot.slane %v3223_v53, 9  ;;  %v4307_v36 = vrot.slane %v4305_v15, 5  ;;  %v4313_v6 = vrot.slane %v4311_v20, 5 }
 0x200   : > { %v4317_v44 = vrot.slane %v4315_v26, 4  ;;  %v2965_v21 = vrot.slane %v2963_v56, 4  ;;  %v2968_v51 = vrot.slane %v2966_v9, 5  ;;  %v2978_v48 = vrot.slane %v2976_v35, 4 }
 0x201   : > { %v3380_v14 = vsel %vm9572_vm10, %v8711_v52, %v3379_v7  ;;  %v4321_v24 = vshll.u32 %v3940_v46, 16  ;;  %v4547_v46 = vld [vmem:[#allocation2 + $0x18] sm:$0xe]  ;;  %vm5743_vm4 = vcmask 1042434   ;;  %vm12302_vm9 = vcmask 1043459  }
 0x202   : > { %v4318_v4 = vor.u32 %v4317_v44, %v4313_v6  ;;  %v2969_v23 = vor.u32 %v2968_v51, %v2965_v21  ;;  %v4613_v21 = vrot.slane %v10192_v57, 5 }
 0x203   : > { %8807 = vmatmul.msk.bf16.gmra.mxu2 %vm1521_vm12, %v9241_v13  ;;  %v2601_v13 = vld [vmem:[#allocation2 + $0xc8] sm:$0x1]  ;;  %v4323_v56 = vrot.slane %v4321_v24, 5 }
 0x204   : > { %v3121_v59 = vpop.f32.mrf.mxu0  ;;  %8824 = vmatmul.msk.bf16.gmra.mxu3 %vm1521_vm12, %v4372_v32  ;;  %v3381_v32 = vrot.slane %v3379_v7, 4  ;;  %v3382_v49 = vrot.slane %v2601_v13, 5  ;;  %v2982_v15 = vshll.u32 %v2601_v13, 16 }
 0x205   : > { %v10774_v54 = vadd.f32 %v3121_v59, %v10166_v37  ;;  %v2951_v37 = vsel %vm9629_vm7, %v2946_v58, %v2950_v43  ;;  %v2972_v43 = vshll.u32 %v2600_v38, 16  ;;  %v3017_v58 = vunpack.c.l.b16 %v2961_v27 }
 0x206   : > { %v3016_v59 = vunpack.c.l.b16 %v2951_v37  ;;  %v4308_v38 = vor.u32 %v4307_v36, %v4304_v2  ;;  %v3416_v37 = vunpack.c.l.b16 %v3380_v14  ;;  %v4319_v27 = vrot.slane %v4318_v4, 4  ;;  %v9243_v36 = vld [vmem:[#allocation2 + $0xcc] sm:$0xff] }
 0x207   : > { %8693 = vmatmul.msk.bf16.gmra.mxu0 %vm1521_vm12, %v3033_v11  ;;  %v4355_v11 = vunpack.c.l.b16 %v4290_v39  ;;  %v2974_v30 = vrot.slane %v2972_v43, 5  ;;  %v2970_v43 = vrot.slane %v2969_v23, 4  ;;  %v2984_v35 = vrot.slane %v2982_v15, 5  ;;  %v9320_v15 = vld [vmem:[#allocation2 + $0x2c] sm:$0x1] }
 0x208   : > { %v3034_v39 = vpack.c.b16 %v3017_v58, %v3016_v59  ;;  %v4309_v7 = vrot.slane %v4308_v38, 4  ;;  %v4324_v13 = vsel %vm9629_vm7, %v4319_v27, %v4323_v56  ;;  %v4615_v14 = vrot.slane %v4613_v21, 4 }
 0x209   : > { %v2979_v17 = vor.u32 %v2978_v48, %v2974_v30  ;;  %v4358_v2 = vunpack.c.l.b16 %v4324_v13  ;;  %v8827_v48 = vrot.slane %v4547_v46, 9 }
 0x20a   : > { %8727 = vmatmul.msk.bf16.gmra.mxu1 %vm1521_vm12, %v3432_v8  ;;  %v4373_v8 = vpack.c.b16 %v4356_v40, %v4355_v11  ;;  %v4314_v52 = vsel %vm9629_vm7, %v4309_v7, %v4313_v6  ;;  %v4623_v7 = vrot.slane %v9320_v15, 5  ;;  %v12375_v15 = vld [vmem:[#allocation16_spill] sm:$0xff] }
 0x20b   : > { %v4357_v40 = vunpack.c.l.b16 %v4314_v52  ;;  %v12367_v52 = vld [vmem:[#allocation9_spill] sm:$0xff] }
 0x20c   : > { %v3123_v41 = vpop.f32.mrf.mxu0  ;;  %v4627_v13 = vrot.slane %v12367_v52, 5  ;;  %v4551_v52 = vld [vmem:[#allocation2 + $0x48] sm:$0xe] }
 0x20d   : > { %v10788_v60 = vadd.f32 %v3123_v41, %v10185_v3  ;;  %v3383_v3 = vsel %vm9572_vm10, %v3381_v32, %v3382_v49  ;;  %v2980_v41 = vrot.slane %v2979_v17, 4  ;;  %v2975_v32 = vsel %vm9629_vm7, %v2970_v43, %v2974_v30 }
 0x20e   : > { %v3417_v20 = vunpack.c.l.b16 %v3383_v3  ;;  %v3018_v44 = vunpack.c.l.b16 %v2975_v32 }
 0x20f   : > { %v2985_v49 = vsel %vm9629_vm7, %v2980_v41, %v2984_v35 }
 0x210   : > { %v3433_v9 = vpack.c.b16 %v3417_v20, %v3416_v37  ;;  %v3019_v6 = vunpack.c.l.b16 %v2985_v49  ;;  %v4620_v37 = vrot.slane %v10241_v1, 5  ;;  %v4549_v49 = vld [vmem:[#allocation2 + $0x30] sm:$0xe] }
 0x212   : > { %v3035_v59 = vpack.c.b16 %v3019_v6, %v3018_v44  ;;  %v4622_v17 = vrot.slane %v4620_v37, 4 }
 0x213   : > { %8808 = vmatmul.msk.bf16.gmra.mxu2 %vm1521_vm12, %v9242_v12  ;;  %v4374_v12 = vpack.c.b16 %v4358_v2, %v4357_v40  ;;  %v8829_v40 = vrot.slane %v4549_v49, 9  ;;  %v4629_v2 = vrot.slane %v4627_v13, 4  ;;  %v9323_v49 = vld [vmem:[#allocation2 + $0x50] sm:$0x1] }
 0x214   : > { %v3126_v53 = vpop.f32.mrf.mxu0  ;;  %8825 = vmatmul.msk.bf16.gmra.mxu3 %vm1521_vm12, %v4373_v8  ;;  %v4614_v8 = vsel %vm9572_vm10, %v8827_v48, %v4613_v21  ;;  %v4624_v56 = vsel %vm9572_vm10, %v4622_v17, %v4623_v7 }
 0x215   : > { %v10796_v26 = vadd.f32 %v3126_v53, %v10216_v31  ;;  %v4548_v53 = vld [vmem:[#allocation2 + $0x24] sm:$0xe] }
 0x216   : > { %v8828_v23 = vrot.slane %v4548_v53, 9 }
 0x217   : > { %8694 = vmatmul.msk.bf16.gmra.mxu0 %vm1521_vm12, %v3034_v39 }
 0x21a   : > { %8728 = vmatmul.msk.bf16.gmra.mxu1 %vm1521_vm12, %v3433_v9  ;;  %v12365_v9 = vld [vmem:[#allocation10_spill] sm:$0xff] }
 0x21c   : > { %v3128_v31 = vpop.f32.mrf.mxu0 }
 0x21d   : > { %v10810_v11 = vadd.f32 %v3128_v31, %v10239_v62  ;;  %v9319_v62 = vld [vmem:[#allocation2 + $0x20] sm:$0x1]  ;;  %v12368_v31 = vld [vmem:[#allocation12_spill] sm:$0xff] }
 0x21e   : > { %v4616_v30 = vrot.slane %v9319_v62, 5 }
 0x220   : > { %v4617_v38 = vsel %vm9572_vm10, %v4615_v14, %v4616_v30  ;;  %v12372_v14 = vld [vmem:[#allocation11_spill] sm:$0xff] }
 0x221   : > { %v4726_v4 = vunpack.c.l.b16 %v4617_v38 }
 0x223   : > { %8809 = vmatmul.msk.bf16.gmra.mxu2 %vm1521_vm12, %v9243_v36  ;;  %v9321_v36 = vld [vmem:[#allocation2 + $0x38] sm:$0x1] }
 0x224   : > { %v3131_v58 = vpop.f32.mrf.mxu0  ;;  %8826 = vmatmul.msk.bf16.gmra.mxu3 %vm1521_vm12, %v4374_v12  ;;  %v4630_v44 = vrot.slane %v9321_v36, 5  ;;  %v4628_v12 = vsel %vm9572_vm10, %v8829_v40, %v4627_v13  ;;  %v8831_v13 = vrot.slane %v4551_v52, 9  ;;  %v4644_v40 = vrot.slane %v9323_v49, 5 }
 0x225   : > { %v10815_v51 = vadd.f32 %v3131_v58, %v10267_v28  ;;  %v4725_v28 = vunpack.c.l.b16 %v4614_v8  ;;  %v12370_v58 = vld [vmem:[#allocation13_spill] sm:$0xff]  ;;  %v4729_v46 = vunpack.c.l.b16 %v4628_v12  ;;  %v12373_v8 = vld [vmem:[#allocation15_spill] sm:$0xff] }
 0x227   : > { %8695 = vmatmul.msk.bf16.gmra.mxu0 %vm1521_vm12, %v3035_v59  ;;  %v4757_v24 = vpack.c.b16 %v4726_v4, %v4725_v28  ;;  %v4631_v59 = vsel %vm9572_vm10, %v4629_v2, %v4630_v44  ;;  %v4550_v28 = vld [vmem:[#allocation2 + $0x3c] sm:$0xe]  ;;  %v5941_v2 = vld [vmem:[%s12273_s4] sm:$0xf]  ;;  %v8957_v44 = vld [vmem:[%s12273_s4 + $0x8] sm:$0xf] }
 0x228   : > { %v4730_v62 = vunpack.c.l.b16 %v4631_v59  ;;  %v8830_v4 = vrot.slane %v4550_v28, 9  ;;  %v6155_v36 = vsel %vm12295_vm1, %v5941_v2, 0  ;;  %v12388_v2 = vld [vmem:[#allocation20_spill] sm:$0xff] }
 0x229   : > { %6164 = vmatpush.bf16.msra.mxu2 %v6155_v36  ;;  %v4655_v36 = vrot.slane %v12388_v2, 5  ;;  %v10926_v2 = vpop.f32.mrf.mxu2 }
 0x22a   : > { %v4759_v30 = vpack.c.b16 %v4730_v62, %v4729_v46  ;;  %v12380_v46 = vld [vmem:[#allocation19_spill] sm:$0xff] }
 0x22c   : > { %v3133_v3 = vpop.f32.mrf.mxu0 }
 0x22d   : > { %v10824_v57 = vadd.f32 %v3133_v3, %v10288_v19  ;;  %v4621_v19 = vsel %vm9572_vm10, %v8828_v23, %v4620_v37  ;;  %v4634_v3 = vrot.slane %v12372_v14, 5 }
 0x22e   : > { %v4727_v1 = vunpack.c.l.b16 %v4621_v19 }
 0x22f   : > { %12363 = vst [vmem:[#allocation26_spill] sm:$0xff] %v10824_v57  ;;  %v4635_v23 = vsel %vm9572_vm10, %v8830_v4, %v4634_v3  ;;  %v12382_v4 = vld [vmem:[#allocation17_spill] sm:$0xff] }
 0x234   : > { %v3136_v39 = vpop.f32.mrf.mxu0 }
 0x235   : > { %v10828_v20 = vadd.f32 %v3136_v39, %v10308_v50  ;;  %v4728_v50 = vunpack.c.l.b16 %v4624_v56  ;;  %v9322_v39 = vld [vmem:[#allocation2 + $0x44] sm:$0x1] }
 0x236   : > { %v4637_v37 = vrot.slane %v9322_v39, 5  ;;  %v12383_v39 = vld [vmem:[#allocation21_spill] sm:$0xff] }
 0x237   : > { %12364 = vst [vmem:[#allocation27_spill] sm:$0xff] %v10828_v20  ;;  %8844 = vmatmul.msk.bf16.vlgmr.msra.gmra.mxu0 %vm1521_vm12, %v4757_v24  ;;  %v4758_v41 = vpack.c.b16 %v4728_v50, %v4727_v1  ;;  %v4636_v24 = vrot.slane %v4634_v3, 4  ;;  %v12377_v1 = vld [vmem:[#allocation14_spill] sm:$0xff] }
 0x238   : > { %v4641_v50 = vrot.slane %v12377_v1, 5  ;;  %v12385_v1 = vld [vmem:[#allocation22_spill] sm:$0xff] }
 0x239   : > { %v4638_v17 = vsel %vm9572_vm10, %v4636_v24, %v4637_v37  ;;  %v4648_v24 = vrot.slane %v12382_v4, 5 }
 0x23a   : > { %v4732_v19 = vunpack.c.l.b16 %v4638_v17  ;;  %v4642_v12 = vsel %vm9572_vm10, %v8831_v13, %v4641_v50  ;;  %v4554_v13 = vld [vmem:[#allocation2 + $0x6c] sm:$0xe] }
 0x23b   : > { %v4733_v14 = vunpack.c.l.b16 %v4642_v12  ;;  %v4650_v17 = vrot.slane %v4648_v24, 4  ;;  %v4553_v12 = vld [vmem:[#allocation2 + $0x60] sm:$0xe] }
 0x23c   : > { %v3138_v27 = vpop.f32.mrf.mxu0 }
 0x23d   : > { %v10836_v43 = vadd.f32 %v3138_v27, %v12365_v9  ;;  %v4731_v27 = vunpack.c.l.b16 %v4635_v23 }
 0x23f   : > { %12366 = vst [vmem:[#allocation10_spill] sm:$0xff] %v10836_v43  ;;  %v4760_v56 = vpack.c.b16 %v4732_v19, %v4731_v27 }
 0x244   : > { %v3141_v35 = vpop.f32.mrf.mxu0 }
 0x245   : > { %v10840_v32 = vadd.f32 %v3141_v35, %v12368_v31  ;;  %v4643_v31 = vrot.slane %v4641_v50, 4 }
 0x247   : > { %12369 = vst [vmem:[#allocation9_spill] sm:$0xff] %v10840_v32  ;;  %8845 = vmatmul.msk.bf16.gmra.mxu0 %vm1521_vm12, %v4758_v41  ;;  %v12378_v41 = vld [vmem:[#allocation18_spill] sm:$0xff]  ;;  %v4645_v59 = vsel %vm9572_vm10, %v4643_v31, %v4644_v40  ;;  %v12387_v31 = vmov 0  }
 0x248   : > { %v4734_v3 = vunpack.c.l.b16 %v4645_v59  ;;  %5484 = vst.msk [vmem:[#allocation2 + $0x6c] sm:$0xf] %vm5479_vm11, %v12387_v31  ;;  %v8833_v59 = vrot.slane %v4553_v12, 9  ;;  %v12395_v12 = vld [vmem:[#allocation25_spill] sm:$0xff]  ;;  %vm6076_vm11 = vcmask 64512  }
 0x24c   : > { %v3143_v6 = vpop.f32.mrf.mxu0 }
 0x24d   : > { %v10848_v21 = vadd.f32 %v3143_v6, %v12370_v58  ;;  %v6269_v58 = vsel %vm12295_vm1, %v8957_v44, 0  ;;  %v12389_v44 = vld [vmem:[#allocation24_spill] sm:$0xff] }
 0x24e   : > { %6278 = vmatpush.bf16.msra.mxu3 %v6269_v58  ;;  %v4657_v58 = vrot.slane %v4655_v36, 4 }
 0x24f   : > { %12371 = vst [vmem:[#allocation12_spill] sm:$0xff] %v10848_v21 }
 0x254   : > { %v3146_v48 = vpop.f32.mrf.mxu0 }
 0x255   : > { %v10852_v38 = vadd.f32 %v3146_v48, %v12373_v8  ;;  %v4761_v8 = vpack.c.b16 %v4734_v3, %v4733_v14  ;;  %v4656_v14 = vsel %vm9572_vm10, %v8833_v59, %v4655_v36  ;;  %v9327_v36 = vld [vmem:[#allocation2 + $0x7c] sm:$0xf] }
 0x257   : > { %12374 = vst [vmem:[#allocation13_spill] sm:$0xff] %v10852_v38  ;;  %8846 = vmatmul.msk.bf16.gmra.mxu0 %vm1521_vm12, %v4759_v30  ;;  %v8924_v30 = vld [vmem:[%s12273_s4 + $0x4] sm:$0xf] }
 0x258   : > { %v6091_v48 = vsel %vm12295_vm1, %v8924_v30, 0  ;;  %vm7270_vm1 = vcmask 124930  }
 0x259   : > { %6100 = vmatpush.bf16.msra.mxu1 %v6091_v48 }
 0x25c   : > { %v3148_v53 = vpop.f32.mrf.mxu0 }
 0x25d   : > { %v10860_v7 = vadd.f32 %v3148_v53, %v12375_v15  ;;  %v4552_v53 = vld [vmem:[#allocation2 + $0x54] sm:$0xe]  ;;  %v9324_v15 = vld [vmem:[#allocation2 + $0x5c] sm:$0x1] }
 0x25e   : > { %v8832_v23 = vrot.slane %v4552_v53, 9  ;;  %v4651_v27 = vrot.slane %v9324_v15, 5  ;;  %v12392_v53 = vld [vmem:[#allocation23_spill] sm:$0xff]  ;;  %v8834_v15 = vrot.slane %v4554_v13, 9 }
 0x25f   : > { %12376 = vst [vmem:[#allocation11_spill] sm:$0xff] %v10860_v7 }
 0x264   : > { %v3151_v9 = vpop.f32.mrf.mxu0 }
 0x265   : > { %v10864_v35 = vadd.f32 %v3151_v9, %v12378_v41  ;;  %v4652_v9 = vsel %vm9572_vm10, %v4650_v17, %v4651_v27 }
 0x266   : > { %v4736_v52 = vunpack.c.l.b16 %v4652_v9 }
 0x267   : > { %12379 = vst [vmem:[#allocation15_spill] sm:$0xff] %v10864_v35  ;;  %8847 = vmatmul.msk.bf16.gmra.mxu0 %vm1521_vm12, %v4760_v56  ;;  %v4649_v56 = vsel %vm9572_vm10, %v8832_v23, %v4648_v24  ;;  %v4662_v23 = vrot.slane %v12392_v53, 5  ;;  %v10941_v53 = vpop.f32.mrf.mxu2 }
 0x268   : > { %v4735_v41 = vunpack.c.l.b16 %v4649_v56 }
 0x269   : > { %v4664_v27 = vrot.slane %v4662_v23, 4 }
 0x26a   : > { %v4762_v49 = vpack.c.b16 %v4736_v52, %v4735_v41 }
 0x26c   : > { %v3153_v6 = vpop.f32.mrf.mxu0 }
 0x26d   : > { %v10880_v62 = vadd.f32 %v3153_v6, %v12380_v46  ;;  %v9325_v46 = vld [vmem:[#allocation2 + $0x68] sm:$0x1] }
 0x26e   : > { %v4658_v30 = vrot.slane %v9325_v46, 5  ;;  %v10931_v46 = vpop.f32.mrf.mxu3 }
 0x26f   : > { %12381 = vst [vmem:[#allocation16_spill] sm:$0xff] %v10880_v62 }
 0x270   : > { %v4659_v3 = vsel %vm9572_vm10, %v4657_v58, %v4658_v30  ;;  %v4555_v58 = vld [vmem:[#allocation2 + $0x78] sm:$0xe] }
 0x271   : > { %v4738_v4 = vunpack.c.l.b16 %v4659_v3 }
 0x274   : > { %v3156_v28 = vpop.f32.mrf.mxu0 }
 0x275   : > { %v10888_v37 = vadd.f32 %v3156_v28, %v12383_v39  ;;  %v4737_v28 = vunpack.c.l.b16 %v4656_v14 }
 0x277   : > { %12384 = vst [vmem:[#allocation14_spill] sm:$0xff] %v10888_v37  ;;  %8848 = vmatmul.msk.bf16.gmra.mxu0 %vm1521_vm12, %v4761_v8  ;;  %v4763_v24 = vpack.c.b16 %v4738_v4, %v4737_v28 }
 0x27c   : > { %v3158_v19 = vpop.f32.mrf.mxu0 }
 0x27d   : > { %v10896_v50 = vadd.f32 %v3158_v19, %v12385_v1  ;;  %v9326_v19 = vld [vmem:[#allocation2 + $0x74] sm:$0x1] }
 0x27e   : > { %v4665_v56 = vrot.slane %v9326_v19, 5 }
 0x27f   : > { %12386 = vst [vmem:[#allocation18_spill] sm:$0xff] %v10896_v50 }
 0x280   : > { %v4666_v1 = vsel %vm9572_vm10, %v4664_v27, %v4665_v56  ;;  %v10943_v27 = vpop.f32.mrf.mxu3 }
 0x284   : > { %v3161_v40 = vpop.f32.mrf.mxu0 }
 0x285   : > { %v10902_v6 = vadd.f32 %v3161_v40, %v12389_v44  ;;  %v4669_v44 = vrot.slane %v9327_v36, 5 }
 0x287   : > { %12390 = vst [vmem:[#allocation19_spill] sm:$0xff] %v10902_v6  ;;  %8849 = vmatmul.msk.bf16.gmra.mxu0 %vm1521_vm12, %v4762_v49  ;;  %v4740_v49 = vunpack.c.l.b16 %v4666_v1  ;;  %v4671_v30 = vrot.slane %v4669_v44, 4  ;;  %v4556_v1 = vld [vmem:[#allocation2 + $0x84] sm:$0xe]  ;;  %v9333_v6 = vld [vmem:[#allocation2 + $0xa0] sm:$0xf] }
 0x28c   : > { %v3163_v48 = vpop.f32.mrf.mxu0 }
 0x28d   : > { %v10910_v8 = vadd.f32 %v3163_v48, %v10556_v61  ;;  %v4663_v61 = vsel %vm9572_vm10, %v8834_v15, %v4662_v23  ;;  %v9328_v48 = vld [vmem:[#allocation2 + $0x80] sm:$0x1] }
 0x28e   : > { %v4739_v52 = vunpack.c.l.b16 %v4663_v61  ;;  %v4672_v14 = vrot.slane %v9328_v48, 5 }
 0x28f   : > { %12391 = vst [vmem:[#allocation17_spill] sm:$0xff] %v10910_v8 }
 0x290   : > { %v4764_v40 = vpack.c.b16 %v4740_v49, %v4739_v52  ;;  %v4673_v4 = vsel %vm9572_vm10, %v4671_v30, %v4672_v14  ;;  %v10946_v49 = vpop.f32.mrf.mxu2 }
 0x291   : > { %v4742_v15 = vunpack.c.l.b16 %v4673_v4 }
 0x294   : > { %v3166_v39 = vpop.f32.mrf.mxu0 }
 0x295   : > { %v10914_v17 = vadd.f32 %v3166_v39, %v10570_v0  ;;  %v10924_v0 = vpop.f32.mrf.mxu1 }
 0x297   : > { %12393 = vst [vmem:[#allocation21_spill] sm:$0xff] %v10914_v17  ;;  %8850 = vmatmul.msk.bf16.gmra.mxu0 %vm1521_vm12, %v4763_v24 }
 0x298   : > { %v10962_v4 = vpop.f32.mrf.mxu2 }
 0x29c   : > { %v3168_v9 = vpop.f32.mrf.mxu0 }
 0x29d   : > { %v10922_v41 = vadd.f32 %v3168_v9, %v10588_v42  ;;  %v8835_v42 = vrot.slane %v4555_v58, 9  ;;  %v3516_v24 = vpop.f32.mrf.mxu1  ;;  %v9329_v9 = vld [vmem:[#allocation2 + $0x88] sm:$0xf] }
 0x29e   : > { %v4676_v61 = vrot.slane %v9329_v9, 5 }
 0x29f   : > { %12394 = vst [vmem:[#allocation22_spill] sm:$0xff] %v10922_v41  ;;  %v4670_v28 = vsel %vm9572_vm10, %v8835_v42, %v4669_v44  ;;  %v10948_v44 = vpop.f32.mrf.mxu3 }
 0x2a0   : > { %v4741_v23 = vunpack.c.l.b16 %v4670_v28  ;;  %v10960_v28 = vld [vmem:[%s12271_s2] ss:$0 sm:$0xff] }
 0x2a2   : > { %v4765_v19 = vpack.c.b16 %v4742_v15, %v4741_v23  ;;  %v4557_v23 = vld [vmem:[#allocation2 + $0x90] sm:$0xe] }
 0x2a4   : > { %v3171_v13 = vpop.f32.mrf.mxu0 }
 0x2a5   : > { %v10929_v59 = vadd.f32 %v3171_v13, %v12395_v12  ;;  %v3519_v52 = vpop.f32.mrf.mxu1  ;;  %v4678_v13 = vrot.slane %v4676_v61, 4 }
 0x2a7   : > { %12396 = vst [vmem:[#allocation20_spill] sm:$0xff] %v10929_v59  ;;  %8851 = vmatmul.msk.bf16.gmra.mxu0 %vm1521_vm12, %v4764_v40  ;;  %v8836_v40 = vrot.slane %v4556_v1, 9 }
 0x2a9   : > { %v4677_v58 = vsel %vm9572_vm10, %v8836_v40, %v4676_v61  ;;  %v10964_v61 = vpop.f32.mrf.mxu3  ;;  %v10969_v40 = vld [vmem:[%s12272_s3] ss:$0 sm:$0xff] }
 0x2aa   : > { %v4743_v30 = vunpack.c.l.b16 %v4677_v58  ;;  %v9332_v58 = vld [vmem:[#allocation2 + $0x98] sm:$0x1]  ;;  %v11012_v50 = vrot.slane %v10969_v40, 6 }
 0x2ac   : > { %v3173_v3 = vpop.f32.mrf.mxu0 }
 0x2ad   : > { %v10939_v39 = vadd.f32 %v3173_v3, %v10622_v10  ;;  %v9330_v10 = vld [vmem:[#allocation2 + $0x8c] sm:$0x1]  ;;  %v10954_v14 = vpop.f32.mrf.mxu1 }
 0x2ae   : > { %v4679_v36 = vrot.slane %v9330_v10, 5 }
 0x2af   : > { %12397 = vst [vmem:[#allocation24_spill] sm:$0xff] %v10939_v39 }
 0x2b0   : > { %v4680_v42 = vsel %vm9572_vm10, %v4678_v13, %v4679_v36  ;;  %v8837_v13 = vrot.slane %v4557_v23, 9 }
 0x2b1   : > { %v4744_v48 = vunpack.c.l.b16 %v4680_v42  ;;  %v4686_v42 = vrot.slane %v9332_v58, 5 }
 0x2b3   : > { %v4766_v15 = vpack.c.b16 %v4744_v48, %v4743_v30  ;;  %v10976_v30 = vrot.slane %v10969_v40, 2 }
 0x2b4   : > { %v4833_v56 = vpop.f32.mrf.mxu0 }
 0x2b5   : > { %v4913_v3 = vadd.f32 %v4833_v56, %v10640_v25  ;;  %12398 = vst [vmem:[#allocation23_spill] sm:$0xff] %v10976_v30  ;;  %v10985_v23 = vpop.f32.mrf.mxu1 }
 0x2b7   : > { %8852 = vmatmul.msk.bf16.gmra.mxu0 %vm1521_vm12, %v4765_v19  ;;  %v9331_v19 = vld [vmem:[#allocation2 + $0x94] sm:$0xf]  ;;  %v4949_v25 = vadd.f32 %v10960_v28, %v4913_v3 }
 0x2b8   : > { %v4683_v9 = vrot.slane %v9331_v19, 5 }
 0x2b9   : > { %v4981_v48 = vmax.f32 %v4949_v25, 0.0  ;;  %v10992_v25 = vpop.f32.mrf.mxu2 }
 0x2ba   : > { %v4685_v36 = vrot.slane %v4683_v9, 4  ;;  %v4684_v39 = vsel %vm9572_vm10, %v8837_v13, %v4683_v9 }
 0x2bc   : > { %v4835_v12 = vpop.f32.mrf.mxu0 }
 0x2bd   : > { %v4914_v3 = vadd.f32 %v4835_v12, %v10652_v55  ;;  %v10998_v55 = vrot.slane %v10976_v30, 1 }
 0x2bf   : > { %12399 = vst [vmem:[#allocation25_spill] sm:$0xff] %v10998_v55 }
 0x2c4   : > { %v4838_v1 = vpop.f32.mrf.mxu0 }
 0x2c5   : > { %v4915_v56 = vadd.f32 %v4838_v1, %v10667_v34  ;;  %v10983_v34 = vadd.f32 %v10924_v0, %v10746_v33  ;;  %v4687_v1 = vsel %vm9572_vm10, %v4685_v36, %v4686_v42  ;;  %v4745_v33 = vunpack.c.l.b16 %v4684_v39 }
 0x2c6   : > { %v4950_v36 = vadd.f32 %v10960_v28, %v4914_v3  ;;  %v4746_v42 = vunpack.c.l.b16 %v4687_v1  ;;  %v11008_v39 = vadd.f32 %v3519_v52, %v10774_v54  ;;  %v4690_v3 = vrot.slane %v9333_v6, 5  ;;  %v4558_v1 = vld [vmem:[#allocation2 + $0x9c] sm:$0xe] }
 0x2c7   : > { %v4951_v10 = vadd.f32 %v10960_v28, %v4915_v56  ;;  %8853 = vmatmul.msk.bf16.gmra.mxu0 %vm1521_vm12, %v4766_v15  ;;  %v10990_v56 = vadd.f32 %v3516_v24, %v10766_v47  ;;  %v11005_v24 = vrot.slane %v10969_v40, 4 }
 0x2c8   : > { %v4982_v7 = vmax.f32 %v4950_v36, 0.0  ;;  %v4767_v54 = vpack.c.b16 %v4746_v42, %v4745_v33  ;;  %v4692_v33 = vrot.slane %v4690_v3, 4  ;;  %v11026_v42 = vpop.f32.mrf.mxu2 }
 0x2c9   : > { %v4983_v19 = vmax.f32 %v4951_v10, 0.0  ;;  %v10995_v10 = vrot.slane %v10969_v40, 1  ;;  %12401 = vst [vmem:[#allocation29_spill] sm:$0xff] %v11026_v42 }
 0x2cb   : > { %v5013_v15 = vmax.f32 %v4981_v48, %v4983_v19  ;;  %v11000_v48 = vpop.f32.mrf.mxu3 }
 0x2cc   : > { %v4840_v12 = vpop.f32.mrf.mxu0  ;;  %12400 = vst [vmem:[#allocation28_spill] sm:$0xff] %v11000_v48 }
 0x2cd   : > { %v5045_v0 = vrot.slane %v5013_v15, 2  ;;  %v5046_v9 = vrot.slane %v5013_v15, 4  ;;  %v5047_v13 = vrot.slane %v5013_v15, 6  ;;  %v8860_v58 = vrot.slane %v5013_v15, 9 }
 0x2ce   : > { %v4916_v47 = vadd.f32 %v4840_v12, %v10681_v29 }
 0x2cf   : > { %v8861_v19 = vrot.slane %v5045_v0, 9  ;;  %v8862_v59 = vrot.slane %v5046_v9, 9  ;;  %v8863_v41 = vrot.slane %v5047_v13, 9  ;;  %v5333_v17 = vmax.f32 %v5013_v15, %v8860_v58 }
 0x2d0   : > { %v4952_v8 = vadd.f32 %v10960_v28, %v4916_v47  ;;  %v11016_v15 = vrot.slane %v11005_v24, 1 }
 0x2d1   : > { %v5334_v37 = vmax.f32 %v5045_v0, %v8861_v19  ;;  %v5335_v29 = vmax.f32 %v5046_v9, %v8862_v59  ;;  %v5336_v12 = vmax.f32 %v5047_v13, %v8863_v41  ;;  %v5415_v62 = vadd.f32 %v10969_v40, %v5333_v17  ;;  %v11024_v9 = vpop.f32.mrf.mxu1 }
 0x2d2   : > { %v4984_v35 = vmax.f32 %v4952_v8, 0.0  ;;  %v11022_v41 = vrot.slane %v11012_v50, 1  ;;  %v8838_v0 = vrot.slane %v4558_v1, 9 }
 0x2d3   : > { %v5416_v52 = vadd.f32 %v10995_v10, %v5334_v37  ;;  %v5417_v58 = vadd.f32 %v10976_v30, %v5335_v29  ;;  %v5418_v47 = vadd.f32 %v10998_v55, %v5336_v12  ;;  %v5549_v6 = vpack.c.bf16 %v5415_v62, %v5415_v62  ;;  %v11029_v1 = vpop.f32.mrf.mxu3 }
 0x2d4   : > { %v5014_v59 = vmax.f32 %v4982_v7, %v4984_v35  ;;  %v4843_v17 = vpop.f32.mrf.mxu0  ;;  %v9334_v35 = vld [vmem:[#allocation2 + $0xa4] sm:$0x1]  ;;  %12402 = vst [vmem:[#allocation30_spill] sm:$0xff] %v11029_v1 }
 0x2d5   : > { %v5550_v8 = vpack.c.bf16 %v5416_v52, %v5416_v52  ;;  %v5551_v13 = vpack.c.bf16 %v5417_v58, %v5417_v58  ;;  %v5677_v36 = vunpack.c.l.b16 %v5549_v6  ;;  %v5552_v62 = vpack.c.bf16 %v5418_v47, %v5418_v47 }
 0x2d6   : > { %v5048_v37 = vrot.slane %v5014_v59, 2  ;;  %v5049_v19 = vrot.slane %v5014_v59, 4  ;;  %v5050_v29 = vrot.slane %v5014_v59, 6  ;;  %v8864_v12 = vrot.slane %v5014_v59, 9 }
 0x2d7   : > { %v5678_v38 = vunpack.c.l.b16 %v5550_v8  ;;  %v5679_v7 = vunpack.c.l.b16 %v5551_v13  ;;  %8854 = vmatmul.msk.bf16.gmra.mxu0 %vm1521_vm12, %v4767_v54  ;;  %v4693_v21 = vrot.slane %v9334_v35, 5  ;;  %v5741_v32 = vrot.slane %v5677_v36, 7 }
 0x2d8   : > { %v8865_v43 = vrot.slane %v5048_v37, 9  ;;  %v8866_v52 = vrot.slane %v5049_v19, 9  ;;  %v8867_v58 = vrot.slane %v5050_v29, 9  ;;  %v5337_v6 = vmax.f32 %v5014_v59, %v8864_v12 }
 0x2d9   : > { %v5742_v20 = vrot.slane %v5678_v38, 6  ;;  %v5680_v8 = vunpack.c.l.b16 %v5552_v62  ;;  %v5745_v13 = vrot.slane %v5679_v7, 5  ;;  %v4691_v54 = vsel %vm9572_vm10, %v8838_v0, %v4690_v3 }
 0x2da   : > { %v5338_v57 = vmax.f32 %v5048_v37, %v8865_v43  ;;  %v5339_v42 = vmax.f32 %v5049_v19, %v8866_v52  ;;  %v5340_v48 = vmax.f32 %v5050_v29, %v8867_v58  ;;  %v5419_v47 = vadd.f32 %v11005_v24, %v5337_v6  ;;  %v4559_v37 = vld [vmem:[#allocation2 + $0xa8] sm:$0xe]  ;;  %v9335_v29 = vld [vmem:[#allocation2 + $0xac] sm:$0xf] }
 0x2db   : > { %v4694_v35 = vsel %vm9572_vm10, %v4692_v33, %v4693_v21  ;;  %v5744_v1 = vsel %vm5743_vm4, %v5742_v20, %v5741_v32  ;;  %v4697_v12 = vrot.slane %v9335_v29, 5  ;;  %v4747_v7 = vunpack.c.l.b16 %v4691_v54  ;;  %v11040_v21 = vpop.f32.mrf.mxu1  ;;  %v11046_v29 = vpop.f32.mrf.mxu3 }
 0x2dc   : > { %v5420_v59 = vadd.f32 %v11016_v15, %v5338_v57  ;;  %v5421_v38 = vadd.f32 %v11012_v50, %v5339_v42  ;;  %v5422_v43 = vadd.f32 %v11022_v41, %v5340_v48  ;;  %v4845_v36 = vpop.f32.mrf.mxu0  ;;  %v5553_v19 = vpack.c.bf16 %v5419_v47, %v5419_v47  ;;  %v11043_v42 = vpop.f32.mrf.mxu2 }
 0x2dd   : > { %v5747_v20 = vsel %vm12302_vm9, %v5745_v13, %v5744_v1  ;;  %v4748_v32 = vunpack.c.l.b16 %v4694_v35  ;;  %v8839_v33 = vrot.slane %v4559_v37, 9  ;;  %v5748_v48 = vrot.slane %v5680_v8, 4 }
 0x2de   : > { %v5554_v62 = vpack.c.bf16 %v5420_v59, %v5420_v59  ;;  %v5555_v3 = vpack.c.bf16 %v5421_v38, %v5421_v38  ;;  %v5556_v0 = vpack.c.bf16 %v5422_v43, %v5422_v43  ;;  %v5681_v57 = vunpack.c.l.b16 %v5553_v19  ;;  %v9336_v43 = vld [vmem:[#allocation2 + $0xb0] sm:$0x1] }
 0x2df   : > { %v4917_v59 = vadd.f32 %v4843_v17, %v10697_v22  ;;  %v4699_v38 = vrot.slane %v4697_v12, 4  ;;  %v4700_v54 = vrot.slane %v9336_v43, 5  ;;  %v5750_v1 = vsel %vm12299_vm14, %v5748_v48, %v5747_v20  ;;  %v5885_v17 = vld [vmem:[#allocation2 + $0xc] sm:$0xf] }
 0x2e0   : > { %v5682_v52 = vunpack.c.l.b16 %v5554_v62  ;;  %v5683_v58 = vunpack.c.l.b16 %v5555_v3  ;;  %v5684_v6 = vunpack.c.l.b16 %v5556_v0  ;;  %v5751_v47 = vrot.slane %v5681_v57, 3 }
 0x2e1   : > { %v3585_v8 = vadd.f32 %v10954_v14, %v10788_v60  ;;  %v4918_v62 = vadd.f32 %v4845_v36, %v10708_v5  ;;  %v4768_v3 = vpack.c.b16 %v4748_v32, %v4747_v7  ;;  %v4698_v20 = vsel %vm9572_vm10, %v8839_v33, %v4697_v12  ;;  %v11069_v36 = vld [vmem:[#allocation2 + $0x4] sm:$0x1]  ;;  %v6186_v7 = vld [vmem:[#allocation2] sm:$0xe] }
 0x2e2   : > { %v5754_v13 = vrot.slane %v5682_v52, 2  ;;  %v5757_v35 = vrot.slane %v5683_v58, 1  ;;  %v5852_v37 = vpack.c.b16 %v5684_v6, %v5684_v6  ;;  %v5753_v19 = vsel %vm5752_vm15, %v5751_v47, %v5750_v1 }
 0x2e3   : > { %v4953_v5 = vadd.f32 %v10960_v28, %v4917_v59  ;;  %v3869_v12 = vadd.f32 %v10926_v2, %v10983_v34  ;;  %v3870_v32 = vadd.f32 %v10941_v53, %v10990_v56  ;;  %v3871_v33 = vadd.f32 %v10946_v49, %v11008_v39  ;;  %v11083_v59 = vld [vmem:[#allocation2] sm:$0xf] }
 0x2e4   : > { %v5756_v22 = vsel %vm12297_vm2, %v5754_v13, %v5753_v19  ;;  %v5889_v57 = vsel %vm9651_vm8, %v5852_v37, %v5888_v18  ;;  %v4848_v43 = vpop.f32.mrf.mxu0  ;;  %v4701_v18 = vsel %vm9572_vm10, %v4699_v38, %v4700_v54  ;;  %v3872_v58 = vadd.f32 %v10962_v4, %v3585_v8  ;;  %v11087_v53 = vld [vmem:[#allocation2] sm:$0xf]  ;;  %v11090_v4 = vpop.f32.mrf.mxu1 }
 0x2e5   : > { %v5759_v60 = vsel %vm12296_vm6, %v5757_v35, %v5756_v22  ;;  %5890 = vst [vmem:[#allocation2 + $0x10] sm:$0x1] %v5889_v57  ;;  %v4919_v14 = vadd.f32 %v4848_v43, %v10726_v45  ;;  %v11079_v45 = vadd.f32 %v10960_v28, %v4918_v62  ;;  %v4749_v47 = vunpack.c.l.b16 %v4698_v20  ;;  %v11101_v35 = vpop.f32.mrf.mxu2  ;;  %v11112_v19 = vpop.f32.mrf.mxu3 }
 0x2e6   : > { %v5851_v52 = vpack.c.b16 %v5759_v60, %v5759_v60  ;;  %v4750_v34 = vunpack.c.l.b16 %v4701_v18  ;;  %v8949_v49 = vrot.slane %v6186_v7, 9  ;;  %v6212_v56 = vrot.slane %v11069_v36, 5  ;;  %7247 = vst.msk [vmem:[#allocation2] sm:$0x7] %vm12294_vm5, %v12387_v31 }
 0x2e7   : > { %v4955_v6 = vadd.f32 %v10960_v28, %v4919_v14  ;;  %8855 = vmatmul.msk.bf16.gmra.mxu0 %vm1521_vm12, %v4768_v3  ;;  %v4985_v39 = vmax.f32 %v4953_v5, 0.0  ;;  %v11093_v54 = vadd.f32 %v10931_v46, %v3869_v12  ;;  %v11096_v1 = vadd.f32 %v10943_v27, %v3870_v32 }
 0x2e8   : > { %v5886_v2 = vsel %vm11060_vm13, %v5851_v52, %v5885_v17  ;;  %v11099_v13 = vadd.f32 %v10948_v44, %v3871_v33  ;;  %v11106_v37 = vadd.f32 %v10964_v61, %v3872_v58  ;;  %v11110_v8 = vadd.f32 %v10985_v23, %v10796_v26 }
 0x2e9   : > { %5887 = vst [vmem:[#allocation2 + $0xc] sm:$0xf] %v5886_v2  ;;  %v4987_v38 = vmax.f32 %v4955_v6, 0.0  ;;  %v4986_v27 = vmax.f32 %v11079_v45, 0.0  ;;  %v4769_v62 = vpack.c.b16 %v4750_v34, %v4749_v47  ;;  %v11117_v3 = vsel %vm9572_vm10, %v8949_v49, %v6212_v56 }
 0x2ea   : > { %vm7250_vm5 = vcmask 122880   ;;  %vm7271_vm6 = vsmask.f32 7946  ;;  %v5951_v23 = vshrl.u32 %v11083_v59, 16  ;;  %v12406_v32 = vmov 0 }
 0x2eb   : > { %v5015_v46 = vmax.f32 %v4985_v39, %v4987_v38  ;;  %vm11125_vm2 = vmand %vm7250_vm5, %vm454_vm3  ;;  %v5960_v33 = vshll.u32 %v11069_v36, 16  ;;  %vm7434_vm5 = vsmask.f32 3336 }
 0x2ec   : > { %v4850_v44 = vpop.f32.mrf.mxu0  ;;  %v12407_v32 = vsel %vm11125_vm2, 4294967295, %v12406_v32  ;;  %v11132_v47 = vld [vmem:[#allocation2 + $0x10] sm:$0x1]  ;;  %vm11144_vm3 = vmand %vm7270_vm1, %vm7271_vm6  ;;  %vm12301_vm1 = vcmask 1043458   ;;  %vm7433_vm6 = vsmask.f32 1280 }
 0x2ed   : > { %v5051_v22 = vrot.slane %v5015_v46, 2  ;;  %v5052_v61 = vrot.slane %v5015_v46, 4  ;;  %v5053_v17 = vrot.slane %v5015_v46, 6  ;;  %v8868_v57 = vrot.slane %v5015_v46, 9  ;;  %12408 = vst [vmem:[#allocation8_spill] sm:$0xff] %v12407_v32 }
 0x2ee   : > { %v4920_v26 = vadd.f32 %v4850_v44, %v10742_v63  ;;  %v5954_v63 = vshll.u32 %v11083_v59, 16  ;;  %v7252_v2 = vld [vmem:[#allocation2] sm:$0x1]  ;;  %v7273_v34 = vld [vmem:[#allocation2] sm:$0x4] }
 0x2ef   : > { %v8869_v43 = vrot.slane %v5051_v22, 9  ;;  %v8870_v20 = vrot.slane %v5052_v61, 9  ;;  %v8871_v60 = vrot.slane %v5053_v17, 9  ;;  %v5341_v5 = vmax.f32 %v5015_v46, %v8868_v57  ;;  %v11137_v46 = vpop.f32.mrf.mxu1 }
 0x2f0   : > { %v4956_v14 = vadd.f32 %v10960_v28, %v4920_v26  ;;  %v9244_v18 = vld [vmem:[#allocation2 + $0x8] sm:$0xf0]  ;;  %v7253_v38 = vsel %vm11125_vm2, 0, %v7252_v2  ;;  %v6216_v26 = vrot.slane %v11132_v47, 5 }
 0x2f1   : > { %v6187_v7 = vld [vmem:[#allocation2 + $0xc] sm:$0xe]  ;;  %v5342_v52 = vmax.f32 %v5051_v22, %v8869_v43  ;;  %v5343_v58 = vmax.f32 %v5052_v61, %v8870_v20  ;;  %v5344_v45 = vmax.f32 %v5053_v17, %v8871_v60  ;;  %v5423_v6 = vadd.f32 %v10969_v40, %v5341_v5  ;;  %7254 = vst [vmem:[#allocation2] sm:$0x1] %v7253_v38 }
 0x2f2   : > { %v4988_v49 = vmax.f32 %v4956_v14, 0.0  ;;  %v8932_v56 = vor.u32 %v9244_v18, %v11087_v53  ;;  %v8950_v39 = vrot.slane %v6187_v7, 9  ;;  %v11148_v53 = vpop.f32.mrf.mxu2  ;;  %v7274_v43 = vsel %vm11144_vm3, 0, %v7273_v34  ;;  %v11156_v7 = vpop.f32.mrf.mxu3 }
 0x2f3   : > { %v5424_v36 = vadd.f32 %v10995_v10, %v5342_v52  ;;  %v5425_v59 = vadd.f32 %v10976_v30, %v5343_v58  ;;  %v5426_v44 = vadd.f32 %v10998_v55, %v5344_v45  ;;  %v5557_v22 = vpack.c.bf16 %v5423_v6, %v5423_v6  ;;  %7275 = vst [vmem:[#allocation2] sm:$0x4] %v7274_v43 }
 0x2f4   : > { %v5016_v17 = vmax.f32 %v4986_v27, %v4988_v49  ;;  %8945 = vmatmul.msk.bf16.vlgmr.msra.gmra.mxu2 %vm6076_vm11, %v8932_v56  ;;  %v4853_v57 = vpop.f32.mrf.mxu0  ;;  %v11154_v20 = vrot.slane %v5951_v23, 4  ;;  %12411 = vst [vmem:[#allocation31_spill] sm:$0xff] %v11156_v7  ;;  %v6217_v34 = vsel %vm9572_vm10, %v8950_v39, %v6216_v26  ;;  %v5956_v23 = vrot.slane %v5954_v63, 5 }
 0x2f5   : > { %v5558_v60 = vpack.c.bf16 %v5424_v36, %v5424_v36  ;;  %v5559_v5 = vpack.c.bf16 %v5425_v59, %v5425_v59  ;;  %v5560_v14 = vpack.c.bf16 %v5426_v44, %v5426_v44  ;;  %v5685_v18 = vunpack.c.l.b16 %v5557_v22 }
 0x2f6   : > { %v5054_v52 = vrot.slane %v5016_v17, 2  ;;  %v5055_v58 = vrot.slane %v5016_v17, 4  ;;  %v5056_v27 = vrot.slane %v5016_v17, 6  ;;  %v8872_v45 = vrot.slane %v5016_v17, 9 }
 0x2f7   : > { %v5686_v6 = vunpack.c.l.b16 %v5558_v60  ;;  %v5687_v2 = vunpack.c.l.b16 %v5559_v5  ;;  %8856 = vmatmul.msk.bf16.gmra.mxu0 %vm1521_vm12, %v4769_v62  ;;  %v5688_v59 = vunpack.c.l.b16 %v5560_v14  ;;  %v5760_v44 = vrot.slane %v5685_v18, 7 }
 0x2f8   : > { %v8873_v49 = vrot.slane %v5054_v52, 9  ;;  %v8874_v56 = vrot.slane %v5055_v58, 9  ;;  %v8875_v38 = vrot.slane %v5056_v27, 9  ;;  %v5345_v36 = vmax.f32 %v5016_v17, %v8872_v45 }
 0x2f9   : > { %v5761_v22 = vrot.slane %v5686_v6, 6  ;;  %v5763_v43 = vrot.slane %v5687_v2, 5  ;;  %v3588_v62 = vadd.f32 %v11040_v21, %v10815_v51  ;;  %v6245_v39 = vunpack.c.l.b16 %v6217_v34 }
 0x2fa   : > { %v5346_v12 = vmax.f32 %v5054_v52, %v8873_v49  ;;  %v5347_v31 = vmax.f32 %v5055_v58, %v8874_v56  ;;  %v5348_v7 = vmax.f32 %v5056_v27, %v8875_v38  ;;  %v5427_v60 = vadd.f32 %v11005_v24, %v5345_v36  ;;  %v7396_v52 = vld [vmem:[#allocation2] sm:$0x7]  ;;  %v11173_v27 = vpop.f32.mrf.mxu1  ;;  %v11178_v2 = vpop.f32.mrf.mxu2 }
 0x2fb   : > { %v5762_v5 = vsel %vm5743_vm4, %v5761_v22, %v5760_v44  ;;  %v11165_v63 = vrot.slane %v5960_v33, 5  ;;  %v5765_v45 = vrot.slane %v5688_v59, 4  ;;  %v12412_v21 = vunpack.c.l.b16 %v11117_v3  ;;  %v11183_v36 = vpop.f32.mrf.mxu3 }
 0x2fc   : > { %v5764_v26 = vsel %vm12302_vm9, %v5763_v43, %v5762_v5  ;;  %v5428_v17 = vadd.f32 %v11016_v15, %v5346_v12  ;;  %v5429_v14 = vadd.f32 %v11012_v50, %v5347_v31  ;;  %v5430_v18 = vadd.f32 %v11022_v41, %v5348_v7  ;;  %v11171_v58 = vpop.f32.mrf.mxu0 }
 0x2fd   : > { %v5561_v51 = vpack.c.bf16 %v5427_v60, %v5427_v60  ;;  %v6252_v6 = vpack.c.b16 %v6245_v39, %v12412_v21  ;;  %v5957_v33 = vor.u32 %v5956_v23, %v11154_v20  ;;  %v7404_v31 = vrot.slane %v7396_v52, 2  ;;  %v5894_v20 = vld [vmem:[#allocation2 + $0x1c] sm:$0x1]  ;;  %v5934_v21 = vld [vmem:[#allocation2 + $0xc] sm:$0xf] }
 0x2fe   : > { %v5562_v34 = vpack.c.bf16 %v5428_v17, %v5428_v17  ;;  %v5563_v12 = vpack.c.bf16 %v5429_v14, %v5429_v14  ;;  %v5564_v49 = vpack.c.bf16 %v5430_v18, %v5430_v18  ;;  %v5766_v7 = vsel %vm12299_vm14, %v5765_v45, %v5764_v26 }
 0x2ff   : > { %v5689_v56 = vunpack.c.l.b16 %v5561_v51  ;;  %v4921_v38 = vadd.f32 %v4853_v57, %v11093_v54  ;;  %8958 = vmatmul.msk.bf16.vlgmr.msra.gmra.mxu3 %vm6076_vm11, %v6252_v6  ;;  %v7410_v23 = vsel %vm12300_vm0, %v7396_v52, %v7404_v31  ;;  %v7412_v43 = vsel %vm12301_vm1, %v7396_v52, %v7404_v31  ;;  %vm11193_vm0 = vmor %vm7433_vm6, %vm7434_vm5  ;;  %v4561_v51 = vld [vmem:[#allocation2 + $0xc0] sm:$0xe] }
 0x300   : > { %v5690_v3 = vunpack.c.l.b16 %v5562_v34  ;;  %v5691_v59 = vunpack.c.l.b16 %v5563_v12  ;;  %v5692_v44 = vunpack.c.l.b16 %v5564_v49  ;;  %v7414_v54 = vrot.slane %v7412_v43, 2  ;;  %v5891_v12 = vld [vmem:[#allocation2 + $0x18] sm:$0xf] }
 0x301   : > { %v5767_v22 = vrot.slane %v5689_v56, 3  ;;  %v7440_v26 = vshrl.u32 %v7410_v23, 16  ;;  %v7443_v17 = vshll.u32 %v7410_v23, 16  ;;  %v11188_v14 = vrot.slane %v5957_v33, 4 }
 0x302   : > { %v5769_v60 = vrot.slane %v5690_v3, 2  ;;  %v5771_v5 = vrot.slane %v5691_v59, 1  ;;  %v5854_v39 = vpack.c.b16 %v5692_v44, %v5692_v44  ;;  %vm12413_vm14 = vcmask 1046534   ;;  %v11206_v44 = vpop.f32.mrf.mxu1 }
 0x303   : > { %v5768_v57 = vsel %vm5752_vm15, %v5767_v22, %v5766_v7  ;;  %vm7436_vm1 = vsmask.f32 5392  ;;  %v7449_v52 = vshll.u32 %v7414_v54, 16  ;;  %vm12416_vm9 = vcmask 1047559   ;;  %v11215_v22 = vpop.f32.mrf.mxu2 }
 0x304   : > { %v5770_v18 = vsel %vm12413_vm14, %v5769_v60, %v5768_v57  ;;  %v5895_v45 = vsel %vm9651_vm8, %v5854_v39, %v5894_v20  ;;  %v4858_v6 = vpop.f32.mrf.mxu0  ;;  %v4957_v33 = vadd.f32 %v10960_v28, %v4921_v38  ;;  %v7442_v49 = vrot.slane %v7440_v26, 6  ;;  %v11226_v57 = vpop.f32.mrf.mxu3 }
 0x305   : > { %v5772_v34 = vsel %vm12416_vm9, %v5771_v5, %v5770_v18  ;;  %5896 = vst [vmem:[#allocation2 + $0x1c] sm:$0x1] %v5895_v45  ;;  %v7445_v31 = vrot.slane %v7443_v17, 7  ;;  %v3873_v7 = vadd.f32 %v10992_v25, %v11110_v8  ;;  %v3587_v56 = vadd.f32 %v11024_v9, %v10810_v11  ;;  %vm11211_vm9 = vmor %vm11193_vm0, %vm7436_vm1  ;;  %v4560_v8 = vld [vmem:[#allocation2 + $0xb4] sm:$0xe] }
 0x306   : > { %v11204_v3 = vadd.f32 %v11043_v42, %v3588_v62  ;;  %v5853_v59 = vpack.c.b16 %v5772_v34, %v5772_v34  ;;  %vm7438_vm14 = vsmask.f32 7448  ;;  %v7451_v23 = vrot.slane %v7449_v52, 7  ;;  %v9339_v52 = vld [vmem:[#allocation2 + $0xc4] sm:$0xf] }
 0x307   : > { %v7446_v38 = vor.u32 %v7445_v31, %v7442_v49  ;;  %v5965_v25 = vshrl.u32 %v5934_v21, 16  ;;  %v5963_v42 = vsel %vm9629_vm7, %v11188_v14, %v11165_v63  ;;  %v5968_v62 = vshll.u32 %v5934_v21, 16  ;;  %vm11231_vm0 = vmor %vm11211_vm9, %vm7438_vm14  ;;  %v9337_v14 = vld [vmem:[#allocation2 + $0xb8] sm:$0xf]  ;;  %v9340_v34 = vld [vmem:[#allocation2 + $0xc8] sm:$0x1] }
 0x308   : > { %v5892_v11 = vsel %vm11060_vm13, %v5853_v59, %v5891_v12  ;;  %v5974_v43 = vshll.u32 %v11132_v47, 16  ;;  %v4989_v60 = vmax.f32 %v4957_v33, 0.0  ;;  %v4922_v39 = vadd.f32 %v11171_v58, %v11096_v1  ;;  %v9338_v1 = vld [vmem:[#allocation2 + $0xbc] sm:$0x1] }
 0x309   : > { %5893 = vst [vmem:[#allocation2 + $0x18] sm:$0xf] %v5892_v11  ;;  %v7447_v5 = vrot.slane %v7446_v38, 2  ;;  %v5967_v54 = vrot.slane %v5965_v25, 4  ;;  %v12420_v26 = vmov 0  ;;  %v5970_v63 = vrot.slane %v5968_v62, 5 }
 0x30a   : > { %v12421_v26 = vsel %vm11231_vm0, 4294967295, %v12420_v26  ;;  %v4923_v17 = vadd.f32 %v4858_v6, %v11099_v13  ;;  %v8840_v47 = vrot.slane %v4560_v8, 9  ;;  %v4704_v18 = vrot.slane %v9337_v14, 5 }
 0x30b   : > { %12422 = vst [vmem:[#allocation7_spill] sm:$0xff] %v12421_v26  ;;  %v7452_v45 = vsel %vm11231_vm0, %v7447_v5, %v7451_v23  ;;  %v4707_v58 = vrot.slane %v9338_v1, 5  ;;  %v4711_v21 = vrot.slane %v9339_v52, 5  ;;  %v4714_v12 = vrot.slane %v9340_v34, 5  ;;  %v11254_v1 = vpop.f32.mrf.mxu1 }
 0x30c   : > { %7496 = vst [vmem:[#allocation1] ss:$4 sm:$0xff] %v7452_v45  ;;  %v5971_v33 = vor.u32 %v5970_v63, %v5967_v54  ;;  %v4959_v49 = vadd.f32 %v10960_v28, %v4923_v17  ;;  %v4705_v13 = vsel %vm9572_vm10, %v8840_v47, %v4704_v18  ;;  %v4706_v6 = vrot.slane %v4704_v18, 4  ;;  %v4860_v31 = vpop.f32.mrf.mxu0  ;;  %v12423_v47 = vld [vmem:[#allocation28_spill] sm:$0xff]  ;;  %v12424_v18 = vld [vmem:[#allocation29_spill] sm:$0xff] }
 0x30d   : > { %v4751_v59 = vunpack.c.l.b16 %v4705_v13  ;;  %v4924_v20 = vadd.f32 %v4860_v31, %v11106_v37  ;;  %v8841_v38 = vrot.slane %v4561_v51, 9  ;;  %v4713_v23 = vrot.slane %v4711_v21, 4 }
 0x30e   : > { %v5972_v25 = vrot.slane %v5971_v33, 4  ;;  %v5976_v8 = vrot.slane %v5974_v43, 5  ;;  %v4991_v11 = vmax.f32 %v4959_v49, 0.0  ;;  %v4708_v62 = vsel %vm9572_vm10, %v4706_v6, %v4707_v58  ;;  %v11271_v6 = vpop.f32.mrf.mxu3 }
 0x30f   : > { %v4958_v5 = vadd.f32 %v10960_v28, %v4922_v39  ;;  %v6064_v54 = vunpack.c.l.b16 %v5963_v42  ;;  %v4752_v63 = vunpack.c.l.b16 %v4708_v62  ;;  %v4960_v17 = vadd.f32 %v10960_v28, %v4924_v20 }
 0x310   : > { %v11247_v14 = vadd.f32 %v12423_v47, %v3873_v7  ;;  %v11250_v45 = vadd.f32 %v12424_v18, %v3587_v56  ;;  %v5977_v37 = vsel %vm9629_vm7, %v5972_v25, %v5976_v8  ;;  %v5017_v43 = vmax.f32 %v4989_v60, %v4991_v11  ;;  %v11264_v7 = vpop.f32.mrf.mxu2 }
 0x311   : > { %v6065_v51 = vunpack.c.l.b16 %v5977_v37  ;;  %v4770_v58 = vpack.c.b16 %v4752_v63, %v4751_v59  ;;  %v11258_v42 = vsel %vm9572_vm10, %v8841_v38, %v4711_v21  ;;  %v11262_v39 = vsel %vm9572_vm10, %v4713_v23, %v4714_v12  ;;  %v12425_v23 = vld [vmem:[#allocation26_spill] sm:$0xff] }
 0x312   : > { %v5057_v56 = vrot.slane %v5017_v43, 2  ;;  %v5058_v52 = vrot.slane %v5017_v43, 4  ;;  %v5059_v34 = vrot.slane %v5017_v43, 6  ;;  %v8876_v33 = vrot.slane %v5017_v43, 9 }
 0x313   : > { %v11268_v60 = vadd.f32 %v11046_v29, %v11204_v3  ;;  %v4990_v49 = vmax.f32 %v4958_v5, 0.0  ;;  %v6072_v13 = vpack.c.b16 %v6065_v51, %v6064_v54  ;;  %8857 = vmatmul.msk.bf16.gmra.mxu0 %vm1521_vm12, %v4770_v58  ;;  %v4992_v21 = vmax.f32 %v4960_v17, 0.0 }
 0x314   : > { %v8877_v31 = vrot.slane %v5057_v56, 9  ;;  %v8878_v12 = vrot.slane %v5058_v52, 9  ;;  %v8879_v59 = vrot.slane %v5059_v34, 9  ;;  %v5349_v20 = vmax.f32 %v5017_v43, %v8876_v33  ;;  %v4863_v38 = vpop.f32.mrf.mxu0 }
 0x315   : > { %v11275_v25 = vadd.f32 %v11090_v4, %v12425_v23  ;;  %8925 = vmatmul.msk.bf16.vlgmr.msra.gmra.mxu1 %vm6076_vm11, %v6072_v13  ;;  %v5018_v29 = vmax.f32 %v4990_v49, %v4992_v21  ;;  %v4753_v3 = vunpack.c.l.b16 %v11258_v42  ;;  %v4754_v8 = vunpack.c.l.b16 %v11262_v39 }
 0x316   : > { %v5350_v11 = vmax.f32 %v5057_v56, %v8877_v31  ;;  %v5351_v62 = vmax.f32 %v5058_v52, %v8878_v12  ;;  %v5352_v5 = vmax.f32 %v5059_v34, %v8879_v59  ;;  %v5431_v54 = vadd.f32 %v10969_v40, %v5349_v20  ;;  %v11284_v40 = vpop.f32.mrf.mxu1  ;;  %v12426_v59 = vld [vmem:[#allocation27_spill] sm:$0xff] }
 0x317   : > { %v5060_v63 = vrot.slane %v5018_v29, 2  ;;  %v5061_v17 = vrot.slane %v5018_v29, 4  ;;  %v5062_v47 = vrot.slane %v5018_v29, 6  ;;  %v8880_v18 = vrot.slane %v5018_v29, 9 }
 0x318   : > { %v5432_v37 = vadd.f32 %v10995_v10, %v5350_v11  ;;  %v5433_v4 = vadd.f32 %v10976_v30, %v5351_v62  ;;  %v5434_v43 = vadd.f32 %v10998_v55, %v5352_v5  ;;  %v5565_v51 = vpack.c.bf16 %v5431_v54, %v5431_v54  ;;  %v11289_v23 = vpop.f32.mrf.mxu2  ;;  %v7255_v54 = vld [vmem:[#allocation2 + $0xc] sm:$0x1] }
 0x319   : > { %v8881_v58 = vrot.slane %v5060_v63, 9  ;;  %v8882_v42 = vrot.slane %v5061_v17, 9  ;;  %v8883_v33 = vrot.slane %v5062_v47, 9  ;;  %v5353_v39 = vmax.f32 %v5018_v29, %v8880_v18 }
 0x31a   : > { %v5566_v56 = vpack.c.bf16 %v5432_v37, %v5432_v37  ;;  %v5567_v52 = vpack.c.bf16 %v5433_v4, %v5433_v4  ;;  %v5568_v34 = vpack.c.bf16 %v5434_v43, %v5434_v43  ;;  %v5693_v49 = vunpack.c.l.b16 %v5565_v51 }
 0x31b   : > { %v5354_v13 = vmax.f32 %v5060_v63, %v8881_v58  ;;  %v5355_v21 = vmax.f32 %v5061_v17, %v8882_v42  ;;  %v5356_v31 = vmax.f32 %v5062_v47, %v8883_v33  ;;  %v5435_v12 = vadd.f32 %v11005_v24, %v5353_v39  ;;  %v11296_v47 = vpop.f32.mrf.mxu3 }
 0x31c   : > { %v3590_v20 = vadd.f32 %v11137_v46, %v12426_v59  ;;  %v5694_v11 = vunpack.c.l.b16 %v5566_v56  ;;  %v5695_v62 = vunpack.c.l.b16 %v5567_v52  ;;  %v5696_v5 = vunpack.c.l.b16 %v5568_v34  ;;  %v11291_v29 = vpop.f32.mrf.mxu0  ;;  %v4562_v56 = vld [vmem:[#allocation2 + $0xcc] sm:$0xe] }
 0x31d   : > { %v5436_v18 = vadd.f32 %v11016_v15, %v5354_v13  ;;  %v5437_v37 = vadd.f32 %v11012_v50, %v5355_v21  ;;  %v5438_v63 = vadd.f32 %v11022_v41, %v5356_v31  ;;  %v5569_v17 = vpack.c.bf16 %v5435_v12, %v5435_v12  ;;  %v7276_v31 = vld [vmem:[#allocation2 + $0xc] sm:$0x4] }
 0x31e   : > { %v5773_v4 = vrot.slane %v5693_v49, 7  ;;  %v5774_v43 = vrot.slane %v5694_v11, 6  ;;  %v5776_v46 = vrot.slane %v5695_v62, 5  ;;  %v4771_v51 = vpack.c.b16 %v4754_v8, %v4753_v3  ;;  %v11303_v3 = vld [vmem:[#allocation2 + $0xc] sm:$0xf] }
 0x31f   : > { %v5570_v58 = vpack.c.bf16 %v5436_v18, %v5436_v18  ;;  %v5571_v42 = vpack.c.bf16 %v5437_v37, %v5437_v37  ;;  %v5572_v33 = vpack.c.bf16 %v5438_v63, %v5438_v63  ;;  %v5697_v39 = vunpack.c.l.b16 %v5569_v17  ;;  %12428 = vst [vmem:[#allocation28_spill] sm:$0xff] %v11303_v3  ;;  %v5900_v18 = vld [vmem:[#allocation2 + $0x28] sm:$0x1]  ;;  %v9341_v63 = vld [vmem:[#allocation2 + $0xd0] sm:$0xf] }
 0x320   : > { %v7256_v52 = vsel %vm11125_vm2, 0, %v7255_v54  ;;  %v5775_v34 = vsel %vm5743_vm4, %v5774_v43, %v5773_v4  ;;  %v5778_v13 = vrot.slane %v5696_v5, 4  ;;  %v4925_v21 = vadd.f32 %v4863_v38, %v11247_v14  ;;  %v9342_v14 = vld [vmem:[#allocation2 + $0xd4] sm:$0x1] }
 0x321   : > { %vm12427_vm1 = vcmask 1043459   ;;  %v5698_v49 = vunpack.c.l.b16 %v5570_v58  ;;  %v5699_v59 = vunpack.c.l.b16 %v5571_v42  ;;  %v5700_v11 = vunpack.c.l.b16 %v5572_v33  ;;  %v12430_v43 = vld [vmem:[#allocation9_spill] sm:$0xff] }
 0x322   : > { %v5777_v12 = vsel %vm12427_vm1, %v5776_v46, %v5775_v34  ;;  %vm12429_vm6 = vcmask 1044484   ;;  %v5780_v62 = vrot.slane %v5697_v39, 3  ;;  %v8842_v37 = vrot.slane %v4562_v56, 9  ;;  %v11312_v56 = vld [vmem:[#allocation2 + $0xc] sm:$0xe] }
 0x323   : > { %v5779_v8 = vsel %vm12429_vm6, %v5778_v13, %v5777_v12  ;;  %v4718_v54 = vrot.slane %v9341_v63, 5  ;;  %v5782_v17 = vrot.slane %v5698_v49, 2  ;;  %v5784_v4 = vrot.slane %v5699_v59, 1  ;;  %8858 = vmatmul.msk.bf16.gmra.mxu0 %vm1521_vm12, %v4771_v51  ;;  %12431 = vst [vmem:[#allocation29_spill] sm:$0xff] %v11312_v56  ;;  %v11314_v34 = vld [vmem:[#allocation2 + $0xc] sm:$0xf]  ;;  %v11316_v13 = vpop.f32.mrf.mxu1  ;;  %vm12445_vm14 = vmmov %vm12429_vm6 }
 0x324   : > { %v5856_v5 = vpack.c.b16 %v5700_v11, %v5700_v11  ;;  %v4721_v38 = vrot.slane %v9342_v14, 5  ;;  %v3592_v46 = vadd.f32 %v11206_v44, %v12430_v43  ;;  %v7277_v58 = vsel %vm11144_vm3, 0, %v7276_v31  ;;  %v4868_v33 = vpop.f32.mrf.mxu0  ;;  %12432 = vst [vmem:[#allocation26_spill] sm:$0xff] %v11314_v34  ;;  %v11326_v11 = vpop.f32.mrf.mxu2  ;;  %v5935_v14 = vld [vmem:[#allocation2 + $0x18] sm:$0xf] }
 0x325   : > { %v5781_v42 = vsel %vm5752_vm15, %v5780_v62, %v5779_v8  ;;  %v4720_v39 = vrot.slane %v4718_v54, 4  ;;  %vm12433_vm5 = vcmask 1046534   ;;  %v4961_v44 = vadd.f32 %v10960_v28, %v4925_v21  ;;  %7257 = vst [vmem:[#allocation2 + $0xc] sm:$0x1] %v7256_v52  ;;  %v5897_v62 = vld [vmem:[#allocation2 + $0x24] sm:$0xf] }
 0x326   : > { %v5783_v51 = vsel %vm12433_vm5, %v5782_v17, %v5781_v42  ;;  %v5901_v12 = vsel %vm9651_vm8, %v5856_v5, %v5900_v18  ;;  %v4927_v49 = vadd.f32 %v4868_v33, %v11268_v60  ;;  %v3876_v31 = vadd.f32 %v11101_v35, %v11275_v25  ;;  %12434 = vst [vmem:[#allocation27_spill] sm:$0xff] %v11326_v11  ;;  %v12436_v35 = vld [vmem:[#allocation30_spill] sm:$0xff] }
 0x327   : > { %v3877_v59 = vadd.f32 %v11148_v53, %v3590_v20  ;;  %vm12435_vm9 = vcmask 1047559   ;;  %5902 = vst [vmem:[#allocation2 + $0x28] sm:$0x1] %v5901_v12  ;;  %v4719_v21 = vsel %vm9572_vm10, %v8842_v37, %v4718_v54  ;;  %v4722_v60 = vsel %vm9572_vm10, %v4720_v39, %v4721_v38  ;;  %v11337_v20 = vpop.f32.mrf.mxu3  ;;  %v6188_v5 = vld [vmem:[#allocation2 + $0x18] sm:$0xe] }
 0x328   : > { %v5785_v8 = vsel %vm12435_vm9, %v5784_v4, %v5783_v51  ;;  %v4963_v17 = vadd.f32 %v10960_v28, %v4927_v49  ;;  %7278 = vst [vmem:[#allocation2 + $0xc] sm:$0x4] %v7277_v58  ;;  %v4528_v25 = vadd.f32 %v12436_v35, %v11250_v45  ;;  %v3879_v53 = vadd.f32 %v11215_v22, %v3592_v46  ;;  %v12438_v58 = vld [vmem:[#allocation31_spill] sm:$0xff]  ;;  %v12439_v22 = vld [vmem:[#allocation10_spill] sm:$0xff]  ;;  %vm12451_vm6 = vmmov %vm12435_vm9 }
 0x329   : > { %v5855_v63 = vpack.c.b16 %v5785_v8, %v5785_v8  ;;  %12437 = vst [vmem:[#allocation9_spill] sm:$0xff] %v11337_v20  ;;  %v4993_v18 = vmax.f32 %v4961_v44, 0.0  ;;  %v4755_v54 = vunpack.c.l.b16 %v4719_v21  ;;  %v4756_v38 = vunpack.c.l.b16 %v4722_v60  ;;  %v11350_v33 = vld [vmem:[#allocation2 + $0x1c] sm:$0x1]  ;;  %v11359_v21 = vld [vmem:[#allocation2 + $0x18] sm:$0x1]  ;;  %vm12461_vm9 = vmmov %vm12445_vm14 }
 0x32a   : > { %v4995_v4 = vmax.f32 %v4963_v17, 0.0  ;;  %v4926_v37 = vadd.f32 %v11291_v29, %v4528_v25  ;;  %v4530_v43 = vadd.f32 %v11112_v19, %v3876_v31  ;;  %v11344_v45 = vadd.f32 %v12438_v58, %v3877_v59 }
 0x32b   : > { %v5898_v52 = vsel %vm11060_vm13, %v5855_v63, %v5897_v62  ;;  %v11348_v46 = vadd.f32 %v11173_v27, %v12439_v22  ;;  %v11353_v39 = vadd.f32 %v11226_v57, %v3879_v53  ;;  %v8951_v12 = vrot.slane %v6188_v5, 9  ;;  %v11357_v17 = vpop.f32.mrf.mxu1  ;;  %v8935_v22 = vld [vmem:[#allocation2 + $0x18] sm:$0xf] }
 0x32c   : > { %5899 = vst [vmem:[#allocation2 + $0x24] sm:$0xf] %v5898_v52  ;;  %v5019_v42 = vmax.f32 %v4993_v18, %v4995_v4  ;;  %v4870_v51 = vpop.f32.mrf.mxu0  ;;  %v5979_v29 = vshrl.u32 %v5935_v14, 16  ;;  %v5982_v44 = vshll.u32 %v5935_v14, 16  ;;  %v4962_v59 = vadd.f32 %v10960_v28, %v4926_v37  ;;  %v11361_v53 = vpop.f32.mrf.mxu2  ;;  %v11366_v52 = vld [vmem:[%s12271_s2] ss:$0 sm:$0xff] }
 0x32d   : > { %v4772_v62 = vpack.c.b16 %v4756_v38, %v4755_v54  ;;  %v4928_v63 = vadd.f32 %v4870_v51, %v4530_v43  ;;  %v6220_v27 = vrot.slane %v11350_v33, 5  ;;  %v11377_v14 = vld [vmem:[#allocation2 + $0x18] sm:$0x4]  ;;  %v11382_v43 = vld [vmem:[%s12272_s3] ss:$0 sm:$0xff] }
 0x32e   : > { %v5063_v49 = vrot.slane %v5019_v42, 2  ;;  %v5064_v8 = vrot.slane %v5019_v42, 4  ;;  %v5065_v19 = vrot.slane %v5019_v42, 6  ;;  %v8884_v31 = vrot.slane %v5019_v42, 9 }
 0x32f   : > { %v4964_v28 = vadd.f32 %v11366_v52, %v4928_v63  ;;  %v11371_v18 = vsel %vm9572_vm10, %v8951_v12, %v6220_v27  ;;  %v11373_v4 = vrot.slane %v5979_v29, 4  ;;  %v11375_v5 = vrot.slane %v5982_v44, 5  ;;  %v11385_v51 = vpop.f32.mrf.mxu3 }
 0x330   : > { %v8885_v57 = vrot.slane %v5063_v49, 9  ;;  %v8886_v60 = vrot.slane %v5064_v8, 9  ;;  %v8887_v35 = vrot.slane %v5065_v19, 9  ;;  %v5357_v25 = vmax.f32 %v5019_v42, %v8884_v31  ;;  %12440 = vst [vmem:[#allocation30_spill] sm:$0xff] %v11385_v51 }
 0x331   : > { %v4994_v29 = vmax.f32 %v4962_v59, 0.0  ;;  %v4996_v44 = vmax.f32 %v4964_v28, 0.0 }
 0x332   : > { %v5358_v37 = vmax.f32 %v5063_v49, %v8885_v57  ;;  %v5359_v54 = vmax.f32 %v5064_v8, %v8886_v60  ;;  %v5360_v38 = vmax.f32 %v5065_v19, %v8887_v35  ;;  %v5439_v58 = vadd.f32 %v11382_v43, %v5357_v25 }
 0x333   : > { %v9245_v42 = vld [vmem:[#allocation2 + $0x20] sm:$0xf0]  ;;  %8859 = vmatmul.msk.bf16.gmra.mxu0 %vm1521_vm12, %v4772_v62  ;;  %v5020_v57 = vmax.f32 %v4994_v29, %v4996_v44  ;;  %v6246_v35 = vunpack.c.l.b16 %v11371_v18  ;;  %v5988_v25 = vshll.u32 %v11350_v33, 16  ;;  %v5985_v62 = vor.u32 %v11375_v5, %v11373_v4  ;;  %vm12444_vm12 = vmmov %vm12427_vm1 }
 0x334   : > { %v8936_v49 = vor.u32 %v9245_v42, %v8935_v22  ;;  %v5440_v8 = vadd.f32 %v10995_v10, %v5358_v37  ;;  %v5441_v19 = vadd.f32 %v10976_v30, %v5359_v54  ;;  %v5442_v31 = vadd.f32 %v10998_v55, %v5360_v38  ;;  %v4873_v60 = vpop.f32.mrf.mxu0  ;;  %v6189_v59 = vld [vmem:[#allocation2 + $0x24] sm:$0xe]  ;;  %v11400_v38 = vld [vmem:[#allocation2 + $0x28] sm:$0x1]  ;;  %v11407_v5 = vpop.f32.mrf.mxu2  ;;  %vm12448_vm1 = vmmov %vm12433_vm5 }
 0x335   : > { %v5573_v63 = vpack.c.bf16 %v5439_v58, %v5439_v58  ;;  %v5066_v58 = vrot.slane %v5020_v57, 2  ;;  %v5067_v22 = vrot.slane %v5020_v57, 4  ;;  %v5068_v42 = vrot.slane %v5020_v57, 6  ;;  %v5936_v44 = vld [vmem:[#allocation2 + $0x24] sm:$0xf]  ;;  %12442 = vst [vmem:[#allocation10_spill] sm:$0xff] %v11407_v5  ;;  %vm12459_vm5 = vmmov %vm12444_vm12 }
 0x336   : > { %8946 = vmatmul.msk.bf16.gmra.mxu2 %vm6076_vm11, %v8936_v49  ;;  %v5574_v28 = vpack.c.bf16 %v5440_v8, %v5440_v8  ;;  %v5575_v37 = vpack.c.bf16 %v5441_v19, %v5441_v19  ;;  %v8888_v29 = vrot.slane %v5020_v57, 9  ;;  %v5576_v49 = vpack.c.bf16 %v5442_v31, %v5442_v31  ;;  %v11404_v19 = vpop.f32.mrf.mxu1  ;;  %v5906_v5 = vld [vmem:[#allocation2 + $0x34] sm:$0x1] }
 0x337   : > { %v5701_v54 = vunpack.c.l.b16 %v5573_v63  ;;  %v8952_v26 = vrot.slane %v6189_v59, 9  ;;  %v8889_v18 = vrot.slane %v5066_v58, 9  ;;  %v8890_v34 = vrot.slane %v5067_v22, 9  ;;  %12441 = vst [vmem:[#allocation31_spill] sm:$0xff] %v11404_v19 }
 0x338   : > { %v5702_v27 = vunpack.c.l.b16 %v5574_v28  ;;  %v5703_v12 = vunpack.c.l.b16 %v5575_v37  ;;  %v8891_v33 = vrot.slane %v5068_v42, 9  ;;  %v5361_v8 = vmax.f32 %v5020_v57, %v8888_v29  ;;  %v11412_v29 = vpop.f32.mrf.mxu3 }
 0x339   : > { %v5786_v63 = vrot.slane %v5701_v54, 7  ;;  %v6224_v3 = vrot.slane %v11400_v38, 5  ;;  %v5993_v4 = vshrl.u32 %v5936_v44, 16  ;;  %v5362_v20 = vmax.f32 %v5066_v58, %v8889_v18  ;;  %12443 = vst [vmem:[#allocation32_spill] sm:$0xff] %v11412_v29 }
 0x33a   : > { %v5787_v56 = vrot.slane %v5702_v27, 6  ;;  %v5363_v11 = vmax.f32 %v5067_v22, %v8890_v34  ;;  %v5364_v51 = vmax.f32 %v5068_v42, %v8891_v33  ;;  %v5443_v31 = vadd.f32 %v11005_v24, %v5361_v8 }
 0x33b   : > { %v5704_v28 = vunpack.c.l.b16 %v5576_v49  ;;  %v5789_v59 = vrot.slane %v5703_v12, 5  ;;  %v6225_v37 = vsel %vm9572_vm10, %v8952_v26, %v6224_v3  ;;  %v5996_v57 = vshll.u32 %v5936_v44, 16 }
 0x33c   : > { %v5788_v27 = vsel %vm5743_vm4, %v5787_v56, %v5786_v63  ;;  %v5444_v54 = vadd.f32 %v11016_v15, %v5362_v20  ;;  %v5445_v19 = vadd.f32 %v11012_v50, %v5363_v11  ;;  %v5446_v58 = vadd.f32 %v11022_v41, %v5364_v51  ;;  %v11418_v34 = vpop.f32.mrf.mxu0 }
 0x33d   : > { %v5577_v22 = vpack.c.bf16 %v5443_v31, %v5443_v31  ;;  %v6247_v42 = vunpack.c.l.b16 %v6225_v37  ;;  %v5986_v49 = vrot.slane %v5985_v62, 4  ;;  %v5995_v12 = vrot.slane %v5993_v4, 4 }
 0x33e   : > { %v5578_v18 = vpack.c.bf16 %v5444_v54, %v5444_v54  ;;  %v5579_v33 = vpack.c.bf16 %v5445_v19, %v5445_v19  ;;  %v5580_v26 = vpack.c.bf16 %v5446_v58, %v5446_v58  ;;  %v6002_v3 = vshll.u32 %v11400_v38, 16  ;;  %v11430_v58 = vld [vmem:[#allocation2 + $0x18] sm:$0xf] }
 0x33f   : > { %v5790_v44 = vsel %vm12444_vm12, %v5789_v59, %v5788_v27  ;;  %v5705_v56 = vunpack.c.l.b16 %v5577_v22  ;;  %v6253_v8 = vpack.c.b16 %v6247_v42, %v6246_v35  ;;  %v5998_v20 = vrot.slane %v5996_v57, 5  ;;  %v11425_v27 = vpop.f32.mrf.mxu1  ;;  %12446 = vst [vmem:[#allocation33_spill] sm:$0xff] %v11430_v58  ;;  %v11436_v22 = vpop.f32.mrf.mxu2  ;;  %v5903_v42 = vld [vmem:[#allocation2 + $0x30] sm:$0xf]  ;;  %vm12466_vm12 = vmmov %vm12448_vm1 }
 0x340   : > { %v5791_v63 = vrot.slane %v5704_v28, 4  ;;  %v5706_v11 = vunpack.c.l.b16 %v5578_v18  ;;  %v5707_v16 = vunpack.c.l.b16 %v5579_v33  ;;  %v5708_v51 = vunpack.c.l.b16 %v5580_v26  ;;  %v11443_v18 = vld [vmem:[#allocation2 + $0x18] sm:$0xf] }
 0x341   : > { %v5793_v29 = vrot.slane %v5705_v56, 3  ;;  %v4929_v31 = vadd.f32 %v4873_v60, %v11344_v45  ;;  %8959 = vmatmul.msk.bf16.gmra.mxu3 %vm6076_vm11, %v6253_v8  ;;  %v5990_v62 = vrot.slane %v5988_v25, 5  ;;  %v5999_v19 = vor.u32 %v5998_v20, %v5995_v12  ;;  %v12447_v60 = vld [vmem:[#allocation12_spill] sm:$0xff]  ;;  %12450 = vst [vmem:[#allocation34_spill] sm:$0xff] %v11443_v18  ;;  %v11450_v26 = vld [vmem:[#allocation2 + $0x18] sm:$0xe] }
 0x342   : > { %v5792_v4 = vsel %vm12445_vm14, %v5791_v63, %v5790_v44  ;;  %v5795_v38 = vrot.slane %v5706_v11, 2  ;;  %v5797_v37 = vrot.slane %v5707_v16, 1  ;;  %v5858_v59 = vpack.c.b16 %v5708_v51, %v5708_v51  ;;  %12452 = vst [vmem:[#allocation35_spill] sm:$0xff] %v11450_v26  ;;  %v11456_v20 = vld [vmem:[#allocation2 + $0x18] sm:$0xf]  ;;  %vm12467_vm14 = vmmov %vm12451_vm6 }
 0x343   : > { %v5794_v35 = vsel %vm5752_vm15, %v5793_v29, %v5792_v4  ;;  %v5991_v28 = vsel %vm9629_vm7, %v5986_v49, %v5990_v62  ;;  %v6000_v57 = vrot.slane %v5999_v19, 4  ;;  %v6004_v54 = vrot.slane %v6002_v3, 5  ;;  %v11441_v49 = vld [vmem:[#allocation2 + $0x14] sm:$0xf0]  ;;  %12454 = vst [vmem:[#allocation37_spill] sm:$0xff] %v11456_v20 }
 0x344   : > { %v3878_v45 = vadd.f32 %v11178_v2, %v11348_v46  ;;  %v3593_v25 = vadd.f32 %v11254_v1, %v12447_v60  ;;  %v5796_v16 = vsel %vm12448_vm1, %v5795_v38, %v5794_v35  ;;  %v5907_v29 = vsel %vm9651_vm8, %v5858_v59, %v5906_v5  ;;  %v4878_v12 = vpop.f32.mrf.mxu0  ;;  %12449 = vst [vmem:[#allocation12_spill] sm:$0xff] %v11441_v49  ;;  %v11452_v3 = vld [vmem:[#allocation2 + $0x18] sm:$0xe]  ;;  %v11454_v5 = vpop.f32.mrf.mxu3  ;;  %vm12478_vm1 = vmmov %vm12459_vm5 }
 0x345   : > { %v5798_v33 = vsel %vm12451_vm6, %v5797_v37, %v5796_v16  ;;  %5908 = vst [vmem:[#allocation2 + $0x34] sm:$0x1] %v5907_v29  ;;  %v4965_v2 = vadd.f32 %v11366_v52, %v4929_v31  ;;  %v6005_v1 = vsel %vm9629_vm7, %v6000_v57, %v6004_v54  ;;  %v4931_v46 = vadd.f32 %v4878_v12, %v11353_v39  ;;  %vm12479_vm6 = vmmov %vm12461_vm9 }
 0x346   : > { %12453 = vst [vmem:[#allocation36_spill] sm:$0xff] %v11452_v3  ;;  %v5857_v44 = vpack.c.b16 %v5798_v33, %v5798_v33  ;;  %v6066_v56 = vunpack.c.l.b16 %v5991_v28  ;;  %v6067_v8 = vunpack.c.l.b16 %v6005_v1  ;;  %v12455_v11 = vsel %vm11125_vm2, 0, %v11359_v21 }
 0x347   : > { %v4967_v63 = vadd.f32 %v11366_v52, %v4931_v46  ;;  %7260 = vst [vmem:[#allocation2 + $0x18] sm:$0x1] %v12455_v11  ;;  %v4532_v39 = vadd.f32 %v11183_v36, %v3878_v45  ;;  %v3880_v51 = vadd.f32 %v11264_v7, %v3593_v25  ;;  %v12456_v19 = vsel %vm11144_vm3, 0, %v11377_v14  ;;  %v11474_v59 = vpop.f32.mrf.mxu1  ;;  %v11476_v45 = vpop.f32.mrf.mxu2 }
 0x348   : > { %v5904_v31 = vsel %vm11060_vm13, %v5857_v44, %v5903_v42  ;;  %v6073_v62 = vpack.c.b16 %v6067_v8, %v6066_v56  ;;  %7281 = vst [vmem:[#allocation2 + $0x18] sm:$0x4] %v12456_v19  ;;  %v4997_v4 = vmax.f32 %v4965_v2, 0.0  ;;  %v12457_v19 = vld [vmem:[#allocation13_spill] sm:$0xff] }
 0x349   : > { %5905 = vst [vmem:[#allocation2 + $0x30] sm:$0xf] %v5904_v31  ;;  %v4999_v38 = vmax.f32 %v4967_v63, 0.0  ;;  %v4930_v37 = vadd.f32 %v11418_v34, %v4532_v39  ;;  %v4534_v36 = vadd.f32 %v11271_v6, %v3880_v51 }
 0x34a   : > { %8926 = vmatmul.msk.bf16.gmra.mxu1 %vm6076_vm11, %v6073_v62 }
 0x34b   : > { %v5021_v21 = vmax.f32 %v4997_v4, %v4999_v38  ;;  %v4966_v14 = vadd.f32 %v11366_v52, %v4930_v37  ;;  %v3594_v4 = vadd.f32 %v11284_v40, %v12457_v19 }
 0x34c   : > { %v4880_v7 = vpop.f32.mrf.mxu0  ;;  %v11479_v29 = vpop.f32.mrf.mxu3 }
 0x34d   : > { %v5069_v35 = vrot.slane %v5021_v21, 2  ;;  %v5070_v28 = vrot.slane %v5021_v21, 4  ;;  %v5071_v57 = vrot.slane %v5021_v21, 6  ;;  %v8892_v54 = vrot.slane %v5021_v21, 9 }
 0x34e   : > { %v4932_v60 = vadd.f32 %v4880_v7, %v4534_v36  ;;  %v4998_v2 = vmax.f32 %v4966_v14, 0.0 }
 0x34f   : > { %v8893_v25 = vrot.slane %v5069_v35, 9  ;;  %v8894_v16 = vrot.slane %v5070_v28, 9  ;;  %v8895_v34 = vrot.slane %v5071_v57, 9  ;;  %v5365_v42 = vmax.f32 %v5021_v21, %v8892_v54  ;;  %v11488_v36 = vpop.f32.mrf.mxu1  ;;  %v11490_v54 = vpop.f32.mrf.mxu2 }
 0x350   : > { %v4968_v6 = vadd.f32 %v11366_v52, %v4932_v60 }
 0x351   : > { %v5366_v12 = vmax.f32 %v5069_v35, %v8893_v25  ;;  %v5367_v33 = vmax.f32 %v5070_v28, %v8894_v16  ;;  %v5368_v1 = vmax.f32 %v5071_v57, %v8895_v34  ;;  %v5447_v46 = vadd.f32 %v11382_v43, %v5365_v42 }
 0x352   : > { %v5000_v44 = vmax.f32 %v4968_v6, 0.0  ;;  %v3881_v6 = vadd.f32 %v11289_v23, %v3594_v4 }
 0x353   : > { %v5448_v56 = vadd.f32 %v10995_v10, %v5366_v12  ;;  %v5449_v8 = vadd.f32 %v10976_v30, %v5367_v33  ;;  %v5450_v63 = vadd.f32 %v10998_v55, %v5368_v1  ;;  %v5581_v11 = vpack.c.bf16 %v5447_v46, %v5447_v46  ;;  %v12458_v1 = vld [vmem:[#allocation15_spill] sm:$0xff] }
 0x354   : > { %v5022_v39 = vmax.f32 %v4998_v2, %v5000_v44  ;;  %v4883_v51 = vpop.f32.mrf.mxu0  ;;  %v11493_v40 = vpop.f32.mrf.mxu3  ;;  %v3596_v46 = vadd.f32 %v11357_v17, %v12458_v1  ;;  %v4535_v4 = vadd.f32 %v11296_v47, %v3881_v6  ;;  %v12462_v1 = vld [vmem:[#allocation30_spill] sm:$0xff] }
 0x355   : > { %v5582_v31 = vpack.c.bf16 %v5448_v56, %v5448_v56  ;;  %v5583_v62 = vpack.c.bf16 %v5449_v8, %v5449_v8  ;;  %v5709_v38 = vunpack.c.l.b16 %v5581_v11  ;;  %v5584_v14 = vpack.c.bf16 %v5450_v63, %v5450_v63 }
 0x356   : > { %v5072_v37 = vrot.slane %v5022_v39, 2  ;;  %v5073_v21 = vrot.slane %v5022_v39, 4  ;;  %v5074_v28 = vrot.slane %v5022_v39, 6  ;;  %v8896_v57 = vrot.slane %v5022_v39, 9 }
 0x357   : > { %v5710_v7 = vunpack.c.l.b16 %v5582_v31  ;;  %v5711_v35 = vunpack.c.l.b16 %v5583_v62  ;;  %v5799_v12 = vrot.slane %v5709_v38, 7  ;;  %v5712_v63 = vunpack.c.l.b16 %v5584_v14  ;;  %v11509_v47 = vpop.f32.mrf.mxu2 }
 0x358   : > { %v8897_v60 = vrot.slane %v5072_v37, 9  ;;  %v8898_v25 = vrot.slane %v5073_v21, 9  ;;  %v8899_v34 = vrot.slane %v5074_v28, 9  ;;  %v5369_v42 = vmax.f32 %v5022_v39, %v8896_v57 }
 0x359   : > { %v5800_v16 = vrot.slane %v5710_v7, 6  ;;  %v5802_v44 = vrot.slane %v5711_v35, 5  ;;  %v3883_v17 = vadd.f32 %v11361_v53, %v3596_v46  ;;  %v5804_v14 = vrot.slane %v5712_v63, 4  ;;  %v12463_v63 = vld [vmem:[#allocation27_spill] sm:$0xff] }
 0x35a   : > { %v5370_v33 = vmax.f32 %v5072_v37, %v8897_v60  ;;  %v5371_v2 = vmax.f32 %v5073_v21, %v8898_v25  ;;  %v5372_v56 = vmax.f32 %v5074_v28, %v8899_v34  ;;  %v5451_v8 = vadd.f32 %v11005_v24, %v5369_v42  ;;  %v12460_v28 = vld [vmem:[#allocation11_spill] sm:$0xff] }
 0x35b   : > { %v5801_v11 = vsel %vm5743_vm4, %v5800_v16, %v5799_v12  ;;  %v3595_v57 = vadd.f32 %v11316_v13, %v12460_v28  ;;  %v11507_v16 = vpop.f32.mrf.mxu1  ;;  %v4933_v12 = vadd.f32 %v4883_v51, %v4535_v4  ;;  %v4537_v46 = vadd.f32 %v12462_v1, %v3883_v17  ;;  %v11541_v1 = vld [vmem:[#allocation2 + $0x24] sm:$0xe] }
 0x35c   : > { %v5452_v31 = vadd.f32 %v11016_v15, %v5370_v33  ;;  %v5453_v39 = vadd.f32 %v11012_v50, %v5371_v2  ;;  %v4885_v23 = vpop.f32.mrf.mxu0  ;;  %v5454_v62 = vadd.f32 %v11022_v41, %v5372_v56  ;;  %v5585_v19 = vpack.c.bf16 %v5451_v8, %v5451_v8  ;;  %v5912_v2 = vld [vmem:[#allocation2 + $0x40] sm:$0x1]  ;;  %v7282_v56 = vld [vmem:[#allocation2 + $0x24] sm:$0x4]  ;;  %v11517_v51 = vpop.f32.mrf.mxu3  ;;  %12474 = vst [vmem:[#allocation27_spill] sm:$0xff] %v11541_v1 }
 0x35d   : > { %v5803_v21 = vsel %vm12459_vm5, %v5802_v44, %v5801_v11  ;;  %v7261_v44 = vld [vmem:[#allocation2 + $0x24] sm:$0x1]  ;;  %v3882_v11 = vadd.f32 %v12463_v63, %v3595_v57  ;;  %v7283_v28 = vsel %vm11144_vm3, 0, %v7282_v56  ;;  %vm12481_vm5 = vmmov %vm12466_vm12 }
 0x35e   : > { %v5586_v38 = vpack.c.bf16 %v5452_v31, %v5452_v31  ;;  %v5587_v37 = vpack.c.bf16 %v5453_v39, %v5453_v39  ;;  %v5588_v7 = vpack.c.bf16 %v5454_v62, %v5454_v62  ;;  %v5713_v35 = vunpack.c.l.b16 %v5585_v19  ;;  %v12464_v31 = vld [vmem:[#allocation16_spill] sm:$0xff]  ;;  %v12465_v39 = vld [vmem:[#allocation31_spill] sm:$0xff] }
 0x35f   : > { %v5805_v6 = vsel %vm12461_vm9, %v5804_v14, %v5803_v21  ;;  %v3597_v62 = vadd.f32 %v12465_v39, %v12464_v31  ;;  %v4969_v21 = vadd.f32 %v11366_v52, %v4933_v12  ;;  %v12472_v12 = vld [vmem:[#allocation10_spill] sm:$0xff]  ;;  %v11547_v31 = vld [vmem:[#allocation2 + $0x34] sm:$0x1]  ;;  %v12476_v39 = vld [vmem:[#allocation32_spill] sm:$0xff] }
 0x360   : > { %v5714_v60 = vunpack.c.l.b16 %v5586_v38  ;;  %v5715_v25 = vunpack.c.l.b16 %v5587_v37  ;;  %v5716_v34 = vunpack.c.l.b16 %v5588_v7  ;;  %v5806_v42 = vrot.slane %v5713_v35, 3  ;;  %v5909_v37 = vld [vmem:[#allocation2 + $0x3c] sm:$0xf]  ;;  %vm12482_vm9 = vmmov %vm12467_vm14 }
 0x361   : > { %v7262_v35 = vsel %vm11125_vm2, 0, %v7261_v44  ;;  %v5001_v44 = vmax.f32 %v4969_v21, 0.0 }
 0x362   : > { %v5808_v53 = vrot.slane %v5714_v60, 2  ;;  %v5810_v33 = vrot.slane %v5715_v25, 1  ;;  %v5807_v13 = vsel %vm5752_vm15, %v5806_v42, %v5805_v6  ;;  %v5860_v8 = vpack.c.b16 %v5716_v34, %v5716_v34  ;;  %v11529_v60 = vld [vmem:[#allocation2 + $0x24] sm:$0xf]  ;;  %v12471_v42 = vld [vmem:[#allocation9_spill] sm:$0xff] }
 0x363   : > { %12468 = vst [vmem:[#allocation13_spill] sm:$0xff] %v11529_v60  ;;  %v11531_v25 = vld [vmem:[#allocation2 + $0x24] sm:$0xf]  ;;  %v4536_v6 = vadd.f32 %v12471_v42, %v3882_v11  ;;  %v11545_v63 = vpop.f32.mrf.mxu1 }
 0x364   : > { %v5809_v19 = vsel %vm12466_vm12, %v5808_v53, %v5807_v13  ;;  %v4888_v4 = vpop.f32.mrf.mxu0  ;;  %v5913_v17 = vsel %vm9651_vm8, %v5860_v8, %v5912_v2  ;;  %12469 = vst [vmem:[#allocation15_spill] sm:$0xff] %v11531_v25  ;;  %v11533_v34 = vld [vmem:[#allocation2 + $0x24] sm:$0xf]  ;;  %v3884_v53 = vadd.f32 %v12472_v12, %v3597_v62  ;;  %v6190_v13 = vld [vmem:[#allocation2 + $0x30] sm:$0xe]  ;;  %vm12484_vm12 = vcmask 1043456  }
 0x365   : > { %v5811_v38 = vsel %vm12467_vm14, %v5810_v33, %v5809_v19  ;;  %v4935_v7 = vadd.f32 %v4888_v4, %v4537_v46  ;;  %5914 = vst [vmem:[#allocation2 + $0x40] sm:$0x1] %v5913_v17  ;;  %v11539_v2 = vld [vmem:[#allocation2 + $0x24] sm:$0xe]  ;;  %v4934_v8 = vadd.f32 %v4885_v23, %v4536_v6  ;;  %v11550_v19 = vpop.f32.mrf.mxu2  ;;  %vm12485_vm14 = vmmov %vm12484_vm12 }
 0x366   : > { %v5859_v57 = vpack.c.b16 %v5811_v38, %v5811_v38  ;;  %12470 = vst [vmem:[#allocation11_spill] sm:$0xff] %v11533_v34  ;;  %v11543_v46 = vld [vmem:[#allocation2 + $0x20] sm:$0xf0]  ;;  %v4538_v62 = vadd.f32 %v12476_v39, %v3884_v53  ;;  %v8953_v38 = vrot.slane %v6190_v13, 9 }
 0x367   : > { %v4971_v14 = vadd.f32 %v11366_v52, %v4935_v7  ;;  %12473 = vst [vmem:[#allocation30_spill] sm:$0xff] %v11539_v2  ;;  %v4970_v23 = vadd.f32 %v11366_v52, %v4934_v8  ;;  %v8939_v8 = vld [vmem:[#allocation2 + $0x30] sm:$0xf] }
 0x368   : > { %v5910_v33 = vsel %vm11060_vm13, %v5859_v57, %v5909_v37  ;;  %12475 = vst [vmem:[#allocation16_spill] sm:$0xff] %v11543_v46  ;;  %v11552_v57 = vpop.f32.mrf.mxu3 }
 0x369   : > { %5911 = vst [vmem:[#allocation2 + $0x3c] sm:$0xf] %v5910_v33  ;;  %v5003_v56 = vmax.f32 %v4971_v14, 0.0  ;;  %v6228_v14 = vrot.slane %v11547_v31, 5 }
 0x36a   : > { %7263 = vst [vmem:[#allocation2 + $0x24] sm:$0x1] %v7262_v35 }
 0x36b   : > { %v5023_v11 = vmax.f32 %v5001_v44, %v5003_v56  ;;  %7284 = vst [vmem:[#allocation2 + $0x24] sm:$0x4] %v7283_v28  ;;  %v6229_v13 = vsel %vm9572_vm10, %v8953_v38, %v6228_v14 }
 0x36c   : > { %v4890_v4 = vpop.f32.mrf.mxu0  ;;  %v11560_v34 = vld [vmem:[#allocation2 + $0x40] sm:$0x1] }
 0x36d   : > { %v5075_v37 = vrot.slane %v5023_v11, 2  ;;  %v5076_v17 = vrot.slane %v5023_v11, 4  ;;  %v5077_v7 = vrot.slane %v5023_v11, 6  ;;  %v8900_v21 = vrot.slane %v5023_v11, 9 }
 0x36e   : > { %v4936_v35 = vadd.f32 %v4890_v4, %v4538_v62  ;;  %v5937_v62 = vld [vmem:[#allocation2 + $0x30] sm:$0xf]  ;;  %v5002_v4 = vmax.f32 %v4970_v23, 0.0 }
 0x36f   : > { %v8901_v42 = vrot.slane %v5075_v37, 9  ;;  %v8902_v6 = vrot.slane %v5076_v17, 9  ;;  %v8903_v28 = vrot.slane %v5077_v7, 9  ;;  %v5373_v12 = vmax.f32 %v5023_v11, %v8900_v21 }
 0x370   : > { %v4972_v53 = vadd.f32 %v11366_v52, %v4936_v35  ;;  %v9246_v33 = vld [vmem:[#allocation2 + $0x38] sm:$0xf0]  ;;  %v6010_v14 = vshll.u32 %v5937_v62, 16 }
 0x371   : > { %v6191_v44 = vld [vmem:[#allocation2 + $0x3c] sm:$0xe]  ;;  %v5374_v39 = vmax.f32 %v5075_v37, %v8901_v42  ;;  %v5375_v46 = vmax.f32 %v5076_v17, %v8902_v6  ;;  %v5376_v20 = vmax.f32 %v5077_v7, %v8903_v28  ;;  %v5455_v3 = vadd.f32 %v11382_v43, %v5373_v12  ;;  %v11567_v12 = vpop.f32.mrf.mxu1 }
 0x372   : > { %v5004_v1 = vmax.f32 %v4972_v53, 0.0  ;;  %v8940_v18 = vor.u32 %v9246_v33, %v8939_v8  ;;  %v8954_v11 = vrot.slane %v6191_v44, 9  ;;  %v6248_v17 = vunpack.c.l.b16 %v6229_v13  ;;  %v11569_v53 = vpop.f32.mrf.mxu2  ;;  %v11573_v13 = vpop.f32.mrf.mxu3 }
 0x373   : > { %v5456_v21 = vadd.f32 %v10995_v10, %v5374_v39  ;;  %v5457_v35 = vadd.f32 %v10976_v30, %v5375_v46  ;;  %v5458_v25 = vadd.f32 %v10998_v55, %v5376_v20  ;;  %v5589_v38 = vpack.c.bf16 %v5455_v3, %v5455_v3 }
 0x374   : > { %v5024_v37 = vmax.f32 %v5002_v4, %v5004_v1  ;;  %8947 = vmatmul.msk.bf16.gmra.mxu2 %vm6076_vm11, %v8940_v18  ;;  %v6007_v7 = vshrl.u32 %v5937_v62, 16  ;;  %v6232_v28 = vrot.slane %v11560_v34, 5  ;;  %v6012_v26 = vrot.slane %v6010_v14, 5 }
 0x375   : > { %v5590_v42 = vpack.c.bf16 %v5456_v21, %v5456_v21  ;;  %v5591_v23 = vpack.c.bf16 %v5457_v35, %v5457_v35  ;;  %v5717_v6 = vunpack.c.l.b16 %v5589_v38  ;;  %v5592_v3 = vpack.c.bf16 %v5458_v25, %v5458_v25  ;;  %v5938_v35 = vld [vmem:[#allocation2 + $0x3c] sm:$0xf] }
 0x376   : > { %v5078_v33 = vrot.slane %v5024_v37, 2  ;;  %v5079_v46 = vrot.slane %v5024_v37, 4  ;;  %v5080_v44 = vrot.slane %v5024_v37, 6  ;;  %v8904_v20 = vrot.slane %v5024_v37, 9 }
 0x377   : > { %v5718_v1 = vunpack.c.l.b16 %v5590_v42  ;;  %v5719_v39 = vunpack.c.l.b16 %v5591_v23  ;;  %v6233_v18 = vsel %vm9572_vm10, %v8954_v11, %v6232_v28  ;;  %v5812_v38 = vrot.slane %v5717_v6, 7 }
 0x378   : > { %v8905_v8 = vrot.slane %v5078_v33, 9  ;;  %v8906_v62 = vrot.slane %v5079_v46, 9  ;;  %v8907_v4 = vrot.slane %v5080_v44, 9  ;;  %v5377_v21 = vmax.f32 %v5024_v37, %v8904_v20  ;;  %v11580_v20 = vpop.f32.mrf.mxu0 }
 0x379   : > { %v5813_v49 = vrot.slane %v5718_v1, 6  ;;  %v6009_v2 = vrot.slane %v6007_v7, 4  ;;  %v5720_v42 = vunpack.c.l.b16 %v5592_v3  ;;  %v5815_v23 = vrot.slane %v5719_v39, 5 }
 0x37a   : > { %v5378_v60 = vmax.f32 %v5078_v33, %v8905_v8  ;;  %v5379_v58 = vmax.f32 %v5079_v46, %v8906_v62  ;;  %v5380_v55 = vmax.f32 %v5080_v44, %v8907_v4  ;;  %v5459_v25 = vadd.f32 %v11005_v24, %v5377_v21  ;;  %v7264_v8 = vld [vmem:[#allocation2 + $0x30] sm:$0x1] }
 0x37b   : > { %v6249_v56 = vunpack.c.l.b16 %v6233_v18  ;;  %v6021_v11 = vshrl.u32 %v5938_v35, 16  ;;  %v5814_v28 = vsel %vm5743_vm4, %v5813_v49, %v5812_v38  ;;  %v6013_v33 = vor.u32 %v6012_v26, %v6009_v2  ;;  %v11590_v38 = vpop.f32.mrf.mxu3 }
 0x37c   : > { %v5460_v30 = vadd.f32 %v11016_v15, %v5378_v60  ;;  %v5461_v37 = vadd.f32 %v11012_v50, %v5379_v58  ;;  %v5462_v6 = vadd.f32 %v11022_v41, %v5380_v55  ;;  %v5593_v7 = vpack.c.bf16 %v5459_v25, %v5459_v25  ;;  %v11585_v58 = vpop.f32.mrf.mxu1  ;;  %v11587_v55 = vpop.f32.mrf.mxu2 }
 0x37d   : > { %v6254_v14 = vpack.c.b16 %v6249_v56, %v6248_v17  ;;  %v6016_v3 = vshll.u32 %v11547_v31, 16  ;;  %v5816_v39 = vsel %vm12478_vm1, %v5815_v23, %v5814_v28  ;;  %v6023_v49 = vrot.slane %v6021_v11, 4  ;;  %v5918_v17 = vld [vmem:[#allocation2 + $0x4c] sm:$0x1]  ;;  %v12480_v28 = vld [vmem:[#allocation14_spill] sm:$0xff]  ;;  %vm12491_vm1 = vmmov %vm12484_vm12 }
 0x37e   : > { %v5594_v46 = vpack.c.bf16 %v5460_v30, %v5460_v30  ;;  %v5595_v44 = vpack.c.bf16 %v5461_v37, %v5461_v37  ;;  %v5596_v1 = vpack.c.bf16 %v5462_v6, %v5462_v6  ;;  %v5721_v18 = vunpack.c.l.b16 %v5593_v7 }
 0x37f   : > { %8960 = vmatmul.msk.bf16.gmra.mxu3 %vm6076_vm11, %v6254_v14  ;;  %v6024_v60 = vshll.u32 %v5938_v35, 16  ;;  %v5817_v62 = vrot.slane %v5720_v42, 4  ;;  %v6014_v4 = vrot.slane %v6013_v33, 4  ;;  %v6030_v21 = vshll.u32 %v11560_v34, 16  ;;  %v7285_v42 = vld [vmem:[#allocation2 + $0x30] sm:$0x4] }
 0x380   : > { %v5722_v56 = vunpack.c.l.b16 %v5594_v46  ;;  %v5723_v26 = vunpack.c.l.b16 %v5595_v44  ;;  %v5724_v30 = vunpack.c.l.b16 %v5596_v1  ;;  %v5819_v2 = vrot.slane %v5721_v18, 3  ;;  %v5915_v46 = vld [vmem:[#allocation2 + $0x48] sm:$0xf]  ;;  %v11601_v1 = vld [vmem:[#allocation2 + $0x30] sm:$0xf] }
 0x381   : > { %v6026_v31 = vrot.slane %v6024_v60, 5  ;;  %v5818_v25 = vsel %vm12479_vm6, %v5817_v62, %v5816_v39  ;;  %v3598_v37 = vadd.f32 %v11425_v27, %v12480_v28  ;;  %v6018_v7 = vrot.slane %v6016_v3, 5  ;;  %v4895_v62 = vpop.f32.mrf.mxu0 }
 0x382   : > { %v5821_v35 = vrot.slane %v5722_v56, 2  ;;  %v5823_v23 = vrot.slane %v5723_v26, 1  ;;  %v5862_v11 = vpack.c.b16 %v5724_v30, %v5724_v30  ;;  %v5820_v6 = vsel %vm5752_vm15, %v5819_v2, %v5818_v25  ;;  %v11610_v56 = vld [vmem:[#allocation2 + $0x30] sm:$0xf]  ;;  %v12483_v30 = vld [vmem:[#allocation19_spill] sm:$0xff] }
 0x383   : > { %v6027_v14 = vor.u32 %v6026_v31, %v6023_v49  ;;  %v7265_v33 = vsel %vm11125_vm2, 0, %v7264_v8  ;;  %v6019_v27 = vsel %vm9629_vm7, %v6014_v4, %v6018_v7  ;;  %v6032_v3 = vrot.slane %v6030_v21, 5  ;;  %v11606_v49 = vld [vmem:[#allocation2 + $0x2c] sm:$0xf0] }
 0x384   : > { %v5822_v34 = vsel %vm12481_vm5, %v5821_v35, %v5820_v6  ;;  %v5919_v44 = vsel %vm9651_vm8, %v5862_v11, %v5918_v17  ;;  %v7286_v60 = vsel %vm11144_vm3, 0, %v7285_v42  ;;  %v3885_v26 = vadd.f32 %v11436_v22, %v3598_v37  ;;  %v11617_v4 = vld [vmem:[#allocation2 + $0x30] sm:$0xe]  ;;  %v8983_v22 = vld [vmem:[%s12273_s4 + $0x10] sm:$0xf]  ;;  %v11631_v11 = vpop.f32.mrf.mxu1  ;;  %v11633_v28 = vpop.f32.mrf.mxu2 }
 0x385   : > { %v5824_v39 = vsel %vm12482_vm9, %v5823_v23, %v5822_v34  ;;  %5920 = vst [vmem:[#allocation2 + $0x4c] sm:$0x1] %v5919_v44  ;;  %v6028_v18 = vrot.slane %v6027_v14, 4  ;;  %v3600_v2 = vadd.f32 %v11488_v36, %v12483_v30  ;;  %v11619_v31 = vld [vmem:[#allocation2 + $0x30] sm:$0xe]  ;;  %v6068_v35 = vunpack.c.l.b16 %v6019_v27 }
 0x386   : > { %v5861_v8 = vpack.c.b16 %v5824_v39, %v5824_v39  ;;  %v11621_v21 = vld [vmem:[#allocation2 + $0x30] sm:$0xf]  ;;  %v8996_v36 = vld [vmem:[%s12273_s4 + $0x14] sm:$0xf]  ;;  %v6545_v42 = vsel %vm12484_vm12, %v8983_v22, 0  ;;  %v4539_v7 = vadd.f32 %v11454_v5, %v3885_v26  ;;  %vm12499_vm6 = vcmask 124928  }
 0x387   : > { %v6033_v17 = vsel %vm9629_vm7, %v6028_v18, %v6032_v3  ;;  %7266 = vst [vmem:[#allocation2 + $0x30] sm:$0x1] %v7265_v33  ;;  %v6667_v6 = vsel %vm12485_vm14, %v8996_v36, 0  ;;  %v3887_v14 = vadd.f32 %v11490_v54, %v3600_v2  ;;  %6554 = vmatpush.bf16.msrb.mxu2 %v6545_v42  ;;  %v12486_v33 = vld [vmem:[#allocation18_spill] sm:$0xff]  ;;  %v12487_v18 = vld [vmem:[#allocation17_spill] sm:$0xff]  ;;  %vm12500_vm5 = vcmask 1043459  }
 0x388   : > { %v5916_v25 = vsel %vm11060_vm13, %v5861_v8, %v5915_v46  ;;  %v6069_v23 = vunpack.c.l.b16 %v6033_v17  ;;  %7287 = vst [vmem:[#allocation2 + $0x30] sm:$0x4] %v7286_v60  ;;  %6676 = vmatpush.bf16.msrb.mxu3 %v6667_v6  ;;  %v3599_v34 = vadd.f32 %v11474_v59, %v12486_v33  ;;  %v11641_v46 = vpop.f32.mrf.mxu3  ;;  %v4937_v44 = vadd.f32 %v11580_v20, %v4539_v7  ;;  %v12488_v59 = vld [vmem:[#allocation21_spill] sm:$0xff]  ;;  %v8962_v36 = vld [vmem:[%s12273_s4 + $0xc] sm:$0xf] }
 0x389   : > { %5917 = vst [vmem:[#allocation2 + $0x48] sm:$0xf] %v5916_v25  ;;  %v4541_v39 = vadd.f32 %v11493_v40, %v3887_v14  ;;  %v3601_v5 = vadd.f32 %v11507_v16, %v12487_v18  ;;  %v3602_v30 = vadd.f32 %v11545_v63, %v12488_v59  ;;  %vm12501_vm9 = vcmask 1044484  }
 0x38a   : > { %v6074_v37 = vpack.c.b16 %v6069_v23, %v6068_v35  ;;  %v3886_v27 = vadd.f32 %v11476_v45, %v3599_v34  ;;  %v4973_v54 = vadd.f32 %v11366_v52, %v4937_v44  ;;  %v12489_v45 = vld [vmem:[#allocation22_spill] sm:$0xff]  ;;  %v12492_v44 = vld [vmem:[#allocation20_spill] sm:$0xff]  ;;  %vm12503_vm12 = vcmask 1046534  }
 0x38b   : > { %v3888_v40 = vadd.f32 %v11509_v47, %v3601_v5  ;;  %v3603_v25 = vadd.f32 %v11567_v12, %v12489_v45  ;;  %v3889_v42 = vadd.f32 %v11550_v19, %v3602_v30  ;;  %vm12504_vm14 = vcmask 1047559  }
 0x38c   : > { %8927 = vmatmul.msk.bf16.gmra.mxu1 %vm6076_vm11, %v6074_v37  ;;  %v6166_v8 = vpop.f32.mrf.mxu2  ;;  %v4540_v20 = vadd.f32 %v11479_v29, %v3886_v27  ;;  %v5005_v35 = vmax.f32 %v4973_v54, 0.0  ;;  %v6351_v37 = vsel %vm12491_vm1, %v8962_v36, 0 }
 0x38d   : > { %6360 = vmatpush.bf16.msrb.mxu1 %v6351_v37  ;;  %v4542_v47 = vadd.f32 %v11517_v51, %v3888_v40  ;;  %v3890_v12 = vadd.f32 %v11569_v53, %v3603_v25  ;;  %v11670_v18 = vadd.f32 %v11552_v57, %v3889_v42  ;;  %v12494_v40 = vld [vmem:[#allocation24_spill] sm:$0xff]  ;;  %v12495_v25 = vld [vmem:[#allocation23_spill] sm:$0xff] }
 0x38e   : > { %v4938_v63 = vadd.f32 %v4895_v62, %v4540_v20 }
 0x38f   : > { %v11673_v51 = vadd.f32 %v11573_v13, %v3890_v12  ;;  %v3605_v13 = vadd.f32 %v11631_v11, %v12494_v40  ;;  %v11699_v40 = vld [vmem:[#allocation2 + $0x3c] sm:$0xf] }
 0x390   : > { %v4898_v3 = vpop.f32.mrf.mxu0  ;;  %v6280_v16 = vpop.f32.mrf.mxu3  ;;  %v4974_v62 = vadd.f32 %v11366_v52, %v4938_v63 }
 0x391   : > { %v4939_v60 = vadd.f32 %v4898_v3, %v4541_v39  ;;  %v3604_v39 = vadd.f32 %v11585_v58, %v12492_v44 }
 0x392   : > { %v6102_v26 = vpop.f32.mrf.mxu1  ;;  %v5006_v57 = vmax.f32 %v4974_v62, 0.0 }
 0x393   : > { %v6167_v2 = vadd.f32 %v6166_v8, %v6102_v26  ;;  %v4975_v17 = vadd.f32 %v11366_v52, %v4939_v60  ;;  %v12493_v60 = vld [vmem:[#allocation28_spill] sm:$0xff] }
 0x394   : > { %v6407_v8 = vshrl.u32 %v12493_v60, 16  ;;  %v6410_v30 = vshll.u32 %v12493_v60, 16 }
 0x395   : > { %v11657_v23 = vadd.f32 %v6280_v16, %v6167_v2  ;;  %v5007_v22 = vmax.f32 %v4975_v17, 0.0  ;;  %v3891_v2 = vadd.f32 %v11587_v55, %v3604_v39  ;;  %v12496_v16 = vld [vmem:[#allocation25_spill] sm:$0xff] }
 0x396   : > { %v11687_v37 = vrot.slane %v6407_v8, 4  ;;  %v12497_v55 = vld [vmem:[#allocation33_spill] sm:$0xff]  ;;  %v11693_v8 = vld [vmem:[#allocation2 + $0x1c] sm:$0x1] }
 0x397   : > { %12490 = vst [vmem:[#allocation31_spill] sm:$0xff] %v11657_v23  ;;  %v5025_v29 = vmax.f32 %v5005_v35, %v5007_v22  ;;  %v6421_v42 = vshrl.u32 %v12497_v55, 16  ;;  %v6424_v12 = vshll.u32 %v12497_v55, 16  ;;  %v11706_v55 = vld [vmem:[#allocation2 + $0x3c] sm:$0xe] }
 0x398   : > { %v4900_v6 = vpop.f32.mrf.mxu0 }
 0x399   : > { %v5081_v7 = vrot.slane %v5025_v29, 2  ;;  %v5082_v14 = vrot.slane %v5025_v29, 4  ;;  %v5083_v33 = vrot.slane %v5025_v29, 6  ;;  %v8908_v34 = vrot.slane %v5025_v29, 9 }
 0x39a   : > { %v4940_v27 = vadd.f32 %v4900_v6, %v4542_v47  ;;  %v6412_v47 = vrot.slane %v6410_v30, 5  ;;  %v11781_v32 = vpop.f32.mrf.mxu1 }
 0x39b   : > { %v8909_v19 = vrot.slane %v5081_v7, 9  ;;  %v8910_v5 = vrot.slane %v5082_v14, 9  ;;  %v8911_v3 = vrot.slane %v5083_v33, 9  ;;  %v5381_v53 = vmax.f32 %v5025_v29, %v8908_v34  ;;  %12508 = vst [vmem:[#allocation9_spill] sm:$0xff] %v11781_v32 }
 0x39c   : > { %v4976_v54 = vadd.f32 %v11366_v52, %v4940_v27 }
 0x39d   : > { %v5382_v26 = vmax.f32 %v5081_v7, %v8909_v19  ;;  %v5383_v59 = vmax.f32 %v5082_v14, %v8910_v5  ;;  %v5384_v58 = vmax.f32 %v5083_v33, %v8911_v3  ;;  %v5463_v17 = vadd.f32 %v11382_v43, %v5381_v53  ;;  %v11691_v5 = vld [vmem:[#allocation2 + $0x10] sm:$0x1] }
 0x39e   : > { %v5008_v20 = vmax.f32 %v4976_v54, 0.0  ;;  %v6423_v3 = vrot.slane %v6421_v42, 4  ;;  %v11708_v42 = vld [vmem:[#allocation2 + $0x38] sm:$0xf0] }
 0x39f   : > { %v5464_v45 = vadd.f32 %v10995_v10, %v5382_v26  ;;  %v5465_v52 = vadd.f32 %v12495_v25, %v5383_v59  ;;  %v5466_v35 = vadd.f32 %v12496_v16, %v5384_v58  ;;  %v5597_v22 = vpack.c.bf16 %v5463_v17, %v5463_v17  ;;  %v11695_v59 = vld [vmem:[#allocation2 + $0x3c] sm:$0xf] }
 0x3a0   : > { %v5026_v36 = vmax.f32 %v5006_v57, %v5008_v20  ;;  %v11685_v63 = vpop.f32.mrf.mxu0  ;;  %v6426_v26 = vrot.slane %v6424_v12, 5  ;;  %v11697_v20 = vld [vmem:[#allocation2 + $0x3c] sm:$0xe]  ;;  %v6463_v48 = vshrl.u32 %v11695_v59, 16 }
 0x3a1   : > { %v5598_v29 = vpack.c.bf16 %v5464_v45, %v5464_v45  ;;  %v5599_v43 = vpack.c.bf16 %v5465_v52, %v5465_v52  ;;  %v5725_v11 = vunpack.c.l.b16 %v5597_v22  ;;  %v5600_v33 = vpack.c.bf16 %v5466_v35, %v5466_v35 }
 0x3a2   : > { %v5084_v6 = vrot.slane %v5026_v36, 2  ;;  %v5085_v7 = vrot.slane %v5026_v36, 4  ;;  %v5086_v14 = vrot.slane %v5026_v36, 6  ;;  %v8912_v39 = vrot.slane %v5026_v36, 9 }
 0x3a3   : > { %v5726_v34 = vunpack.c.l.b16 %v5598_v29  ;;  %v5727_v44 = vunpack.c.l.b16 %v5599_v43  ;;  %v5825_v53 = vrot.slane %v5725_v11, 7  ;;  %v4545_v45 = vadd.f32 %v11590_v38, %v3891_v2  ;;  %v5939_v2 = vld [vmem:[#allocation2 + $0x48] sm:$0xf] }
 0x3a4   : > { %v8913_v62 = vrot.slane %v5084_v6, 9  ;;  %v8914_v27 = vrot.slane %v5085_v7, 9  ;;  %v8915_v19 = vrot.slane %v5086_v14, 9  ;;  %v5385_v60 = vmax.f32 %v5026_v36, %v8912_v39  ;;  %v11704_v36 = vld [vmem:[#allocation2 + $0x3c] sm:$0xf] }
 0x3a5   : > { %v5826_v54 = vrot.slane %v5726_v34, 6  ;;  %v5828_v58 = vrot.slane %v5727_v44, 5  ;;  %v3892_v52 = vadd.f32 %v11633_v28, %v3605_v13  ;;  %v5728_v35 = vunpack.c.l.b16 %v5600_v33 }
 0x3a6   : > { %v5386_v30 = vmax.f32 %v5084_v6, %v8913_v62  ;;  %v5387_v57 = vmax.f32 %v5085_v7, %v8914_v27  ;;  %v5388_v17 = vmax.f32 %v5086_v14, %v8915_v19  ;;  %v5467_v22 = vadd.f32 %v11005_v24, %v5385_v60 }
 0x3a7   : > { %v5827_v29 = vsel %vm5743_vm4, %v5826_v54, %v5825_v53  ;;  %v12498_v28 = vmov 0   ;;  %v6413_v6 = vor.u32 %v6412_v47, %v11687_v37  ;;  %v6416_v7 = vshll.u32 %v11691_v5, 16 }
 0x3a8   : > { %v5468_v43 = vadd.f32 %v11016_v15, %v5386_v30  ;;  %v5469_v12 = vadd.f32 %v11012_v50, %v5387_v57  ;;  %v5470_v11 = vadd.f32 %v11022_v41, %v5388_v17  ;;  %v4905_v38 = vpop.f32.mrf.mxu0  ;;  %7249 = vst.msk [vmem:[#allocation2 + $0x3c] sm:$0x7] %vm12499_vm6, %v12498_v28  ;;  %v5601_v13 = vpack.c.bf16 %v5467_v22, %v5467_v22  ;;  %v5924_v22 = vld [vmem:[#allocation2 + $0x58] sm:$0x1]  ;;  %vm12511_vm6 = vmmov %vm12500_vm5 }
 0x3a9   : > { %v6427_v14 = vor.u32 %v6426_v26, %v6423_v3  ;;  %v6430_v39 = vshll.u32 %v11693_v8, 16  ;;  %v5829_v62 = vsel %vm12500_vm5, %v5828_v58, %v5827_v29  ;;  %v6035_v19 = vshrl.u32 %v5939_v2, 16  ;;  %vm12512_vm5 = vmmov %vm12491_vm1 }
 0x3aa   : > { %v5602_v33 = vpack.c.bf16 %v5468_v43, %v5468_v43  ;;  %v5603_v34 = vpack.c.bf16 %v5469_v12, %v5469_v12  ;;  %v5604_v44 = vpack.c.bf16 %v5470_v11, %v5470_v11  ;;  %v5729_v27 = vunpack.c.l.b16 %v5601_v13 }
 0x3ab   : > { %v6038_v53 = vshll.u32 %v5939_v2, 16  ;;  %v5830_v54 = vrot.slane %v5728_v35, 4  ;;  %v4941_v37 = vadd.f32 %v11685_v63, %v11670_v18  ;;  %v6414_v47 = vrot.slane %v6413_v6, 4  ;;  %v12502_v35 = vld [vmem:[#allocation29_spill] sm:$0xff]  ;;  %v5948_v18 = vld [vmem:[#allocation2 + $0x4c] sm:$0x1] }
 0x3ac   : > { %v5730_v60 = vunpack.c.l.b16 %v5602_v33  ;;  %v5731_v30 = vunpack.c.l.b16 %v5603_v34  ;;  %v5732_v57 = vunpack.c.l.b16 %v5604_v44  ;;  %v5832_v17 = vrot.slane %v5729_v27, 3 }
 0x3ad   : > { %v6428_v3 = vrot.slane %v6427_v14, 4  ;;  %v5831_v26 = vsel %vm12501_vm9, %v5830_v54, %v5829_v62  ;;  %v6418_v29 = vrot.slane %v6416_v7, 5  ;;  %v6432_v2 = vrot.slane %v6430_v39, 5  ;;  %v5921_v62 = vld [vmem:[#allocation2 + $0x54] sm:$0xf]  ;;  %vm12513_vm9 = vmmov %vm12491_vm1 }
 0x3ae   : > { %v5834_v43 = vrot.slane %v5730_v60, 2  ;;  %v5836_v12 = vrot.slane %v5731_v30, 1  ;;  %v5864_v11 = vpack.c.b16 %v5732_v57, %v5732_v57  ;;  %v5833_v58 = vsel %vm5752_vm15, %v5832_v17, %v5831_v26  ;;  %v9345_v7 = vld [vmem:[%s12271_s2] ss:$0 sm:$0xff]  ;;  %v6192_v54 = vld [vmem:[#allocation2 + $0x48] sm:$0xe] }
 0x3af   : > { %v6037_v63 = vrot.slane %v6035_v19, 4  ;;  %v6040_v6 = vrot.slane %v6038_v53, 5  ;;  %v4546_v14 = vadd.f32 %v11641_v46, %v3892_v52  ;;  %v4977_v39 = vadd.f32 %v9345_v7, %v4941_v37  ;;  %v12505_v53 = vld [vmem:[#allocation13_spill] sm:$0xff] }
 0x3b0   : > { %v5835_v13 = vsel %vm12503_vm12, %v5834_v43, %v5833_v58  ;;  %v5925_v33 = vsel %vm9651_vm8, %v5864_v11, %v5924_v22  ;;  %v4908_v34 = vpop.f32.mrf.mxu0  ;;  %v4942_v30 = vadd.f32 %v4905_v38, %v11673_v51  ;;  %v6419_v19 = vsel %vm9629_vm7, %v6414_v47, %v6418_v29 }
 0x3b1   : > { %v5837_v44 = vsel %vm12504_vm14, %v5836_v12, %v5835_v13  ;;  %5926 = vst [vmem:[#allocation2 + $0x58] sm:$0x1] %v5925_v33  ;;  %v4943_v27 = vadd.f32 %v4908_v34, %v4545_v45  ;;  %v6433_v46 = vsel %vm9629_vm7, %v6428_v3, %v6432_v2  ;;  %v6435_v57 = vshrl.u32 %v12505_v53, 16  ;;  %v12506_v12 = vld [vmem:[#allocation35_spill] sm:$0xff] }
 0x3b2   : > { %v5863_v60 = vpack.c.b16 %v5837_v44, %v5837_v44  ;;  %v6449_v17 = vshrl.u32 %v11601_v1, 16  ;;  %v6452_v22 = vshll.u32 %v11601_v1, 16  ;;  %v8955_v37 = vrot.slane %v6192_v54, 9 }
 0x3b3   : > { %v4979_v52 = vadd.f32 %v9345_v7, %v4943_v27  ;;  %v6041_v26 = vor.u32 %v6040_v6, %v6037_v63  ;;  %v6044_v43 = vshll.u32 %v5948_v18, 16  ;;  %v5009_v51 = vmax.f32 %v4977_v39, 0.0 }
 0x3b4   : > { %v5922_v45 = vsel %vm11060_vm13, %v5863_v60, %v5921_v62  ;;  %v11743_v47 = vunpack.c.l.b16 %v6419_v19  ;;  %v4978_v11 = vadd.f32 %v9345_v7, %v4942_v30  ;;  %v6236_v58 = vrot.slane %v5948_v18, 5 }
 0x3b5   : > { %5923 = vst [vmem:[#allocation2 + $0x54] sm:$0xf] %v5922_v45  ;;  %v5011_v38 = vmax.f32 %v4979_v52, 0.0  ;;  %v11746_v29 = vunpack.c.l.b16 %v6433_v46  ;;  %v11749_v13 = vrot.slane %v6435_v57, 4  ;;  %v11752_v34 = vrot.slane %v6449_v17, 4 }
 0x3b6   : > { %v11758_v62 = vsel %vm9572_vm10, %v8955_v37, %v6236_v58  ;;  %v11760_v39 = vrot.slane %v6041_v26, 4  ;;  %v11762_v18 = vrot.slane %v6044_v43, 5  ;;  %v11764_v27 = vrot.slane %v6452_v22, 5  ;;  %v9022_v46 = vld [vmem:[%s12273_s4 + $0x1c] sm:$0xf] }
 0x3b7   : > { %v5027_v1 = vmax.f32 %v5009_v51, %v5011_v38  ;;  %v5010_v52 = vmax.f32 %v4978_v11, 0.0  ;;  %v6943_v45 = vsel %vm12491_vm1, %v9022_v46, 0  ;;  %v6250_v28 = vunpack.c.l.b16 %v11758_v62 }
 0x3b8   : > { %v4910_v63 = vpop.f32.mrf.mxu0  ;;  %v11754_v6 = vld [vmem:[#allocation2 + $0x58] sm:$0x1]  ;;  %6952 = vmatpush.bf16.msra.mxu2 %v6943_v45  ;;  %vm12515_vm12 = vcmask 1044484   ;;  %vm12519_vm14 = vcmask 1046534   ;;  %vm12543_vm1 = vcmask 1043458  }
 0x3b9   : > { %v5087_v54 = vrot.slane %v5027_v1, 2  ;;  %v5088_v60 = vrot.slane %v5027_v1, 4  ;;  %v5089_v30 = vrot.slane %v5027_v1, 6  ;;  %v8916_v19 = vrot.slane %v5027_v1, 9 }
 0x3ba   : > { %v4944_v57 = vadd.f32 %v4910_v63, %v4546_v14  ;;  %v6240_v17 = vrot.slane %v11754_v6, 5 }
 0x3bb   : > { %v8917_v37 = vrot.slane %v5087_v54, 9  ;;  %v8918_v26 = vrot.slane %v5088_v60, 9  ;;  %v8919_v43 = vrot.slane %v5089_v30, 9  ;;  %v5389_v51 = vmax.f32 %v5027_v1, %v8916_v19  ;;  %v8943_v19 = vld [vmem:[#allocation2 + $0x48] sm:$0xf] }
 0x3bc   : > { %v4980_v22 = vadd.f32 %v9345_v7, %v4944_v57  ;;  %v9247_v38 = vld [vmem:[#allocation2 + $0x50] sm:$0xf0]  ;;  %v9346_v7 = vld [vmem:[%s12272_s3] ss:$0 sm:$0xff] }
 0x3bd   : > { %v6193_v58 = vld [vmem:[#allocation2 + $0x54] sm:$0xe]  ;;  %v5390_v63 = vmax.f32 %v5087_v54, %v8917_v37  ;;  %v5391_v46 = vmax.f32 %v5088_v60, %v8918_v26  ;;  %v5392_v2 = vmax.f32 %v5089_v30, %v8919_v43  ;;  %v5471_v1 = vadd.f32 %v9346_v7, %v5389_v51  ;;  %v11786_v30 = vpop.f32.mrf.mxu2 }
 0x3be   : > { %v5940_v3 = vld [vmem:[#allocation2 + $0x54] sm:$0xf]  ;;  %v5012_v57 = vmax.f32 %v4980_v22, 0.0  ;;  %v8944_v62 = vor.u32 %v9247_v38, %v8943_v19  ;;  %v8956_v45 = vrot.slane %v6193_v58, 9  ;;  %12509 = vst [vmem:[#allocation10_spill] sm:$0xff] %v11786_v30  ;;  %v6058_v51 = vshll.u32 %v11754_v6, 16 }
 0x3bf   : > { %v6049_v33 = vshrl.u32 %v5940_v3, 16  ;;  %v5472_v14 = vadd.f32 %v10995_v10, %v5390_v63  ;;  %v5473_v23 = vadd.f32 %v12495_v25, %v5391_v46  ;;  %v5474_v54 = vadd.f32 %v12496_v16, %v5392_v2  ;;  %v11792_v63 = vpop.f32.mrf.mxu3 }
 0x3c0   : > { %v5605_v60 = vpack.c.bf16 %v5471_v1, %v5471_v1  ;;  %v5028_v37 = vmax.f32 %v5010_v52, %v5012_v57  ;;  %8948 = vmatmul.msk.bf16.gmra.mxu2 %vm6076_vm11, %v8944_v62  ;;  %v6241_v26 = vsel %vm9572_vm10, %v8956_v45, %v6240_v17  ;;  %12510 = vst [vmem:[#allocation32_spill] sm:$0xff] %v11792_v63  ;;  %v6052_v19 = vshll.u32 %v5940_v3, 16  ;;  %v9035_v3 = vld [vmem:[%s12273_s4 + $0x20] sm:$0xf] }
 0x3c1   : > { %v6051_v43 = vrot.slane %v6049_v33, 4  ;;  %v5606_v22 = vpack.c.bf16 %v5472_v14, %v5472_v14  ;;  %v5607_v38 = vpack.c.bf16 %v5473_v23, %v5473_v23  ;;  %v5608_v58 = vpack.c.bf16 %v5474_v54, %v5474_v54 }
 0x3c2   : > { %v5733_v10 = vunpack.c.l.b16 %v5605_v60  ;;  %v5090_v25 = vrot.slane %v5028_v37, 2  ;;  %v5091_v16 = vrot.slane %v5028_v37, 4  ;;  %v5092_v2 = vrot.slane %v5028_v37, 6 }
 0x3c3   : > { %v8920_v46 = vrot.slane %v5028_v37, 9  ;;  %v5734_v7 = vunpack.c.l.b16 %v5606_v22  ;;  %v5735_v52 = vunpack.c.l.b16 %v5607_v38  ;;  %v5736_v1 = vunpack.c.l.b16 %v5608_v58 }
 0x3c4   : > { %v8921_v57 = vrot.slane %v5090_v25, 9  ;;  %v8922_v62 = vrot.slane %v5091_v16, 9  ;;  %v8923_v17 = vrot.slane %v5092_v2, 9  ;;  %v5838_v45 = vrot.slane %v5733_v10, 7 }
 0x3c5   : > { %v5393_v33 = vmax.f32 %v5028_v37, %v8920_v46  ;;  %v5839_v6 = vrot.slane %v5734_v7, 6  ;;  %v5841_v14 = vrot.slane %v5735_v52, 5  ;;  %v6251_v23 = vunpack.c.l.b16 %v6241_v26 }
 0x3c6   : > { %v5394_v54 = vmax.f32 %v5090_v25, %v8921_v57  ;;  %v5395_v60 = vmax.f32 %v5091_v16, %v8922_v62  ;;  %v5396_v11 = vmax.f32 %v5092_v2, %v8923_v17  ;;  %v5843_v32 = vrot.slane %v5736_v1, 4  ;;  %v6171_v25 = vpop.f32.mrf.mxu2 }
 0x3c7   : > { %v5475_v63 = vadd.f32 %v11005_v24, %v5393_v33  ;;  %v5840_v30 = vsel %vm5743_vm4, %v5839_v6, %v5838_v45  ;;  %v6255_v22 = vpack.c.b16 %v6251_v23, %v6250_v28  ;;  %v6107_v38 = vpop.f32.mrf.mxu1  ;;  %v6054_v58 = vrot.slane %v6052_v19, 5  ;;  %v9001_v24 = vld [vmem:[%s12273_s4 + $0x18] sm:$0xf]  ;;  %v6285_v19 = vpop.f32.mrf.mxu3  ;;  %v5930_v6 = vld [vmem:[#allocation2 + $0x64] sm:$0x1] }
 0x3c8   : > { %v5476_v37 = vadd.f32 %v11016_v15, %v5394_v54  ;;  %v5477_v10 = vadd.f32 %v11012_v50, %v5395_v60  ;;  %v5478_v26 = vadd.f32 %v11022_v41, %v5396_v11  ;;  %v6060_v16 = vrot.slane %v6058_v51, 5 }
 0x3c9   : > { %v5842_v28 = vsel %vm12511_vm6, %v5841_v14, %v5840_v30  ;;  %v5609_v2 = vpack.c.bf16 %v5475_v63, %v5475_v63  ;;  %8961 = vmatmul.msk.bf16.gmra.mxu3 %vm6076_vm11, %v6255_v22  ;;  %v6172_v46 = vadd.f32 %v6171_v25, %v6107_v38  ;;  %v6055_v7 = vor.u32 %v6054_v58, %v6051_v43 }
 0x3ca   : > { %v5610_v52 = vpack.c.bf16 %v5476_v37, %v5476_v37  ;;  %v5611_v1 = vpack.c.bf16 %v5477_v10, %v5477_v10  ;;  %v5612_v15 = vpack.c.bf16 %v5478_v26, %v5478_v26  ;;  %v7065_v50 = vsel %vm12512_vm5, %v9035_v3, 0  ;;  %v6397_v3 = vld [vmem:[#allocation2 + $0x34] sm:$0x1] }
 0x3cb   : > { %v5737_v41 = vunpack.c.l.b16 %v5609_v2  ;;  %v11808_v11 = vadd.f32 %v6285_v19, %v6172_v46  ;;  %v6056_v51 = vrot.slane %v6055_v7, 4  ;;  %7074 = vmatpush.bf16.msra.mxu3 %v7065_v50  ;;  %v6749_v57 = vsel %vm12513_vm9, %v9001_v24, 0 }
 0x3cc   : > { %v5738_v62 = vunpack.c.l.b16 %v5610_v52  ;;  %v5739_v30 = vunpack.c.l.b16 %v5611_v1  ;;  %v5740_v63 = vunpack.c.l.b16 %v5612_v15  ;;  %6758 = vmatpush.bf16.msra.mxu1 %v6749_v57  ;;  %v12514_v17 = vshll.u32 %v12505_v53, 16  ;;  %v6400_v15 = vld [vmem:[#allocation2 + $0x48] sm:$0xf] }
 0x3cd   : > { %v5844_v33 = vsel %vm12515_vm12, %v5843_v32, %v5842_v28  ;;  %v5845_v45 = vrot.slane %v5737_v41, 3  ;;  %v6061_v14 = vsel %vm9629_vm7, %v6056_v51, %v6060_v16  ;;  %v12516_v23 = vsel %vm9629_vm7, %v11760_v39, %v11762_v18 }
 0x3ce   : > { %v6440_v43 = vrot.slane %v12514_v17, 5  ;;  %v6070_v54 = vunpack.c.l.b16 %v12516_v23  ;;  %v5847_v60 = vrot.slane %v5738_v62, 2  ;;  %v5849_v22 = vrot.slane %v5739_v30, 1 }
 0x3cf   : > { %v5866_v38 = vpack.c.b16 %v5740_v63, %v5740_v63  ;;  %v6071_v58 = vunpack.c.l.b16 %v6061_v14  ;;  %v5846_v53 = vsel %vm5752_vm15, %v5845_v45, %v5844_v33  ;;  %v6610_v32 = vrot.slane %v11691_v5, 5  ;;  %v6395_v5 = vld [vmem:[#allocation2 + $0x28] sm:$0x1] }
 0x3d0   : > { %v12517_v37 = vrot.slane %v11693_v8, 5  ;;  %v12518_v10 = vrot.slane %v12506_v12, 9  ;;  %v6455_v39 = vor.u32 %v11764_v27, %v11752_v34  ;;  %v5848_v18 = vsel %vm12519_vm14, %v5847_v60, %v5846_v53  ;;  %v5927_v12 = vld [vmem:[#allocation2 + $0x60] sm:$0xf]  ;;  %vm12548_vm14 = vmmov %vm12511_vm6 }
 0x3d1   : > { %v5931_v25 = vsel %vm9651_vm8, %v5866_v38, %v5930_v6  ;;  %v6075_v16 = vpack.c.b16 %v6071_v58, %v6070_v54  ;;  %v12520_v24 = vpack.c.b16 %v11746_v29, %v11743_v47  ;;  %vm12521_vm15 = vcmask 1047559   ;;  %v12523_v6 = vld [vmem:[#allocation30_spill] sm:$0xff]  ;;  %v6401_v38 = vld [vmem:[#allocation2 + $0x4c] sm:$0x1] }
 0x3d2   : > { %v6615_v26 = vsel %vm9572_vm10, %v12518_v10, %v12517_v37  ;;  %v5850_v8 = vsel %vm12521_vm15, %v5849_v22, %v5848_v18  ;;  %5932 = vst [vmem:[#allocation2 + $0x64] sm:$0x1] %v5931_v25  ;;  %v12522_v28 = vrot.slane %v12502_v35, 9  ;;  %v6441_v27 = vor.u32 %v6440_v43, %v11749_v13  ;;  %v12524_v37 = vld [vmem:[#allocation26_spill] sm:$0xff] }
 0x3d3   : > { %8984 = vmatmul.msk.bf16.vlgmr.msrb.gmra.mxu2 %vm6076_vm11, %v12520_v24  ;;  %v6458_v2 = vshll.u32 %v6397_v3, 16  ;;  %v5865_v46 = vpack.c.b16 %v5850_v8, %v5850_v8  ;;  %8928 = vmatmul.msk.bf16.gmra.mxu1 %vm6076_vm11, %v6075_v16  ;;  %v6643_v7 = vunpack.c.l.b16 %v6615_v26  ;;  %v6444_v47 = vshll.u32 %v6395_v5, 16 }
 0x3d4   : > { %v6611_v34 = vsel %vm9572_vm10, %v12522_v28, %v6610_v32  ;;  %v6456_v29 = vrot.slane %v6455_v39, 4  ;;  %v6442_v19 = vrot.slane %v6441_v27, 4  ;;  %v6477_v51 = vshrl.u32 %v6400_v15, 16 }
 0x3d5   : > { %v5928_v52 = vsel %vm11060_vm13, %v5865_v46, %v5927_v12  ;;  %v6642_v1 = vunpack.c.l.b16 %v6611_v34  ;;  %v6460_v35 = vrot.slane %v6458_v2, 5  ;;  %v6446_v41 = vrot.slane %v6444_v47, 5  ;;  %v6402_v34 = vld [vmem:[#allocation2 + $0x54] sm:$0xf] }
 0x3d6   : > { %5929 = vst [vmem:[#allocation2 + $0x60] sm:$0xf] %v5928_v52  ;;  %v6480_v57 = vshll.u32 %v6400_v15, 16  ;;  %v6466_v30 = vshll.u32 %v11695_v59, 16  ;;  %v8991_v17 = vrot.slane %v11617_v4, 9  ;;  %v6479_v43 = vrot.slane %v6477_v51, 4 }
 0x3d7   : > { %v6650_v50 = vpack.c.b16 %v6643_v7, %v6642_v1  ;;  %v6461_v13 = vsel %vm9629_vm7, %v6456_v29, %v6460_v35  ;;  %v6447_v62 = vsel %vm9629_vm7, %v6442_v19, %v6446_v41  ;;  %v8990_v14 = vrot.slane %v12523_v6, 9  ;;  %v12525_v59 = vld [vmem:[#allocation12_spill] sm:$0xff]  ;;  %v6399_v4 = vld [vmem:[#allocation2 + $0x40] sm:$0x1]  ;;  %v6403_v6 = vld [vmem:[#allocation2 + $0x58] sm:$0x1] }
 0x3d8   : > { %v6523_v63 = vunpack.c.l.b16 %v6461_v13  ;;  %v6482_v33 = vrot.slane %v6480_v57, 5  ;;  %v6522_v45 = vunpack.c.l.b16 %v6447_v62  ;;  %v6622_v23 = vrot.slane %v6397_v3, 5  ;;  %v6589_v29 = vld [vmem:[#allocation2 + $0x48] sm:$0xe] }
 0x3d9   : > { %8997 = vmatmul.msk.bf16.vlgmr.msrb.gmra.mxu3 %vm6076_vm11, %v6650_v50  ;;  %v6465_v54 = vrot.slane %v6463_v48, 4  ;;  %v6468_v60 = vrot.slane %v6466_v30, 5  ;;  %v6618_v58 = vrot.slane %v6395_v5, 5  ;;  %v8966_v10 = vor.u32 %v12525_v59, %v12524_v37  ;;  %v6405_v30 = vld [vmem:[#allocation2 + $0x64] sm:$0x1] }
 0x3da   : > { %v6529_v22 = vpack.c.b16 %v6523_v63, %v6522_v45  ;;  %v6623_v53 = vsel %vm9572_vm10, %v8991_v17, %v6622_v23  ;;  %v6483_v32 = vor.u32 %v6482_v33, %v6479_v43  ;;  %v6486_v3 = vshll.u32 %v6401_v38, 16  ;;  %v12526_v17 = vld [vmem:[#allocation15_spill] sm:$0xff] }
 0x3db   : > { %v6619_v26 = vsel %vm9572_vm10, %v8990_v14, %v6618_v58  ;;  %v6469_v39 = vor.u32 %v6468_v60, %v6465_v54  ;;  %v6645_v18 = vunpack.c.l.b16 %v6623_v53  ;;  %v6472_v25 = vshll.u32 %v6399_v4, 16  ;;  %v12527_v53 = vld [vmem:[#allocation11_spill] sm:$0xff] }
 0x3dc   : > { %v6484_v16 = vrot.slane %v6483_v32, 4  ;;  %v6644_v24 = vunpack.c.l.b16 %v6619_v26  ;;  %v6488_v12 = vrot.slane %v6486_v3, 5  ;;  %v6491_v52 = vshrl.u32 %v6402_v34, 16  ;;  %v12528_v3 = vld [vmem:[#allocation34_spill] sm:$0xff] }
 0x3dd   : > { %v6404_v5 = vld [vmem:[#allocation2 + $0x60] sm:$0xf]  ;;  %v6470_v8 = vrot.slane %v6469_v39, 4  ;;  %v6474_v27 = vrot.slane %v6472_v25, 5  ;;  %v6494_v1 = vshll.u32 %v6402_v34, 16  ;;  %v8993_v41 = vrot.slane %v6589_v29, 9 }
 0x3de   : > { %v6651_v28 = vpack.c.b16 %v6645_v18, %v6644_v24  ;;  %v6489_v2 = vsel %vm9629_vm7, %v6484_v16, %v6488_v12  ;;  %v6505_v46 = vshrl.u32 %v6404_v5, 16  ;;  %v6508_v7 = vshll.u32 %v6404_v5, 16  ;;  %v6591_v39 = vld [vmem:[#allocation2 + $0x60] sm:$0xe]  ;;  %v6590_v24 = vld [vmem:[#allocation2 + $0x54] sm:$0xe] }
 0x3df   : > { %v6475_v47 = vsel %vm9629_vm7, %v6470_v8, %v6474_v27  ;;  %v6525_v15 = vunpack.c.l.b16 %v6489_v2  ;;  %v6493_v13 = vrot.slane %v6491_v52, 4  ;;  %v6496_v51 = vrot.slane %v6494_v1, 5  ;;  %v9250_v34 = vld [vmem:[#allocation2 + $0x44] sm:$0xf0] }
 0x3e0   : > { %v6507_v19 = vrot.slane %v6505_v46, 4  ;;  %v6510_v35 = vrot.slane %v6508_v7, 5  ;;  %v6524_v50 = vunpack.c.l.b16 %v6475_v47  ;;  %v8992_v62 = vrot.slane %v11697_v20, 9  ;;  %v5515_v46 = vld [vmem:[#allocation2 + $0x6c] sm:$0x1] }
 0x3e1   : > { %v6630_v48 = vrot.slane %v6401_v38, 5  ;;  %v8970_v43 = vor.u32 %v11606_v49, %v12526_v17  ;;  %v6626_v33 = vrot.slane %v6399_v4, 5  ;;  %v6497_v14 = vor.u32 %v6496_v51, %v6493_v13  ;;  %v6791_v52 = vld [vmem:[#allocation2 + $0x28] sm:$0x1]  ;;  %v11893_v13 = vpop.f32.mrf.mxu2  ;;  %v11895_v51 = vpop.f32.mrf.mxu1 }
 0x3e2   : > { %v6530_v57 = vpack.c.b16 %v6525_v15, %v6524_v50  ;;  %v6511_v63 = vor.u32 %v6510_v35, %v6507_v19  ;;  %v6514_v23 = vshll.u32 %v6405_v30, 16  ;;  %v6500_v60 = vshll.u32 %v6403_v6, 16  ;;  %v6789_v15 = vld [vmem:[#allocation2 + $0x1c] sm:$0x1] }
 0x3e3   : > { %8985 = vmatmul.msk.bf16.gmra.mxu2 %vm6076_vm11, %v6529_v22  ;;  %8979 = vmatmul.msk.bf16.vlgmr.msrb.gmra.mxu1 %vm6076_vm11, %v8966_v10  ;;  %v6631_v45 = vsel %vm9572_vm10, %v8993_v41, %v6630_v48  ;;  %v6627_v20 = vsel %vm9572_vm10, %v8992_v62, %v6626_v33  ;;  %v6498_v58 = vrot.slane %v6497_v14, 4  ;;  %v6819_v32 = vshrl.u32 %v12527_v53, 16 }
 0x3e4   : > { %v6647_v54 = vunpack.c.l.b16 %v6631_v45  ;;  %v6512_v22 = vrot.slane %v6511_v63, 4  ;;  %v6646_v38 = vunpack.c.l.b16 %v6627_v20  ;;  %v6516_v49 = vrot.slane %v6514_v23, 5 }
 0x3e5   : > { %v6502_v59 = vrot.slane %v6500_v60, 5  ;;  %v6822_v4 = vshll.u32 %v12527_v53, 16  ;;  %v6805_v18 = vshrl.u32 %v12528_v3, 16  ;;  %v6808_v25 = vshll.u32 %v12528_v3, 16 }
 0x3e6   : > { %v6652_v37 = vpack.c.b16 %v6647_v54, %v6646_v38  ;;  %v6517_v10 = vsel %vm9629_vm7, %v6512_v22, %v6516_v49  ;;  %v6821_v5 = vrot.slane %v6819_v32, 4  ;;  %v8994_v47 = vrot.slane %v6590_v24, 9 }
 0x3e7   : > { %v6503_v26 = vsel %vm9629_vm7, %v6498_v58, %v6502_v59  ;;  %v6527_v16 = vunpack.c.l.b16 %v6517_v10  ;;  %v6824_v8 = vrot.slane %v6822_v4, 5  ;;  %v6807_v27 = vrot.slane %v6805_v18, 4 }
 0x3e8   : > { %v6526_v12 = vunpack.c.l.b16 %v6503_v26  ;;  %v6810_v2 = vrot.slane %v6808_v25, 5  ;;  %v6638_v29 = vrot.slane %v6405_v30, 5  ;;  %v5516_v1 = vsel %vm9651_vm8, 0, %v5515_v46  ;;  %v11900_v30 = vpop.f32.mrf.mxu3  ;;  %vm12538_vm8 = vmmov %vm12515_vm12 }
 0x3e9   : > { %8998 = vmatmul.msk.bf16.gmra.mxu3 %vm6076_vm11, %v6651_v28  ;;  %v8995_v28 = vrot.slane %v6591_v39, 9  ;;  %v6825_v19 = vor.u32 %v6824_v8, %v6821_v5  ;;  %5517 = vst [vmem:[#allocation2 + $0x6c] sm:$0x1] %v5516_v1  ;;  %v8974_v35 = vor.u32 %v9250_v34, %v11699_v40  ;;  %v6634_v50 = vrot.slane %v6403_v6, 5  ;;  %v9251_v39 = vld [vmem:[#allocation2 + $0x5c] sm:$0xf0]  ;;  %vm12545_vm5 = vmmov %vm12538_vm8 }
 0x3ea   : > { %v6531_v7 = vpack.c.b16 %v6527_v16, %v6526_v12  ;;  %v6828_v62 = vshll.u32 %v6791_v52, 16  ;;  %v6814_v48 = vshll.u32 %v6789_v15, 16  ;;  %v6847_v23 = vshrl.u32 %v11704_v36, 16  ;;  %v12530_v16 = vld [vmem:[#allocation36_spill] sm:$0xff]  ;;  %v6795_v8 = vld [vmem:[#allocation2 + $0x40] sm:$0x1]  ;;  %vm12547_vm12 = vmmov %vm12543_vm1 }
 0x3eb   : > { %v6639_v41 = vsel %vm9572_vm10, %v8995_v28, %v6638_v29  ;;  %v6635_v0 = vsel %vm9572_vm10, %v8994_v47, %v6634_v50  ;;  %v6826_v63 = vrot.slane %v6825_v19, 4  ;;  %v6850_v20 = vshll.u32 %v11704_v36, 16  ;;  %v12529_v36 = vld [vmem:[#allocation27_spill] sm:$0xff]  ;;  %v8977_v12 = vld [vmem:[#allocation2 + $0x54] sm:$0xf]  ;;  %vm12549_vm15 = vmmov %vm12545_vm5 }
 0x3ec   : > { %v6649_v40 = vunpack.c.l.b16 %v6639_v41  ;;  %v6648_v17 = vunpack.c.l.b16 %v6635_v0  ;;  %v6830_v33 = vrot.slane %v6828_v62, 5  ;;  %v6816_v45 = vrot.slane %v6814_v48, 5  ;;  %v7288_v29 = vld [vmem:[#allocation2 + $0x3c] sm:$0x4]  ;;  %v6798_v50 = vld [vmem:[#allocation2 + $0x54] sm:$0xf] }
 0x3ed   : > { %v6833_v38 = vshrl.u32 %v11610_v56, 16  ;;  %v6836_v58 = vshll.u32 %v11610_v56, 16  ;;  %v6852_v59 = vrot.slane %v6850_v20, 5  ;;  %v9028_v26 = vrot.slane %v12529_v36, 9  ;;  %v6796_v62 = vld [vmem:[#allocation2 + $0x48] sm:$0xf] }
 0x3ee   : > { %v6653_v6 = vpack.c.b16 %v6649_v40, %v6648_v17  ;;  %v6831_v14 = vsel %vm9629_vm7, %v6826_v63, %v6830_v33  ;;  %v9027_v24 = vrot.slane %v12530_v16, 9  ;;  %v7012_v5 = vrot.slane %v6791_v52, 5  ;;  %v12532_v36 = vld [vmem:[#allocation16_spill] sm:$0xff] }
 0x3ef   : > { %v6919_v53 = vunpack.c.l.b16 %v6831_v14  ;;  %v6835_v3 = vrot.slane %v6833_v38, 4  ;;  %v6838_v18 = vrot.slane %v6836_v58, 5  ;;  %v8978_v28 = vor.u32 %v9251_v39, %v8977_v12 }
 0x3f0   : > { %v7008_v34 = vrot.slane %v6789_v15, 5  ;;  %v6875_v0 = vshrl.u32 %v6798_v50, 16  ;;  %v6878_v48 = vshll.u32 %v6798_v50, 16  ;;  %v6861_v61 = vshrl.u32 %v6796_v62, 16 }
 0x3f1   : > { %v6839_v46 = vor.u32 %v6838_v18, %v6835_v3  ;;  %v6864_v33 = vshll.u32 %v6796_v62, 16  ;;  %vm12539_vm13 = vcmask 124928  }
 0x3f2   : > { %v7009_v47 = vsel %vm9572_vm10, %v9027_v24, %v7008_v34  ;;  %v6880_v14 = vrot.slane %v6878_v48, 5  ;;  %v6863_v38 = vrot.slane %v6861_v61, 4 }
 0x3f3   : > { %8986 = vmatmul.msk.bf16.gmra.mxu2 %vm6076_vm11, %v6530_v57  ;;  %8980 = vmatmul.msk.bf16.gmra.mxu1 %vm6076_vm11, %v8970_v43  ;;  %v6811_v57 = vor.u32 %v6810_v2, %v6807_v27  ;;  %v7013_v27 = vsel %vm9572_vm10, %v9028_v26, %v7012_v5  ;;  %v6793_v2 = vld [vmem:[#allocation2 + $0x34] sm:$0x1]  ;;  %v7040_v15 = vunpack.c.l.b16 %v7009_v47  ;;  %v6840_v41 = vrot.slane %v6839_v46, 4  ;;  %v6800_v5 = vld [vmem:[#allocation2 + $0x60] sm:$0xf] }
 0x3f4   : > { %v7041_v52 = vunpack.c.l.b16 %v7013_v27  ;;  %v6842_v1 = vshll.u32 %v6793_v2, 16  ;;  %v6866_v58 = vrot.slane %v6864_v33, 5  ;;  %v6889_v27 = vshrl.u32 %v6800_v5, 16 }
 0x3f5   : > { %v6812_v43 = vrot.slane %v6811_v57, 4  ;;  %v9009_v33 = vor.u32 %v11708_v42, %v11621_v21 }
 0x3f6   : > { %v7048_v40 = vpack.c.b16 %v7041_v52, %v7040_v15  ;;  %v6844_v63 = vrot.slane %v6842_v1, 5  ;;  %v6867_v39 = vor.u32 %v6866_v58, %v6863_v38  ;;  %v6986_v1 = vld [vmem:[#allocation2 + $0x48] sm:$0xe] }
 0x3f7   : > { %v6176_v54 = vpop.f32.mrf.mxu2  ;;  %v6817_v22 = vsel %vm9629_vm7, %v6812_v43, %v6816_v45 }
 0x3f8   : > { %v6918_v4 = vunpack.c.l.b16 %v6817_v22  ;;  %v6845_v43 = vsel %vm9629_vm7, %v6840_v41, %v6844_v63  ;;  %v6799_v22 = vld [vmem:[#allocation2 + $0x58] sm:$0x1]  ;;  %v6868_v12 = vrot.slane %v6867_v39, 4  ;;  %v6803_v63 = vld [vmem:[#allocation2 + $0x70] sm:$0x1] }
 0x3f9   : > { %8999 = vmatmul.msk.bf16.gmra.mxu3 %vm6076_vm11, %v6652_v37  ;;  %v6849_v37 = vrot.slane %v6847_v23, 4  ;;  %v9030_v23 = vrot.slane %v11706_v55, 9  ;;  %v6920_v20 = vunpack.c.l.b16 %v6845_v43  ;;  %v6884_v55 = vshll.u32 %v6799_v22, 16 }
 0x3fa   : > { %v6926_v25 = vpack.c.b16 %v6919_v53, %v6918_v4  ;;  %v12531_v4 = vld [vmem:[#allocation37_spill] sm:$0xff]  ;;  %v7028_v48 = vrot.slane %v6799_v22, 5  ;;  %v6912_v61 = vshll.u32 %v6803_v63, 16 }
 0x3fb   : > { %v6853_v56 = vor.u32 %v6852_v59, %v6849_v37  ;;  %v6797_v59 = vld [vmem:[#allocation2 + $0x4c] sm:$0x1]  ;;  %v9005_v26 = vor.u32 %v12532_v36, %v12531_v4  ;;  %v6886_v24 = vrot.slane %v6884_v55, 5  ;;  %v7036_v55 = vrot.slane %v6803_v63, 5 }
 0x3fc   : > { %v6870_v18 = vshll.u32 %v6797_v59, 16  ;;  %v6914_v22 = vrot.slane %v6912_v61, 5 }
 0x3fd   : > { %v6854_v19 = vrot.slane %v6853_v56, 4 }
 0x3ff   : > { %v6178_v4 = vpop.f32.mrf.mxu2 }
 0x402   : > { %v6290_v32 = vpop.f32.mrf.mxu3 }
 0x403   : > { %8987 = vmatmul.msk.bf16.gmra.mxu2 %vm6076_vm11, %v6531_v7  ;;  %8981 = vmatmul.msk.bf16.gmra.mxu1 %vm6076_vm11, %v8974_v35  ;;  %v6856_v7 = vshll.u32 %v6795_v8, 16  ;;  %v7289_v35 = vsel %vm11144_vm3, 0, %v7288_v29  ;;  %v6987_v29 = vld [vmem:[#allocation2 + $0x54] sm:$0xe]  ;;  %vm12542_vm3 = vcmask 1041408  }
 0x404   : > { %7290 = vst [vmem:[#allocation2 + $0x3c] sm:$0x4] %v7289_v35  ;;  %vm12546_vm9 = vmmov %vm12542_vm3 }
 0x405   : > { %v6858_v57 = vrot.slane %v6856_v7, 5 }
 0x407   : > { %v6859_v17 = vsel %vm9629_vm7, %v6854_v19, %v6858_v57  ;;  %v6891_v19 = vrot.slane %v6889_v27, 4  ;;  %v9032_v57 = vrot.slane %v6987_v29, 9 }
 0x408   : > { %v6921_v45 = vunpack.c.l.b16 %v6859_v17 }
 0x409   : > { %9000 = vmatmul.msk.bf16.gmra.mxu3 %vm6076_vm11, %v6653_v6  ;;  %v6112_v60 = vpop.f32.mrf.mxu1  ;;  %v6877_v6 = vrot.slane %v6875_v0, 4  ;;  %v9031_v0 = vrot.slane %v6986_v1, 9 }
 0x40a   : > { %v6177_v49 = vadd.f32 %v6176_v54, %v6112_v60  ;;  %v9029_v54 = vrot.slane %v11619_v31, 9  ;;  %v7020_v60 = vrot.slane %v6795_v8, 5  ;;  %v6802_v8 = vld [vmem:[#allocation2 + $0x6c] sm:$0xf] }
 0x40b   : > { %v6881_v53 = vor.u32 %v6880_v14, %v6877_v6  ;;  %v6903_v46 = vshrl.u32 %v6802_v8, 16  ;;  %v6906_v7 = vshll.u32 %v6802_v8, 16  ;;  %v7029_v6 = vsel %vm9572_vm10, %v9032_v57, %v7028_v48 }
 0x40c   : > { %v11911_v10 = vadd.f32 %v6290_v32, %v6177_v49  ;;  %v6927_v49 = vpack.c.b16 %v6921_v45, %v6920_v20  ;;  %v7016_v32 = vrot.slane %v6793_v2, 5  ;;  %v7021_v37 = vsel %vm9572_vm10, %v9030_v23, %v7020_v60 }
 0x40d   : > { %v7043_v3 = vunpack.c.l.b16 %v7021_v37  ;;  %v6892_v2 = vshll.u32 %v6800_v5, 16  ;;  %v6905_v50 = vrot.slane %v6903_v46, 4  ;;  %v6908_v15 = vrot.slane %v6906_v7, 5  ;;  %v9255_v46 = vld [vmem:[#allocation2 + $0x68] sm:$0xf0] }
 0x40e   : > { %v7017_v31 = vsel %vm9572_vm10, %v9029_v54, %v7016_v32  ;;  %v7024_v45 = vrot.slane %v6797_v59, 5  ;;  %v7045_v20 = vunpack.c.l.b16 %v7029_v6  ;;  %v6989_v32 = vld [vmem:[#allocation2 + $0x6c] sm:$0xe] }
 0x40f   : > { %v7042_v16 = vunpack.c.l.b16 %v7017_v31  ;;  %v6894_v35 = vrot.slane %v6892_v2, 5  ;;  %v6909_v43 = vor.u32 %v6908_v15, %v6905_v50  ;;  %v9254_v31 = vld [vmem:[#allocation2 + $0x50] sm:$0xf0]  ;;  %v9016_v2 = vld [vmem:[#allocation2 + $0x60] sm:$0xf] }
 0x410   : > { %v7025_v23 = vsel %vm9572_vm10, %v9031_v0, %v7024_v45  ;;  %v9017_v29 = vor.u32 %v9255_v46, %v9016_v2  ;;  %v6174_v45 = vadd.f32 %v11893_v13, %v11895_v51 }
 0x411   : > { %v7049_v56 = vpack.c.b16 %v7043_v3, %v7042_v16  ;;  %v6895_v17 = vor.u32 %v6894_v35, %v6891_v19  ;;  %v6910_v60 = vrot.slane %v6909_v43, 4  ;;  %v7044_v38 = vunpack.c.l.b16 %v7025_v23 }
 0x413   : > { %9023 = vmatmul.msk.bf16.vlgmr.msra.gmra.mxu2 %vm6076_vm11, %v6926_v25  ;;  %8982 = vmatmul.msk.bf16.gmra.mxu1 %vm6076_vm11, %v8978_v28  ;;  %v6882_v25 = vrot.slane %v6881_v53, 4  ;;  %v6872_v28 = vrot.slane %v6870_v18, 5  ;;  %v6896_v54 = vrot.slane %v6895_v17, 4  ;;  %v6915_v42 = vsel %vm9629_vm7, %v6910_v60, %v6914_v22  ;;  %v6988_v53 = vld [vmem:[#allocation2 + $0x60] sm:$0xe] }
 0x414   : > { %v6925_v59 = vunpack.c.l.b16 %v6915_v42  ;;  %v9033_v36 = vrot.slane %v6988_v53, 9  ;;  %v9012_v18 = vld [vmem:[#allocation2 + $0x48] sm:$0xf] }
 0x415   : > { %v6887_v34 = vsel %vm9629_vm7, %v6882_v25, %v6886_v24  ;;  %v6873_v47 = vsel %vm9629_vm7, %v6868_v12, %v6872_v28  ;;  %v9013_v25 = vor.u32 %v9254_v31, %v9012_v18  ;;  %v6292_v12 = vpop.f32.mrf.mxu3 }
 0x416   : > { %v6923_v52 = vunpack.c.l.b16 %v6887_v34  ;;  %v6922_v41 = vunpack.c.l.b16 %v6873_v47 }
 0x418   : > { %v6928_v62 = vpack.c.b16 %v6923_v52, %v6922_v41  ;;  %v12533_v41 = vld [vmem:[#allocation31_spill] sm:$0xff] }
 0x419   : > { %9036 = vmatmul.msk.bf16.vlgmr.msra.gmra.mxu3 %vm6076_vm11, %v7048_v40  ;;  %v6801_v40 = vld [vmem:[#allocation2 + $0x64] sm:$0x1] }
 0x41a   : > { %v6898_v14 = vshll.u32 %v6801_v40, 16  ;;  %v7032_v3 = vrot.slane %v6801_v40, 5 }
 0x41c   : > { %v6900_v58 = vrot.slane %v6898_v14, 5  ;;  %v7033_v9 = vsel %vm9572_vm10, %v9033_v36, %v7032_v3 }
 0x41d   : > { %v7046_v5 = vunpack.c.l.b16 %v7033_v9 }
 0x41e   : > { %v6901_v21 = vsel %vm9629_vm7, %v6896_v54, %v6900_v58  ;;  %vm12537_vm7 = vmmov %vm12511_vm6 }
 0x41f   : > { %v6924_v37 = vunpack.c.l.b16 %v6901_v21 }
 0x421   : > { %v6929_v39 = vpack.c.b16 %v6925_v59, %v6924_v37 }
 0x423   : > { %9024 = vmatmul.msk.bf16.gmra.mxu2 %vm6076_vm11, %v6927_v49  ;;  %9018 = vmatmul.msk.bf16.vlgmr.msra.gmra.mxu1 %vm6076_vm11, %v9005_v26  ;;  %v7050_v49 = vpack.c.b16 %v7045_v20, %v7044_v38  ;;  %v9034_v26 = vrot.slane %v6989_v32, 9  ;;  %v6303_v20 = vadd.f32 %v11900_v30, %v6174_v45 }
 0x425   : > { %v7037_v16 = vsel %vm9572_vm10, %v9034_v26, %v7036_v55  ;;  %vm7376_vm10 = vsmask.f32 2306 }
 0x426   : > { %v7047_v8 = vunpack.c.l.b16 %v7037_v16 }
 0x428   : > { %v7051_v28 = vpack.c.b16 %v7047_v8, %v7046_v5  ;;  %v12534_v5 = vld [vmem:[#allocation9_spill] sm:$0xff]  ;;  %v12535_v8 = vld [vmem:[#allocation10_spill] sm:$0xff] }
 0x429   : > { %9037 = vmatmul.msk.bf16.gmra.mxu3 %vm6076_vm11, %v7049_v56  ;;  %v6114_v56 = vpop.f32.mrf.mxu1 }
 0x42a   : > { %v6179_v53 = vadd.f32 %v6178_v4, %v6114_v56 }
 0x42c   : > { %v6305_v37 = vadd.f32 %v6292_v12, %v6179_v53  ;;  %v6169_v12 = vadd.f32 %v12535_v8, %v12534_v5 }
 0x433   : > { %9025 = vmatmul.msk.bf16.gmra.mxu2 %vm6076_vm11, %v6928_v62  ;;  %9019 = vmatmul.msk.bf16.gmra.mxu1 %vm6076_vm11, %v9009_v33 }
 0x439   : > { %9038 = vmatmul.msk.bf16.gmra.mxu3 %vm6076_vm11, %v7050_v49 }
 0x443   : > { %9026 = vmatmul.msk.bf16.gmra.mxu2 %vm6076_vm11, %v6929_v39  ;;  %9020 = vmatmul.msk.bf16.gmra.mxu1 %vm6076_vm11, %v9013_v25  ;;  %v6181_v24 = vpop.f32.mrf.mxu2 }
 0x449   : > { %9039 = vmatmul.msk.bf16.gmra.mxu3 %vm6076_vm11, %v7051_v28 }
 0x44b   : > { %v6183_v34 = vpop.f32.mrf.mxu2 }
 0x44c   : > { %v6295_v27 = vpop.f32.mrf.mxu3 }
 0x450   : > { %v6117_v7 = vpop.f32.mrf.mxu1 }
 0x451   : > { %v6182_v47 = vadd.f32 %v6181_v24, %v6117_v7 }
 0x453   : > { %v6306_v52 = vadd.f32 %v6295_v27, %v6182_v47  ;;  %9021 = vmatmul.msk.bf16.gmra.mxu1 %vm6076_vm11, %v9017_v29  ;;  %v12536_v27 = vld [vmem:[#allocation32_spill] sm:$0xff]  ;;  %vm12015_vm11 = vmand %vm12539_vm13, %vm7376_vm10 }
 0x454   : > { %v6297_v1 = vpop.f32.mrf.mxu3  ;;  %v6301_v2 = vadd.f32 %v12536_v27, %v6169_v12  ;;  %vm12550_vm10 = vmmov %vm12542_vm3 }
 0x455   : > { %vm12553_vm13 = vmmov %vm12545_vm5 }
 0x456   : > { %v6556_v44 = vpop.f32.mrf.mxu2 }
 0x458   : > { %v6119_v19 = vpop.f32.mrf.mxu1 }
 0x459   : > { %v6184_v18 = vadd.f32 %v6183_v34, %v6119_v19 }
 0x45b   : > { %v6307_v4 = vadd.f32 %v6297_v1, %v6184_v18 }
 0x45c   : > { %v6678_v50 = vpop.f32.mrf.mxu3 }
 0x45e   : > { %v6558_v35 = vpop.f32.mrf.mxu2 }
 0x460   : > { %v6362_v15 = vpop.f32.mrf.mxu1 }
 0x461   : > { %v6382_v57 = vadd.f32 %v6362_v15, %v12533_v41  ;;  %v11988_v41 = vld [vmem:[%s12274_s5] ss:$0 sm:$0xff] }
 0x463   : > { %v6576_v62 = vadd.f32 %v6556_v44, %v6382_v57 }
 0x464   : > { %v6680_v40 = vpop.f32.mrf.mxu3 }
 0x465   : > { %v6698_v48 = vadd.f32 %v6678_v50, %v6576_v62 }
 0x466   : > { %v6561_v0 = vpop.f32.mrf.mxu2 }
 0x468   : > { %v6364_v63 = vpop.f32.mrf.mxu1 }
 0x469   : > { %v6383_v7 = vadd.f32 %v6364_v63, %v6301_v2 }
 0x46b   : > { %v6577_v44 = vadd.f32 %v6558_v35, %v6383_v7  ;;  %v11994_v35 = vld [vmem:[%s12275_s6] ss:$0 sm:$0xff] }
 0x46c   : > { %v6683_v17 = vpop.f32.mrf.mxu3 }
 0x46d   : > { %v6699_v50 = vadd.f32 %v6680_v40, %v6577_v44 }
 0x46e   : > { %v6563_v43 = vpop.f32.mrf.mxu2 }
 0x470   : > { %v6367_v61 = vpop.f32.mrf.mxu1 }
 0x471   : > { %v6384_v33 = vadd.f32 %v6367_v61, %v11808_v11 }
 0x473   : > { %v6578_v6 = vadd.f32 %v6561_v0, %v6384_v33  ;;  %v11998_v33 = vrot.slane %v11994_v35, 2 }
 0x474   : > { %v6685_v23 = vpop.f32.mrf.mxu3 }
 0x475   : > { %v11968_v14 = vadd.f32 %v6683_v17, %v6578_v6 }
 0x476   : > { %v6566_v60 = vpop.f32.mrf.mxu2 }
 0x478   : > { %v6369_v54 = vpop.f32.mrf.mxu1 }
 0x479   : > { %v6385_v22 = vadd.f32 %v6369_v54, %v6303_v20 }
 0x47b   : > { %v6579_v38 = vadd.f32 %v6563_v43, %v6385_v22  ;;  %v12004_v22 = vrot.slane %v11998_v33, 1 }
 0x47c   : > { %v6688_v49 = vpop.f32.mrf.mxu3 }
 0x47d   : > { %v11971_v58 = vadd.f32 %v6685_v23, %v6579_v38 }
 0x47e   : > { %v6568_v11 = vpop.f32.mrf.mxu2 }
 0x480   : > { %v6372_v21 = vpop.f32.mrf.mxu1 }
 0x481   : > { %v6386_v42 = vadd.f32 %v6372_v21, %v11911_v10 }
 0x483   : > { %v6580_v32 = vadd.f32 %v6566_v60, %v6386_v42  ;;  %v12001_v60 = vrot.slane %v11994_v35, 1 }
 0x484   : > { %v6690_v51 = vpop.f32.mrf.mxu3 }
 0x485   : > { %v11974_v13 = vadd.f32 %v6688_v49, %v6580_v32 }
 0x486   : > { %v6571_v26 = vpop.f32.mrf.mxu2 }
 0x488   : > { %v6374_v59 = vpop.f32.mrf.mxu1 }
 0x489   : > { %v6387_v36 = vadd.f32 %v6374_v59, %v6305_v37 }
 0x48b   : > { %v6581_v30 = vadd.f32 %v6568_v11, %v6387_v36 }
 0x48c   : > { %v6693_v31 = vpop.f32.mrf.mxu3 }
 0x48d   : > { %v11976_v55 = vadd.f32 %v6690_v51, %v6581_v30 }
 0x48e   : > { %v6573_v10 = vpop.f32.mrf.mxu2 }
 0x490   : > { %v6377_v39 = vpop.f32.mrf.mxu1 }
 0x491   : > { %v6388_v3 = vadd.f32 %v6377_v39, %v6306_v52 }
 0x493   : > { %v6582_v25 = vadd.f32 %v6571_v26, %v6388_v3 }
 0x494   : > { %v6695_v24 = vpop.f32.mrf.mxu3 }
 0x495   : > { %v11978_v9 = vadd.f32 %v6693_v31, %v6582_v25 }
 0x496   : > { %v6954_v47 = vpop.f32.mrf.mxu2 }
 0x498   : > { %v6379_v16 = vpop.f32.mrf.mxu1 }
 0x499   : > { %v6389_v56 = vadd.f32 %v6379_v16, %v6307_v4 }
 0x49b   : > { %v6583_v28 = vadd.f32 %v6573_v10, %v6389_v56 }
 0x49c   : > { %v7076_v52 = vpop.f32.mrf.mxu3 }
 0x49d   : > { %v11983_v46 = vadd.f32 %v6695_v24, %v6583_v28 }
 0x49e   : > { %v6956_v62 = vpop.f32.mrf.mxu2 }
 0x4a0   : > { %v6760_v29 = vpop.f32.mrf.mxu1 }
 0x4a1   : > { %v6780_v34 = vadd.f32 %v6760_v29, %v6698_v48 }
 0x4a3   : > { %v6974_v19 = vadd.f32 %v6954_v47, %v6780_v34 }
 0x4a4   : > { %v7078_v17 = vpop.f32.mrf.mxu3 }
 0x4a5   : > { %v7096_v15 = vadd.f32 %v7076_v52, %v6974_v19  ;;  %v7378_v19 = vld [vmem:[#allocation2 + $0xc] sm:$0x7] }
 0x4a6   : > { %v6959_v18 = vpop.f32.mrf.mxu2 }
 0x4a7   : > { %v7108_v63 = vadd.f32 %v11988_v41, %v7096_v15 }
 0x4a8   : > { %v6762_v1 = vpop.f32.mrf.mxu1 }
 0x4a9   : > { %v6781_v57 = vadd.f32 %v6762_v1, %v6699_v50  ;;  %v7116_v40 = vmax.f32 %v7108_v63, 0.0 }
 0x4ab   : > { %v6975_v0 = vadd.f32 %v6956_v62, %v6781_v57 }
 0x4ac   : > { %v7081_v5 = vpop.f32.mrf.mxu3 }
 0x4ad   : > { %v7097_v43 = vadd.f32 %v7078_v17, %v6975_v0 }
 0x4ae   : > { %v6961_v50 = vpop.f32.mrf.mxu2 }
 0x4af   : > { %v7109_v48 = vadd.f32 %v11988_v41, %v7097_v43 }
 0x4b0   : > { %v6765_v25 = vpop.f32.mrf.mxu1 }
 0x4b1   : > { %v7117_v61 = vmax.f32 %v7109_v48, 0.0  ;;  %v6782_v10 = vadd.f32 %v6765_v25, %v11968_v14 }
 0x4b3   : > { %v7124_v45 = vmax.f32 %v7116_v40, %v7117_v61  ;;  %v6976_v28 = vadd.f32 %v6959_v18, %v6782_v10 }
 0x4b4   : > { %v7083_v57 = vpop.f32.mrf.mxu3 }
 0x4b5   : > { %v7132_v6 = vrot.slane %v7124_v45, 2  ;;  %v7133_v23 = vrot.slane %v7124_v45, 4  ;;  %v7134_v20 = vrot.slane %v7124_v45, 6  ;;  %v9040_v54 = vrot.slane %v7124_v45, 9 }
 0x4b6   : > { %v7098_v52 = vadd.f32 %v7081_v5, %v6976_v28  ;;  %v6964_v5 = vpop.f32.mrf.mxu2 }
 0x4b7   : > { %v9041_v38 = vrot.slane %v7132_v6, 9  ;;  %v9042_v49 = vrot.slane %v7133_v23, 9  ;;  %v9043_v21 = vrot.slane %v7134_v20, 9  ;;  %v7204_v42 = vmax.f32 %v7124_v45, %v9040_v54 }
 0x4b8   : > { %v6767_v14 = vpop.f32.mrf.mxu1  ;;  %v7110_v62 = vadd.f32 %v11988_v41, %v7098_v52 }
 0x4b9   : > { %v7205_v11 = vmax.f32 %v7132_v6, %v9041_v38  ;;  %v7206_v53 = vmax.f32 %v7133_v23, %v9042_v49  ;;  %v7207_v32 = vmax.f32 %v7134_v20, %v9043_v21  ;;  %v7230_v51 = vadd.f32 %v11994_v35, %v7204_v42 }
 0x4ba   : > { %v6783_v44 = vadd.f32 %v6767_v14, %v11971_v58  ;;  %v7118_v63 = vmax.f32 %v7110_v62, 0.0 }
 0x4bb   : > { %v7231_v37 = vadd.f32 %v12001_v60, %v7205_v11  ;;  %v7232_v59 = vadd.f32 %v11998_v33, %v7206_v53  ;;  %v7233_v36 = vadd.f32 %v12004_v22, %v7207_v32  ;;  %v7291_v30 = vpack.c.bf16 %v7230_v51, %v7230_v51 }
 0x4bc   : > { %v6977_v15 = vadd.f32 %v6961_v50, %v6783_v44  ;;  %v7086_v14 = vpop.f32.mrf.mxu3 }
 0x4bd   : > { %v7292_v26 = vpack.c.bf16 %v7231_v37, %v7231_v37  ;;  %v7293_v31 = vpack.c.bf16 %v7232_v59, %v7232_v59  ;;  %v7294_v39 = vpack.c.bf16 %v7233_v36, %v7233_v36  ;;  %v7323_v3 = vunpack.c.l.b16 %v7291_v30 }
 0x4be   : > { %v7099_v0 = vadd.f32 %v7083_v57, %v6977_v15 }
 0x4bf   : > { %v7324_v4 = vunpack.c.l.b16 %v7292_v26  ;;  %v7325_v16 = vunpack.c.l.b16 %v7293_v31  ;;  %v7326_v24 = vunpack.c.l.b16 %v7294_v39  ;;  %v7339_v8 = vrot.slane %v7323_v3, 7 }
 0x4c0   : > { %v7111_v17 = vadd.f32 %v11988_v41, %v7099_v0 }
 0x4c1   : > { %v7340_v12 = vrot.slane %v7324_v4, 6  ;;  %v7342_v56 = vrot.slane %v7325_v16, 5  ;;  %v7344_v2 = vrot.slane %v7326_v24, 4 }
 0x4c2   : > { %v7119_v43 = vmax.f32 %v7111_v17, 0.0 }
 0x4c3   : > { %v7341_v27 = vsel %vm5743_vm4, %v7340_v12, %v7339_v8  ;;  %v6770_v8 = vpop.f32.mrf.mxu1 }
 0x4c4   : > { %v7343_v7 = vsel %vm12537_vm7, %v7342_v56, %v7341_v27  ;;  %v7125_v40 = vmax.f32 %v7118_v63, %v7119_v43  ;;  %v6784_v27 = vadd.f32 %v6770_v8, %v11974_v13  ;;  %vm12551_vm7 = vmmov %vm12543_vm1 }
 0x4c5   : > { %v7345_v47 = vsel %vm12538_vm8, %v7344_v2, %v7343_v7  ;;  %vm12552_vm8 = vmmov %vm12511_vm6 }
 0x4c6   : > { %v7367_v34 = vpack.c.b16 %v7345_v47, %v7345_v47  ;;  %v7135_v45 = vrot.slane %v7125_v40, 2  ;;  %v7136_v58 = vrot.slane %v7125_v40, 4  ;;  %v7137_v6 = vrot.slane %v7125_v40, 6 }
 0x4c7   : > { %v9044_v23 = vrot.slane %v7125_v40, 9 }
 0x4c8   : > { %v7379_v1 = vsel %vm12015_vm11, %v7367_v34, %v7378_v19  ;;  %v9045_v42 = vrot.slane %v7135_v45, 9  ;;  %v9046_v11 = vrot.slane %v7136_v58, 9  ;;  %v9047_v53 = vrot.slane %v7137_v6, 9 }
 0x4c9   : > { %7380 = vst [vmem:[#allocation2 + $0xc] sm:$0x7] %v7379_v1  ;;  %v7208_v32 = vmax.f32 %v7125_v40, %v9044_v23  ;;  %v6978_v1 = vadd.f32 %v6964_v5, %v6784_v27  ;;  %v6966_v40 = vpop.f32.mrf.mxu2 }
 0x4ca   : > { %v7209_v36 = vmax.f32 %v7135_v45, %v9045_v42  ;;  %v7210_v30 = vmax.f32 %v7136_v58, %v9046_v11  ;;  %v7211_v26 = vmax.f32 %v7137_v6, %v9047_v53  ;;  %v7088_v58 = vpop.f32.mrf.mxu3 }
 0x4cb   : > { %v7234_v31 = vadd.f32 %v11994_v35, %v7208_v32  ;;  %v6772_v13 = vpop.f32.mrf.mxu1  ;;  %v7100_v63 = vadd.f32 %v7086_v14, %v6978_v1 }
 0x4cc   : > { %v7235_v3 = vadd.f32 %v12001_v60, %v7209_v36  ;;  %v7236_v18 = vadd.f32 %v11998_v33, %v7210_v30  ;;  %v7237_v25 = vadd.f32 %v12004_v22, %v7211_v26  ;;  %v6785_v43 = vadd.f32 %v6772_v13, %v11976_v55 }
 0x4cd   : > { %v7295_v10 = vpack.c.bf16 %v7234_v31, %v7234_v31  ;;  %v7112_v6 = vadd.f32 %v11988_v41, %v7100_v63 }
 0x4ce   : > { %v7296_v24 = vpack.c.bf16 %v7235_v3, %v7235_v3  ;;  %v7297_v12 = vpack.c.bf16 %v7236_v18, %v7236_v18  ;;  %v7298_v56 = vpack.c.bf16 %v7237_v25, %v7237_v25  ;;  %v6979_v45 = vadd.f32 %v6966_v40, %v6785_v43 }
 0x4cf   : > { %v7327_v28 = vunpack.c.l.b16 %v7295_v10 }
 0x4d0   : > { %v7397_v48 = vld [vmem:[#allocation2 + $0xc] sm:$0x7]  ;;  %v7328_v47 = vunpack.c.l.b16 %v7296_v24  ;;  %v7329_v34 = vunpack.c.l.b16 %v7297_v12  ;;  %v7330_v52 = vunpack.c.l.b16 %v7298_v56  ;;  %v7101_v23 = vadd.f32 %v7088_v58, %v6979_v45 }
 0x4d1   : > { %v7405_v61 = vrot.slane %v7397_v48, 2  ;;  %v7346_v44 = vrot.slane %v7327_v28, 7  ;;  %v6969_v18 = vpop.f32.mrf.mxu2 }
 0x4d2   : > { %v7347_v19 = vrot.slane %v7328_v47, 6  ;;  %v7349_v50 = vrot.slane %v7329_v34, 5  ;;  %v7351_v57 = vrot.slane %v7330_v52, 4  ;;  %v7091_v28 = vpop.f32.mrf.mxu3 }
 0x4d3   : > { %v7417_v20 = vsel %vm12542_vm3, %v7397_v48, %v7405_v61  ;;  %v7418_v54 = vsel %vm12543_vm1, %v7397_v48, %v7405_v61  ;;  %v7381_v48 = vld [vmem:[#allocation2 + $0x18] sm:$0x7]  ;;  %v6775_v25 = vpop.f32.mrf.mxu1  ;;  %vm7513_vm3 = vcmask 130048   ;;  %vm7604_vm1 = vcmask 1040384  }
 0x4d4   : > { %v7420_v38 = vrot.slane %v7418_v54, 2  ;;  %v7453_v49 = vshrl.u32 %v7417_v20, 16  ;;  %v7456_v21 = vshll.u32 %v7417_v20, 16  ;;  %v7348_v15 = vsel %vm5743_vm4, %v7347_v19, %v7346_v44 }
 0x4d5   : > { %v7350_v62 = vsel %vm12511_vm6, %v7349_v50, %v7348_v15  ;;  %v7113_v20 = vadd.f32 %v11988_v41, %v7101_v23  ;;  %v7120_v54 = vmax.f32 %v7112_v6, 0.0  ;;  %v6786_v56 = vadd.f32 %v6775_v25, %v11978_v9  ;;  %vm7606_vm6 = vmor %vm7604_vm1, %vm5743_vm4 }
 0x4d6   : > { %v7455_v51 = vrot.slane %v7453_v49, 6  ;;  %v7458_v37 = vrot.slane %v7456_v21, 7  ;;  %v7462_v59 = vshll.u32 %v7420_v38, 16  ;;  %v7352_v0 = vsel %vm12545_vm5, %v7351_v57, %v7350_v62  ;;  %vm12554_vm5 = vmmov %vm12546_vm9 }
 0x4d7   : > { %v7368_v17 = vpack.c.b16 %v7352_v0, %v7352_v0  ;;  %v7121_v38 = vmax.f32 %v7113_v20, 0.0  ;;  %v6980_v50 = vadd.f32 %v6969_v18, %v6786_v56 }
 0x4d8   : > { %v7459_v39 = vor.u32 %v7458_v37, %v7455_v51  ;;  %v7464_v16 = vrot.slane %v7462_v59, 7 }
 0x4d9   : > { %v7382_v61 = vsel %vm12015_vm11, %v7368_v17, %v7381_v48  ;;  %v7126_v21 = vmax.f32 %v7120_v54, %v7121_v38  ;;  %v7102_v48 = vadd.f32 %v7091_v28, %v6980_v50  ;;  %v6971_v45 = vpop.f32.mrf.mxu2 }
 0x4da   : > { %v7460_v4 = vrot.slane %v7459_v39, 2  ;;  %7383 = vst [vmem:[#allocation2 + $0x18] sm:$0x7] %v7382_v61  ;;  %v7093_v54 = vpop.f32.mrf.mxu3 }
 0x4db   : > { %v7138_v11 = vrot.slane %v7126_v21, 2  ;;  %v7139_v55 = vrot.slane %v7126_v21, 4  ;;  %v7140_v53 = vrot.slane %v7126_v21, 6  ;;  %v9048_v32 = vrot.slane %v7126_v21, 9  ;;  %v6777_v17 = vpop.f32.mrf.mxu1 }
 0x4dc   : > { %v7465_v7 = vsel %vm11231_vm0, %v7460_v4, %v7464_v16  ;;  %v6787_v40 = vadd.f32 %v6777_v17, %v11983_v46  ;;  %v9258_v46 = vld [vmem:[%s12276_s7 + $0x10] sm:$0xff] }
 0x4dd   : > { %7499 = vst [vmem:[#allocation1 + $0x1] ss:$4 sm:$0xff] %v7465_v7  ;;  %v9049_v26 = vrot.slane %v7138_v11, 9  ;;  %v9050_v31 = vrot.slane %v7139_v55, 9  ;;  %v9051_v39 = vrot.slane %v7140_v53, 9  ;;  %v7212_v3 = vmax.f32 %v7126_v21, %v9048_v32  ;;  %7657 = vmatpush.bf16.msrb.mxu3 %v9258_v46 }
 0x4de   : > { %v6981_v23 = vadd.f32 %v6971_v45, %v6787_v40 }
 0x4df   : > { %v7213_v24 = vmax.f32 %v7138_v11, %v9049_v26  ;;  %v7214_v5 = vmax.f32 %v7139_v55, %v9050_v31  ;;  %v7215_v8 = vmax.f32 %v7140_v53, %v9051_v39  ;;  %v7238_v12 = vadd.f32 %v11994_v35, %v7212_v3  ;;  %v9256_v11 = vld [vmem:[%s12276_s7] sm:$0xff]  ;;  %v9257_v55 = vld [vmem:[%s12276_s7 + $0x8] sm:$0xff] }
 0x4e0   : > { %v7103_v21 = vadd.f32 %v7093_v54, %v6981_v23  ;;  %v7384_v53 = vld [vmem:[#allocation2 + $0x24] sm:$0x7]  ;;  %7557 = vmatpush.bf16.msrb.mxu2 %v9256_v11  ;;  %7523 = vmatpush.bf16.msrb.mxu1 %v9257_v55  ;;  %v7387_v54 = vld [vmem:[#allocation2 + $0x30] sm:$0x7] }
 0x4e1   : > { %v7398_v49 = vld [vmem:[#allocation2 + $0x18] sm:$0x7]  ;;  %v7239_v7 = vadd.f32 %v12001_v60, %v7213_v24  ;;  %v7240_v47 = vadd.f32 %v11998_v33, %v7214_v5  ;;  %v7241_v14 = vadd.f32 %v12004_v22, %v7215_v8  ;;  %v7299_v34 = vpack.c.bf16 %v7238_v12, %v7238_v12 }
 0x4e2   : > { %v7406_v42 = vrot.slane %v7398_v49, 2  ;;  %v7115_v32 = vadd.f32 %v11988_v41, %v7103_v21  ;;  %v7566_v11 = vld [vmem:[#allocation2 + $0x18] sm:$0x6] }
 0x4e3   : > { %v7300_v19 = vpack.c.bf16 %v7239_v7, %v7239_v7  ;;  %v7301_v1 = vpack.c.bf16 %v7240_v47, %v7240_v47  ;;  %v7302_v15 = vpack.c.bf16 %v7241_v14, %v7241_v14  ;;  %v7331_v57 = vunpack.c.l.b16 %v7299_v34 }
 0x4e4   : > { %v7423_v51 = vsel %vm12546_vm9, %v7398_v49, %v7406_v42  ;;  %v7424_v37 = vsel %vm12547_vm12, %v7398_v49, %v7406_v42  ;;  %v7114_v49 = vadd.f32 %v11988_v41, %v7102_v48  ;;  %vm12555_vm9 = vmmov %vm12551_vm7 }
 0x4e5   : > { %v7426_v59 = vrot.slane %v7424_v37, 2  ;;  %v7466_v36 = vshrl.u32 %v7423_v51, 16  ;;  %v7469_v30 = vshll.u32 %v7423_v51, 16  ;;  %v7332_v9 = vunpack.c.l.b16 %v7300_v19  ;;  %v9272_v51 = vld [vmem:[%s12279_s10 + $0x38] sm:$0xff] }
 0x4e6   : > { %v7333_v0 = vunpack.c.l.b16 %v7301_v1  ;;  %v7334_v13 = vunpack.c.l.b16 %v7302_v15  ;;  %v7353_v63 = vrot.slane %v7331_v57, 7  ;;  %8382 = vmatpush.bf16.msrb.mxu0 %v9272_v51 }
 0x4e7   : > { %v7468_v10 = vrot.slane %v7466_v36, 6  ;;  %v7471_v4 = vrot.slane %v7469_v30, 7  ;;  %v7475_v16 = vshll.u32 %v7426_v59, 16  ;;  %v7354_v43 = vrot.slane %v7332_v9, 6 }
 0x4e8   : > { %v7356_v61 = vrot.slane %v7333_v0, 5  ;;  %v7358_v6 = vrot.slane %v7334_v13, 4  ;;  %v7122_v59 = vmax.f32 %v7114_v49, 0.0  ;;  %v7123_v36 = vmax.f32 %v7115_v32, 0.0  ;;  %v7390_v49 = vld [vmem:[#allocation2] sm:$0x3] }
 0x4e9   : > { %v7472_v27 = vor.u32 %v7471_v4, %v7468_v10  ;;  %v7477_v44 = vrot.slane %v7475_v16, 7  ;;  %v7355_v58 = vsel %vm5743_vm4, %v7354_v43, %v7353_v63 }
 0x4ea   : > { %v7357_v20 = vsel %vm12548_vm14, %v7356_v61, %v7355_v58  ;;  %v7127_v30 = vmax.f32 %v7122_v59, %v7123_v36  ;;  %v9259_v61 = vld [vmem:[%s12276_s7 + $0x18] sm:$0xff]  ;;  %v7574_v59 = vrot.slane %v7566_v11, 2  ;;  %v9260_v36 = vld [vmem:[%s12276_s7 + $0x20] sm:$0xff]  ;;  %vm12558_vm14 = vmmov %vm12551_vm7 }
 0x4eb   : > { %v7473_v52 = vrot.slane %v7472_v27, 2  ;;  %v7359_v38 = vsel %vm12549_vm15, %v7358_v6, %v7357_v20  ;;  %7700 = vmatpush.bf16.msra.mxu1 %v9259_v61  ;;  %v7564_v20 = vld [vmem:[#allocation2] sm:$0x6]  ;;  %7827 = vmatpush.bf16.msra.mxu2 %v9260_v36  ;;  %v9263_v36 = vld [vmem:[%s12276_s7 + $0x38] sm:$0xff] }
 0x4ec   : > { %v7369_v42 = vpack.c.b16 %v7359_v38, %v7359_v38  ;;  %v7141_v26 = vrot.slane %v7127_v30, 2  ;;  %v7142_v31 = vrot.slane %v7127_v30, 4  ;;  %v7143_v39 = vrot.slane %v7127_v30, 6 }
 0x4ed   : > { %v7478_v62 = vsel %vm11231_vm0, %v7473_v52, %v7477_v44  ;;  %v9052_v3 = vrot.slane %v7127_v30, 9  ;;  %v7572_v21 = vrot.slane %v7564_v20, 2 }
 0x4ee   : > { %7502 = vst [vmem:[#allocation1 + $0x2] ss:$4 sm:$0xff] %v7478_v62  ;;  %v7385_v37 = vsel %vm12015_vm11, %v7369_v42, %v7384_v53  ;;  %v9053_v41 = vrot.slane %v7141_v26, 9  ;;  %v9054_v18 = vrot.slane %v7142_v31, 9  ;;  %v9055_v25 = vrot.slane %v7143_v39, 9 }
 0x4ef   : > { %7386 = vst [vmem:[#allocation2 + $0x24] sm:$0x7] %v7385_v37  ;;  %v7216_v10 = vmax.f32 %v7127_v30, %v9052_v3  ;;  %v7565_v42 = vld [vmem:[#allocation2 + $0xc] sm:$0x6]  ;;  %v7578_v51 = vsel %vm12554_vm5, %v7564_v20, %v7572_v21  ;;  %v7580_v29 = vsel %vm12555_vm9, %v7564_v20, %v7572_v21  ;;  %v7392_v37 = vld [vmem:[#allocation2 + $0x18] sm:$0x3] }
 0x4f0   : > { %v7217_v24 = vmax.f32 %v7141_v26, %v9053_v41  ;;  %v7218_v5 = vmax.f32 %v7142_v31, %v9054_v18  ;;  %v7219_v8 = vmax.f32 %v7143_v39, %v9055_v25  ;;  %v7391_v53 = vld [vmem:[#allocation2 + $0xc] sm:$0x3]  ;;  %v7573_v32 = vrot.slane %v7565_v42, 2 }
 0x4f1   : > { %v7242_v12 = vadd.f32 %v11994_v35, %v7216_v10  ;;  %v9068_v31 = vrot.slane %v7578_v51, 9  ;;  %v9069_v39 = vrot.slane %v7580_v29, 9  ;;  %v7709_v10 = vld [vmem:[#allocation2 + $0xc] sm:$0x7] }
 0x4f2   : > { %v7243_v27 = vadd.f32 %v12001_v60, %v7217_v24  ;;  %v7244_v7 = vadd.f32 %v11998_v33, %v7218_v5  ;;  %v7245_v52 = vadd.f32 %v12004_v22, %v7219_v8  ;;  %v7587_v41 = vsel %vm12558_vm14, %v7565_v42, %v7573_v32  ;;  %v7710_v24 = vld [vmem:[#allocation2 + $0x18] sm:$0x7] }
 0x4f3   : > { %v7303_v44 = vpack.c.bf16 %v7242_v12, %v7242_v12  ;;  %v9071_v12 = vrot.slane %v7587_v41, 9 }
 0x4f4   : > { %v7304_v19 = vpack.c.bf16 %v7243_v27, %v7243_v27  ;;  %v7305_v50 = vpack.c.bf16 %v7244_v7, %v7244_v7  ;;  %v7306_v35 = vpack.c.bf16 %v7245_v52, %v7245_v52 }
 0x4f5   : > { %v7335_v62 = vunpack.c.l.b16 %v7303_v44  ;;  %v7718_v44 = vrot.slane %v7710_v24, 2 }
 0x4f6   : > { %v7399_v4 = vld [vmem:[#allocation2 + $0x24] sm:$0x7]  ;;  %v7336_v9 = vunpack.c.l.b16 %v7304_v19  ;;  %v7337_v0 = vunpack.c.l.b16 %v7305_v50  ;;  %v7338_v17 = vunpack.c.l.b16 %v7306_v35 }
 0x4f7   : > { %v7407_v16 = vrot.slane %v7399_v4, 2  ;;  %v7360_v60 = vrot.slane %v7335_v62, 7  ;;  %v7567_v55 = vld [vmem:[#allocation2 + $0x24] sm:$0x6] }
 0x4f8   : > { %v7361_v63 = vrot.slane %v7336_v9, 6  ;;  %v7363_v33 = vrot.slane %v7337_v0, 5  ;;  %v7365_v22 = vrot.slane %v7338_v17, 4  ;;  %v7393_v30 = vld [vmem:[#allocation2 + $0x24] sm:$0x3]  ;;  %v7575_v26 = vrot.slane %v7567_v55, 2 }
 0x4f9   : > { %v7429_v56 = vsel %vm12550_vm10, %v7399_v4, %v7407_v16  ;;  %v7430_v28 = vsel %vm12551_vm7, %v7399_v4, %v7407_v16  ;;  %vm12560_vm10 = vmmov %vm12551_vm7  ;;  %v9261_v62 = vld [vmem:[%s12276_s7 + $0x28] sm:$0xff] }
 0x4fa   : > { %v7432_v47 = vrot.slane %v7430_v28, 2  ;;  %v7479_v14 = vshrl.u32 %v7429_v56, 16  ;;  %v7482_v34 = vshll.u32 %v7429_v56, 16  ;;  %v7362_v40 = vsel %vm5743_vm4, %v7361_v63, %v7360_v60  ;;  %vm12557_vm4 = vmmov %vm12554_vm5  ;;  %v7711_v56 = vld [vmem:[#allocation2 + $0x24] sm:$0x7]  ;;  %7922 = vmatpush.bf16.msra.mxu3 %v9261_v62 }
 0x4fb   : > { %v7364_v58 = vsel %vm12552_vm8, %v7363_v33, %v7362_v40  ;;  %v7585_v3 = vsel %vm12557_vm4, %v7565_v42, %v7573_v32  ;;  %vm12559_vm15 = vmmov %vm12557_vm4  ;;  %v7594_v25 = vsel %vm12560_vm10, %v7566_v11, %v7574_v59  ;;  %v7719_v50 = vrot.slane %v7711_v56, 2 }
 0x4fc   : > { %v7481_v1 = vrot.slane %v7479_v14, 6  ;;  %v7484_v15 = vrot.slane %v7482_v34, 7  ;;  %v7488_v57 = vshll.u32 %v7432_v47, 16  ;;  %v7366_v6 = vsel %vm12553_vm13, %v7365_v22, %v7364_v58  ;;  %vm12561_vm7 = vmmov %vm12557_vm4 }
 0x4fd   : > { %v7370_v23 = vpack.c.b16 %v7366_v6, %v7366_v6  ;;  %v7592_v18 = vsel %vm12559_vm15, %v7566_v11, %v7574_v59  ;;  %v7599_v4 = vsel %vm12561_vm7, %v7567_v55, %v7575_v26  ;;  %vm12562_vm8 = vmmov %vm12555_vm9  ;;  %v9070_v8 = vrot.slane %v7585_v3, 9  ;;  %v7666_v6 = vld [vmem:[#allocation2 + $0xc] sm:$0x3] }
 0x4fe   : > { %v7485_v13 = vor.u32 %v7484_v15, %v7481_v1  ;;  %v7490_v48 = vrot.slane %v7488_v57, 7  ;;  %v7601_v16 = vsel %vm12562_vm8, %v7567_v55, %v7575_v26  ;;  %v9072_v27 = vrot.slane %v7592_v18, 9  ;;  %vm12567_vm5 = vmmov %vm12557_vm4  ;;  %v9262_v59 = vld [vmem:[%s12276_s7 + $0x30] sm:$0xff] }
 0x4ff   : > { %v7388_v38 = vsel %vm12015_vm11, %v7370_v23, %v7387_v54  ;;  %vm12556_vm11 = vmmov %vm12553_vm13  ;;  %vm12563_vm13 = vcmask 1046534   ;;  %v9073_v7 = vrot.slane %v7594_v25, 9  ;;  %v7717_v14 = vrot.slane %v7709_v10, 2  ;;  %v7667_v54 = vld [vmem:[#allocation2 + $0x18] sm:$0x3] }
 0x500   : > { %v7486_v43 = vrot.slane %v7485_v13, 2  ;;  %7389 = vst [vmem:[#allocation2 + $0x30] sm:$0x7] %v7388_v38  ;;  %vm7608_vm12 = vmor %vm7606_vm6, %vm12556_vm11  ;;  %v9074_v34 = vrot.slane %v7599_v4, 9  ;;  %v9075_v52 = vrot.slane %v7601_v16, 9  ;;  %v7729_v0 = vsel %vm12567_vm5, %v7710_v24, %v7718_v44 }
 0x501   : > { %vm12101_vm1 = vmor %vm7608_vm12, %vm12563_vm13 }
 0x502   : > { %v7491_v45 = vsel %vm11231_vm0, %v7486_v43, %v7490_v48  ;;  %v7614_v28 = vsel %vm12101_vm1, %v9068_v31, %v9069_v39  ;;  %v7618_v1 = vsel %vm12101_vm1, %v9070_v8, %v9071_v12  ;;  %v7622_v57 = vsel %vm12101_vm1, %v9072_v27, %v9073_v7  ;;  %vm12566_vm6 = vmmov %vm12557_vm4 }
 0x503   : > { %7505 = vst [vmem:[#allocation1 + $0x3] ss:$4 sm:$0xff] %v7491_v45  ;;  %v7723_v35 = vsel %vm12566_vm6, %v7709_v10, %v7717_v14  ;;  %v7626_v9 = vsel %vm12101_vm1, %v9074_v34, %v9075_v52  ;;  %vm12568_vm9 = vmmov %vm12557_vm4  ;;  %v7758_v43 = vshrl.u32 %v7729_v0, 16  ;;  %v7761_v48 = vshll.u32 %v7729_v0, 16 }
 0x504   : > { %v7735_v13 = vsel %vm12568_vm9, %v7711_v56, %v7719_v50  ;;  %vm12569_vm11 = vmmov %vm12557_vm4  ;;  %v7745_v60 = vshrl.u32 %v7723_v35, 16  ;;  %v7748_v33 = vshll.u32 %v7723_v35, 16 }
 0x505   : > { %vm12570_vm12 = vmmov %vm12562_vm8  ;;  %v7771_v22 = vshrl.u32 %v7735_v13, 16  ;;  %v7774_v61 = vshll.u32 %v7735_v13, 16  ;;  %v7760_v21 = vrot.slane %v7758_v43, 6  ;;  %v7763_v42 = vrot.slane %v7761_v48, 7 }
 0x506   : > { %v7724_v63 = vsel %vm12570_vm12, %v7709_v10, %v7717_v14  ;;  %vm12571_vm4 = vmmov %vm12562_vm8  ;;  %v7747_v20 = vrot.slane %v7745_v60, 6  ;;  %v7837_v14 = vld [vmem:[#allocation2 + $0x18] sm:$0x6] }
 0x507   : > { %v7712_v47 = vld [vmem:[#allocation2 + $0x30] sm:$0x7]  ;;  %v7730_v40 = vsel %vm12571_vm4, %v7710_v24, %v7718_v44  ;;  %v7726_v23 = vrot.slane %v7724_v63, 2  ;;  %vm12572_vm14 = vmmov %vm12571_vm4  ;;  %v7776_v51 = vrot.slane %v7774_v61, 7  ;;  %v7764_v25 = vor.u32 %v7763_v42, %v7760_v21  ;;  %v7838_v44 = vld [vmem:[#allocation2 + $0x24] sm:$0x6] }
 0x508   : > { %v7720_v15 = vrot.slane %v7712_v47, 2  ;;  %v7732_v38 = vrot.slane %v7730_v40, 2  ;;  %v7736_v55 = vsel %vm12572_vm14, %v7711_v56, %v7719_v50  ;;  %vm12573_vm15 = vmmov %vm12571_vm4  ;;  %v7669_v26 = vld [vmem:[#allocation2 + $0x30] sm:$0x3]  ;;  %v7836_v56 = vld [vmem:[#allocation2 + $0xc] sm:$0x6] }
 0x509   : > { %v7738_v31 = vrot.slane %v7736_v55, 2  ;;  %v7754_v10 = vshll.u32 %v7726_v23, 16  ;;  %v7846_v13 = vrot.slane %v7838_v44, 2  ;;  %vm12576_vm10 = vmmov %vm12571_vm4  ;;  %v9264_v40 = vld [vmem:[%s12276_s7 + $0x40] sm:$0xff] }
 0x50a   : > { %v7506_v46 = vld.sshfl [vmem:[#allocation1] sm:$0xff pattern:$0x73625140]  ;;  %v7741_v17 = vsel %vm12569_vm11, %v7712_v47, %v7720_v15  ;;  %v7742_v32 = vsel %vm12573_vm15, %v7712_v47, %v7720_v15  ;;  %v7767_v16 = vshll.u32 %v7732_v38, 16  ;;  %vm12578_vm8 = vmmov %vm12571_vm4 }
 0x50b   : > { %7531 = vst [vmem:[#allocation1] ss:$4 sm:$0xff] %v7390_v49  ;;  %9062 = vmatmul.msk.bf16.vlgmr.msrb.gmra.mxu1 %vm7513_vm3, %v7506_v46  ;;  %v7784_v45 = vshrl.u32 %v7741_v17, 16  ;;  %v7787_v58 = vshll.u32 %v7741_v17, 16  ;;  %v7750_v49 = vrot.slane %v7748_v33, 7  ;;  %v7744_v18 = vrot.slane %v7742_v32, 2  ;;  %vm12580_vm6 = vmmov %vm12571_vm4 }
 0x50c   : > { %7534 = vst [vmem:[#allocation1 + $0x1] ss:$4 sm:$0xff] %v7391_v53  ;;  %v7668_v46 = vld [vmem:[#allocation2 + $0x24] sm:$0x3]  ;;  %v7773_v53 = vrot.slane %v7771_v22, 6  ;;  %7965 = vmatpush.bf16.msrb.mxu1 %v9262_v59  ;;  %v7780_v12 = vshll.u32 %v7738_v31, 16  ;;  %v7866_v61 = vsel %vm12580_vm6, %v7838_v44, %v7846_v13  ;;  %vm12582_vm9 = vmmov %vm12571_vm4 }
 0x50d   : > { %7537 = vst [vmem:[#allocation1 + $0x2] ss:$4 sm:$0xff] %v7392_v37  ;;  %v7786_v29 = vrot.slane %v7784_v45, 6  ;;  %v7789_v37 = vrot.slane %v7787_v58, 7  ;;  %v7751_v39 = vor.u32 %v7750_v49, %v7747_v20  ;;  %v7793_v27 = vshll.u32 %v7744_v18, 16  ;;  %vm12586_vm14 = vmmov %vm12580_vm6 }
 0x50e   : > { %7540 = vst [vmem:[#allocation1 + $0x3] ss:$4 sm:$0xff] %v7393_v30  ;;  %v7267_v30 = vld [vmem:[#allocation2 + $0x3c] sm:$0x1]  ;;  %v7777_v4 = vor.u32 %v7776_v51, %v7773_v53  ;;  %v7756_v7 = vrot.slane %v7754_v10, 7  ;;  %v7769_v34 = vrot.slane %v7767_v16, 7 }
 0x50f   : > { %v7268_v41 = vsel %vm11125_vm2, 0, %v7267_v30  ;;  %v7790_v24 = vor.u32 %v7789_v37, %v7786_v29  ;;  %v7752_v8 = vrot.slane %v7751_v39, 2  ;;  %v7782_v15 = vrot.slane %v7780_v12, 7  ;;  %vm12575_vm2 = vmmov %vm12567_vm5  ;;  %v7974_v20 = vld [vmem:[#allocation2 + $0x18] sm:$0x7] }
 0x510   : > { %7269 = vst [vmem:[#allocation2 + $0x3c] sm:$0x1] %v7268_v41  ;;  %v7778_v47 = vrot.slane %v7777_v4, 2  ;;  %v7795_v62 = vrot.slane %v7793_v27, 7  ;;  %vm12577_vm7 = vmmov %vm12575_vm2  ;;  %v7982_v32 = vrot.slane %v7974_v20, 2 }
 0x511   : > { %v7791_v52 = vrot.slane %v7790_v24, 2  ;;  %vm12579_vm13 = vmmov %vm12575_vm2 }
 0x512   : > { %v7783_v0 = vsel %vm11231_vm0, %v7778_v47, %v7782_v15  ;;  %v7864_v22 = vsel %vm12579_vm13, %v7838_v44, %v7846_v13  ;;  %vm12581_vm5 = vmmov %vm12575_vm2  ;;  %v7989_v18 = vsel %vm12586_vm14, %v7974_v20, %v7982_v32 }
 0x513   : > { %v7796_v17 = vsel %vm11231_vm0, %v7791_v52, %v7795_v62  ;;  %v9101_v42 = vrot.slane %v7864_v22, 9  ;;  %vm12583_vm11 = vmmov %vm12575_vm2  ;;  %v7991_v47 = vrot.slane %v7989_v18, 2 }
 0x514   : > { %v7988_v39 = vsel %vm12583_vm11, %v7974_v20, %v7982_v32  ;;  %vm12584_vm12 = vmmov %vm12575_vm2 }
 0x515   : > { %v7541_v19 = vld.sshfl [vmem:[#allocation1] sm:$0xff pattern:$0x73625140]  ;;  %vm12585_vm4 = vmmov %vm12575_vm2  ;;  %v8010_v10 = vshrl.u32 %v7988_v39, 16  ;;  %v8013_v4 = vshll.u32 %v7988_v39, 16 }
 0x516   : > { %9067 = vmatmul.msk.bf16.vlgmr.msrb.gmra.mxu2 %vm7513_vm3, %v7541_v19  ;;  %7631 = vst [vmem:[#allocation1] ss:$4 sm:$0xff] %v7614_v28  ;;  %v7765_v28 = vrot.slane %v7764_v25, 2  ;;  %v7844_v19 = vrot.slane %v7836_v56, 2  ;;  %vm12587_vm15 = vmmov %vm12575_vm2 }
 0x517   : > { %7634 = vst [vmem:[#allocation1 + $0x1] ss:$4 sm:$0xff] %v7618_v1  ;;  %8092 = vmatpush.bf16.msrb.mxu2 %v9263_v36  ;;  %v7757_v1 = vsel %vm11231_vm0, %v7752_v8, %v7756_v7  ;;  %v7977_v21 = vld [vmem:[#allocation2 + $0x3c] sm:$0x7]  ;;  %v7931_v7 = vld [vmem:[#allocation2 + $0x18] sm:$0x3] }
 0x518   : > { %7637 = vst [vmem:[#allocation1 + $0x2] ss:$4 sm:$0xff] %v7622_v57  ;;  %v7839_v57 = vld [vmem:[#allocation2 + $0x30] sm:$0x6]  ;;  %v7770_v35 = vsel %vm11231_vm0, %v7765_v28, %v7769_v34  ;;  %v7850_v63 = vsel %vm12575_vm2, %v7836_v56, %v7844_v19  ;;  %v7852_v33 = vsel %vm12576_vm10, %v7836_v56, %v7844_v19  ;;  %v7985_v59 = vrot.slane %v7977_v21, 2  ;;  %vm12588_vm2 = vmmov %vm12580_vm6 }
 0x519   : > { %7640 = vst [vmem:[#allocation1 + $0x3] ss:$4 sm:$0xff] %v7626_v9  ;;  %v7845_v9 = vrot.slane %v7837_v14, 2  ;;  %v7847_v60 = vrot.slane %v7839_v57, 2  ;;  %v9098_v23 = vrot.slane %v7852_v33, 9  ;;  %vm12589_vm10 = vmmov %vm12588_vm2  ;;  %v8012_v52 = vrot.slane %v8010_v10, 6 }
 0x51a   : > { %v8006_v41 = vsel %vm12585_vm4, %v7977_v21, %v7985_v59  ;;  %v8007_v56 = vsel %vm12588_vm2, %v7977_v21, %v7985_v59  ;;  %v7932_v34 = vld [vmem:[#allocation2 + $0x24] sm:$0x3]  ;;  %v8015_v44 = vrot.slane %v8013_v4, 7  ;;  %vm12592_vm13 = vmmov %vm12588_vm2 }
 0x51b   : > { %v7857_v43 = vsel %vm12577_vm7, %v7837_v14, %v7845_v9  ;;  %v7859_v48 = vsel %vm12578_vm8, %v7837_v14, %v7845_v9  ;;  %v7871_v45 = vsel %vm12581_vm5, %v7839_v57, %v7847_v60  ;;  %v7873_v58 = vsel %vm12582_vm9, %v7839_v57, %v7847_v60  ;;  %vm12590_vm7 = vmmov %vm12588_vm2  ;;  %v7934_v9 = vld [vmem:[#allocation2 + $0x3c] sm:$0x3] }
 0x51c   : > { %v9099_v38 = vrot.slane %v7857_v43, 9  ;;  %v9100_v49 = vrot.slane %v7859_v48, 9  ;;  %v9103_v55 = vrot.slane %v7871_v45, 9  ;;  %v9104_v53 = vrot.slane %v7873_v58, 9  ;;  %vm12591_vm8 = vmmov %vm12585_vm4 }
 0x51d   : > { %v8049_v8 = vshrl.u32 %v8006_v41, 16  ;;  %v8052_v12 = vshll.u32 %v8006_v41, 16  ;;  %v8009_v57 = vrot.slane %v8007_v56, 2  ;;  %v8016_v43 = vor.u32 %v8015_v44, %v8012_v52  ;;  %vm12593_vm6 = vmmov %vm12585_vm4 }
 0x51e   : > { %v7883_v36 = vsel %vm12101_vm1, %v9099_v38, %v9100_v49  ;;  %v7891_v31 = vsel %vm12101_vm1, %v9103_v55, %v9104_v53  ;;  %v8101_v49 = vld [vmem:[#allocation2 + $0x18] sm:$0x6]  ;;  %v8103_v53 = vld [vmem:[#allocation2 + $0x30] sm:$0x6]  ;;  %vm12594_vm5 = vmmov %vm12588_vm2 }
 0x51f   : > { %v8054_v62 = vrot.slane %v8052_v12, 7  ;;  %v8058_v22 = vshll.u32 %v8009_v57, 16  ;;  %v8111_v39 = vrot.slane %v8103_v53, 2  ;;  %vm12595_vm9 = vmmov %vm12585_vm4 }
 0x520   : > { %v7641_v11 = vld.sshfl [vmem:[#allocation1] sm:$0xff pattern:$0x73625140]  ;;  %vm12596_vm11 = vmmov %vm12588_vm2 }
 0x521   : > { %9082 = vmatmul.msk.bf16.vlgmr.msrb.gmra.mxu3 %vm7513_vm3, %v7641_v11  ;;  %7674 = vst [vmem:[#allocation1] ss:$4 sm:$0xff] %v7666_v6  ;;  %v9097_v6 = vrot.slane %v7850_v63, 9  ;;  %v9102_v11 = vrot.slane %v7866_v61, 9  ;;  %v9271_v63 = vld [vmem:[%s12279_s10 + $0x30] sm:$0xff]  ;;  %v8019_v61 = vshll.u32 %v7991_v47, 16 }
 0x522   : > { %7677 = vst [vmem:[#allocation1 + $0x1] ss:$4 sm:$0xff] %v7667_v54  ;;  %v7975_v54 = vld [vmem:[#allocation2 + $0x24] sm:$0x7]  ;;  %8187 = vmatpush.bf16.msrb.mxu3 %v9264_v40  ;;  %8383 = vmatpush.bf16.msrb.mxu0 %v9271_v63  ;;  %v8060_v38 = vrot.slane %v8058_v22, 7 }
 0x523   : > { %7680 = vst [vmem:[#allocation1 + $0x2] ss:$4 sm:$0xff] %v7668_v46  ;;  %v7976_v46 = vld [vmem:[#allocation2 + $0x30] sm:$0x7]  ;;  %v7983_v51 = vrot.slane %v7975_v54, 2  ;;  %v7879_v37 = vsel %vm12101_vm1, %v9097_v6, %v9098_v23  ;;  %v8017_v6 = vrot.slane %v8016_v43, 2 }
 0x524   : > { %7683 = vst [vmem:[#allocation1 + $0x3] ss:$4 sm:$0xff] %v7669_v26  ;;  %v7984_v30 = vrot.slane %v7976_v46, 2  ;;  %v7887_v26 = vsel %vm12101_vm1, %v9101_v42, %v9102_v11  ;;  %v8021_v21 = vrot.slane %v8019_v61, 7  ;;  %v8102_v11 = vld [vmem:[#allocation2 + $0x24] sm:$0x6] }
 0x525   : > { %v7994_v3 = vsel %vm12584_vm12, %v7975_v54, %v7983_v51  ;;  %v7995_v14 = vsel %vm12589_vm10, %v7975_v54, %v7983_v51  ;;  %vm12597_vm12 = vmmov %vm12585_vm4 }
 0x526   : > { %v8000_v25 = vsel %vm12587_vm15, %v7976_v46, %v7984_v30  ;;  %v8023_v16 = vshrl.u32 %v7994_v3, 16  ;;  %v8026_v24 = vshll.u32 %v7994_v3, 16  ;;  %v8001_v15 = vsel %vm12590_vm7, %v7976_v46, %v7984_v30  ;;  %v8104_v46 = vld [vmem:[#allocation2 + $0x3c] sm:$0x6]  ;;  %vm12598_vm4 = vmmov %vm12588_vm2 }
 0x527   : > { %v8036_v28 = vshrl.u32 %v8000_v25, 16  ;;  %v8039_v27 = vshll.u32 %v8000_v25, 16  ;;  %v7997_v60 = vrot.slane %v7995_v14, 2  ;;  %v8003_v33 = vrot.slane %v8001_v15, 2  ;;  %vm12602_vm15 = vmmov %vm12588_vm2 }
 0x528   : > { %v8025_v19 = vrot.slane %v8023_v16, 6  ;;  %v8022_v51 = vsel %vm11231_vm0, %v8017_v6, %v8021_v21  ;;  %v8110_v30 = vrot.slane %v8102_v11, 2  ;;  %v8129_v16 = vsel %vm12597_vm12, %v8103_v53, %v8111_v39 }
 0x529   : > { %v8041_v13 = vrot.slane %v8039_v27, 7  ;;  %v8032_v58 = vshll.u32 %v7997_v60, 16  ;;  %v8045_v23 = vshll.u32 %v8003_v33, 16  ;;  %v8131_v2 = vsel %vm12598_vm4, %v8103_v53, %v8111_v39  ;;  %v9269_v53 = vld [vmem:[%s12279_s10 + $0x20] sm:$0xff] }
 0x52a   : > { %v8122_v18 = vsel %vm12593_vm6, %v8102_v11, %v8110_v30  ;;  %v8124_v25 = vsel %vm12594_vm5, %v8102_v11, %v8110_v30  ;;  %v9131_v47 = vrot.slane %v8131_v2, 9  ;;  %v9317_v11 = vld [vmem:[%s12277_s8] ss:$0 sm:$0xff] }
 0x52b   : > { %v7684_v50 = vld.sshfl [vmem:[#allocation1] sm:$0xff pattern:$0x73625140]  ;;  %v8034_v55 = vrot.slane %v8032_v58, 7  ;;  %v9128_v12 = vrot.slane %v8122_v18, 9  ;;  %v9129_v56 = vrot.slane %v8124_v25, 9 }
 0x52c   : > { %9089 = vmatmul.msk.bf16.vlgmr.msra.gmra.mxu1 %vm7513_vm3, %v7684_v50  ;;  %7801 = vst [vmem:[#allocation1] ss:$4 sm:$0xff] %v7757_v1  ;;  %v8028_v50 = vrot.slane %v8026_v24, 7 }
 0x52d   : > { %7804 = vst [vmem:[#allocation1 + $0x1] ss:$4 sm:$0xff] %v7770_v35  ;;  %v8051_v35 = vrot.slane %v8049_v8, 6  ;;  %v8148_v52 = vsel %vm12101_vm1, %v9128_v12, %v9129_v56 }
 0x52e   : > { %7807 = vst [vmem:[#allocation1 + $0x2] ss:$4 sm:$0xff] %v7783_v0  ;;  %v8038_v0 = vrot.slane %v8036_v28, 6  ;;  %v8029_v48 = vor.u32 %v8028_v50, %v8025_v19 }
 0x52f   : > { %7810 = vst [vmem:[#allocation1 + $0x3] ss:$4 sm:$0xff] %v7796_v17  ;;  %v7933_v17 = vld [vmem:[#allocation2 + $0x30] sm:$0x3]  ;;  %v8055_v40 = vor.u32 %v8054_v62, %v8051_v35 }
 0x530   : > { %v8042_v45 = vor.u32 %v8041_v13, %v8038_v0  ;;  %v8030_v20 = vrot.slane %v8029_v48, 2 }
 0x531   : > { %v8056_v54 = vrot.slane %v8055_v40, 2 }
 0x532   : > { %v8043_v42 = vrot.slane %v8042_v45, 2  ;;  %v8035_v59 = vsel %vm11231_vm0, %v8030_v20, %v8034_v55  ;;  %v9265_v55 = vld [vmem:[%s12279_s10] sm:$0xff] }
 0x536   : > { %v7811_v29 = vld.sshfl [vmem:[#allocation1] sm:$0xff pattern:$0x73625140] }
 0x537   : > { %9096 = vmatmul.msk.bf16.vlgmr.msra.gmra.mxu2 %vm7513_vm3, %v7811_v29  ;;  %7896 = vst [vmem:[#allocation1] ss:$4 sm:$0xff] %v7879_v37  ;;  %v8047_v29 = vrot.slane %v8045_v23, 7  ;;  %v8109_v37 = vrot.slane %v8101_v49, 2 }
 0x538   : > { %7899 = vst [vmem:[#allocation1 + $0x1] ss:$4 sm:$0xff] %v7883_v36  ;;  %v8061_v36 = vsel %vm11231_vm0, %v8056_v54, %v8060_v38  ;;  %v9266_v54 = vld [vmem:[%s12279_s10 + $0x8] sm:$0xff] }
 0x539   : > { %7902 = vst [vmem:[#allocation1 + $0x2] ss:$4 sm:$0xff] %v7887_v26  ;;  %v8112_v26 = vrot.slane %v8104_v46, 2  ;;  %v8115_v3 = vsel %vm12591_vm8, %v8101_v49, %v8109_v37  ;;  %v8117_v41 = vsel %vm12592_vm13, %v8101_v49, %v8109_v37  ;;  %v9270_v38 = vld [vmem:[%s12279_s10 + $0x28] sm:$0xff]  ;;  %v9268_v49 = vld [vmem:[%s12279_s10 + $0x18] sm:$0xff]  ;;  %8313 = vmatpush.bf16.msra.mxu2 %v9266_v54 }
 0x53a   : > { %7905 = vst [vmem:[#allocation1 + $0x3] ss:$4 sm:$0xff] %v7891_v31  ;;  %v8048_v31 = vsel %vm11231_vm0, %v8043_v42, %v8047_v29  ;;  %v9126_v24 = vrot.slane %v8115_v3, 9  ;;  %v9127_v8 = vrot.slane %v8117_v41, 9  ;;  %8285 = vmatpush.bf16.msra.mxu1 %v9268_v49  ;;  %v9267_v29 = vld [vmem:[%s12279_s10 + $0x10] sm:$0xff]  ;;  %vm12599_vm0 = vmmov %vm12593_vm6 }
 0x53b   : > { %v8136_v10 = vsel %vm12595_vm9, %v8104_v46, %v8112_v26  ;;  %v8138_v4 = vsel %vm12596_vm11, %v8104_v46, %v8112_v26  ;;  %vm12601_vm14 = vmmov %vm12599_vm0 }
 0x53c   : > { %v9132_v28 = vrot.slane %v8136_v10, 9  ;;  %v9133_v27 = vrot.slane %v8138_v4, 9  ;;  %v9318_v4 = vld [vmem:[%s12278_s9] ss:$0 sm:$0xff] }
 0x53d   : > { %8314 = vmatpush.bf16.msra.mxu2 %v9265_v55 }
 0x53e   : > { %v8156_v44 = vsel %vm12101_vm1, %v9132_v28, %v9133_v27  ;;  %8286 = vmatpush.bf16.msra.mxu1 %v9267_v29 }
 0x541   : > { %v7906_v1 = vld.sshfl [vmem:[#allocation1] sm:$0xff pattern:$0x73625140] }
 0x542   : > { %9111 = vmatmul.msk.bf16.vlgmr.msra.gmra.mxu3 %vm7513_vm3, %v7906_v1  ;;  %7939 = vst [vmem:[#allocation1] ss:$4 sm:$0xff] %v7931_v7  ;;  %v9130_v7 = vrot.slane %v8129_v16, 9 }
 0x543   : > { %7942 = vst [vmem:[#allocation1 + $0x1] ss:$4 sm:$0xff] %v7932_v34  ;;  %v8144_v34 = vsel %vm12101_vm1, %v9126_v24, %v9127_v8  ;;  %8347 = vmatpush.bf16.msra.mxu3 %v9270_v38 }
 0x544   : > { %7945 = vst [vmem:[#allocation1 + $0x2] ss:$4 sm:$0xff] %v7933_v17  ;;  %v8152_v19 = vsel %vm12101_vm1, %v9130_v7, %v9131_v47  ;;  %v8245_v7 = vrot.slane %v9318_v4, 1  ;;  %vm8275_vm1 = vcmask 261120  }
 0x545   : > { %7948 = vst [vmem:[#allocation1 + $0x3] ss:$4 sm:$0xff] %v7934_v9 }
 0x547   : > { %8348 = vmatpush.bf16.msra.mxu3 %v9269_v53 }
 0x54c   : > { %v7949_v32 = vld.sshfl [vmem:[#allocation1] sm:$0xff pattern:$0x73625140] }
 0x54d   : > { %9118 = vmatmul.msk.bf16.vlgmr.msrb.gmra.mxu1 %vm7513_vm3, %v7949_v32  ;;  %8066 = vst [vmem:[#allocation1] ss:$4 sm:$0xff] %v8022_v51 }
 0x54e   : > { %8069 = vst [vmem:[#allocation1 + $0x1] ss:$4 sm:$0xff] %v8035_v59 }
 0x54f   : > { %8072 = vst [vmem:[#allocation1 + $0x2] ss:$4 sm:$0xff] %v8048_v31 }
 0x550   : > { %8075 = vst [vmem:[#allocation1 + $0x3] ss:$4 sm:$0xff] %v8061_v36 }
 0x557   : > { %v8076_v14 = vld.sshfl [vmem:[#allocation1] sm:$0xff pattern:$0x73625140] }
 0x558   : > { %9125 = vmatmul.msk.bf16.vlgmr.msrb.gmra.mxu2 %vm7513_vm3, %v8076_v14  ;;  %8161 = vst [vmem:[#allocation1] ss:$4 sm:$0xff] %v8144_v34 }
 0x559   : > { %8164 = vst [vmem:[#allocation1 + $0x1] ss:$4 sm:$0xff] %v8148_v52 }
 0x55a   : > { %8167 = vst [vmem:[#allocation1 + $0x2] ss:$4 sm:$0xff] %v8152_v19 }
 0x55b   : > { %8170 = vst [vmem:[#allocation1 + $0x3] ss:$4 sm:$0xff] %v8156_v44 }
 0x562   : > { %v8171_v50 = vld.sshfl [vmem:[#allocation1] sm:$0xff pattern:$0x73625140] }
 0x563   : > { %9140 = vmatmul.msk.bf16.vlgmr.msrb.gmra.mxu3 %vm7513_vm3, %v8171_v50  ;;  %vm12600_vm3 = vmmov %vm12588_vm2  ;;  %vm8392_vm2 = vcmask 8192  }
 0x588   : > { %v7525_v1 = vpop.f32.mrf.mxu1 }
 0x590   : > { %v7527_v35 = vpop.f32.mrf.mxu1 }
 0x599   : > { %v7559_v15 = vpop.f32.mrf.mxu2 }
 0x59a   : > { %v7560_v60 = vadd.f32 %v7559_v15, %v7525_v1 }
 0x5a1   : > { %v7561_v62 = vpop.f32.mrf.mxu2 }
 0x5a2   : > { %v7562_v48 = vadd.f32 %v7561_v62, %v7527_v35 }
 0x5a4   : > { %v7659_v57 = vpop.f32.mrf.mxu3 }
 0x5a5   : > { %v7664_v33 = vadd.f32 %v7659_v57, %v7560_v60 }
 0x5a9   : > { %v7702_v9 = vpop.f32.mrf.mxu1 }
 0x5aa   : > { %v7707_v43 = vadd.f32 %v7702_v9, %v7664_v33 }
 0x5ac   : > { %v7661_v0 = vpop.f32.mrf.mxu3 }
 0x5ad   : > { %v7665_v45 = vadd.f32 %v7661_v0, %v7562_v48 }
 0x5b1   : > { %v7704_v63 = vpop.f32.mrf.mxu1 }
 0x5b2   : > { %v7708_v23 = vadd.f32 %v7704_v63, %v7665_v45 }
 0x5ba   : > { %v7829_v13 = vpop.f32.mrf.mxu2 }
 0x5bb   : > { %v7834_v40 = vadd.f32 %v7829_v13, %v7707_v43 }
 0x5c2   : > { %v7831_v5 = vpop.f32.mrf.mxu2 }
 0x5c3   : > { %v7835_v21 = vadd.f32 %v7831_v5, %v7708_v23 }
 0x5c5   : > { %v7924_v17 = vpop.f32.mrf.mxu3 }
 0x5c6   : > { %v7929_v58 = vadd.f32 %v7924_v17, %v7834_v40 }
 0x5ca   : > { %v7967_v22 = vpop.f32.mrf.mxu1 }
 0x5cb   : > { %v7972_v20 = vadd.f32 %v7967_v22, %v7929_v58  ;;  %v8390_v58 = vld [vmem:[%s12280_s11] sm:$0x1] }
 0x5cd   : > { %v7926_v61 = vpop.f32.mrf.mxu3 }
 0x5ce   : > { %v7930_v32 = vadd.f32 %v7926_v61, %v7835_v21 }
 0x5d2   : > { %v7969_v37 = vpop.f32.mrf.mxu1 }
 0x5d3   : > { %v7973_v30 = vadd.f32 %v7969_v37, %v7930_v32 }
 0x5db   : > { %v8094_v6 = vpop.f32.mrf.mxu2 }
 0x5dc   : > { %v8099_v42 = vadd.f32 %v8094_v6, %v7972_v20 }
 0x5e3   : > { %v8096_v36 = vpop.f32.mrf.mxu2 }
 0x5e4   : > { %v8100_v31 = vadd.f32 %v8096_v36, %v7973_v30 }
 0x5e6   : > { %v8189_v46 = vpop.f32.mrf.mxu3 }
 0x5e7   : > { %v8194_v51 = vadd.f32 %v8189_v46, %v8099_v42 }
 0x5e9   : > { %v8200_v59 = vadd.f32 %v9317_v11, %v8194_v51 }
 0x5eb   : > { %v8202_v26 = vmax.f32 %v8200_v59, 0.0 }
 0x5ed   : > { %v8206_v39 = vrot.slane %v8202_v26, 4 }
 0x5ee   : > { %v8191_v3 = vpop.f32.mrf.mxu3 }
 0x5ef   : > { %v8210_v41 = vmax.f32 %v8202_v26, %v8206_v39  ;;  %v8195_v18 = vadd.f32 %v8191_v3, %v8100_v31 }
 0x5f1   : > { %v8214_v25 = vrot.slane %v8210_v41, 2  ;;  %v8201_v10 = vadd.f32 %v9317_v11, %v8195_v18 }
 0x5f3   : > { %v8216_v16 = vsel %vm12599_vm0, %v8210_v41, %v8214_v25  ;;  %v8217_v2 = vsel %vm12600_vm3, %v8210_v41, %v8214_v25  ;;  %v8203_v24 = vmax.f32 %v8201_v10, 0.0 }
 0x5f4   : > { %v8218_v8 = vrot.slane %v8217_v2, 2  ;;  %v9141_v12 = vrot.slane %v8216_v16, 9 }
 0x5f5   : > { %v8207_v56 = vrot.slane %v8203_v24, 4 }
 0x5f6   : > { %v9142_v28 = vrot.slane %v8218_v8, 9  ;;  %v8238_v27 = vmax.f32 %v8216_v16, %v9141_v12 }
 0x5f7   : > { %v8211_v47 = vmax.f32 %v8203_v24, %v8207_v56 }
 0x5f8   : > { %v8239_v14 = vmax.f32 %v8218_v8, %v9142_v28  ;;  %v8248_v34 = vadd.f32 %v9318_v4, %v8238_v27 }
 0x5f9   : > { %v8215_v52 = vrot.slane %v8211_v47, 2 }
 0x5fa   : > { %v8249_v44 = vadd.f32 %v8245_v7, %v8239_v14  ;;  %v8252_v19 = vpack.c.bf16 %v8248_v34, %v8248_v34 }
 0x5fb   : > { %v8219_v50 = vsel %vm12601_vm14, %v8211_v47, %v8215_v52  ;;  %v8220_v1 = vsel %vm12602_vm15, %v8211_v47, %v8215_v52 }
 0x5fc   : > { %v8257_v15 = vpack.c.bf16 %v8249_v44, %v8249_v44  ;;  %v8221_v57 = vrot.slane %v8220_v1, 2  ;;  %v9143_v35 = vrot.slane %v8219_v50, 9  ;;  %9166 = vmatmul.msk.bf16.vlgmr.msra.gmra.mxu2 %vm8275_vm1, %v8252_v19 }
 0x5fe   : > { %v9144_v62 = vrot.slane %v8221_v57, 9  ;;  %v8240_v9 = vmax.f32 %v8219_v50, %v9143_v35  ;;  %9157 = vmatmul.msk.bf16.vlgmr.msra.gmra.mxu1 %vm8275_vm1, %v8257_v15 }
 0x600   : > { %v8241_v0 = vmax.f32 %v8221_v57, %v9144_v62  ;;  %v8250_v13 = vadd.f32 %v9318_v4, %v8240_v9 }
 0x602   : > { %v8251_v17 = vadd.f32 %v8245_v7, %v8241_v0  ;;  %v8320_v60 = vpack.c.bf16 %v8250_v13, %v8250_v13 }
 0x604   : > { %v8355_v63 = vpack.c.bf16 %v8251_v17, %v8251_v17  ;;  %9179 = vmatmul.msk.bf16.vlgmr.msra.gmra.mxu3 %vm8275_vm1, %v8320_v60 }
 0x606   : > { %9192 = vmatmul.msk.bf16.vlgmr.msrb.gmra.mxu0 %vm8275_vm1, %v8355_v63 }
 0x67b   : > { %v8288_v33 = vpop.f32.mrf.mxu1 }
 0x67f   : > { %v8316_v5 = vpop.f32.mrf.mxu2 }
 0x680   : > { %v8317_v40 = vadd.f32 %v8316_v5, %v8288_v33 }
 0x683   : > { %v8290_v43 = vpop.f32.mrf.mxu1  ;;  %v8385_v48 = vpop.f32.mrf.mxu0 }
 0x687   : > { %v8318_v22 = vpop.f32.mrf.mxu2  ;;  %v8350_v61 = vpop.f32.mrf.mxu3 }
 0x688   : > { %v8354_v45 = vadd.f32 %v8350_v61, %v8317_v40 }
 0x68a   : > { %v8389_v6 = vadd.f32 %v8385_v48, %v8354_v45 }
 0x68b   : > { %v8387_v23 = vpop.f32.mrf.mxu0 }
 0x68c   : > { %v8391_v20 = vadd.f32 %v8390_v58, %v8389_v6 }
 0x68e   : > { %8393 = vst.msk [vmem:[%s405_s17] sm:$0x1] %vm8392_vm2, %v8391_v20 }
 0x68f   : > { %v8352_v54 = vpop.f32.mrf.mxu3 }
 0x690   : > { %9374 = shalt.err (!%p9371_p3)
}
 0x691   : > { %9273 = dma.vmem_to_hbm [thread:$0]  (%p9515_p5), %s8406_s18, 16, %s8408_s19, %s8395_s25  }
 0x692 PF: > { %p9279_p4 = scmp.ge.s32.totalorder %s9409_s24, 2  ;;  %s8419_s20 = sand.u32 1, %s9397_s21  }
 0x693   : > { %s8420_s17 = scalar_lea.sflag [#allocation4], %s8419_s20 }
 0x694   : > { %p9276_p7 = pnand %p9279_p4, %p9519_p6 }
 0x696   : > { %p9277_p8 = pneg %p9276_p7 }
 0x698   : > { %9392 = dma.done.wait (%p9277_p8), %s8420_s17, 16  }
 0x699   : > { %9394 = vsyncadd (%p9277_p8), %s8420_s17, 4294967280  ;;  %p22_p9 = scmp.ge.s32.totalorder %s9502_s27, 4   ;;  %s12603_s21 = smov %s9401_s22 }
 0x69a   : > { %s12604_s22 = smov %s9405_s23  ;;  %s12605_s23 = smov %s9513_s30 }
 0x69b   : > { %s12606_s24 = smov %s9502_s27  ;;  %24 = sbr.rel (!%p22_p9) target bundleno = 6 (0x6), region = 162 }
 0x6a0   :  { %8425 = vsyncpa [#allocation4], 1 }
 0x6a1   :  { %8427 = vsyncpa [#allocation4 + $0x1], 1 }

</bundles_post_ra>
